<compile_context>
chip_gen: v5e
topology: v5e:2x2
jax: 0.10.0
libtpu: 0.0.40
codegen_flags: <defaults>
</compile_context>

<pallas_src>
import functools

import jax
import jax.numpy as jnp
from jax.experimental import pallas as pl
from jax.experimental.pallas import tpu as pltpu


# ----------------------------- Pallas kernel -------------------------------
def _decoder_kernel(x_ref, s_ref, w_ref, b_ref, o_ref, *, apply_gelu=False):
    """One (batch, time-tile) step of  z = conv_transpose_freq(x + skip) + bias.

    x_ref, s_ref : (1, chin, F_in, TT)      VMEM (TT lanes -> lane-dense)
    w_ref        : (chin*chout*K,)          SMEM flattened ConvTranspose2d weight
    b_ref        : (chout,)                 SMEM bias
    o_ref        : (1, chout, F_in, S, TT)  VMEM; output frequency = S*f + r
    """
    chin, f_in, tt = x_ref.shape[1], x_ref.shape[2], x_ref.shape[3]
    chout = o_ref.shape[1]
    s = o_ref.shape[3]            # stride
    k_taps = 2 * s                # kernel_size (== 2*stride, pad == stride//2)
    half = s // 2

    # fused skip-add
    y = x_ref[0] + s_ref[0]                                    # (chin, F_in, TT)

    zrow = jnp.zeros((chin, 1, tt), dtype=y.dtype)
    y_prev = jnp.concatenate([zrow, y[:, :-1, :]], axis=1)     # y at f-1 (0 @ f=0)
    y_next = jnp.concatenate([y[:, 1:, :], zrow], axis=1)      # y at f+1 (0 @ top)

    def wv(ci, co, k):            # static-index scalar weight read from SMEM
        return w_ref[(ci * chout + co) * k_taps + k]

    for r in range(s):            # output residue: out freq = s*f + r
        k_c = r + half                                   # center tap (from y[f])
        if r < half:
            k_n, u = r + s + half, y_prev                # tap from y[f-1]
        else:
            k_n, u = r - half, y_next                    # tap from y[f+1]
        rows = []
        for co in range(chout):
            acc = wv(0, co, k_c) * y[0] + wv(0, co, k_n) * u[0]
            for ci in range(1, chin):
                acc = acc + wv(ci, co, k_c) * y[ci] + wv(ci, co, k_n) * u[ci]
            rows.append(acc + b_ref[co])
        plane = jnp.stack(rows, axis=0)                  # (chout, F_in, TT)
        if apply_gelu:            # only used when the torch module has last=False
            plane = 0.5 * plane * (1.0 + jax.lax.erf(plane * 0.7071067811865476))
        o_ref[0, :, :, r, :] = plane


# ------------------------------ tiling heuristic ----------------------------
def _pick_time_tile(batch, t, chin, chout, f_in, stride):
    """Largest 128-lane-multiple time tile keeping >=~8 grid steps and VMEM headroom."""
    chunks_total = -(-t // 128)                       # ceil(T / 128)
    chunks = max(1, min(8, (batch * chunks_total) // 8))
    # double-buffered VMEM per 128-lane chunk (out S-axis pads 4 -> 8 sublanes)
    bytes_per_chunk = (2 * chin * f_in + 2 * stride * chout * f_in) * 128 * 4 * 2
    while chunks > 1 and chunks * bytes_per_chunk > 12 * 1024 * 1024:
        chunks //= 2
    tt = 128 * chunks
    t_blocks = -(-chunks_total // chunks)
    return tt, t_blocks, t_blocks * tt


# ------------------------------ wrapper -------------------------------------
@functools.partial(jax.jit, static_argnames=("kernel_size", "stride", "last"))
def decoder_forward(x, skip, w, b, *, kernel_size=8, stride=4, last=True):
    """Decoder.forward with defaults (freq=True, pad=True, norm=False, empty=False).

    x, skip : (B, chin, F_in, T) float32           (4-D "freq" layout)
    w       : (chin, chout, kernel_size, 1)        ConvTranspose2d weight
    b       : (chout,)                             ConvTranspose2d bias
    returns : (B, chout, stride*F_in, T)
    """
    batch, chin, f_in, t = x.shape
    chout = w.shape[1]
    k = kernel_size
    s = stride
    assert w.shape == (chin, chout, k, 1)
    assert k == 2 * s and s % 2 == 0, "assumes kernel_size == 2*stride (demucs default)"

    tt, t_blocks, t_pad = _pick_time_tile(batch, t, chin, chout, f_in, s)
    if t_pad != t:
        cfg = ((0, 0), (0, 0), (0, 0), (0, t_pad - t))
        x = jnp.pad(x, cfg)
        skip = jnp.pad(skip, cfg)

    # flat index = (ci*chout + co)*K + k  (row-major over (chin, chout, K, 1))
    w_flat = w.reshape(chin * chout * k).astype(jnp.float32)
    b_vec = b.astype(jnp.float32)

    kernel = functools.partial(_decoder_kernel, apply_gelu=not last)

    out5 = pl.pallas_call(
        kernel,
        out_shape=jax.ShapeDtypeStruct((batch, chout, f_in, s, t_pad), jnp.float32),
        grid_spec=pltpu.PrefetchScalarGridSpec(
            num_scalar_prefetch=0,
            grid=(batch, t_blocks),
            in_specs=[
                pl.BlockSpec((1, chin, f_in, tt), lambda bb, ti: (bb, 0, 0, ti)),
                pl.BlockSpec((1, chin, f_in, tt), lambda bb, ti: (bb, 0, 0, ti)),
                pl.BlockSpec(memory_space=pltpu.MemorySpace.SMEM),
                pl.BlockSpec(memory_space=pltpu.MemorySpace.SMEM),
            ],
            out_specs=pl.BlockSpec((1, chout, f_in, s, tt),
                                   lambda bb, ti: (bb, 0, 0, 0, ti)),
        ),
        compiler_params=pltpu.CompilerParams(
            dimension_semantics=("parallel", "parallel")),
    )(x, skip, w_flat, b_vec)

    out = out5.reshape(batch, chout, s * f_in, t_pad)   # free row-major reshape
    if t_pad != t:
        out = out[..., :t]
    return out


# --------------------------- pure-JAX reference -----------------------------
def decoder_reference(x, skip, w, b, *, kernel_size=8, stride=4, last=True):
    """Brute-force overlap-add definition of ConvTranspose2d((K,1),(S,1),(K//4,0))."""
    y = x + skip
    batch, chin, f_in, t = x.shape
    chout = w.shape[1]
    pad = kernel_size // 4
    f_full = (f_in - 1) * stride + kernel_size
    full = jnp.zeros((batch, chout, f_full, t), jnp.float32)
    for f in range(f_in):
        for kk in range(kernel_size):
            contrib = jnp.einsum("bct,co->bot", y[:, :, f, :], w[:, :, kk, 0],
                                 precision=jax.lax.Precision.HIGHEST)
            full = full.at[:, :, f * stride + kk, :].add(contrib)
    out = full[:, :, pad:pad + stride * f_in, :] + b[None, :, None, None]
    if not last:
        out = 0.5 * out * (1.0 + jax.lax.erf(out / jnp.sqrt(2.0)))
    return out


# --------------------------------- main -------------------------------------
if __name__ == "__main__":
    B, CHIN, CHOUT, F_IN, T = 2, 4, 8, 16, 1024
    K, STRIDE = 8, 4

    key = jax.random.PRNGKey(0)
    kx, ks, kw, kb = jax.random.split(key, 4)
    x = jax.random.normal(kx, (B, CHIN, F_IN, T), dtype=jnp.float32)
    skip = jax.random.normal(ks, (B, CHIN, F_IN, T), dtype=jnp.float32)

    lim = 1.0 / float(CHOUT * K) ** 0.5      # PyTorch-like uniform init scale
    w = jax.random.uniform(kw, (CHIN, CHOUT, K, 1), jnp.float32, -lim, lim)
    b = jax.random.uniform(kb, (CHOUT,), jnp.float32, -lim, lim)

    out = decoder_forward(x, skip, w, b, kernel_size=K, stride=STRIDE)
    out = jax.block_until_ready(out)

    ref = decoder_reference(x, skip, w, b, kernel_size=K, stride=STRIDE)
    assert out.shape == (B, CHOUT, STRIDE * F_IN, T), out.shape
    max_err = float(jnp.max(jnp.abs(out - ref)))
    assert jnp.allclose(out, ref, atol=1e-4, rtol=1e-4), max_err

    print("KERNEL_OK")
</pallas_src>

<mosaic_0001>
module attributes {stable_mosaic.version = 11 : i64} {
  func.func @_decoder_kernel(%arg0: i32, %arg1: i32, %arg2: memref<1x4x16x256xf32, #tpu.memory_space<vmem>>, %arg3: memref<1x4x16x256xf32, #tpu.memory_space<vmem>>, %arg4: memref<256xf32, #tpu.memory_space<smem>>, %arg5: memref<8xf32, #tpu.memory_space<smem>>, %arg6: memref<1x8x16x4x256xf32, #tpu.memory_space<vmem>>) attributes {dimension_semantics = [#tpu.dimension_semantics<parallel>, #tpu.dimension_semantics<parallel>], iteration_bounds = array<i64: 2, 4>, scalar_prefetch = 0 : i64, scratch_operands = 0 : i64, tpu.core_type = #tpu.core_type<tc>, window_params = [{transform_indices = @transform_0, window_bounds = array<i64: 1, 4, 16, 256>}, {transform_indices = @transform_1, window_bounds = array<i64: 1, 4, 16, 256>}, {transform_indices = @transform_2, window_bounds = array<i64: 256>}, {transform_indices = @transform_3, window_bounds = array<i64: 8>}, {transform_indices = @transform_4, window_bounds = array<i64: 1, 8, 16, 4, 256>}]} {
    %c0 = arith.constant 0 : index
    %c0_0 = arith.constant 0 : index
    %c0_1 = arith.constant 0 : index
    %c0_2 = arith.constant 0 : index
    %0 = vector.load %arg2[%c0, %c0_0, %c0_1, %c0_2] : memref<1x4x16x256xf32, #tpu.memory_space<vmem>>, vector<1x4x16x256xf32>
    %1 = vector.shape_cast %0 : vector<1x4x16x256xf32> to vector<4x16x256xf32>
    %c0_3 = arith.constant 0 : index
    %c0_4 = arith.constant 0 : index
    %c0_5 = arith.constant 0 : index
    %c0_6 = arith.constant 0 : index
    %2 = vector.load %arg3[%c0_3, %c0_4, %c0_5, %c0_6] : memref<1x4x16x256xf32, #tpu.memory_space<vmem>>, vector<1x4x16x256xf32>
    %3 = vector.shape_cast %2 : vector<1x4x16x256xf32> to vector<4x16x256xf32>
    %4 = arith.addf %1, %3 : vector<4x16x256xf32>
    %cst = arith.constant 0.000000e+00 : f32
    %5 = vector.broadcast %cst : f32 to vector<4x1x256xf32>
    %6 = vector.extract_strided_slice %4 {offsets = [0, 0, 0], sizes = [4, 15, 256], strides = [1, 1, 1]} : vector<4x16x256xf32> to vector<4x15x256xf32>
    %7 = tpu.concatenate %5, %6 in 1 : vector<4x1x256xf32>, vector<4x15x256xf32> -> vector<4x16x256xf32>
    %8 = vector.extract_strided_slice %4 {offsets = [0, 1, 0], sizes = [4, 15, 256], strides = [1, 1, 1]} : vector<4x16x256xf32> to vector<4x15x256xf32>
    %9 = tpu.concatenate %8, %5 in 1 : vector<4x15x256xf32>, vector<4x1x256xf32> -> vector<4x16x256xf32>
    %c2 = arith.constant 2 : index
    %10 = memref.load %arg4[%c2] : memref<256xf32, #tpu.memory_space<smem>>
    %11 = vector.extract_strided_slice %4 {offsets = [0, 0, 0], sizes = [1, 16, 256], strides = [1, 1, 1]} : vector<4x16x256xf32> to vector<1x16x256xf32>
    %12 = vector.shape_cast %11 : vector<1x16x256xf32> to vector<16x256xf32>
    %13 = vector.broadcast %10 : f32 to vector<16x256xf32>
    %14 = arith.mulf %13, %12 : vector<16x256xf32>
    %c6 = arith.constant 6 : index
    %15 = memref.load %arg4[%c6] : memref<256xf32, #tpu.memory_space<smem>>
    %16 = vector.extract_strided_slice %7 {offsets = [0, 0, 0], sizes = [1, 16, 256], strides = [1, 1, 1]} : vector<4x16x256xf32> to vector<1x16x256xf32>
    %17 = vector.shape_cast %16 : vector<1x16x256xf32> to vector<16x256xf32>
    %18 = vector.broadcast %15 : f32 to vector<16x256xf32>
    %19 = arith.mulf %18, %17 : vector<16x256xf32>
    %20 = arith.addf %14, %19 : vector<16x256xf32>
    %c66 = arith.constant 66 : index
    %21 = memref.load %arg4[%c66] : memref<256xf32, #tpu.memory_space<smem>>
    %22 = vector.extract_strided_slice %4 {offsets = [1, 0, 0], sizes = [1, 16, 256], strides = [1, 1, 1]} : vector<4x16x256xf32> to vector<1x16x256xf32>
    %23 = vector.shape_cast %22 : vector<1x16x256xf32> to vector<16x256xf32>
    %24 = vector.broadcast %21 : f32 to vector<16x256xf32>
    %25 = arith.mulf %24, %23 : vector<16x256xf32>
    %26 = arith.addf %20, %25 : vector<16x256xf32>
    %c70 = arith.constant 70 : index
    %27 = memref.load %arg4[%c70] : memref<256xf32, #tpu.memory_space<smem>>
    %28 = vector.extract_strided_slice %7 {offsets = [1, 0, 0], sizes = [1, 16, 256], strides = [1, 1, 1]} : vector<4x16x256xf32> to vector<1x16x256xf32>
    %29 = vector.shape_cast %28 : vector<1x16x256xf32> to vector<16x256xf32>
    %30 = vector.broadcast %27 : f32 to vector<16x256xf32>
    %31 = arith.mulf %30, %29 : vector<16x256xf32>
    %32 = arith.addf %26, %31 : vector<16x256xf32>
    %c130 = arith.constant 130 : index
    %33 = memref.load %arg4[%c130] : memref<256xf32, #tpu.memory_space<smem>>
    %34 = vector.extract_strided_slice %4 {offsets = [2, 0, 0], sizes = [1, 16, 256], strides = [1, 1, 1]} : vector<4x16x256xf32> to vector<1x16x256xf32>
    %35 = vector.shape_cast %34 : vector<1x16x256xf32> to vector<16x256xf32>
    %36 = vector.broadcast %33 : f32 to vector<16x256xf32>
    %37 = arith.mulf %36, %35 : vector<16x256xf32>
    %38 = arith.addf %32, %37 : vector<16x256xf32>
    %c134 = arith.constant 134 : index
    %39 = memref.load %arg4[%c134] : memref<256xf32, #tpu.memory_space<smem>>
    %40 = vector.extract_strided_slice %7 {offsets = [2, 0, 0], sizes = [1, 16, 256], strides = [1, 1, 1]} : vector<4x16x256xf32> to vector<1x16x256xf32>
    %41 = vector.shape_cast %40 : vector<1x16x256xf32> to vector<16x256xf32>
    %42 = vector.broadcast %39 : f32 to vector<16x256xf32>
    %43 = arith.mulf %42, %41 : vector<16x256xf32>
    %44 = arith.addf %38, %43 : vector<16x256xf32>
    %c194 = arith.constant 194 : index
    %45 = memref.load %arg4[%c194] : memref<256xf32, #tpu.memory_space<smem>>
    %46 = vector.extract_strided_slice %4 {offsets = [3, 0, 0], sizes = [1, 16, 256], strides = [1, 1, 1]} : vector<4x16x256xf32> to vector<1x16x256xf32>
    %47 = vector.shape_cast %46 : vector<1x16x256xf32> to vector<16x256xf32>
    %48 = vector.broadcast %45 : f32 to vector<16x256xf32>
    %49 = arith.mulf %48, %47 : vector<16x256xf32>
    %50 = arith.addf %44, %49 : vector<16x256xf32>
    %c198 = arith.constant 198 : index
    %51 = memref.load %arg4[%c198] : memref<256xf32, #tpu.memory_space<smem>>
    %52 = vector.extract_strided_slice %7 {offsets = [3, 0, 0], sizes = [1, 16, 256], strides = [1, 1, 1]} : vector<4x16x256xf32> to vector<1x16x256xf32>
    %53 = vector.shape_cast %52 : vector<1x16x256xf32> to vector<16x256xf32>
    %54 = vector.broadcast %51 : f32 to vector<16x256xf32>
    %55 = arith.mulf %54, %53 : vector<16x256xf32>
    %56 = arith.addf %50, %55 : vector<16x256xf32>
    %c0_7 = arith.constant 0 : index
    %57 = memref.load %arg5[%c0_7] : memref<8xf32, #tpu.memory_space<smem>>
    %58 = vector.broadcast %57 : f32 to vector<16x256xf32>
    %59 = arith.addf %56, %58 : vector<16x256xf32>
    %c10 = arith.constant 10 : index
    %60 = memref.load %arg4[%c10] : memref<256xf32, #tpu.memory_space<smem>>
    %61 = vector.extract_strided_slice %4 {offsets = [0, 0, 0], sizes = [1, 16, 256], strides = [1, 1, 1]} : vector<4x16x256xf32> to vector<1x16x256xf32>
    %62 = vector.shape_cast %61 : vector<1x16x256xf32> to vector<16x256xf32>
    %63 = vector.broadcast %60 : f32 to vector<16x256xf32>
    %64 = arith.mulf %63, %62 : vector<16x256xf32>
    %c14 = arith.constant 14 : index
    %65 = memref.load %arg4[%c14] : memref<256xf32, #tpu.memory_space<smem>>
    %66 = vector.extract_strided_slice %7 {offsets = [0, 0, 0], sizes = [1, 16, 256], strides = [1, 1, 1]} : vector<4x16x256xf32> to vector<1x16x256xf32>
    %67 = vector.shape_cast %66 : vector<1x16x256xf32> to vector<16x256xf32>
    %68 = vector.broadcast %65 : f32 to vector<16x256xf32>
    %69 = arith.mulf %68, %67 : vector<16x256xf32>
    %70 = arith.addf %64, %69 : vector<16x256xf32>
    %c74 = arith.constant 74 : index
    %71 = memref.load %arg4[%c74] : memref<256xf32, #tpu.memory_space<smem>>
    %72 = vector.extract_strided_slice %4 {offsets = [1, 0, 0], sizes = [1, 16, 256], strides = [1, 1, 1]} : vector<4x16x256xf32> to vector<1x16x256xf32>
    %73 = vector.shape_cast %72 : vector<1x16x256xf32> to vector<16x256xf32>
    %74 = vector.broadcast %71 : f32 to vector<16x256xf32>
    %75 = arith.mulf %74, %73 : vector<16x256xf32>
    %76 = arith.addf %70, %75 : vector<16x256xf32>
    %c78 = arith.constant 78 : index
    %77 = memref.load %arg4[%c78] : memref<256xf32, #tpu.memory_space<smem>>
    %78 = vector.extract_strided_slice %7 {offsets = [1, 0, 0], sizes = [1, 16, 256], strides = [1, 1, 1]} : vector<4x16x256xf32> to vector<1x16x256xf32>
    %79 = vector.shape_cast %78 : vector<1x16x256xf32> to vector<16x256xf32>
    %80 = vector.broadcast %77 : f32 to vector<16x256xf32>
    %81 = arith.mulf %80, %79 : vector<16x256xf32>
    %82 = arith.addf %76, %81 : vector<16x256xf32>
    %c138 = arith.constant 138 : index
    %83 = memref.load %arg4[%c138] : memref<256xf32, #tpu.memory_space<smem>>
    %84 = vector.extract_strided_slice %4 {offsets = [2, 0, 0], sizes = [1, 16, 256], strides = [1, 1, 1]} : vector<4x16x256xf32> to vector<1x16x256xf32>
    %85 = vector.shape_cast %84 : vector<1x16x256xf32> to vector<16x256xf32>
    %86 = vector.broadcast %83 : f32 to vector<16x256xf32>
    %87 = arith.mulf %86, %85 : vector<16x256xf32>
    %88 = arith.addf %82, %87 : vector<16x256xf32>
    %c142 = arith.constant 142 : index
    %89 = memref.load %arg4[%c142] : memref<256xf32, #tpu.memory_space<smem>>
    %90 = vector.extract_strided_slice %7 {offsets = [2, 0, 0], sizes = [1, 16, 256], strides = [1, 1, 1]} : vector<4x16x256xf32> to vector<1x16x256xf32>
    %91 = vector.shape_cast %90 : vector<1x16x256xf32> to vector<16x256xf32>
    %92 = vector.broadcast %89 : f32 to vector<16x256xf32>
    %93 = arith.mulf %92, %91 : vector<16x256xf32>
    %94 = arith.addf %88, %93 : vector<16x256xf32>
    %c202 = arith.constant 202 : index
    %95 = memref.load %arg4[%c202] : memref<256xf32, #tpu.memory_space<smem>>
    %96 = vector.extract_strided_slice %4 {offsets = [3, 0, 0], sizes = [1, 16, 256], strides = [1, 1, 1]} : vector<4x16x256xf32> to vector<1x16x256xf32>
    %97 = vector.shape_cast %96 : vector<1x16x256xf32> to vector<16x256xf32>
    %98 = vector.broadcast %95 : f32 to vector<16x256xf32>
    %99 = arith.mulf %98, %97 : vector<16x256xf32>
    %100 = arith.addf %94, %99 : vector<16x256xf32>
    %c206 = arith.constant 206 : index
    %101 = memref.load %arg4[%c206] : memref<256xf32, #tpu.memory_space<smem>>
    %102 = vector.extract_strided_slice %7 {offsets = [3, 0, 0], sizes = [1, 16, 256], strides = [1, 1, 1]} : vector<4x16x256xf32> to vector<1x16x256xf32>
    %103 = vector.shape_cast %102 : vector<1x16x256xf32> to vector<16x256xf32>
    %104 = vector.broadcast %101 : f32 to vector<16x256xf32>
    %105 = arith.mulf %104, %103 : vector<16x256xf32>
    %106 = arith.addf %100, %105 : vector<16x256xf32>
    %c1 = arith.constant 1 : index
    %107 = memref.load %arg5[%c1] : memref<8xf32, #tpu.memory_space<smem>>
    %108 = vector.broadcast %107 : f32 to vector<16x256xf32>
    %109 = arith.addf %106, %108 : vector<16x256xf32>
    %c18 = arith.constant 18 : index
    %110 = memref.load %arg4[%c18] : memref<256xf32, #tpu.memory_space<smem>>
    %111 = vector.extract_strided_slice %4 {offsets = [0, 0, 0], sizes = [1, 16, 256], strides = [1, 1, 1]} : vector<4x16x256xf32> to vector<1x16x256xf32>
    %112 = vector.shape_cast %111 : vector<1x16x256xf32> to vector<16x256xf32>
    %113 = vector.broadcast %110 : f32 to vector<16x256xf32>
    %114 = arith.mulf %113, %112 : vector<16x256xf32>
    %c22 = arith.constant 22 : index
    %115 = memref.load %arg4[%c22] : memref<256xf32, #tpu.memory_space<smem>>
    %116 = vector.extract_strided_slice %7 {offsets = [0, 0, 0], sizes = [1, 16, 256], strides = [1, 1, 1]} : vector<4x16x256xf32> to vector<1x16x256xf32>
    %117 = vector.shape_cast %116 : vector<1x16x256xf32> to vector<16x256xf32>
    %118 = vector.broadcast %115 : f32 to vector<16x256xf32>
    %119 = arith.mulf %118, %117 : vector<16x256xf32>
    %120 = arith.addf %114, %119 : vector<16x256xf32>
    %c82 = arith.constant 82 : index
    %121 = memref.load %arg4[%c82] : memref<256xf32, #tpu.memory_space<smem>>
    %122 = vector.extract_strided_slice %4 {offsets = [1, 0, 0], sizes = [1, 16, 256], strides = [1, 1, 1]} : vector<4x16x256xf32> to vector<1x16x256xf32>
    %123 = vector.shape_cast %122 : vector<1x16x256xf32> to vector<16x256xf32>
    %124 = vector.broadcast %121 : f32 to vector<16x256xf32>
    %125 = arith.mulf %124, %123 : vector<16x256xf32>
    %126 = arith.addf %120, %125 : vector<16x256xf32>
    %c86 = arith.constant 86 : index
    %127 = memref.load %arg4[%c86] : memref<256xf32, #tpu.memory_space<smem>>
    %128 = vector.extract_strided_slice %7 {offsets = [1, 0, 0], sizes = [1, 16, 256], strides = [1, 1, 1]} : vector<4x16x256xf32> to vector<1x16x256xf32>
    %129 = vector.shape_cast %128 : vector<1x16x256xf32> to vector<16x256xf32>
    %130 = vector.broadcast %127 : f32 to vector<16x256xf32>
    %131 = arith.mulf %130, %129 : vector<16x256xf32>
    %132 = arith.addf %126, %131 : vector<16x256xf32>
    %c146 = arith.constant 146 : index
    %133 = memref.load %arg4[%c146] : memref<256xf32, #tpu.memory_space<smem>>
    %134 = vector.extract_strided_slice %4 {offsets = [2, 0, 0], sizes = [1, 16, 256], strides = [1, 1, 1]} : vector<4x16x256xf32> to vector<1x16x256xf32>
    %135 = vector.shape_cast %134 : vector<1x16x256xf32> to vector<16x256xf32>
    %136 = vector.broadcast %133 : f32 to vector<16x256xf32>
    %137 = arith.mulf %136, %135 : vector<16x256xf32>
    %138 = arith.addf %132, %137 : vector<16x256xf32>
    %c150 = arith.constant 150 : index
    %139 = memref.load %arg4[%c150] : memref<256xf32, #tpu.memory_space<smem>>
    %140 = vector.extract_strided_slice %7 {offsets = [2, 0, 0], sizes = [1, 16, 256], strides = [1, 1, 1]} : vector<4x16x256xf32> to vector<1x16x256xf32>
    %141 = vector.shape_cast %140 : vector<1x16x256xf32> to vector<16x256xf32>
    %142 = vector.broadcast %139 : f32 to vector<16x256xf32>
    %143 = arith.mulf %142, %141 : vector<16x256xf32>
    %144 = arith.addf %138, %143 : vector<16x256xf32>
    %c210 = arith.constant 210 : index
    %145 = memref.load %arg4[%c210] : memref<256xf32, #tpu.memory_space<smem>>
    %146 = vector.extract_strided_slice %4 {offsets = [3, 0, 0], sizes = [1, 16, 256], strides = [1, 1, 1]} : vector<4x16x256xf32> to vector<1x16x256xf32>
    %147 = vector.shape_cast %146 : vector<1x16x256xf32> to vector<16x256xf32>
    %148 = vector.broadcast %145 : f32 to vector<16x256xf32>
    %149 = arith.mulf %148, %147 : vector<16x256xf32>
    %150 = arith.addf %144, %149 : vector<16x256xf32>
    %c214 = arith.constant 214 : index
    %151 = memref.load %arg4[%c214] : memref<256xf32, #tpu.memory_space<smem>>
    %152 = vector.extract_strided_slice %7 {offsets = [3, 0, 0], sizes = [1, 16, 256], strides = [1, 1, 1]} : vector<4x16x256xf32> to vector<1x16x256xf32>
    %153 = vector.shape_cast %152 : vector<1x16x256xf32> to vector<16x256xf32>
    %154 = vector.broadcast %151 : f32 to vector<16x256xf32>
    %155 = arith.mulf %154, %153 : vector<16x256xf32>
    %156 = arith.addf %150, %155 : vector<16x256xf32>
    %c2_8 = arith.constant 2 : index
    %157 = memref.load %arg5[%c2_8] : memref<8xf32, #tpu.memory_space<smem>>
    %158 = vector.broadcast %157 : f32 to vector<16x256xf32>
    %159 = arith.addf %156, %158 : vector<16x256xf32>
    %c26 = arith.constant 26 : index
    %160 = memref.load %arg4[%c26] : memref<256xf32, #tpu.memory_space<smem>>
    %161 = vector.extract_strided_slice %4 {offsets = [0, 0, 0], sizes = [1, 16, 256], strides = [1, 1, 1]} : vector<4x16x256xf32> to vector<1x16x256xf32>
    %162 = vector.shape_cast %161 : vector<1x16x256xf32> to vector<16x256xf32>
    %163 = vector.broadcast %160 : f32 to vector<16x256xf32>
    %164 = arith.mulf %163, %162 : vector<16x256xf32>
    %c30 = arith.constant 30 : index
    %165 = memref.load %arg4[%c30] : memref<256xf32, #tpu.memory_space<smem>>
    %166 = vector.extract_strided_slice %7 {offsets = [0, 0, 0], sizes = [1, 16, 256], strides = [1, 1, 1]} : vector<4x16x256xf32> to vector<1x16x256xf32>
    %167 = vector.shape_cast %166 : vector<1x16x256xf32> to vector<16x256xf32>
    %168 = vector.broadcast %165 : f32 to vector<16x256xf32>
    %169 = arith.mulf %168, %167 : vector<16x256xf32>
    %170 = arith.addf %164, %169 : vector<16x256xf32>
    %c90 = arith.constant 90 : index
    %171 = memref.load %arg4[%c90] : memref<256xf32, #tpu.memory_space<smem>>
    %172 = vector.extract_strided_slice %4 {offsets = [1, 0, 0], sizes = [1, 16, 256], strides = [1, 1, 1]} : vector<4x16x256xf32> to vector<1x16x256xf32>
    %173 = vector.shape_cast %172 : vector<1x16x256xf32> to vector<16x256xf32>
    %174 = vector.broadcast %171 : f32 to vector<16x256xf32>
    %175 = arith.mulf %174, %173 : vector<16x256xf32>
    %176 = arith.addf %170, %175 : vector<16x256xf32>
    %c94 = arith.constant 94 : index
    %177 = memref.load %arg4[%c94] : memref<256xf32, #tpu.memory_space<smem>>
    %178 = vector.extract_strided_slice %7 {offsets = [1, 0, 0], sizes = [1, 16, 256], strides = [1, 1, 1]} : vector<4x16x256xf32> to vector<1x16x256xf32>
    %179 = vector.shape_cast %178 : vector<1x16x256xf32> to vector<16x256xf32>
    %180 = vector.broadcast %177 : f32 to vector<16x256xf32>
    %181 = arith.mulf %180, %179 : vector<16x256xf32>
    %182 = arith.addf %176, %181 : vector<16x256xf32>
    %c154 = arith.constant 154 : index
    %183 = memref.load %arg4[%c154] : memref<256xf32, #tpu.memory_space<smem>>
    %184 = vector.extract_strided_slice %4 {offsets = [2, 0, 0], sizes = [1, 16, 256], strides = [1, 1, 1]} : vector<4x16x256xf32> to vector<1x16x256xf32>
    %185 = vector.shape_cast %184 : vector<1x16x256xf32> to vector<16x256xf32>
    %186 = vector.broadcast %183 : f32 to vector<16x256xf32>
    %187 = arith.mulf %186, %185 : vector<16x256xf32>
    %188 = arith.addf %182, %187 : vector<16x256xf32>
    %c158 = arith.constant 158 : index
    %189 = memref.load %arg4[%c158] : memref<256xf32, #tpu.memory_space<smem>>
    %190 = vector.extract_strided_slice %7 {offsets = [2, 0, 0], sizes = [1, 16, 256], strides = [1, 1, 1]} : vector<4x16x256xf32> to vector<1x16x256xf32>
    %191 = vector.shape_cast %190 : vector<1x16x256xf32> to vector<16x256xf32>
    %192 = vector.broadcast %189 : f32 to vector<16x256xf32>
    %193 = arith.mulf %192, %191 : vector<16x256xf32>
    %194 = arith.addf %188, %193 : vector<16x256xf32>
    %c218 = arith.constant 218 : index
    %195 = memref.load %arg4[%c218] : memref<256xf32, #tpu.memory_space<smem>>
    %196 = vector.extract_strided_slice %4 {offsets = [3, 0, 0], sizes = [1, 16, 256], strides = [1, 1, 1]} : vector<4x16x256xf32> to vector<1x16x256xf32>
    %197 = vector.shape_cast %196 : vector<1x16x256xf32> to vector<16x256xf32>
    %198 = vector.broadcast %195 : f32 to vector<16x256xf32>
    %199 = arith.mulf %198, %197 : vector<16x256xf32>
    %200 = arith.addf %194, %199 : vector<16x256xf32>
    %c222 = arith.constant 222 : index
    %201 = memref.load %arg4[%c222] : memref<256xf32, #tpu.memory_space<smem>>
    %202 = vector.extract_strided_slice %7 {offsets = [3, 0, 0], sizes = [1, 16, 256], strides = [1, 1, 1]} : vector<4x16x256xf32> to vector<1x16x256xf32>
    %203 = vector.shape_cast %202 : vector<1x16x256xf32> to vector<16x256xf32>
    %204 = vector.broadcast %201 : f32 to vector<16x256xf32>
    %205 = arith.mulf %204, %203 : vector<16x256xf32>
    %206 = arith.addf %200, %205 : vector<16x256xf32>
    %c3 = arith.constant 3 : index
    %207 = memref.load %arg5[%c3] : memref<8xf32, #tpu.memory_space<smem>>
    %208 = vector.broadcast %207 : f32 to vector<16x256xf32>
    %209 = arith.addf %206, %208 : vector<16x256xf32>
    %c34 = arith.constant 34 : index
    %210 = memref.load %arg4[%c34] : memref<256xf32, #tpu.memory_space<smem>>
    %211 = vector.extract_strided_slice %4 {offsets = [0, 0, 0], sizes = [1, 16, 256], strides = [1, 1, 1]} : vector<4x16x256xf32> to vector<1x16x256xf32>
    %212 = vector.shape_cast %211 : vector<1x16x256xf32> to vector<16x256xf32>
    %213 = vector.broadcast %210 : f32 to vector<16x256xf32>
    %214 = arith.mulf %213, %212 : vector<16x256xf32>
    %c38 = arith.constant 38 : index
    %215 = memref.load %arg4[%c38] : memref<256xf32, #tpu.memory_space<smem>>
    %216 = vector.extract_strided_slice %7 {offsets = [0, 0, 0], sizes = [1, 16, 256], strides = [1, 1, 1]} : vector<4x16x256xf32> to vector<1x16x256xf32>
    %217 = vector.shape_cast %216 : vector<1x16x256xf32> to vector<16x256xf32>
    %218 = vector.broadcast %215 : f32 to vector<16x256xf32>
    %219 = arith.mulf %218, %217 : vector<16x256xf32>
    %220 = arith.addf %214, %219 : vector<16x256xf32>
    %c98 = arith.constant 98 : index
    %221 = memref.load %arg4[%c98] : memref<256xf32, #tpu.memory_space<smem>>
    %222 = vector.extract_strided_slice %4 {offsets = [1, 0, 0], sizes = [1, 16, 256], strides = [1, 1, 1]} : vector<4x16x256xf32> to vector<1x16x256xf32>
    %223 = vector.shape_cast %222 : vector<1x16x256xf32> to vector<16x256xf32>
    %224 = vector.broadcast %221 : f32 to vector<16x256xf32>
    %225 = arith.mulf %224, %223 : vector<16x256xf32>
    %226 = arith.addf %220, %225 : vector<16x256xf32>
    %c102 = arith.constant 102 : index
    %227 = memref.load %arg4[%c102] : memref<256xf32, #tpu.memory_space<smem>>
    %228 = vector.extract_strided_slice %7 {offsets = [1, 0, 0], sizes = [1, 16, 256], strides = [1, 1, 1]} : vector<4x16x256xf32> to vector<1x16x256xf32>
    %229 = vector.shape_cast %228 : vector<1x16x256xf32> to vector<16x256xf32>
    %230 = vector.broadcast %227 : f32 to vector<16x256xf32>
    %231 = arith.mulf %230, %229 : vector<16x256xf32>
    %232 = arith.addf %226, %231 : vector<16x256xf32>
    %c162 = arith.constant 162 : index
    %233 = memref.load %arg4[%c162] : memref<256xf32, #tpu.memory_space<smem>>
    %234 = vector.extract_strided_slice %4 {offsets = [2, 0, 0], sizes = [1, 16, 256], strides = [1, 1, 1]} : vector<4x16x256xf32> to vector<1x16x256xf32>
    %235 = vector.shape_cast %234 : vector<1x16x256xf32> to vector<16x256xf32>
    %236 = vector.broadcast %233 : f32 to vector<16x256xf32>
    %237 = arith.mulf %236, %235 : vector<16x256xf32>
    %238 = arith.addf %232, %237 : vector<16x256xf32>
    %c166 = arith.constant 166 : index
    %239 = memref.load %arg4[%c166] : memref<256xf32, #tpu.memory_space<smem>>
    %240 = vector.extract_strided_slice %7 {offsets = [2, 0, 0], sizes = [1, 16, 256], strides = [1, 1, 1]} : vector<4x16x256xf32> to vector<1x16x256xf32>
    %241 = vector.shape_cast %240 : vector<1x16x256xf32> to vector<16x256xf32>
    %242 = vector.broadcast %239 : f32 to vector<16x256xf32>
    %243 = arith.mulf %242, %241 : vector<16x256xf32>
    %244 = arith.addf %238, %243 : vector<16x256xf32>
    %c226 = arith.constant 226 : index
    %245 = memref.load %arg4[%c226] : memref<256xf32, #tpu.memory_space<smem>>
    %246 = vector.extract_strided_slice %4 {offsets = [3, 0, 0], sizes = [1, 16, 256], strides = [1, 1, 1]} : vector<4x16x256xf32> to vector<1x16x256xf32>
    %247 = vector.shape_cast %246 : vector<1x16x256xf32> to vector<16x256xf32>
    %248 = vector.broadcast %245 : f32 to vector<16x256xf32>
    %249 = arith.mulf %248, %247 : vector<16x256xf32>
    %250 = arith.addf %244, %249 : vector<16x256xf32>
    %c230 = arith.constant 230 : index
    %251 = memref.load %arg4[%c230] : memref<256xf32, #tpu.memory_space<smem>>
    %252 = vector.extract_strided_slice %7 {offsets = [3, 0, 0], sizes = [1, 16, 256], strides = [1, 1, 1]} : vector<4x16x256xf32> to vector<1x16x256xf32>
    %253 = vector.shape_cast %252 : vector<1x16x256xf32> to vector<16x256xf32>
    %254 = vector.broadcast %251 : f32 to vector<16x256xf32>
    %255 = arith.mulf %254, %253 : vector<16x256xf32>
    %256 = arith.addf %250, %255 : vector<16x256xf32>
    %c4 = arith.constant 4 : index
    %257 = memref.load %arg5[%c4] : memref<8xf32, #tpu.memory_space<smem>>
    %258 = vector.broadcast %257 : f32 to vector<16x256xf32>
    %259 = arith.addf %256, %258 : vector<16x256xf32>
    %c42 = arith.constant 42 : index
    %260 = memref.load %arg4[%c42] : memref<256xf32, #tpu.memory_space<smem>>
    %261 = vector.extract_strided_slice %4 {offsets = [0, 0, 0], sizes = [1, 16, 256], strides = [1, 1, 1]} : vector<4x16x256xf32> to vector<1x16x256xf32>
    %262 = vector.shape_cast %261 : vector<1x16x256xf32> to vector<16x256xf32>
    %263 = vector.broadcast %260 : f32 to vector<16x256xf32>
    %264 = arith.mulf %263, %262 : vector<16x256xf32>
    %c46 = arith.constant 46 : index
    %265 = memref.load %arg4[%c46] : memref<256xf32, #tpu.memory_space<smem>>
    %266 = vector.extract_strided_slice %7 {offsets = [0, 0, 0], sizes = [1, 16, 256], strides = [1, 1, 1]} : vector<4x16x256xf32> to vector<1x16x256xf32>
    %267 = vector.shape_cast %266 : vector<1x16x256xf32> to vector<16x256xf32>
    %268 = vector.broadcast %265 : f32 to vector<16x256xf32>
    %269 = arith.mulf %268, %267 : vector<16x256xf32>
    %270 = arith.addf %264, %269 : vector<16x256xf32>
    %c106 = arith.constant 106 : index
    %271 = memref.load %arg4[%c106] : memref<256xf32, #tpu.memory_space<smem>>
    %272 = vector.extract_strided_slice %4 {offsets = [1, 0, 0], sizes = [1, 16, 256], strides = [1, 1, 1]} : vector<4x16x256xf32> to vector<1x16x256xf32>
    %273 = vector.shape_cast %272 : vector<1x16x256xf32> to vector<16x256xf32>
    %274 = vector.broadcast %271 : f32 to vector<16x256xf32>
    %275 = arith.mulf %274, %273 : vector<16x256xf32>
    %276 = arith.addf %270, %275 : vector<16x256xf32>
    %c110 = arith.constant 110 : index
    %277 = memref.load %arg4[%c110] : memref<256xf32, #tpu.memory_space<smem>>
    %278 = vector.extract_strided_slice %7 {offsets = [1, 0, 0], sizes = [1, 16, 256], strides = [1, 1, 1]} : vector<4x16x256xf32> to vector<1x16x256xf32>
    %279 = vector.shape_cast %278 : vector<1x16x256xf32> to vector<16x256xf32>
    %280 = vector.broadcast %277 : f32 to vector<16x256xf32>
    %281 = arith.mulf %280, %279 : vector<16x256xf32>
    %282 = arith.addf %276, %281 : vector<16x256xf32>
    %c170 = arith.constant 170 : index
    %283 = memref.load %arg4[%c170] : memref<256xf32, #tpu.memory_space<smem>>
    %284 = vector.extract_strided_slice %4 {offsets = [2, 0, 0], sizes = [1, 16, 256], strides = [1, 1, 1]} : vector<4x16x256xf32> to vector<1x16x256xf32>
    %285 = vector.shape_cast %284 : vector<1x16x256xf32> to vector<16x256xf32>
    %286 = vector.broadcast %283 : f32 to vector<16x256xf32>
    %287 = arith.mulf %286, %285 : vector<16x256xf32>
    %288 = arith.addf %282, %287 : vector<16x256xf32>
    %c174 = arith.constant 174 : index
    %289 = memref.load %arg4[%c174] : memref<256xf32, #tpu.memory_space<smem>>
    %290 = vector.extract_strided_slice %7 {offsets = [2, 0, 0], sizes = [1, 16, 256], strides = [1, 1, 1]} : vector<4x16x256xf32> to vector<1x16x256xf32>
    %291 = vector.shape_cast %290 : vector<1x16x256xf32> to vector<16x256xf32>
    %292 = vector.broadcast %289 : f32 to vector<16x256xf32>
    %293 = arith.mulf %292, %291 : vector<16x256xf32>
    %294 = arith.addf %288, %293 : vector<16x256xf32>
    %c234 = arith.constant 234 : index
    %295 = memref.load %arg4[%c234] : memref<256xf32, #tpu.memory_space<smem>>
    %296 = vector.extract_strided_slice %4 {offsets = [3, 0, 0], sizes = [1, 16, 256], strides = [1, 1, 1]} : vector<4x16x256xf32> to vector<1x16x256xf32>
    %297 = vector.shape_cast %296 : vector<1x16x256xf32> to vector<16x256xf32>
    %298 = vector.broadcast %295 : f32 to vector<16x256xf32>
    %299 = arith.mulf %298, %297 : vector<16x256xf32>
    %300 = arith.addf %294, %299 : vector<16x256xf32>
    %c238 = arith.constant 238 : index
    %301 = memref.load %arg4[%c238] : memref<256xf32, #tpu.memory_space<smem>>
    %302 = vector.extract_strided_slice %7 {offsets = [3, 0, 0], sizes = [1, 16, 256], strides = [1, 1, 1]} : vector<4x16x256xf32> to vector<1x16x256xf32>
    %303 = vector.shape_cast %302 : vector<1x16x256xf32> to vector<16x256xf32>
    %304 = vector.broadcast %301 : f32 to vector<16x256xf32>
    %305 = arith.mulf %304, %303 : vector<16x256xf32>
    %306 = arith.addf %300, %305 : vector<16x256xf32>
    %c5 = arith.constant 5 : index
    %307 = memref.load %arg5[%c5] : memref<8xf32, #tpu.memory_space<smem>>
    %308 = vector.broadcast %307 : f32 to vector<16x256xf32>
    %309 = arith.addf %306, %308 : vector<16x256xf32>
    %c50 = arith.constant 50 : index
    %310 = memref.load %arg4[%c50] : memref<256xf32, #tpu.memory_space<smem>>
    %311 = vector.extract_strided_slice %4 {offsets = [0, 0, 0], sizes = [1, 16, 256], strides = [1, 1, 1]} : vector<4x16x256xf32> to vector<1x16x256xf32>
    %312 = vector.shape_cast %311 : vector<1x16x256xf32> to vector<16x256xf32>
    %313 = vector.broadcast %310 : f32 to vector<16x256xf32>
    %314 = arith.mulf %313, %312 : vector<16x256xf32>
    %c54 = arith.constant 54 : index
    %315 = memref.load %arg4[%c54] : memref<256xf32, #tpu.memory_space<smem>>
    %316 = vector.extract_strided_slice %7 {offsets = [0, 0, 0], sizes = [1, 16, 256], strides = [1, 1, 1]} : vector<4x16x256xf32> to vector<1x16x256xf32>
    %317 = vector.shape_cast %316 : vector<1x16x256xf32> to vector<16x256xf32>
    %318 = vector.broadcast %315 : f32 to vector<16x256xf32>
    %319 = arith.mulf %318, %317 : vector<16x256xf32>
    %320 = arith.addf %314, %319 : vector<16x256xf32>
    %c114 = arith.constant 114 : index
    %321 = memref.load %arg4[%c114] : memref<256xf32, #tpu.memory_space<smem>>
    %322 = vector.extract_strided_slice %4 {offsets = [1, 0, 0], sizes = [1, 16, 256], strides = [1, 1, 1]} : vector<4x16x256xf32> to vector<1x16x256xf32>
    %323 = vector.shape_cast %322 : vector<1x16x256xf32> to vector<16x256xf32>
    %324 = vector.broadcast %321 : f32 to vector<16x256xf32>
    %325 = arith.mulf %324, %323 : vector<16x256xf32>
    %326 = arith.addf %320, %325 : vector<16x256xf32>
    %c118 = arith.constant 118 : index
    %327 = memref.load %arg4[%c118] : memref<256xf32, #tpu.memory_space<smem>>
    %328 = vector.extract_strided_slice %7 {offsets = [1, 0, 0], sizes = [1, 16, 256], strides = [1, 1, 1]} : vector<4x16x256xf32> to vector<1x16x256xf32>
    %329 = vector.shape_cast %328 : vector<1x16x256xf32> to vector<16x256xf32>
    %330 = vector.broadcast %327 : f32 to vector<16x256xf32>
    %331 = arith.mulf %330, %329 : vector<16x256xf32>
    %332 = arith.addf %326, %331 : vector<16x256xf32>
    %c178 = arith.constant 178 : index
    %333 = memref.load %arg4[%c178] : memref<256xf32, #tpu.memory_space<smem>>
    %334 = vector.extract_strided_slice %4 {offsets = [2, 0, 0], sizes = [1, 16, 256], strides = [1, 1, 1]} : vector<4x16x256xf32> to vector<1x16x256xf32>
    %335 = vector.shape_cast %334 : vector<1x16x256xf32> to vector<16x256xf32>
    %336 = vector.broadcast %333 : f32 to vector<16x256xf32>
    %337 = arith.mulf %336, %335 : vector<16x256xf32>
    %338 = arith.addf %332, %337 : vector<16x256xf32>
    %c182 = arith.constant 182 : index
    %339 = memref.load %arg4[%c182] : memref<256xf32, #tpu.memory_space<smem>>
    %340 = vector.extract_strided_slice %7 {offsets = [2, 0, 0], sizes = [1, 16, 256], strides = [1, 1, 1]} : vector<4x16x256xf32> to vector<1x16x256xf32>
    %341 = vector.shape_cast %340 : vector<1x16x256xf32> to vector<16x256xf32>
    %342 = vector.broadcast %339 : f32 to vector<16x256xf32>
    %343 = arith.mulf %342, %341 : vector<16x256xf32>
    %344 = arith.addf %338, %343 : vector<16x256xf32>
    %c242 = arith.constant 242 : index
    %345 = memref.load %arg4[%c242] : memref<256xf32, #tpu.memory_space<smem>>
    %346 = vector.extract_strided_slice %4 {offsets = [3, 0, 0], sizes = [1, 16, 256], strides = [1, 1, 1]} : vector<4x16x256xf32> to vector<1x16x256xf32>
    %347 = vector.shape_cast %346 : vector<1x16x256xf32> to vector<16x256xf32>
    %348 = vector.broadcast %345 : f32 to vector<16x256xf32>
    %349 = arith.mulf %348, %347 : vector<16x256xf32>
    %350 = arith.addf %344, %349 : vector<16x256xf32>
    %c246 = arith.constant 246 : index
    %351 = memref.load %arg4[%c246] : memref<256xf32, #tpu.memory_space<smem>>
    %352 = vector.extract_strided_slice %7 {offsets = [3, 0, 0], sizes = [1, 16, 256], strides = [1, 1, 1]} : vector<4x16x256xf32> to vector<1x16x256xf32>
    %353 = vector.shape_cast %352 : vector<1x16x256xf32> to vector<16x256xf32>
    %354 = vector.broadcast %351 : f32 to vector<16x256xf32>
    %355 = arith.mulf %354, %353 : vector<16x256xf32>
    %356 = arith.addf %350, %355 : vector<16x256xf32>
    %c6_9 = arith.constant 6 : index
    %357 = memref.load %arg5[%c6_9] : memref<8xf32, #tpu.memory_space<smem>>
    %358 = vector.broadcast %357 : f32 to vector<16x256xf32>
    %359 = arith.addf %356, %358 : vector<16x256xf32>
    %c58 = arith.constant 58 : index
    %360 = memref.load %arg4[%c58] : memref<256xf32, #tpu.memory_space<smem>>
    %361 = vector.extract_strided_slice %4 {offsets = [0, 0, 0], sizes = [1, 16, 256], strides = [1, 1, 1]} : vector<4x16x256xf32> to vector<1x16x256xf32>
    %362 = vector.shape_cast %361 : vector<1x16x256xf32> to vector<16x256xf32>
    %363 = vector.broadcast %360 : f32 to vector<16x256xf32>
    %364 = arith.mulf %363, %362 : vector<16x256xf32>
    %c62 = arith.constant 62 : index
    %365 = memref.load %arg4[%c62] : memref<256xf32, #tpu.memory_space<smem>>
    %366 = vector.extract_strided_slice %7 {offsets = [0, 0, 0], sizes = [1, 16, 256], strides = [1, 1, 1]} : vector<4x16x256xf32> to vector<1x16x256xf32>
    %367 = vector.shape_cast %366 : vector<1x16x256xf32> to vector<16x256xf32>
    %368 = vector.broadcast %365 : f32 to vector<16x256xf32>
    %369 = arith.mulf %368, %367 : vector<16x256xf32>
    %370 = arith.addf %364, %369 : vector<16x256xf32>
    %c122 = arith.constant 122 : index
    %371 = memref.load %arg4[%c122] : memref<256xf32, #tpu.memory_space<smem>>
    %372 = vector.extract_strided_slice %4 {offsets = [1, 0, 0], sizes = [1, 16, 256], strides = [1, 1, 1]} : vector<4x16x256xf32> to vector<1x16x256xf32>
    %373 = vector.shape_cast %372 : vector<1x16x256xf32> to vector<16x256xf32>
    %374 = vector.broadcast %371 : f32 to vector<16x256xf32>
    %375 = arith.mulf %374, %373 : vector<16x256xf32>
    %376 = arith.addf %370, %375 : vector<16x256xf32>
    %c126 = arith.constant 126 : index
    %377 = memref.load %arg4[%c126] : memref<256xf32, #tpu.memory_space<smem>>
    %378 = vector.extract_strided_slice %7 {offsets = [1, 0, 0], sizes = [1, 16, 256], strides = [1, 1, 1]} : vector<4x16x256xf32> to vector<1x16x256xf32>
    %379 = vector.shape_cast %378 : vector<1x16x256xf32> to vector<16x256xf32>
    %380 = vector.broadcast %377 : f32 to vector<16x256xf32>
    %381 = arith.mulf %380, %379 : vector<16x256xf32>
    %382 = arith.addf %376, %381 : vector<16x256xf32>
    %c186 = arith.constant 186 : index
    %383 = memref.load %arg4[%c186] : memref<256xf32, #tpu.memory_space<smem>>
    %384 = vector.extract_strided_slice %4 {offsets = [2, 0, 0], sizes = [1, 16, 256], strides = [1, 1, 1]} : vector<4x16x256xf32> to vector<1x16x256xf32>
    %385 = vector.shape_cast %384 : vector<1x16x256xf32> to vector<16x256xf32>
    %386 = vector.broadcast %383 : f32 to vector<16x256xf32>
    %387 = arith.mulf %386, %385 : vector<16x256xf32>
    %388 = arith.addf %382, %387 : vector<16x256xf32>
    %c190 = arith.constant 190 : index
    %389 = memref.load %arg4[%c190] : memref<256xf32, #tpu.memory_space<smem>>
    %390 = vector.extract_strided_slice %7 {offsets = [2, 0, 0], sizes = [1, 16, 256], strides = [1, 1, 1]} : vector<4x16x256xf32> to vector<1x16x256xf32>
    %391 = vector.shape_cast %390 : vector<1x16x256xf32> to vector<16x256xf32>
    %392 = vector.broadcast %389 : f32 to vector<16x256xf32>
    %393 = arith.mulf %392, %391 : vector<16x256xf32>
    %394 = arith.addf %388, %393 : vector<16x256xf32>
    %c250 = arith.constant 250 : index
    %395 = memref.load %arg4[%c250] : memref<256xf32, #tpu.memory_space<smem>>
    %396 = vector.extract_strided_slice %4 {offsets = [3, 0, 0], sizes = [1, 16, 256], strides = [1, 1, 1]} : vector<4x16x256xf32> to vector<1x16x256xf32>
    %397 = vector.shape_cast %396 : vector<1x16x256xf32> to vector<16x256xf32>
    %398 = vector.broadcast %395 : f32 to vector<16x256xf32>
    %399 = arith.mulf %398, %397 : vector<16x256xf32>
    %400 = arith.addf %394, %399 : vector<16x256xf32>
    %c254 = arith.constant 254 : index
    %401 = memref.load %arg4[%c254] : memref<256xf32, #tpu.memory_space<smem>>
    %402 = vector.extract_strided_slice %7 {offsets = [3, 0, 0], sizes = [1, 16, 256], strides = [1, 1, 1]} : vector<4x16x256xf32> to vector<1x16x256xf32>
    %403 = vector.shape_cast %402 : vector<1x16x256xf32> to vector<16x256xf32>
    %404 = vector.broadcast %401 : f32 to vector<16x256xf32>
    %405 = arith.mulf %404, %403 : vector<16x256xf32>
    %406 = arith.addf %400, %405 : vector<16x256xf32>
    %c7 = arith.constant 7 : index
    %407 = memref.load %arg5[%c7] : memref<8xf32, #tpu.memory_space<smem>>
    %408 = vector.broadcast %407 : f32 to vector<16x256xf32>
    %409 = arith.addf %406, %408 : vector<16x256xf32>
    %410 = vector.shape_cast %59 : vector<16x256xf32> to vector<1x16x256xf32>
    %411 = vector.shape_cast %109 : vector<16x256xf32> to vector<1x16x256xf32>
    %412 = vector.shape_cast %159 : vector<16x256xf32> to vector<1x16x256xf32>
    %413 = vector.shape_cast %209 : vector<16x256xf32> to vector<1x16x256xf32>
    %414 = vector.shape_cast %259 : vector<16x256xf32> to vector<1x16x256xf32>
    %415 = vector.shape_cast %309 : vector<16x256xf32> to vector<1x16x256xf32>
    %416 = vector.shape_cast %359 : vector<16x256xf32> to vector<1x16x256xf32>
    %417 = vector.shape_cast %409 : vector<16x256xf32> to vector<1x16x256xf32>
    %418 = tpu.concatenate %410, %411, %412, %413, %414, %415, %416, %417 in 0 : vector<1x16x256xf32>, vector<1x16x256xf32>, vector<1x16x256xf32>, vector<1x16x256xf32>, vector<1x16x256xf32>, vector<1x16x256xf32>, vector<1x16x256xf32>, vector<1x16x256xf32> -> vector<8x16x256xf32>
    %c0_10 = arith.constant 0 : index
    %c0_11 = arith.constant 0 : index
    %c0_12 = arith.constant 0 : index
    %c0_13 = arith.constant 0 : index
    %c0_14 = arith.constant 0 : index
    %419 = vector.load %arg6[%c0_10, %c0_11, %c0_12, %c0_13, %c0_14] : memref<1x8x16x4x256xf32, #tpu.memory_space<vmem>>, vector<1x8x16x1x256xf32>
    %420 = vector.shape_cast %419 : vector<1x8x16x1x256xf32> to vector<8x16x256xf32>
    %421 = vector.shape_cast %418 : vector<8x16x256xf32> to vector<1x8x16x1x256xf32>
    tpu.vector_store %arg6[%c0_10, %c0_11, %c0_12, %c0_13, %c0_14], %421 {strides = array<i32>} : memref<1x8x16x4x256xf32, #tpu.memory_space<vmem>>, vector<1x8x16x1x256xf32>,
    %c3_15 = arith.constant 3 : index
    %422 = memref.load %arg4[%c3_15] : memref<256xf32, #tpu.memory_space<smem>>
    %423 = vector.extract_strided_slice %4 {offsets = [0, 0, 0], sizes = [1, 16, 256], strides = [1, 1, 1]} : vector<4x16x256xf32> to vector<1x16x256xf32>
    %424 = vector.shape_cast %423 : vector<1x16x256xf32> to vector<16x256xf32>
    %425 = vector.broadcast %422 : f32 to vector<16x256xf32>
    %426 = arith.mulf %425, %424 : vector<16x256xf32>
    %c7_16 = arith.constant 7 : index
    %427 = memref.load %arg4[%c7_16] : memref<256xf32, #tpu.memory_space<smem>>
    %428 = vector.extract_strided_slice %7 {offsets = [0, 0, 0], sizes = [1, 16, 256], strides = [1, 1, 1]} : vector<4x16x256xf32> to vector<1x16x256xf32>
    %429 = vector.shape_cast %428 : vector<1x16x256xf32> to vector<16x256xf32>
    %430 = vector.broadcast %427 : f32 to vector<16x256xf32>
    %431 = arith.mulf %430, %429 : vector<16x256xf32>
    %432 = arith.addf %426, %431 : vector<16x256xf32>
    %c67 = arith.constant 67 : index
    %433 = memref.load %arg4[%c67] : memref<256xf32, #tpu.memory_space<smem>>
    %434 = vector.extract_strided_slice %4 {offsets = [1, 0, 0], sizes = [1, 16, 256], strides = [1, 1, 1]} : vector<4x16x256xf32> to vector<1x16x256xf32>
    %435 = vector.shape_cast %434 : vector<1x16x256xf32> to vector<16x256xf32>
    %436 = vector.broadcast %433 : f32 to vector<16x256xf32>
    %437 = arith.mulf %436, %435 : vector<16x256xf32>
    %438 = arith.addf %432, %437 : vector<16x256xf32>
    %c71 = arith.constant 71 : index
    %439 = memref.load %arg4[%c71] : memref<256xf32, #tpu.memory_space<smem>>
    %440 = vector.extract_strided_slice %7 {offsets = [1, 0, 0], sizes = [1, 16, 256], strides = [1, 1, 1]} : vector<4x16x256xf32> to vector<1x16x256xf32>
    %441 = vector.shape_cast %440 : vector<1x16x256xf32> to vector<16x256xf32>
    %442 = vector.broadcast %439 : f32 to vector<16x256xf32>
    %443 = arith.mulf %442, %441 : vector<16x256xf32>
    %444 = arith.addf %438, %443 : vector<16x256xf32>
    %c131 = arith.constant 131 : index
    %445 = memref.load %arg4[%c131] : memref<256xf32, #tpu.memory_space<smem>>
    %446 = vector.extract_strided_slice %4 {offsets = [2, 0, 0], sizes = [1, 16, 256], strides = [1, 1, 1]} : vector<4x16x256xf32> to vector<1x16x256xf32>
    %447 = vector.shape_cast %446 : vector<1x16x256xf32> to vector<16x256xf32>
    %448 = vector.broadcast %445 : f32 to vector<16x256xf32>
    %449 = arith.mulf %448, %447 : vector<16x256xf32>
    %450 = arith.addf %444, %449 : vector<16x256xf32>
    %c135 = arith.constant 135 : index
    %451 = memref.load %arg4[%c135] : memref<256xf32, #tpu.memory_space<smem>>
    %452 = vector.extract_strided_slice %7 {offsets = [2, 0, 0], sizes = [1, 16, 256], strides = [1, 1, 1]} : vector<4x16x256xf32> to vector<1x16x256xf32>
    %453 = vector.shape_cast %452 : vector<1x16x256xf32> to vector<16x256xf32>
    %454 = vector.broadcast %451 : f32 to vector<16x256xf32>
    %455 = arith.mulf %454, %453 : vector<16x256xf32>
    %456 = arith.addf %450, %455 : vector<16x256xf32>
    %c195 = arith.constant 195 : index
    %457 = memref.load %arg4[%c195] : memref<256xf32, #tpu.memory_space<smem>>
    %458 = vector.extract_strided_slice %4 {offsets = [3, 0, 0], sizes = [1, 16, 256], strides = [1, 1, 1]} : vector<4x16x256xf32> to vector<1x16x256xf32>
    %459 = vector.shape_cast %458 : vector<1x16x256xf32> to vector<16x256xf32>
    %460 = vector.broadcast %457 : f32 to vector<16x256xf32>
    %461 = arith.mulf %460, %459 : vector<16x256xf32>
    %462 = arith.addf %456, %461 : vector<16x256xf32>
    %c199 = arith.constant 199 : index
    %463 = memref.load %arg4[%c199] : memref<256xf32, #tpu.memory_space<smem>>
    %464 = vector.extract_strided_slice %7 {offsets = [3, 0, 0], sizes = [1, 16, 256], strides = [1, 1, 1]} : vector<4x16x256xf32> to vector<1x16x256xf32>
    %465 = vector.shape_cast %464 : vector<1x16x256xf32> to vector<16x256xf32>
    %466 = vector.broadcast %463 : f32 to vector<16x256xf32>
    %467 = arith.mulf %466, %465 : vector<16x256xf32>
    %468 = arith.addf %462, %467 : vector<16x256xf32>
    %c0_17 = arith.constant 0 : index
    %469 = memref.load %arg5[%c0_17] : memref<8xf32, #tpu.memory_space<smem>>
    %470 = vector.broadcast %469 : f32 to vector<16x256xf32>
    %471 = arith.addf %468, %470 : vector<16x256xf32>
    %c11 = arith.constant 11 : index
    %472 = memref.load %arg4[%c11] : memref<256xf32, #tpu.memory_space<smem>>
    %473 = vector.extract_strided_slice %4 {offsets = [0, 0, 0], sizes = [1, 16, 256], strides = [1, 1, 1]} : vector<4x16x256xf32> to vector<1x16x256xf32>
    %474 = vector.shape_cast %473 : vector<1x16x256xf32> to vector<16x256xf32>
    %475 = vector.broadcast %472 : f32 to vector<16x256xf32>
    %476 = arith.mulf %475, %474 : vector<16x256xf32>
    %c15 = arith.constant 15 : index
    %477 = memref.load %arg4[%c15] : memref<256xf32, #tpu.memory_space<smem>>
    %478 = vector.extract_strided_slice %7 {offsets = [0, 0, 0], sizes = [1, 16, 256], strides = [1, 1, 1]} : vector<4x16x256xf32> to vector<1x16x256xf32>
    %479 = vector.shape_cast %478 : vector<1x16x256xf32> to vector<16x256xf32>
    %480 = vector.broadcast %477 : f32 to vector<16x256xf32>
    %481 = arith.mulf %480, %479 : vector<16x256xf32>
    %482 = arith.addf %476, %481 : vector<16x256xf32>
    %c75 = arith.constant 75 : index
    %483 = memref.load %arg4[%c75] : memref<256xf32, #tpu.memory_space<smem>>
    %484 = vector.extract_strided_slice %4 {offsets = [1, 0, 0], sizes = [1, 16, 256], strides = [1, 1, 1]} : vector<4x16x256xf32> to vector<1x16x256xf32>
    %485 = vector.shape_cast %484 : vector<1x16x256xf32> to vector<16x256xf32>
    %486 = vector.broadcast %483 : f32 to vector<16x256xf32>
    %487 = arith.mulf %486, %485 : vector<16x256xf32>
    %488 = arith.addf %482, %487 : vector<16x256xf32>
    %c79 = arith.constant 79 : index
    %489 = memref.load %arg4[%c79] : memref<256xf32, #tpu.memory_space<smem>>
    %490 = vector.extract_strided_slice %7 {offsets = [1, 0, 0], sizes = [1, 16, 256], strides = [1, 1, 1]} : vector<4x16x256xf32> to vector<1x16x256xf32>
    %491 = vector.shape_cast %490 : vector<1x16x256xf32> to vector<16x256xf32>
    %492 = vector.broadcast %489 : f32 to vector<16x256xf32>
    %493 = arith.mulf %492, %491 : vector<16x256xf32>
    %494 = arith.addf %488, %493 : vector<16x256xf32>
    %c139 = arith.constant 139 : index
    %495 = memref.load %arg4[%c139] : memref<256xf32, #tpu.memory_space<smem>>
    %496 = vector.extract_strided_slice %4 {offsets = [2, 0, 0], sizes = [1, 16, 256], strides = [1, 1, 1]} : vector<4x16x256xf32> to vector<1x16x256xf32>
    %497 = vector.shape_cast %496 : vector<1x16x256xf32> to vector<16x256xf32>
    %498 = vector.broadcast %495 : f32 to vector<16x256xf32>
    %499 = arith.mulf %498, %497 : vector<16x256xf32>
    %500 = arith.addf %494, %499 : vector<16x256xf32>
    %c143 = arith.constant 143 : index
    %501 = memref.load %arg4[%c143] : memref<256xf32, #tpu.memory_space<smem>>
    %502 = vector.extract_strided_slice %7 {offsets = [2, 0, 0], sizes = [1, 16, 256], strides = [1, 1, 1]} : vector<4x16x256xf32> to vector<1x16x256xf32>
    %503 = vector.shape_cast %502 : vector<1x16x256xf32> to vector<16x256xf32>
    %504 = vector.broadcast %501 : f32 to vector<16x256xf32>
    %505 = arith.mulf %504, %503 : vector<16x256xf32>
    %506 = arith.addf %500, %505 : vector<16x256xf32>
    %c203 = arith.constant 203 : index
    %507 = memref.load %arg4[%c203] : memref<256xf32, #tpu.memory_space<smem>>
    %508 = vector.extract_strided_slice %4 {offsets = [3, 0, 0], sizes = [1, 16, 256], strides = [1, 1, 1]} : vector<4x16x256xf32> to vector<1x16x256xf32>
    %509 = vector.shape_cast %508 : vector<1x16x256xf32> to vector<16x256xf32>
    %510 = vector.broadcast %507 : f32 to vector<16x256xf32>
    %511 = arith.mulf %510, %509 : vector<16x256xf32>
    %512 = arith.addf %506, %511 : vector<16x256xf32>
    %c207 = arith.constant 207 : index
    %513 = memref.load %arg4[%c207] : memref<256xf32, #tpu.memory_space<smem>>
    %514 = vector.extract_strided_slice %7 {offsets = [3, 0, 0], sizes = [1, 16, 256], strides = [1, 1, 1]} : vector<4x16x256xf32> to vector<1x16x256xf32>
    %515 = vector.shape_cast %514 : vector<1x16x256xf32> to vector<16x256xf32>
    %516 = vector.broadcast %513 : f32 to vector<16x256xf32>
    %517 = arith.mulf %516, %515 : vector<16x256xf32>
    %518 = arith.addf %512, %517 : vector<16x256xf32>
    %c1_18 = arith.constant 1 : index
    %519 = memref.load %arg5[%c1_18] : memref<8xf32, #tpu.memory_space<smem>>
    %520 = vector.broadcast %519 : f32 to vector<16x256xf32>
    %521 = arith.addf %518, %520 : vector<16x256xf32>
    %c19 = arith.constant 19 : index
    %522 = memref.load %arg4[%c19] : memref<256xf32, #tpu.memory_space<smem>>
    %523 = vector.extract_strided_slice %4 {offsets = [0, 0, 0], sizes = [1, 16, 256], strides = [1, 1, 1]} : vector<4x16x256xf32> to vector<1x16x256xf32>
    %524 = vector.shape_cast %523 : vector<1x16x256xf32> to vector<16x256xf32>
    %525 = vector.broadcast %522 : f32 to vector<16x256xf32>
    %526 = arith.mulf %525, %524 : vector<16x256xf32>
    %c23 = arith.constant 23 : index
    %527 = memref.load %arg4[%c23] : memref<256xf32, #tpu.memory_space<smem>>
    %528 = vector.extract_strided_slice %7 {offsets = [0, 0, 0], sizes = [1, 16, 256], strides = [1, 1, 1]} : vector<4x16x256xf32> to vector<1x16x256xf32>
    %529 = vector.shape_cast %528 : vector<1x16x256xf32> to vector<16x256xf32>
    %530 = vector.broadcast %527 : f32 to vector<16x256xf32>
    %531 = arith.mulf %530, %529 : vector<16x256xf32>
    %532 = arith.addf %526, %531 : vector<16x256xf32>
    %c83 = arith.constant 83 : index
    %533 = memref.load %arg4[%c83] : memref<256xf32, #tpu.memory_space<smem>>
    %534 = vector.extract_strided_slice %4 {offsets = [1, 0, 0], sizes = [1, 16, 256], strides = [1, 1, 1]} : vector<4x16x256xf32> to vector<1x16x256xf32>
    %535 = vector.shape_cast %534 : vector<1x16x256xf32> to vector<16x256xf32>
    %536 = vector.broadcast %533 : f32 to vector<16x256xf32>
    %537 = arith.mulf %536, %535 : vector<16x256xf32>
    %538 = arith.addf %532, %537 : vector<16x256xf32>
    %c87 = arith.constant 87 : index
    %539 = memref.load %arg4[%c87] : memref<256xf32, #tpu.memory_space<smem>>
    %540 = vector.extract_strided_slice %7 {offsets = [1, 0, 0], sizes = [1, 16, 256], strides = [1, 1, 1]} : vector<4x16x256xf32> to vector<1x16x256xf32>
    %541 = vector.shape_cast %540 : vector<1x16x256xf32> to vector<16x256xf32>
    %542 = vector.broadcast %539 : f32 to vector<16x256xf32>
    %543 = arith.mulf %542, %541 : vector<16x256xf32>
    %544 = arith.addf %538, %543 : vector<16x256xf32>
    %c147 = arith.constant 147 : index
    %545 = memref.load %arg4[%c147] : memref<256xf32, #tpu.memory_space<smem>>
    %546 = vector.extract_strided_slice %4 {offsets = [2, 0, 0], sizes = [1, 16, 256], strides = [1, 1, 1]} : vector<4x16x256xf32> to vector<1x16x256xf32>
    %547 = vector.shape_cast %546 : vector<1x16x256xf32> to vector<16x256xf32>
    %548 = vector.broadcast %545 : f32 to vector<16x256xf32>
    %549 = arith.mulf %548, %547 : vector<16x256xf32>
    %550 = arith.addf %544, %549 : vector<16x256xf32>
    %c151 = arith.constant 151 : index
    %551 = memref.load %arg4[%c151] : memref<256xf32, #tpu.memory_space<smem>>
    %552 = vector.extract_strided_slice %7 {offsets = [2, 0, 0], sizes = [1, 16, 256], strides = [1, 1, 1]} : vector<4x16x256xf32> to vector<1x16x256xf32>
    %553 = vector.shape_cast %552 : vector<1x16x256xf32> to vector<16x256xf32>
    %554 = vector.broadcast %551 : f32 to vector<16x256xf32>
    %555 = arith.mulf %554, %553 : vector<16x256xf32>
    %556 = arith.addf %550, %555 : vector<16x256xf32>
    %c211 = arith.constant 211 : index
    %557 = memref.load %arg4[%c211] : memref<256xf32, #tpu.memory_space<smem>>
    %558 = vector.extract_strided_slice %4 {offsets = [3, 0, 0], sizes = [1, 16, 256], strides = [1, 1, 1]} : vector<4x16x256xf32> to vector<1x16x256xf32>
    %559 = vector.shape_cast %558 : vector<1x16x256xf32> to vector<16x256xf32>
    %560 = vector.broadcast %557 : f32 to vector<16x256xf32>
    %561 = arith.mulf %560, %559 : vector<16x256xf32>
    %562 = arith.addf %556, %561 : vector<16x256xf32>
    %c215 = arith.constant 215 : index
    %563 = memref.load %arg4[%c215] : memref<256xf32, #tpu.memory_space<smem>>
    %564 = vector.extract_strided_slice %7 {offsets = [3, 0, 0], sizes = [1, 16, 256], strides = [1, 1, 1]} : vector<4x16x256xf32> to vector<1x16x256xf32>
    %565 = vector.shape_cast %564 : vector<1x16x256xf32> to vector<16x256xf32>
    %566 = vector.broadcast %563 : f32 to vector<16x256xf32>
    %567 = arith.mulf %566, %565 : vector<16x256xf32>
    %568 = arith.addf %562, %567 : vector<16x256xf32>
    %c2_19 = arith.constant 2 : index
    %569 = memref.load %arg5[%c2_19] : memref<8xf32, #tpu.memory_space<smem>>
    %570 = vector.broadcast %569 : f32 to vector<16x256xf32>
    %571 = arith.addf %568, %570 : vector<16x256xf32>
    %c27 = arith.constant 27 : index
    %572 = memref.load %arg4[%c27] : memref<256xf32, #tpu.memory_space<smem>>
    %573 = vector.extract_strided_slice %4 {offsets = [0, 0, 0], sizes = [1, 16, 256], strides = [1, 1, 1]} : vector<4x16x256xf32> to vector<1x16x256xf32>
    %574 = vector.shape_cast %573 : vector<1x16x256xf32> to vector<16x256xf32>
    %575 = vector.broadcast %572 : f32 to vector<16x256xf32>
    %576 = arith.mulf %575, %574 : vector<16x256xf32>
    %c31 = arith.constant 31 : index
    %577 = memref.load %arg4[%c31] : memref<256xf32, #tpu.memory_space<smem>>
    %578 = vector.extract_strided_slice %7 {offsets = [0, 0, 0], sizes = [1, 16, 256], strides = [1, 1, 1]} : vector<4x16x256xf32> to vector<1x16x256xf32>
    %579 = vector.shape_cast %578 : vector<1x16x256xf32> to vector<16x256xf32>
    %580 = vector.broadcast %577 : f32 to vector<16x256xf32>
    %581 = arith.mulf %580, %579 : vector<16x256xf32>
    %582 = arith.addf %576, %581 : vector<16x256xf32>
    %c91 = arith.constant 91 : index
    %583 = memref.load %arg4[%c91] : memref<256xf32, #tpu.memory_space<smem>>
    %584 = vector.extract_strided_slice %4 {offsets = [1, 0, 0], sizes = [1, 16, 256], strides = [1, 1, 1]} : vector<4x16x256xf32> to vector<1x16x256xf32>
    %585 = vector.shape_cast %584 : vector<1x16x256xf32> to vector<16x256xf32>
    %586 = vector.broadcast %583 : f32 to vector<16x256xf32>
    %587 = arith.mulf %586, %585 : vector<16x256xf32>
    %588 = arith.addf %582, %587 : vector<16x256xf32>
    %c95 = arith.constant 95 : index
    %589 = memref.load %arg4[%c95] : memref<256xf32, #tpu.memory_space<smem>>
    %590 = vector.extract_strided_slice %7 {offsets = [1, 0, 0], sizes = [1, 16, 256], strides = [1, 1, 1]} : vector<4x16x256xf32> to vector<1x16x256xf32>
    %591 = vector.shape_cast %590 : vector<1x16x256xf32> to vector<16x256xf32>
    %592 = vector.broadcast %589 : f32 to vector<16x256xf32>
    %593 = arith.mulf %592, %591 : vector<16x256xf32>
    %594 = arith.addf %588, %593 : vector<16x256xf32>
    %c155 = arith.constant 155 : index
    %595 = memref.load %arg4[%c155] : memref<256xf32, #tpu.memory_space<smem>>
    %596 = vector.extract_strided_slice %4 {offsets = [2, 0, 0], sizes = [1, 16, 256], strides = [1, 1, 1]} : vector<4x16x256xf32> to vector<1x16x256xf32>
    %597 = vector.shape_cast %596 : vector<1x16x256xf32> to vector<16x256xf32>
    %598 = vector.broadcast %595 : f32 to vector<16x256xf32>
    %599 = arith.mulf %598, %597 : vector<16x256xf32>
    %600 = arith.addf %594, %599 : vector<16x256xf32>
    %c159 = arith.constant 159 : index
    %601 = memref.load %arg4[%c159] : memref<256xf32, #tpu.memory_space<smem>>
    %602 = vector.extract_strided_slice %7 {offsets = [2, 0, 0], sizes = [1, 16, 256], strides = [1, 1, 1]} : vector<4x16x256xf32> to vector<1x16x256xf32>
    %603 = vector.shape_cast %602 : vector<1x16x256xf32> to vector<16x256xf32>
    %604 = vector.broadcast %601 : f32 to vector<16x256xf32>
    %605 = arith.mulf %604, %603 : vector<16x256xf32>
    %606 = arith.addf %600, %605 : vector<16x256xf32>
    %c219 = arith.constant 219 : index
    %607 = memref.load %arg4[%c219] : memref<256xf32, #tpu.memory_space<smem>>
    %608 = vector.extract_strided_slice %4 {offsets = [3, 0, 0], sizes = [1, 16, 256], strides = [1, 1, 1]} : vector<4x16x256xf32> to vector<1x16x256xf32>
    %609 = vector.shape_cast %608 : vector<1x16x256xf32> to vector<16x256xf32>
    %610 = vector.broadcast %607 : f32 to vector<16x256xf32>
    %611 = arith.mulf %610, %609 : vector<16x256xf32>
    %612 = arith.addf %606, %611 : vector<16x256xf32>
    %c223 = arith.constant 223 : index
    %613 = memref.load %arg4[%c223] : memref<256xf32, #tpu.memory_space<smem>>
    %614 = vector.extract_strided_slice %7 {offsets = [3, 0, 0], sizes = [1, 16, 256], strides = [1, 1, 1]} : vector<4x16x256xf32> to vector<1x16x256xf32>
    %615 = vector.shape_cast %614 : vector<1x16x256xf32> to vector<16x256xf32>
    %616 = vector.broadcast %613 : f32 to vector<16x256xf32>
    %617 = arith.mulf %616, %615 : vector<16x256xf32>
    %618 = arith.addf %612, %617 : vector<16x256xf32>
    %c3_20 = arith.constant 3 : index
    %619 = memref.load %arg5[%c3_20] : memref<8xf32, #tpu.memory_space<smem>>
    %620 = vector.broadcast %619 : f32 to vector<16x256xf32>
    %621 = arith.addf %618, %620 : vector<16x256xf32>
    %c35 = arith.constant 35 : index
    %622 = memref.load %arg4[%c35] : memref<256xf32, #tpu.memory_space<smem>>
    %623 = vector.extract_strided_slice %4 {offsets = [0, 0, 0], sizes = [1, 16, 256], strides = [1, 1, 1]} : vector<4x16x256xf32> to vector<1x16x256xf32>
    %624 = vector.shape_cast %623 : vector<1x16x256xf32> to vector<16x256xf32>
    %625 = vector.broadcast %622 : f32 to vector<16x256xf32>
    %626 = arith.mulf %625, %624 : vector<16x256xf32>
    %c39 = arith.constant 39 : index
    %627 = memref.load %arg4[%c39] : memref<256xf32, #tpu.memory_space<smem>>
    %628 = vector.extract_strided_slice %7 {offsets = [0, 0, 0], sizes = [1, 16, 256], strides = [1, 1, 1]} : vector<4x16x256xf32> to vector<1x16x256xf32>
    %629 = vector.shape_cast %628 : vector<1x16x256xf32> to vector<16x256xf32>
    %630 = vector.broadcast %627 : f32 to vector<16x256xf32>
    %631 = arith.mulf %630, %629 : vector<16x256xf32>
    %632 = arith.addf %626, %631 : vector<16x256xf32>
    %c99 = arith.constant 99 : index
    %633 = memref.load %arg4[%c99] : memref<256xf32, #tpu.memory_space<smem>>
    %634 = vector.extract_strided_slice %4 {offsets = [1, 0, 0], sizes = [1, 16, 256], strides = [1, 1, 1]} : vector<4x16x256xf32> to vector<1x16x256xf32>
    %635 = vector.shape_cast %634 : vector<1x16x256xf32> to vector<16x256xf32>
    %636 = vector.broadcast %633 : f32 to vector<16x256xf32>
    %637 = arith.mulf %636, %635 : vector<16x256xf32>
    %638 = arith.addf %632, %637 : vector<16x256xf32>
    %c103 = arith.constant 103 : index
    %639 = memref.load %arg4[%c103] : memref<256xf32, #tpu.memory_space<smem>>
    %640 = vector.extract_strided_slice %7 {offsets = [1, 0, 0], sizes = [1, 16, 256], strides = [1, 1, 1]} : vector<4x16x256xf32> to vector<1x16x256xf32>
    %641 = vector.shape_cast %640 : vector<1x16x256xf32> to vector<16x256xf32>
    %642 = vector.broadcast %639 : f32 to vector<16x256xf32>
    %643 = arith.mulf %642, %641 : vector<16x256xf32>
    %644 = arith.addf %638, %643 : vector<16x256xf32>
    %c163 = arith.constant 163 : index
    %645 = memref.load %arg4[%c163] : memref<256xf32, #tpu.memory_space<smem>>
    %646 = vector.extract_strided_slice %4 {offsets = [2, 0, 0], sizes = [1, 16, 256], strides = [1, 1, 1]} : vector<4x16x256xf32> to vector<1x16x256xf32>
    %647 = vector.shape_cast %646 : vector<1x16x256xf32> to vector<16x256xf32>
    %648 = vector.broadcast %645 : f32 to vector<16x256xf32>
    %649 = arith.mulf %648, %647 : vector<16x256xf32>
    %650 = arith.addf %644, %649 : vector<16x256xf32>
    %c167 = arith.constant 167 : index
    %651 = memref.load %arg4[%c167] : memref<256xf32, #tpu.memory_space<smem>>
    %652 = vector.extract_strided_slice %7 {offsets = [2, 0, 0], sizes = [1, 16, 256], strides = [1, 1, 1]} : vector<4x16x256xf32> to vector<1x16x256xf32>
    %653 = vector.shape_cast %652 : vector<1x16x256xf32> to vector<16x256xf32>
    %654 = vector.broadcast %651 : f32 to vector<16x256xf32>
    %655 = arith.mulf %654, %653 : vector<16x256xf32>
    %656 = arith.addf %650, %655 : vector<16x256xf32>
    %c227 = arith.constant 227 : index
    %657 = memref.load %arg4[%c227] : memref<256xf32, #tpu.memory_space<smem>>
    %658 = vector.extract_strided_slice %4 {offsets = [3, 0, 0], sizes = [1, 16, 256], strides = [1, 1, 1]} : vector<4x16x256xf32> to vector<1x16x256xf32>
    %659 = vector.shape_cast %658 : vector<1x16x256xf32> to vector<16x256xf32>
    %660 = vector.broadcast %657 : f32 to vector<16x256xf32>
    %661 = arith.mulf %660, %659 : vector<16x256xf32>
    %662 = arith.addf %656, %661 : vector<16x256xf32>
    %c231 = arith.constant 231 : index
    %663 = memref.load %arg4[%c231] : memref<256xf32, #tpu.memory_space<smem>>
    %664 = vector.extract_strided_slice %7 {offsets = [3, 0, 0], sizes = [1, 16, 256], strides = [1, 1, 1]} : vector<4x16x256xf32> to vector<1x16x256xf32>
    %665 = vector.shape_cast %664 : vector<1x16x256xf32> to vector<16x256xf32>
    %666 = vector.broadcast %663 : f32 to vector<16x256xf32>
    %667 = arith.mulf %666, %665 : vector<16x256xf32>
    %668 = arith.addf %662, %667 : vector<16x256xf32>
    %c4_21 = arith.constant 4 : index
    %669 = memref.load %arg5[%c4_21] : memref<8xf32, #tpu.memory_space<smem>>
    %670 = vector.broadcast %669 : f32 to vector<16x256xf32>
    %671 = arith.addf %668, %670 : vector<16x256xf32>
    %c43 = arith.constant 43 : index
    %672 = memref.load %arg4[%c43] : memref<256xf32, #tpu.memory_space<smem>>
    %673 = vector.extract_strided_slice %4 {offsets = [0, 0, 0], sizes = [1, 16, 256], strides = [1, 1, 1]} : vector<4x16x256xf32> to vector<1x16x256xf32>
    %674 = vector.shape_cast %673 : vector<1x16x256xf32> to vector<16x256xf32>
    %675 = vector.broadcast %672 : f32 to vector<16x256xf32>
    %676 = arith.mulf %675, %674 : vector<16x256xf32>
    %c47 = arith.constant 47 : index
    %677 = memref.load %arg4[%c47] : memref<256xf32, #tpu.memory_space<smem>>
    %678 = vector.extract_strided_slice %7 {offsets = [0, 0, 0], sizes = [1, 16, 256], strides = [1, 1, 1]} : vector<4x16x256xf32> to vector<1x16x256xf32>
    %679 = vector.shape_cast %678 : vector<1x16x256xf32> to vector<16x256xf32>
    %680 = vector.broadcast %677 : f32 to vector<16x256xf32>
    %681 = arith.mulf %680, %679 : vector<16x256xf32>
    %682 = arith.addf %676, %681 : vector<16x256xf32>
    %c107 = arith.constant 107 : index
    %683 = memref.load %arg4[%c107] : memref<256xf32, #tpu.memory_space<smem>>
    %684 = vector.extract_strided_slice %4 {offsets = [1, 0, 0], sizes = [1, 16, 256], strides = [1, 1, 1]} : vector<4x16x256xf32> to vector<1x16x256xf32>
    %685 = vector.shape_cast %684 : vector<1x16x256xf32> to vector<16x256xf32>
    %686 = vector.broadcast %683 : f32 to vector<16x256xf32>
    %687 = arith.mulf %686, %685 : vector<16x256xf32>
    %688 = arith.addf %682, %687 : vector<16x256xf32>
    %c111 = arith.constant 111 : index
    %689 = memref.load %arg4[%c111] : memref<256xf32, #tpu.memory_space<smem>>
    %690 = vector.extract_strided_slice %7 {offsets = [1, 0, 0], sizes = [1, 16, 256], strides = [1, 1, 1]} : vector<4x16x256xf32> to vector<1x16x256xf32>
    %691 = vector.shape_cast %690 : vector<1x16x256xf32> to vector<16x256xf32>
    %692 = vector.broadcast %689 : f32 to vector<16x256xf32>
    %693 = arith.mulf %692, %691 : vector<16x256xf32>
    %694 = arith.addf %688, %693 : vector<16x256xf32>
    %c171 = arith.constant 171 : index
    %695 = memref.load %arg4[%c171] : memref<256xf32, #tpu.memory_space<smem>>
    %696 = vector.extract_strided_slice %4 {offsets = [2, 0, 0], sizes = [1, 16, 256], strides = [1, 1, 1]} : vector<4x16x256xf32> to vector<1x16x256xf32>
    %697 = vector.shape_cast %696 : vector<1x16x256xf32> to vector<16x256xf32>
    %698 = vector.broadcast %695 : f32 to vector<16x256xf32>
    %699 = arith.mulf %698, %697 : vector<16x256xf32>
    %700 = arith.addf %694, %699 : vector<16x256xf32>
    %c175 = arith.constant 175 : index
    %701 = memref.load %arg4[%c175] : memref<256xf32, #tpu.memory_space<smem>>
    %702 = vector.extract_strided_slice %7 {offsets = [2, 0, 0], sizes = [1, 16, 256], strides = [1, 1, 1]} : vector<4x16x256xf32> to vector<1x16x256xf32>
    %703 = vector.shape_cast %702 : vector<1x16x256xf32> to vector<16x256xf32>
    %704 = vector.broadcast %701 : f32 to vector<16x256xf32>
    %705 = arith.mulf %704, %703 : vector<16x256xf32>
    %706 = arith.addf %700, %705 : vector<16x256xf32>
    %c235 = arith.constant 235 : index
    %707 = memref.load %arg4[%c235] : memref<256xf32, #tpu.memory_space<smem>>
    %708 = vector.extract_strided_slice %4 {offsets = [3, 0, 0], sizes = [1, 16, 256], strides = [1, 1, 1]} : vector<4x16x256xf32> to vector<1x16x256xf32>
    %709 = vector.shape_cast %708 : vector<1x16x256xf32> to vector<16x256xf32>
    %710 = vector.broadcast %707 : f32 to vector<16x256xf32>
    %711 = arith.mulf %710, %709 : vector<16x256xf32>
    %712 = arith.addf %706, %711 : vector<16x256xf32>
    %c239 = arith.constant 239 : index
    %713 = memref.load %arg4[%c239] : memref<256xf32, #tpu.memory_space<smem>>
    %714 = vector.extract_strided_slice %7 {offsets = [3, 0, 0], sizes = [1, 16, 256], strides = [1, 1, 1]} : vector<4x16x256xf32> to vector<1x16x256xf32>
    %715 = vector.shape_cast %714 : vector<1x16x256xf32> to vector<16x256xf32>
    %716 = vector.broadcast %713 : f32 to vector<16x256xf32>
    %717 = arith.mulf %716, %715 : vector<16x256xf32>
    %718 = arith.addf %712, %717 : vector<16x256xf32>
    %c5_22 = arith.constant 5 : index
    %719 = memref.load %arg5[%c5_22] : memref<8xf32, #tpu.memory_space<smem>>
    %720 = vector.broadcast %719 : f32 to vector<16x256xf32>
    %721 = arith.addf %718, %720 : vector<16x256xf32>
    %c51 = arith.constant 51 : index
    %722 = memref.load %arg4[%c51] : memref<256xf32, #tpu.memory_space<smem>>
    %723 = vector.extract_strided_slice %4 {offsets = [0, 0, 0], sizes = [1, 16, 256], strides = [1, 1, 1]} : vector<4x16x256xf32> to vector<1x16x256xf32>
    %724 = vector.shape_cast %723 : vector<1x16x256xf32> to vector<16x256xf32>
    %725 = vector.broadcast %722 : f32 to vector<16x256xf32>
    %726 = arith.mulf %725, %724 : vector<16x256xf32>
    %c55 = arith.constant 55 : index
    %727 = memref.load %arg4[%c55] : memref<256xf32, #tpu.memory_space<smem>>
    %728 = vector.extract_strided_slice %7 {offsets = [0, 0, 0], sizes = [1, 16, 256], strides = [1, 1, 1]} : vector<4x16x256xf32> to vector<1x16x256xf32>
    %729 = vector.shape_cast %728 : vector<1x16x256xf32> to vector<16x256xf32>
    %730 = vector.broadcast %727 : f32 to vector<16x256xf32>
    %731 = arith.mulf %730, %729 : vector<16x256xf32>
    %732 = arith.addf %726, %731 : vector<16x256xf32>
    %c115 = arith.constant 115 : index
    %733 = memref.load %arg4[%c115] : memref<256xf32, #tpu.memory_space<smem>>
    %734 = vector.extract_strided_slice %4 {offsets = [1, 0, 0], sizes = [1, 16, 256], strides = [1, 1, 1]} : vector<4x16x256xf32> to vector<1x16x256xf32>
    %735 = vector.shape_cast %734 : vector<1x16x256xf32> to vector<16x256xf32>
    %736 = vector.broadcast %733 : f32 to vector<16x256xf32>
    %737 = arith.mulf %736, %735 : vector<16x256xf32>
    %738 = arith.addf %732, %737 : vector<16x256xf32>
    %c119 = arith.constant 119 : index
    %739 = memref.load %arg4[%c119] : memref<256xf32, #tpu.memory_space<smem>>
    %740 = vector.extract_strided_slice %7 {offsets = [1, 0, 0], sizes = [1, 16, 256], strides = [1, 1, 1]} : vector<4x16x256xf32> to vector<1x16x256xf32>
    %741 = vector.shape_cast %740 : vector<1x16x256xf32> to vector<16x256xf32>
    %742 = vector.broadcast %739 : f32 to vector<16x256xf32>
    %743 = arith.mulf %742, %741 : vector<16x256xf32>
    %744 = arith.addf %738, %743 : vector<16x256xf32>
    %c179 = arith.constant 179 : index
    %745 = memref.load %arg4[%c179] : memref<256xf32, #tpu.memory_space<smem>>
    %746 = vector.extract_strided_slice %4 {offsets = [2, 0, 0], sizes = [1, 16, 256], strides = [1, 1, 1]} : vector<4x16x256xf32> to vector<1x16x256xf32>
    %747 = vector.shape_cast %746 : vector<1x16x256xf32> to vector<16x256xf32>
    %748 = vector.broadcast %745 : f32 to vector<16x256xf32>
    %749 = arith.mulf %748, %747 : vector<16x256xf32>
    %750 = arith.addf %744, %749 : vector<16x256xf32>
    %c183 = arith.constant 183 : index
    %751 = memref.load %arg4[%c183] : memref<256xf32, #tpu.memory_space<smem>>
    %752 = vector.extract_strided_slice %7 {offsets = [2, 0, 0], sizes = [1, 16, 256], strides = [1, 1, 1]} : vector<4x16x256xf32> to vector<1x16x256xf32>
    %753 = vector.shape_cast %752 : vector<1x16x256xf32> to vector<16x256xf32>
    %754 = vector.broadcast %751 : f32 to vector<16x256xf32>
    %755 = arith.mulf %754, %753 : vector<16x256xf32>
    %756 = arith.addf %750, %755 : vector<16x256xf32>
    %c243 = arith.constant 243 : index
    %757 = memref.load %arg4[%c243] : memref<256xf32, #tpu.memory_space<smem>>
    %758 = vector.extract_strided_slice %4 {offsets = [3, 0, 0], sizes = [1, 16, 256], strides = [1, 1, 1]} : vector<4x16x256xf32> to vector<1x16x256xf32>
    %759 = vector.shape_cast %758 : vector<1x16x256xf32> to vector<16x256xf32>
    %760 = vector.broadcast %757 : f32 to vector<16x256xf32>
    %761 = arith.mulf %760, %759 : vector<16x256xf32>
    %762 = arith.addf %756, %761 : vector<16x256xf32>
    %c247 = arith.constant 247 : index
    %763 = memref.load %arg4[%c247] : memref<256xf32, #tpu.memory_space<smem>>
    %764 = vector.extract_strided_slice %7 {offsets = [3, 0, 0], sizes = [1, 16, 256], strides = [1, 1, 1]} : vector<4x16x256xf32> to vector<1x16x256xf32>
    %765 = vector.shape_cast %764 : vector<1x16x256xf32> to vector<16x256xf32>
    %766 = vector.broadcast %763 : f32 to vector<16x256xf32>
    %767 = arith.mulf %766, %765 : vector<16x256xf32>
    %768 = arith.addf %762, %767 : vector<16x256xf32>
    %c6_23 = arith.constant 6 : index
    %769 = memref.load %arg5[%c6_23] : memref<8xf32, #tpu.memory_space<smem>>
    %770 = vector.broadcast %769 : f32 to vector<16x256xf32>
    %771 = arith.addf %768, %770 : vector<16x256xf32>
    %c59 = arith.constant 59 : index
    %772 = memref.load %arg4[%c59] : memref<256xf32, #tpu.memory_space<smem>>
    %773 = vector.extract_strided_slice %4 {offsets = [0, 0, 0], sizes = [1, 16, 256], strides = [1, 1, 1]} : vector<4x16x256xf32> to vector<1x16x256xf32>
    %774 = vector.shape_cast %773 : vector<1x16x256xf32> to vector<16x256xf32>
    %775 = vector.broadcast %772 : f32 to vector<16x256xf32>
    %776 = arith.mulf %775, %774 : vector<16x256xf32>
    %c63 = arith.constant 63 : index
    %777 = memref.load %arg4[%c63] : memref<256xf32, #tpu.memory_space<smem>>
    %778 = vector.extract_strided_slice %7 {offsets = [0, 0, 0], sizes = [1, 16, 256], strides = [1, 1, 1]} : vector<4x16x256xf32> to vector<1x16x256xf32>
    %779 = vector.shape_cast %778 : vector<1x16x256xf32> to vector<16x256xf32>
    %780 = vector.broadcast %777 : f32 to vector<16x256xf32>
    %781 = arith.mulf %780, %779 : vector<16x256xf32>
    %782 = arith.addf %776, %781 : vector<16x256xf32>
    %c123 = arith.constant 123 : index
    %783 = memref.load %arg4[%c123] : memref<256xf32, #tpu.memory_space<smem>>
    %784 = vector.extract_strided_slice %4 {offsets = [1, 0, 0], sizes = [1, 16, 256], strides = [1, 1, 1]} : vector<4x16x256xf32> to vector<1x16x256xf32>
    %785 = vector.shape_cast %784 : vector<1x16x256xf32> to vector<16x256xf32>
    %786 = vector.broadcast %783 : f32 to vector<16x256xf32>
    %787 = arith.mulf %786, %785 : vector<16x256xf32>
    %788 = arith.addf %782, %787 : vector<16x256xf32>
    %c127 = arith.constant 127 : index
    %789 = memref.load %arg4[%c127] : memref<256xf32, #tpu.memory_space<smem>>
    %790 = vector.extract_strided_slice %7 {offsets = [1, 0, 0], sizes = [1, 16, 256], strides = [1, 1, 1]} : vector<4x16x256xf32> to vector<1x16x256xf32>
    %791 = vector.shape_cast %790 : vector<1x16x256xf32> to vector<16x256xf32>
    %792 = vector.broadcast %789 : f32 to vector<16x256xf32>
    %793 = arith.mulf %792, %791 : vector<16x256xf32>
    %794 = arith.addf %788, %793 : vector<16x256xf32>
    %c187 = arith.constant 187 : index
    %795 = memref.load %arg4[%c187] : memref<256xf32, #tpu.memory_space<smem>>
    %796 = vector.extract_strided_slice %4 {offsets = [2, 0, 0], sizes = [1, 16, 256], strides = [1, 1, 1]} : vector<4x16x256xf32> to vector<1x16x256xf32>
    %797 = vector.shape_cast %796 : vector<1x16x256xf32> to vector<16x256xf32>
    %798 = vector.broadcast %795 : f32 to vector<16x256xf32>
    %799 = arith.mulf %798, %797 : vector<16x256xf32>
    %800 = arith.addf %794, %799 : vector<16x256xf32>
    %c191 = arith.constant 191 : index
    %801 = memref.load %arg4[%c191] : memref<256xf32, #tpu.memory_space<smem>>
    %802 = vector.extract_strided_slice %7 {offsets = [2, 0, 0], sizes = [1, 16, 256], strides = [1, 1, 1]} : vector<4x16x256xf32> to vector<1x16x256xf32>
    %803 = vector.shape_cast %802 : vector<1x16x256xf32> to vector<16x256xf32>
    %804 = vector.broadcast %801 : f32 to vector<16x256xf32>
    %805 = arith.mulf %804, %803 : vector<16x256xf32>
    %806 = arith.addf %800, %805 : vector<16x256xf32>
    %c251 = arith.constant 251 : index
    %807 = memref.load %arg4[%c251] : memref<256xf32, #tpu.memory_space<smem>>
    %808 = vector.extract_strided_slice %4 {offsets = [3, 0, 0], sizes = [1, 16, 256], strides = [1, 1, 1]} : vector<4x16x256xf32> to vector<1x16x256xf32>
    %809 = vector.shape_cast %808 : vector<1x16x256xf32> to vector<16x256xf32>
    %810 = vector.broadcast %807 : f32 to vector<16x256xf32>
    %811 = arith.mulf %810, %809 : vector<16x256xf32>
    %812 = arith.addf %806, %811 : vector<16x256xf32>
    %c255 = arith.constant 255 : index
    %813 = memref.load %arg4[%c255] : memref<256xf32, #tpu.memory_space<smem>>
    %814 = vector.extract_strided_slice %7 {offsets = [3, 0, 0], sizes = [1, 16, 256], strides = [1, 1, 1]} : vector<4x16x256xf32> to vector<1x16x256xf32>
    %815 = vector.shape_cast %814 : vector<1x16x256xf32> to vector<16x256xf32>
    %816 = vector.broadcast %813 : f32 to vector<16x256xf32>
    %817 = arith.mulf %816, %815 : vector<16x256xf32>
    %818 = arith.addf %812, %817 : vector<16x256xf32>
    %c7_24 = arith.constant 7 : index
    %819 = memref.load %arg5[%c7_24] : memref<8xf32, #tpu.memory_space<smem>>
    %820 = vector.broadcast %819 : f32 to vector<16x256xf32>
    %821 = arith.addf %818, %820 : vector<16x256xf32>
    %822 = vector.shape_cast %471 : vector<16x256xf32> to vector<1x16x256xf32>
    %823 = vector.shape_cast %521 : vector<16x256xf32> to vector<1x16x256xf32>
    %824 = vector.shape_cast %571 : vector<16x256xf32> to vector<1x16x256xf32>
    %825 = vector.shape_cast %621 : vector<16x256xf32> to vector<1x16x256xf32>
    %826 = vector.shape_cast %671 : vector<16x256xf32> to vector<1x16x256xf32>
    %827 = vector.shape_cast %721 : vector<16x256xf32> to vector<1x16x256xf32>
    %828 = vector.shape_cast %771 : vector<16x256xf32> to vector<1x16x256xf32>
    %829 = vector.shape_cast %821 : vector<16x256xf32> to vector<1x16x256xf32>
    %830 = tpu.concatenate %822, %823, %824, %825, %826, %827, %828, %829 in 0 : vector<1x16x256xf32>, vector<1x16x256xf32>, vector<1x16x256xf32>, vector<1x16x256xf32>, vector<1x16x256xf32>, vector<1x16x256xf32>, vector<1x16x256xf32>, vector<1x16x256xf32> -> vector<8x16x256xf32>
    %c0_25 = arith.constant 0 : index
    %c0_26 = arith.constant 0 : index
    %c0_27 = arith.constant 0 : index
    %c1_28 = arith.constant 1 : index
    %c0_29 = arith.constant 0 : index
    %831 = vector.load %arg6[%c0_25, %c0_26, %c0_27, %c1_28, %c0_29] : memref<1x8x16x4x256xf32, #tpu.memory_space<vmem>>, vector<1x8x16x1x256xf32>
    %832 = vector.shape_cast %831 : vector<1x8x16x1x256xf32> to vector<8x16x256xf32>
    %833 = vector.shape_cast %830 : vector<8x16x256xf32> to vector<1x8x16x1x256xf32>
    tpu.vector_store %arg6[%c0_25, %c0_26, %c0_27, %c1_28, %c0_29], %833 {strides = array<i32>} : memref<1x8x16x4x256xf32, #tpu.memory_space<vmem>>, vector<1x8x16x1x256xf32>,
    %c4_30 = arith.constant 4 : index
    %834 = memref.load %arg4[%c4_30] : memref<256xf32, #tpu.memory_space<smem>>
    %835 = vector.extract_strided_slice %4 {offsets = [0, 0, 0], sizes = [1, 16, 256], strides = [1, 1, 1]} : vector<4x16x256xf32> to vector<1x16x256xf32>
    %836 = vector.shape_cast %835 : vector<1x16x256xf32> to vector<16x256xf32>
    %837 = vector.broadcast %834 : f32 to vector<16x256xf32>
    %838 = arith.mulf %837, %836 : vector<16x256xf32>
    %c0_31 = arith.constant 0 : index
    %839 = memref.load %arg4[%c0_31] : memref<256xf32, #tpu.memory_space<smem>>
    %840 = vector.extract_strided_slice %9 {offsets = [0, 0, 0], sizes = [1, 16, 256], strides = [1, 1, 1]} : vector<4x16x256xf32> to vector<1x16x256xf32>
    %841 = vector.shape_cast %840 : vector<1x16x256xf32> to vector<16x256xf32>
    %842 = vector.broadcast %839 : f32 to vector<16x256xf32>
    %843 = arith.mulf %842, %841 : vector<16x256xf32>
    %844 = arith.addf %838, %843 : vector<16x256xf32>
    %c68 = arith.constant 68 : index
    %845 = memref.load %arg4[%c68] : memref<256xf32, #tpu.memory_space<smem>>
    %846 = vector.extract_strided_slice %4 {offsets = [1, 0, 0], sizes = [1, 16, 256], strides = [1, 1, 1]} : vector<4x16x256xf32> to vector<1x16x256xf32>
    %847 = vector.shape_cast %846 : vector<1x16x256xf32> to vector<16x256xf32>
    %848 = vector.broadcast %845 : f32 to vector<16x256xf32>
    %849 = arith.mulf %848, %847 : vector<16x256xf32>
    %850 = arith.addf %844, %849 : vector<16x256xf32>
    %c64 = arith.constant 64 : index
    %851 = memref.load %arg4[%c64] : memref<256xf32, #tpu.memory_space<smem>>
    %852 = vector.extract_strided_slice %9 {offsets = [1, 0, 0], sizes = [1, 16, 256], strides = [1, 1, 1]} : vector<4x16x256xf32> to vector<1x16x256xf32>
    %853 = vector.shape_cast %852 : vector<1x16x256xf32> to vector<16x256xf32>
    %854 = vector.broadcast %851 : f32 to vector<16x256xf32>
    %855 = arith.mulf %854, %853 : vector<16x256xf32>
    %856 = arith.addf %850, %855 : vector<16x256xf32>
    %c132 = arith.constant 132 : index
    %857 = memref.load %arg4[%c132] : memref<256xf32, #tpu.memory_space<smem>>
    %858 = vector.extract_strided_slice %4 {offsets = [2, 0, 0], sizes = [1, 16, 256], strides = [1, 1, 1]} : vector<4x16x256xf32> to vector<1x16x256xf32>
    %859 = vector.shape_cast %858 : vector<1x16x256xf32> to vector<16x256xf32>
    %860 = vector.broadcast %857 : f32 to vector<16x256xf32>
    %861 = arith.mulf %860, %859 : vector<16x256xf32>
    %862 = arith.addf %856, %861 : vector<16x256xf32>
    %c128 = arith.constant 128 : index
    %863 = memref.load %arg4[%c128] : memref<256xf32, #tpu.memory_space<smem>>
    %864 = vector.extract_strided_slice %9 {offsets = [2, 0, 0], sizes = [1, 16, 256], strides = [1, 1, 1]} : vector<4x16x256xf32> to vector<1x16x256xf32>
    %865 = vector.shape_cast %864 : vector<1x16x256xf32> to vector<16x256xf32>
    %866 = vector.broadcast %863 : f32 to vector<16x256xf32>
    %867 = arith.mulf %866, %865 : vector<16x256xf32>
    %868 = arith.addf %862, %867 : vector<16x256xf32>
    %c196 = arith.constant 196 : index
    %869 = memref.load %arg4[%c196] : memref<256xf32, #tpu.memory_space<smem>>
    %870 = vector.extract_strided_slice %4 {offsets = [3, 0, 0], sizes = [1, 16, 256], strides = [1, 1, 1]} : vector<4x16x256xf32> to vector<1x16x256xf32>
    %871 = vector.shape_cast %870 : vector<1x16x256xf32> to vector<16x256xf32>
    %872 = vector.broadcast %869 : f32 to vector<16x256xf32>
    %873 = arith.mulf %872, %871 : vector<16x256xf32>
    %874 = arith.addf %868, %873 : vector<16x256xf32>
    %c192 = arith.constant 192 : index
    %875 = memref.load %arg4[%c192] : memref<256xf32, #tpu.memory_space<smem>>
    %876 = vector.extract_strided_slice %9 {offsets = [3, 0, 0], sizes = [1, 16, 256], strides = [1, 1, 1]} : vector<4x16x256xf32> to vector<1x16x256xf32>
    %877 = vector.shape_cast %876 : vector<1x16x256xf32> to vector<16x256xf32>
    %878 = vector.broadcast %875 : f32 to vector<16x256xf32>
    %879 = arith.mulf %878, %877 : vector<16x256xf32>
    %880 = arith.addf %874, %879 : vector<16x256xf32>
    %c0_32 = arith.constant 0 : index
    %881 = memref.load %arg5[%c0_32] : memref<8xf32, #tpu.memory_space<smem>>
    %882 = vector.broadcast %881 : f32 to vector<16x256xf32>
    %883 = arith.addf %880, %882 : vector<16x256xf32>
    %c12 = arith.constant 12 : index
    %884 = memref.load %arg4[%c12] : memref<256xf32, #tpu.memory_space<smem>>
    %885 = vector.extract_strided_slice %4 {offsets = [0, 0, 0], sizes = [1, 16, 256], strides = [1, 1, 1]} : vector<4x16x256xf32> to vector<1x16x256xf32>
    %886 = vector.shape_cast %885 : vector<1x16x256xf32> to vector<16x256xf32>
    %887 = vector.broadcast %884 : f32 to vector<16x256xf32>
    %888 = arith.mulf %887, %886 : vector<16x256xf32>
    %c8 = arith.constant 8 : index
    %889 = memref.load %arg4[%c8] : memref<256xf32, #tpu.memory_space<smem>>
    %890 = vector.extract_strided_slice %9 {offsets = [0, 0, 0], sizes = [1, 16, 256], strides = [1, 1, 1]} : vector<4x16x256xf32> to vector<1x16x256xf32>
    %891 = vector.shape_cast %890 : vector<1x16x256xf32> to vector<16x256xf32>
    %892 = vector.broadcast %889 : f32 to vector<16x256xf32>
    %893 = arith.mulf %892, %891 : vector<16x256xf32>
    %894 = arith.addf %888, %893 : vector<16x256xf32>
    %c76 = arith.constant 76 : index
    %895 = memref.load %arg4[%c76] : memref<256xf32, #tpu.memory_space<smem>>
    %896 = vector.extract_strided_slice %4 {offsets = [1, 0, 0], sizes = [1, 16, 256], strides = [1, 1, 1]} : vector<4x16x256xf32> to vector<1x16x256xf32>
    %897 = vector.shape_cast %896 : vector<1x16x256xf32> to vector<16x256xf32>
    %898 = vector.broadcast %895 : f32 to vector<16x256xf32>
    %899 = arith.mulf %898, %897 : vector<16x256xf32>
    %900 = arith.addf %894, %899 : vector<16x256xf32>
    %c72 = arith.constant 72 : index
    %901 = memref.load %arg4[%c72] : memref<256xf32, #tpu.memory_space<smem>>
    %902 = vector.extract_strided_slice %9 {offsets = [1, 0, 0], sizes = [1, 16, 256], strides = [1, 1, 1]} : vector<4x16x256xf32> to vector<1x16x256xf32>
    %903 = vector.shape_cast %902 : vector<1x16x256xf32> to vector<16x256xf32>
    %904 = vector.broadcast %901 : f32 to vector<16x256xf32>
    %905 = arith.mulf %904, %903 : vector<16x256xf32>
    %906 = arith.addf %900, %905 : vector<16x256xf32>
    %c140 = arith.constant 140 : index
    %907 = memref.load %arg4[%c140] : memref<256xf32, #tpu.memory_space<smem>>
    %908 = vector.extract_strided_slice %4 {offsets = [2, 0, 0], sizes = [1, 16, 256], strides = [1, 1, 1]} : vector<4x16x256xf32> to vector<1x16x256xf32>
    %909 = vector.shape_cast %908 : vector<1x16x256xf32> to vector<16x256xf32>
    %910 = vector.broadcast %907 : f32 to vector<16x256xf32>
    %911 = arith.mulf %910, %909 : vector<16x256xf32>
    %912 = arith.addf %906, %911 : vector<16x256xf32>
    %c136 = arith.constant 136 : index
    %913 = memref.load %arg4[%c136] : memref<256xf32, #tpu.memory_space<smem>>
    %914 = vector.extract_strided_slice %9 {offsets = [2, 0, 0], sizes = [1, 16, 256], strides = [1, 1, 1]} : vector<4x16x256xf32> to vector<1x16x256xf32>
    %915 = vector.shape_cast %914 : vector<1x16x256xf32> to vector<16x256xf32>
    %916 = vector.broadcast %913 : f32 to vector<16x256xf32>
    %917 = arith.mulf %916, %915 : vector<16x256xf32>
    %918 = arith.addf %912, %917 : vector<16x256xf32>
    %c204 = arith.constant 204 : index
    %919 = memref.load %arg4[%c204] : memref<256xf32, #tpu.memory_space<smem>>
    %920 = vector.extract_strided_slice %4 {offsets = [3, 0, 0], sizes = [1, 16, 256], strides = [1, 1, 1]} : vector<4x16x256xf32> to vector<1x16x256xf32>
    %921 = vector.shape_cast %920 : vector<1x16x256xf32> to vector<16x256xf32>
    %922 = vector.broadcast %919 : f32 to vector<16x256xf32>
    %923 = arith.mulf %922, %921 : vector<16x256xf32>
    %924 = arith.addf %918, %923 : vector<16x256xf32>
    %c200 = arith.constant 200 : index
    %925 = memref.load %arg4[%c200] : memref<256xf32, #tpu.memory_space<smem>>
    %926 = vector.extract_strided_slice %9 {offsets = [3, 0, 0], sizes = [1, 16, 256], strides = [1, 1, 1]} : vector<4x16x256xf32> to vector<1x16x256xf32>
    %927 = vector.shape_cast %926 : vector<1x16x256xf32> to vector<16x256xf32>
    %928 = vector.broadcast %925 : f32 to vector<16x256xf32>
    %929 = arith.mulf %928, %927 : vector<16x256xf32>
    %930 = arith.addf %924, %929 : vector<16x256xf32>
    %c1_33 = arith.constant 1 : index
    %931 = memref.load %arg5[%c1_33] : memref<8xf32, #tpu.memory_space<smem>>
    %932 = vector.broadcast %931 : f32 to vector<16x256xf32>
    %933 = arith.addf %930, %932 : vector<16x256xf32>
    %c20 = arith.constant 20 : index
    %934 = memref.load %arg4[%c20] : memref<256xf32, #tpu.memory_space<smem>>
    %935 = vector.extract_strided_slice %4 {offsets = [0, 0, 0], sizes = [1, 16, 256], strides = [1, 1, 1]} : vector<4x16x256xf32> to vector<1x16x256xf32>
    %936 = vector.shape_cast %935 : vector<1x16x256xf32> to vector<16x256xf32>
    %937 = vector.broadcast %934 : f32 to vector<16x256xf32>
    %938 = arith.mulf %937, %936 : vector<16x256xf32>
    %c16 = arith.constant 16 : index
    %939 = memref.load %arg4[%c16] : memref<256xf32, #tpu.memory_space<smem>>
    %940 = vector.extract_strided_slice %9 {offsets = [0, 0, 0], sizes = [1, 16, 256], strides = [1, 1, 1]} : vector<4x16x256xf32> to vector<1x16x256xf32>
    %941 = vector.shape_cast %940 : vector<1x16x256xf32> to vector<16x256xf32>
    %942 = vector.broadcast %939 : f32 to vector<16x256xf32>
    %943 = arith.mulf %942, %941 : vector<16x256xf32>
    %944 = arith.addf %938, %943 : vector<16x256xf32>
    %c84 = arith.constant 84 : index
    %945 = memref.load %arg4[%c84] : memref<256xf32, #tpu.memory_space<smem>>
    %946 = vector.extract_strided_slice %4 {offsets = [1, 0, 0], sizes = [1, 16, 256], strides = [1, 1, 1]} : vector<4x16x256xf32> to vector<1x16x256xf32>
    %947 = vector.shape_cast %946 : vector<1x16x256xf32> to vector<16x256xf32>
    %948 = vector.broadcast %945 : f32 to vector<16x256xf32>
    %949 = arith.mulf %948, %947 : vector<16x256xf32>
    %950 = arith.addf %944, %949 : vector<16x256xf32>
    %c80 = arith.constant 80 : index
    %951 = memref.load %arg4[%c80] : memref<256xf32, #tpu.memory_space<smem>>
    %952 = vector.extract_strided_slice %9 {offsets = [1, 0, 0], sizes = [1, 16, 256], strides = [1, 1, 1]} : vector<4x16x256xf32> to vector<1x16x256xf32>
    %953 = vector.shape_cast %952 : vector<1x16x256xf32> to vector<16x256xf32>
    %954 = vector.broadcast %951 : f32 to vector<16x256xf32>
    %955 = arith.mulf %954, %953 : vector<16x256xf32>
    %956 = arith.addf %950, %955 : vector<16x256xf32>
    %c148 = arith.constant 148 : index
    %957 = memref.load %arg4[%c148] : memref<256xf32, #tpu.memory_space<smem>>
    %958 = vector.extract_strided_slice %4 {offsets = [2, 0, 0], sizes = [1, 16, 256], strides = [1, 1, 1]} : vector<4x16x256xf32> to vector<1x16x256xf32>
    %959 = vector.shape_cast %958 : vector<1x16x256xf32> to vector<16x256xf32>
    %960 = vector.broadcast %957 : f32 to vector<16x256xf32>
    %961 = arith.mulf %960, %959 : vector<16x256xf32>
    %962 = arith.addf %956, %961 : vector<16x256xf32>
    %c144 = arith.constant 144 : index
    %963 = memref.load %arg4[%c144] : memref<256xf32, #tpu.memory_space<smem>>
    %964 = vector.extract_strided_slice %9 {offsets = [2, 0, 0], sizes = [1, 16, 256], strides = [1, 1, 1]} : vector<4x16x256xf32> to vector<1x16x256xf32>
    %965 = vector.shape_cast %964 : vector<1x16x256xf32> to vector<16x256xf32>
    %966 = vector.broadcast %963 : f32 to vector<16x256xf32>
    %967 = arith.mulf %966, %965 : vector<16x256xf32>
    %968 = arith.addf %962, %967 : vector<16x256xf32>
    %c212 = arith.constant 212 : index
    %969 = memref.load %arg4[%c212] : memref<256xf32, #tpu.memory_space<smem>>
    %970 = vector.extract_strided_slice %4 {offsets = [3, 0, 0], sizes = [1, 16, 256], strides = [1, 1, 1]} : vector<4x16x256xf32> to vector<1x16x256xf32>
    %971 = vector.shape_cast %970 : vector<1x16x256xf32> to vector<16x256xf32>
    %972 = vector.broadcast %969 : f32 to vector<16x256xf32>
    %973 = arith.mulf %972, %971 : vector<16x256xf32>
    %974 = arith.addf %968, %973 : vector<16x256xf32>
    %c208 = arith.constant 208 : index
    %975 = memref.load %arg4[%c208] : memref<256xf32, #tpu.memory_space<smem>>
    %976 = vector.extract_strided_slice %9 {offsets = [3, 0, 0], sizes = [1, 16, 256], strides = [1, 1, 1]} : vector<4x16x256xf32> to vector<1x16x256xf32>
    %977 = vector.shape_cast %976 : vector<1x16x256xf32> to vector<16x256xf32>
    %978 = vector.broadcast %975 : f32 to vector<16x256xf32>
    %979 = arith.mulf %978, %977 : vector<16x256xf32>
    %980 = arith.addf %974, %979 : vector<16x256xf32>
    %c2_34 = arith.constant 2 : index
    %981 = memref.load %arg5[%c2_34] : memref<8xf32, #tpu.memory_space<smem>>
    %982 = vector.broadcast %981 : f32 to vector<16x256xf32>
    %983 = arith.addf %980, %982 : vector<16x256xf32>
    %c28 = arith.constant 28 : index
    %984 = memref.load %arg4[%c28] : memref<256xf32, #tpu.memory_space<smem>>
    %985 = vector.extract_strided_slice %4 {offsets = [0, 0, 0], sizes = [1, 16, 256], strides = [1, 1, 1]} : vector<4x16x256xf32> to vector<1x16x256xf32>
    %986 = vector.shape_cast %985 : vector<1x16x256xf32> to vector<16x256xf32>
    %987 = vector.broadcast %984 : f32 to vector<16x256xf32>
    %988 = arith.mulf %987, %986 : vector<16x256xf32>
    %c24 = arith.constant 24 : index
    %989 = memref.load %arg4[%c24] : memref<256xf32, #tpu.memory_space<smem>>
    %990 = vector.extract_strided_slice %9 {offsets = [0, 0, 0], sizes = [1, 16, 256], strides = [1, 1, 1]} : vector<4x16x256xf32> to vector<1x16x256xf32>
    %991 = vector.shape_cast %990 : vector<1x16x256xf32> to vector<16x256xf32>
    %992 = vector.broadcast %989 : f32 to vector<16x256xf32>
    %993 = arith.mulf %992, %991 : vector<16x256xf32>
    %994 = arith.addf %988, %993 : vector<16x256xf32>
    %c92 = arith.constant 92 : index
    %995 = memref.load %arg4[%c92] : memref<256xf32, #tpu.memory_space<smem>>
    %996 = vector.extract_strided_slice %4 {offsets = [1, 0, 0], sizes = [1, 16, 256], strides = [1, 1, 1]} : vector<4x16x256xf32> to vector<1x16x256xf32>
    %997 = vector.shape_cast %996 : vector<1x16x256xf32> to vector<16x256xf32>
    %998 = vector.broadcast %995 : f32 to vector<16x256xf32>
    %999 = arith.mulf %998, %997 : vector<16x256xf32>
    %1000 = arith.addf %994, %999 : vector<16x256xf32>
    %c88 = arith.constant 88 : index
    %1001 = memref.load %arg4[%c88] : memref<256xf32, #tpu.memory_space<smem>>
    %1002 = vector.extract_strided_slice %9 {offsets = [1, 0, 0], sizes = [1, 16, 256], strides = [1, 1, 1]} : vector<4x16x256xf32> to vector<1x16x256xf32>
    %1003 = vector.shape_cast %1002 : vector<1x16x256xf32> to vector<16x256xf32>
    %1004 = vector.broadcast %1001 : f32 to vector<16x256xf32>
    %1005 = arith.mulf %1004, %1003 : vector<16x256xf32>
    %1006 = arith.addf %1000, %1005 : vector<16x256xf32>
    %c156 = arith.constant 156 : index
    %1007 = memref.load %arg4[%c156] : memref<256xf32, #tpu.memory_space<smem>>
    %1008 = vector.extract_strided_slice %4 {offsets = [2, 0, 0], sizes = [1, 16, 256], strides = [1, 1, 1]} : vector<4x16x256xf32> to vector<1x16x256xf32>
    %1009 = vector.shape_cast %1008 : vector<1x16x256xf32> to vector<16x256xf32>
    %1010 = vector.broadcast %1007 : f32 to vector<16x256xf32>
    %1011 = arith.mulf %1010, %1009 : vector<16x256xf32>
    %1012 = arith.addf %1006, %1011 : vector<16x256xf32>
    %c152 = arith.constant 152 : index
    %1013 = memref.load %arg4[%c152] : memref<256xf32, #tpu.memory_space<smem>>
    %1014 = vector.extract_strided_slice %9 {offsets = [2, 0, 0], sizes = [1, 16, 256], strides = [1, 1, 1]} : vector<4x16x256xf32> to vector<1x16x256xf32>
    %1015 = vector.shape_cast %1014 : vector<1x16x256xf32> to vector<16x256xf32>
    %1016 = vector.broadcast %1013 : f32 to vector<16x256xf32>
    %1017 = arith.mulf %1016, %1015 : vector<16x256xf32>
    %1018 = arith.addf %1012, %1017 : vector<16x256xf32>
    %c220 = arith.constant 220 : index
    %1019 = memref.load %arg4[%c220] : memref<256xf32, #tpu.memory_space<smem>>
    %1020 = vector.extract_strided_slice %4 {offsets = [3, 0, 0], sizes = [1, 16, 256], strides = [1, 1, 1]} : vector<4x16x256xf32> to vector<1x16x256xf32>
    %1021 = vector.shape_cast %1020 : vector<1x16x256xf32> to vector<16x256xf32>
    %1022 = vector.broadcast %1019 : f32 to vector<16x256xf32>
    %1023 = arith.mulf %1022, %1021 : vector<16x256xf32>
    %1024 = arith.addf %1018, %1023 : vector<16x256xf32>
    %c216 = arith.constant 216 : index
    %1025 = memref.load %arg4[%c216] : memref<256xf32, #tpu.memory_space<smem>>
    %1026 = vector.extract_strided_slice %9 {offsets = [3, 0, 0], sizes = [1, 16, 256], strides = [1, 1, 1]} : vector<4x16x256xf32> to vector<1x16x256xf32>
    %1027 = vector.shape_cast %1026 : vector<1x16x256xf32> to vector<16x256xf32>
    %1028 = vector.broadcast %1025 : f32 to vector<16x256xf32>
    %1029 = arith.mulf %1028, %1027 : vector<16x256xf32>
    %1030 = arith.addf %1024, %1029 : vector<16x256xf32>
    %c3_35 = arith.constant 3 : index
    %1031 = memref.load %arg5[%c3_35] : memref<8xf32, #tpu.memory_space<smem>>
    %1032 = vector.broadcast %1031 : f32 to vector<16x256xf32>
    %1033 = arith.addf %1030, %1032 : vector<16x256xf32>
    %c36 = arith.constant 36 : index
    %1034 = memref.load %arg4[%c36] : memref<256xf32, #tpu.memory_space<smem>>
    %1035 = vector.extract_strided_slice %4 {offsets = [0, 0, 0], sizes = [1, 16, 256], strides = [1, 1, 1]} : vector<4x16x256xf32> to vector<1x16x256xf32>
    %1036 = vector.shape_cast %1035 : vector<1x16x256xf32> to vector<16x256xf32>
    %1037 = vector.broadcast %1034 : f32 to vector<16x256xf32>
    %1038 = arith.mulf %1037, %1036 : vector<16x256xf32>
    %c32 = arith.constant 32 : index
    %1039 = memref.load %arg4[%c32] : memref<256xf32, #tpu.memory_space<smem>>
    %1040 = vector.extract_strided_slice %9 {offsets = [0, 0, 0], sizes = [1, 16, 256], strides = [1, 1, 1]} : vector<4x16x256xf32> to vector<1x16x256xf32>
    %1041 = vector.shape_cast %1040 : vector<1x16x256xf32> to vector<16x256xf32>
    %1042 = vector.broadcast %1039 : f32 to vector<16x256xf32>
    %1043 = arith.mulf %1042, %1041 : vector<16x256xf32>
    %1044 = arith.addf %1038, %1043 : vector<16x256xf32>
    %c100 = arith.constant 100 : index
    %1045 = memref.load %arg4[%c100] : memref<256xf32, #tpu.memory_space<smem>>
    %1046 = vector.extract_strided_slice %4 {offsets = [1, 0, 0], sizes = [1, 16, 256], strides = [1, 1, 1]} : vector<4x16x256xf32> to vector<1x16x256xf32>
    %1047 = vector.shape_cast %1046 : vector<1x16x256xf32> to vector<16x256xf32>
    %1048 = vector.broadcast %1045 : f32 to vector<16x256xf32>
    %1049 = arith.mulf %1048, %1047 : vector<16x256xf32>
    %1050 = arith.addf %1044, %1049 : vector<16x256xf32>
    %c96 = arith.constant 96 : index
    %1051 = memref.load %arg4[%c96] : memref<256xf32, #tpu.memory_space<smem>>
    %1052 = vector.extract_strided_slice %9 {offsets = [1, 0, 0], sizes = [1, 16, 256], strides = [1, 1, 1]} : vector<4x16x256xf32> to vector<1x16x256xf32>
    %1053 = vector.shape_cast %1052 : vector<1x16x256xf32> to vector<16x256xf32>
    %1054 = vector.broadcast %1051 : f32 to vector<16x256xf32>
    %1055 = arith.mulf %1054, %1053 : vector<16x256xf32>
    %1056 = arith.addf %1050, %1055 : vector<16x256xf32>
    %c164 = arith.constant 164 : index
    %1057 = memref.load %arg4[%c164] : memref<256xf32, #tpu.memory_space<smem>>
    %1058 = vector.extract_strided_slice %4 {offsets = [2, 0, 0], sizes = [1, 16, 256], strides = [1, 1, 1]} : vector<4x16x256xf32> to vector<1x16x256xf32>
    %1059 = vector.shape_cast %1058 : vector<1x16x256xf32> to vector<16x256xf32>
    %1060 = vector.broadcast %1057 : f32 to vector<16x256xf32>
    %1061 = arith.mulf %1060, %1059 : vector<16x256xf32>
    %1062 = arith.addf %1056, %1061 : vector<16x256xf32>
    %c160 = arith.constant 160 : index
    %1063 = memref.load %arg4[%c160] : memref<256xf32, #tpu.memory_space<smem>>
    %1064 = vector.extract_strided_slice %9 {offsets = [2, 0, 0], sizes = [1, 16, 256], strides = [1, 1, 1]} : vector<4x16x256xf32> to vector<1x16x256xf32>
    %1065 = vector.shape_cast %1064 : vector<1x16x256xf32> to vector<16x256xf32>
    %1066 = vector.broadcast %1063 : f32 to vector<16x256xf32>
    %1067 = arith.mulf %1066, %1065 : vector<16x256xf32>
    %1068 = arith.addf %1062, %1067 : vector<16x256xf32>
    %c228 = arith.constant 228 : index
    %1069 = memref.load %arg4[%c228] : memref<256xf32, #tpu.memory_space<smem>>
    %1070 = vector.extract_strided_slice %4 {offsets = [3, 0, 0], sizes = [1, 16, 256], strides = [1, 1, 1]} : vector<4x16x256xf32> to vector<1x16x256xf32>
    %1071 = vector.shape_cast %1070 : vector<1x16x256xf32> to vector<16x256xf32>
    %1072 = vector.broadcast %1069 : f32 to vector<16x256xf32>
    %1073 = arith.mulf %1072, %1071 : vector<16x256xf32>
    %1074 = arith.addf %1068, %1073 : vector<16x256xf32>
    %c224 = arith.constant 224 : index
    %1075 = memref.load %arg4[%c224] : memref<256xf32, #tpu.memory_space<smem>>
    %1076 = vector.extract_strided_slice %9 {offsets = [3, 0, 0], sizes = [1, 16, 256], strides = [1, 1, 1]} : vector<4x16x256xf32> to vector<1x16x256xf32>
    %1077 = vector.shape_cast %1076 : vector<1x16x256xf32> to vector<16x256xf32>
    %1078 = vector.broadcast %1075 : f32 to vector<16x256xf32>
    %1079 = arith.mulf %1078, %1077 : vector<16x256xf32>
    %1080 = arith.addf %1074, %1079 : vector<16x256xf32>
    %c4_36 = arith.constant 4 : index
    %1081 = memref.load %arg5[%c4_36] : memref<8xf32, #tpu.memory_space<smem>>
    %1082 = vector.broadcast %1081 : f32 to vector<16x256xf32>
    %1083 = arith.addf %1080, %1082 : vector<16x256xf32>
    %c44 = arith.constant 44 : index
    %1084 = memref.load %arg4[%c44] : memref<256xf32, #tpu.memory_space<smem>>
    %1085 = vector.extract_strided_slice %4 {offsets = [0, 0, 0], sizes = [1, 16, 256], strides = [1, 1, 1]} : vector<4x16x256xf32> to vector<1x16x256xf32>
    %1086 = vector.shape_cast %1085 : vector<1x16x256xf32> to vector<16x256xf32>
    %1087 = vector.broadcast %1084 : f32 to vector<16x256xf32>
    %1088 = arith.mulf %1087, %1086 : vector<16x256xf32>
    %c40 = arith.constant 40 : index
    %1089 = memref.load %arg4[%c40] : memref<256xf32, #tpu.memory_space<smem>>
    %1090 = vector.extract_strided_slice %9 {offsets = [0, 0, 0], sizes = [1, 16, 256], strides = [1, 1, 1]} : vector<4x16x256xf32> to vector<1x16x256xf32>
    %1091 = vector.shape_cast %1090 : vector<1x16x256xf32> to vector<16x256xf32>
    %1092 = vector.broadcast %1089 : f32 to vector<16x256xf32>
    %1093 = arith.mulf %1092, %1091 : vector<16x256xf32>
    %1094 = arith.addf %1088, %1093 : vector<16x256xf32>
    %c108 = arith.constant 108 : index
    %1095 = memref.load %arg4[%c108] : memref<256xf32, #tpu.memory_space<smem>>
    %1096 = vector.extract_strided_slice %4 {offsets = [1, 0, 0], sizes = [1, 16, 256], strides = [1, 1, 1]} : vector<4x16x256xf32> to vector<1x16x256xf32>
    %1097 = vector.shape_cast %1096 : vector<1x16x256xf32> to vector<16x256xf32>
    %1098 = vector.broadcast %1095 : f32 to vector<16x256xf32>
    %1099 = arith.mulf %1098, %1097 : vector<16x256xf32>
    %1100 = arith.addf %1094, %1099 : vector<16x256xf32>
    %c104 = arith.constant 104 : index
    %1101 = memref.load %arg4[%c104] : memref<256xf32, #tpu.memory_space<smem>>
    %1102 = vector.extract_strided_slice %9 {offsets = [1, 0, 0], sizes = [1, 16, 256], strides = [1, 1, 1]} : vector<4x16x256xf32> to vector<1x16x256xf32>
    %1103 = vector.shape_cast %1102 : vector<1x16x256xf32> to vector<16x256xf32>
    %1104 = vector.broadcast %1101 : f32 to vector<16x256xf32>
    %1105 = arith.mulf %1104, %1103 : vector<16x256xf32>
    %1106 = arith.addf %1100, %1105 : vector<16x256xf32>
    %c172 = arith.constant 172 : index
    %1107 = memref.load %arg4[%c172] : memref<256xf32, #tpu.memory_space<smem>>
    %1108 = vector.extract_strided_slice %4 {offsets = [2, 0, 0], sizes = [1, 16, 256], strides = [1, 1, 1]} : vector<4x16x256xf32> to vector<1x16x256xf32>
    %1109 = vector.shape_cast %1108 : vector<1x16x256xf32> to vector<16x256xf32>
    %1110 = vector.broadcast %1107 : f32 to vector<16x256xf32>
    %1111 = arith.mulf %1110, %1109 : vector<16x256xf32>
    %1112 = arith.addf %1106, %1111 : vector<16x256xf32>
    %c168 = arith.constant 168 : index
    %1113 = memref.load %arg4[%c168] : memref<256xf32, #tpu.memory_space<smem>>
    %1114 = vector.extract_strided_slice %9 {offsets = [2, 0, 0], sizes = [1, 16, 256], strides = [1, 1, 1]} : vector<4x16x256xf32> to vector<1x16x256xf32>
    %1115 = vector.shape_cast %1114 : vector<1x16x256xf32> to vector<16x256xf32>
    %1116 = vector.broadcast %1113 : f32 to vector<16x256xf32>
    %1117 = arith.mulf %1116, %1115 : vector<16x256xf32>
    %1118 = arith.addf %1112, %1117 : vector<16x256xf32>
    %c236 = arith.constant 236 : index
    %1119 = memref.load %arg4[%c236] : memref<256xf32, #tpu.memory_space<smem>>
    %1120 = vector.extract_strided_slice %4 {offsets = [3, 0, 0], sizes = [1, 16, 256], strides = [1, 1, 1]} : vector<4x16x256xf32> to vector<1x16x256xf32>
    %1121 = vector.shape_cast %1120 : vector<1x16x256xf32> to vector<16x256xf32>
    %1122 = vector.broadcast %1119 : f32 to vector<16x256xf32>
    %1123 = arith.mulf %1122, %1121 : vector<16x256xf32>
    %1124 = arith.addf %1118, %1123 : vector<16x256xf32>
    %c232 = arith.constant 232 : index
    %1125 = memref.load %arg4[%c232] : memref<256xf32, #tpu.memory_space<smem>>
    %1126 = vector.extract_strided_slice %9 {offsets = [3, 0, 0], sizes = [1, 16, 256], strides = [1, 1, 1]} : vector<4x16x256xf32> to vector<1x16x256xf32>
    %1127 = vector.shape_cast %1126 : vector<1x16x256xf32> to vector<16x256xf32>
    %1128 = vector.broadcast %1125 : f32 to vector<16x256xf32>
    %1129 = arith.mulf %1128, %1127 : vector<16x256xf32>
    %1130 = arith.addf %1124, %1129 : vector<16x256xf32>
    %c5_37 = arith.constant 5 : index
    %1131 = memref.load %arg5[%c5_37] : memref<8xf32, #tpu.memory_space<smem>>
    %1132 = vector.broadcast %1131 : f32 to vector<16x256xf32>
    %1133 = arith.addf %1130, %1132 : vector<16x256xf32>
    %c52 = arith.constant 52 : index
    %1134 = memref.load %arg4[%c52] : memref<256xf32, #tpu.memory_space<smem>>
    %1135 = vector.extract_strided_slice %4 {offsets = [0, 0, 0], sizes = [1, 16, 256], strides = [1, 1, 1]} : vector<4x16x256xf32> to vector<1x16x256xf32>
    %1136 = vector.shape_cast %1135 : vector<1x16x256xf32> to vector<16x256xf32>
    %1137 = vector.broadcast %1134 : f32 to vector<16x256xf32>
    %1138 = arith.mulf %1137, %1136 : vector<16x256xf32>
    %c48 = arith.constant 48 : index
    %1139 = memref.load %arg4[%c48] : memref<256xf32, #tpu.memory_space<smem>>
    %1140 = vector.extract_strided_slice %9 {offsets = [0, 0, 0], sizes = [1, 16, 256], strides = [1, 1, 1]} : vector<4x16x256xf32> to vector<1x16x256xf32>
    %1141 = vector.shape_cast %1140 : vector<1x16x256xf32> to vector<16x256xf32>
    %1142 = vector.broadcast %1139 : f32 to vector<16x256xf32>
    %1143 = arith.mulf %1142, %1141 : vector<16x256xf32>
    %1144 = arith.addf %1138, %1143 : vector<16x256xf32>
    %c116 = arith.constant 116 : index
    %1145 = memref.load %arg4[%c116] : memref<256xf32, #tpu.memory_space<smem>>
    %1146 = vector.extract_strided_slice %4 {offsets = [1, 0, 0], sizes = [1, 16, 256], strides = [1, 1, 1]} : vector<4x16x256xf32> to vector<1x16x256xf32>
    %1147 = vector.shape_cast %1146 : vector<1x16x256xf32> to vector<16x256xf32>
    %1148 = vector.broadcast %1145 : f32 to vector<16x256xf32>
    %1149 = arith.mulf %1148, %1147 : vector<16x256xf32>
    %1150 = arith.addf %1144, %1149 : vector<16x256xf32>
    %c112 = arith.constant 112 : index
    %1151 = memref.load %arg4[%c112] : memref<256xf32, #tpu.memory_space<smem>>
    %1152 = vector.extract_strided_slice %9 {offsets = [1, 0, 0], sizes = [1, 16, 256], strides = [1, 1, 1]} : vector<4x16x256xf32> to vector<1x16x256xf32>
    %1153 = vector.shape_cast %1152 : vector<1x16x256xf32> to vector<16x256xf32>
    %1154 = vector.broadcast %1151 : f32 to vector<16x256xf32>
    %1155 = arith.mulf %1154, %1153 : vector<16x256xf32>
    %1156 = arith.addf %1150, %1155 : vector<16x256xf32>
    %c180 = arith.constant 180 : index
    %1157 = memref.load %arg4[%c180] : memref<256xf32, #tpu.memory_space<smem>>
    %1158 = vector.extract_strided_slice %4 {offsets = [2, 0, 0], sizes = [1, 16, 256], strides = [1, 1, 1]} : vector<4x16x256xf32> to vector<1x16x256xf32>
    %1159 = vector.shape_cast %1158 : vector<1x16x256xf32> to vector<16x256xf32>
    %1160 = vector.broadcast %1157 : f32 to vector<16x256xf32>
    %1161 = arith.mulf %1160, %1159 : vector<16x256xf32>
    %1162 = arith.addf %1156, %1161 : vector<16x256xf32>
    %c176 = arith.constant 176 : index
    %1163 = memref.load %arg4[%c176] : memref<256xf32, #tpu.memory_space<smem>>
    %1164 = vector.extract_strided_slice %9 {offsets = [2, 0, 0], sizes = [1, 16, 256], strides = [1, 1, 1]} : vector<4x16x256xf32> to vector<1x16x256xf32>
    %1165 = vector.shape_cast %1164 : vector<1x16x256xf32> to vector<16x256xf32>
    %1166 = vector.broadcast %1163 : f32 to vector<16x256xf32>
    %1167 = arith.mulf %1166, %1165 : vector<16x256xf32>
    %1168 = arith.addf %1162, %1167 : vector<16x256xf32>
    %c244 = arith.constant 244 : index
    %1169 = memref.load %arg4[%c244] : memref<256xf32, #tpu.memory_space<smem>>
    %1170 = vector.extract_strided_slice %4 {offsets = [3, 0, 0], sizes = [1, 16, 256], strides = [1, 1, 1]} : vector<4x16x256xf32> to vector<1x16x256xf32>
    %1171 = vector.shape_cast %1170 : vector<1x16x256xf32> to vector<16x256xf32>
    %1172 = vector.broadcast %1169 : f32 to vector<16x256xf32>
    %1173 = arith.mulf %1172, %1171 : vector<16x256xf32>
    %1174 = arith.addf %1168, %1173 : vector<16x256xf32>
    %c240 = arith.constant 240 : index
    %1175 = memref.load %arg4[%c240] : memref<256xf32, #tpu.memory_space<smem>>
    %1176 = vector.extract_strided_slice %9 {offsets = [3, 0, 0], sizes = [1, 16, 256], strides = [1, 1, 1]} : vector<4x16x256xf32> to vector<1x16x256xf32>
    %1177 = vector.shape_cast %1176 : vector<1x16x256xf32> to vector<16x256xf32>
    %1178 = vector.broadcast %1175 : f32 to vector<16x256xf32>
    %1179 = arith.mulf %1178, %1177 : vector<16x256xf32>
    %1180 = arith.addf %1174, %1179 : vector<16x256xf32>
    %c6_38 = arith.constant 6 : index
    %1181 = memref.load %arg5[%c6_38] : memref<8xf32, #tpu.memory_space<smem>>
    %1182 = vector.broadcast %1181 : f32 to vector<16x256xf32>
    %1183 = arith.addf %1180, %1182 : vector<16x256xf32>
    %c60 = arith.constant 60 : index
    %1184 = memref.load %arg4[%c60] : memref<256xf32, #tpu.memory_space<smem>>
    %1185 = vector.extract_strided_slice %4 {offsets = [0, 0, 0], sizes = [1, 16, 256], strides = [1, 1, 1]} : vector<4x16x256xf32> to vector<1x16x256xf32>
    %1186 = vector.shape_cast %1185 : vector<1x16x256xf32> to vector<16x256xf32>
    %1187 = vector.broadcast %1184 : f32 to vector<16x256xf32>
    %1188 = arith.mulf %1187, %1186 : vector<16x256xf32>
    %c56 = arith.constant 56 : index
    %1189 = memref.load %arg4[%c56] : memref<256xf32, #tpu.memory_space<smem>>
    %1190 = vector.extract_strided_slice %9 {offsets = [0, 0, 0], sizes = [1, 16, 256], strides = [1, 1, 1]} : vector<4x16x256xf32> to vector<1x16x256xf32>
    %1191 = vector.shape_cast %1190 : vector<1x16x256xf32> to vector<16x256xf32>
    %1192 = vector.broadcast %1189 : f32 to vector<16x256xf32>
    %1193 = arith.mulf %1192, %1191 : vector<16x256xf32>
    %1194 = arith.addf %1188, %1193 : vector<16x256xf32>
    %c124 = arith.constant 124 : index
    %1195 = memref.load %arg4[%c124] : memref<256xf32, #tpu.memory_space<smem>>
    %1196 = vector.extract_strided_slice %4 {offsets = [1, 0, 0], sizes = [1, 16, 256], strides = [1, 1, 1]} : vector<4x16x256xf32> to vector<1x16x256xf32>
    %1197 = vector.shape_cast %1196 : vector<1x16x256xf32> to vector<16x256xf32>
    %1198 = vector.broadcast %1195 : f32 to vector<16x256xf32>
    %1199 = arith.mulf %1198, %1197 : vector<16x256xf32>
    %1200 = arith.addf %1194, %1199 : vector<16x256xf32>
    %c120 = arith.constant 120 : index
    %1201 = memref.load %arg4[%c120] : memref<256xf32, #tpu.memory_space<smem>>
    %1202 = vector.extract_strided_slice %9 {offsets = [1, 0, 0], sizes = [1, 16, 256], strides = [1, 1, 1]} : vector<4x16x256xf32> to vector<1x16x256xf32>
    %1203 = vector.shape_cast %1202 : vector<1x16x256xf32> to vector<16x256xf32>
    %1204 = vector.broadcast %1201 : f32 to vector<16x256xf32>
    %1205 = arith.mulf %1204, %1203 : vector<16x256xf32>
    %1206 = arith.addf %1200, %1205 : vector<16x256xf32>
    %c188 = arith.constant 188 : index
    %1207 = memref.load %arg4[%c188] : memref<256xf32, #tpu.memory_space<smem>>
    %1208 = vector.extract_strided_slice %4 {offsets = [2, 0, 0], sizes = [1, 16, 256], strides = [1, 1, 1]} : vector<4x16x256xf32> to vector<1x16x256xf32>
    %1209 = vector.shape_cast %1208 : vector<1x16x256xf32> to vector<16x256xf32>
    %1210 = vector.broadcast %1207 : f32 to vector<16x256xf32>
    %1211 = arith.mulf %1210, %1209 : vector<16x256xf32>
    %1212 = arith.addf %1206, %1211 : vector<16x256xf32>
    %c184 = arith.constant 184 : index
    %1213 = memref.load %arg4[%c184] : memref<256xf32, #tpu.memory_space<smem>>
    %1214 = vector.extract_strided_slice %9 {offsets = [2, 0, 0], sizes = [1, 16, 256], strides = [1, 1, 1]} : vector<4x16x256xf32> to vector<1x16x256xf32>
    %1215 = vector.shape_cast %1214 : vector<1x16x256xf32> to vector<16x256xf32>
    %1216 = vector.broadcast %1213 : f32 to vector<16x256xf32>
    %1217 = arith.mulf %1216, %1215 : vector<16x256xf32>
    %1218 = arith.addf %1212, %1217 : vector<16x256xf32>
    %c252 = arith.constant 252 : index
    %1219 = memref.load %arg4[%c252] : memref<256xf32, #tpu.memory_space<smem>>
    %1220 = vector.extract_strided_slice %4 {offsets = [3, 0, 0], sizes = [1, 16, 256], strides = [1, 1, 1]} : vector<4x16x256xf32> to vector<1x16x256xf32>
    %1221 = vector.shape_cast %1220 : vector<1x16x256xf32> to vector<16x256xf32>
    %1222 = vector.broadcast %1219 : f32 to vector<16x256xf32>
    %1223 = arith.mulf %1222, %1221 : vector<16x256xf32>
    %1224 = arith.addf %1218, %1223 : vector<16x256xf32>
    %c248 = arith.constant 248 : index
    %1225 = memref.load %arg4[%c248] : memref<256xf32, #tpu.memory_space<smem>>
    %1226 = vector.extract_strided_slice %9 {offsets = [3, 0, 0], sizes = [1, 16, 256], strides = [1, 1, 1]} : vector<4x16x256xf32> to vector<1x16x256xf32>
    %1227 = vector.shape_cast %1226 : vector<1x16x256xf32> to vector<16x256xf32>
    %1228 = vector.broadcast %1225 : f32 to vector<16x256xf32>
    %1229 = arith.mulf %1228, %1227 : vector<16x256xf32>
    %1230 = arith.addf %1224, %1229 : vector<16x256xf32>
    %c7_39 = arith.constant 7 : index
    %1231 = memref.load %arg5[%c7_39] : memref<8xf32, #tpu.memory_space<smem>>
    %1232 = vector.broadcast %1231 : f32 to vector<16x256xf32>
    %1233 = arith.addf %1230, %1232 : vector<16x256xf32>
    %1234 = vector.shape_cast %883 : vector<16x256xf32> to vector<1x16x256xf32>
    %1235 = vector.shape_cast %933 : vector<16x256xf32> to vector<1x16x256xf32>
    %1236 = vector.shape_cast %983 : vector<16x256xf32> to vector<1x16x256xf32>
    %1237 = vector.shape_cast %1033 : vector<16x256xf32> to vector<1x16x256xf32>
    %1238 = vector.shape_cast %1083 : vector<16x256xf32> to vector<1x16x256xf32>
    %1239 = vector.shape_cast %1133 : vector<16x256xf32> to vector<1x16x256xf32>
    %1240 = vector.shape_cast %1183 : vector<16x256xf32> to vector<1x16x256xf32>
    %1241 = vector.shape_cast %1233 : vector<16x256xf32> to vector<1x16x256xf32>
    %1242 = tpu.concatenate %1234, %1235, %1236, %1237, %1238, %1239, %1240, %1241 in 0 : vector<1x16x256xf32>, vector<1x16x256xf32>, vector<1x16x256xf32>, vector<1x16x256xf32>, vector<1x16x256xf32>, vector<1x16x256xf32>, vector<1x16x256xf32>, vector<1x16x256xf32> -> vector<8x16x256xf32>
    %c0_40 = arith.constant 0 : index
    %c0_41 = arith.constant 0 : index
    %c0_42 = arith.constant 0 : index
    %c2_43 = arith.constant 2 : index
    %c0_44 = arith.constant 0 : index
    %1243 = vector.load %arg6[%c0_40, %c0_41, %c0_42, %c2_43, %c0_44] : memref<1x8x16x4x256xf32, #tpu.memory_space<vmem>>, vector<1x8x16x1x256xf32>
    %1244 = vector.shape_cast %1243 : vector<1x8x16x1x256xf32> to vector<8x16x256xf32>
    %1245 = vector.shape_cast %1242 : vector<8x16x256xf32> to vector<1x8x16x1x256xf32>
    tpu.vector_store %arg6[%c0_40, %c0_41, %c0_42, %c2_43, %c0_44], %1245 {strides = array<i32>} : memref<1x8x16x4x256xf32, #tpu.memory_space<vmem>>, vector<1x8x16x1x256xf32>,
    %c5_45 = arith.constant 5 : index
    %1246 = memref.load %arg4[%c5_45] : memref<256xf32, #tpu.memory_space<smem>>
    %1247 = vector.extract_strided_slice %4 {offsets = [0, 0, 0], sizes = [1, 16, 256], strides = [1, 1, 1]} : vector<4x16x256xf32> to vector<1x16x256xf32>
    %1248 = vector.shape_cast %1247 : vector<1x16x256xf32> to vector<16x256xf32>
    %1249 = vector.broadcast %1246 : f32 to vector<16x256xf32>
    %1250 = arith.mulf %1249, %1248 : vector<16x256xf32>
    %c1_46 = arith.constant 1 : index
    %1251 = memref.load %arg4[%c1_46] : memref<256xf32, #tpu.memory_space<smem>>
    %1252 = vector.extract_strided_slice %9 {offsets = [0, 0, 0], sizes = [1, 16, 256], strides = [1, 1, 1]} : vector<4x16x256xf32> to vector<1x16x256xf32>
    %1253 = vector.shape_cast %1252 : vector<1x16x256xf32> to vector<16x256xf32>
    %1254 = vector.broadcast %1251 : f32 to vector<16x256xf32>
    %1255 = arith.mulf %1254, %1253 : vector<16x256xf32>
    %1256 = arith.addf %1250, %1255 : vector<16x256xf32>
    %c69 = arith.constant 69 : index
    %1257 = memref.load %arg4[%c69] : memref<256xf32, #tpu.memory_space<smem>>
    %1258 = vector.extract_strided_slice %4 {offsets = [1, 0, 0], sizes = [1, 16, 256], strides = [1, 1, 1]} : vector<4x16x256xf32> to vector<1x16x256xf32>
    %1259 = vector.shape_cast %1258 : vector<1x16x256xf32> to vector<16x256xf32>
    %1260 = vector.broadcast %1257 : f32 to vector<16x256xf32>
    %1261 = arith.mulf %1260, %1259 : vector<16x256xf32>
    %1262 = arith.addf %1256, %1261 : vector<16x256xf32>
    %c65 = arith.constant 65 : index
    %1263 = memref.load %arg4[%c65] : memref<256xf32, #tpu.memory_space<smem>>
    %1264 = vector.extract_strided_slice %9 {offsets = [1, 0, 0], sizes = [1, 16, 256], strides = [1, 1, 1]} : vector<4x16x256xf32> to vector<1x16x256xf32>
    %1265 = vector.shape_cast %1264 : vector<1x16x256xf32> to vector<16x256xf32>
    %1266 = vector.broadcast %1263 : f32 to vector<16x256xf32>
    %1267 = arith.mulf %1266, %1265 : vector<16x256xf32>
    %1268 = arith.addf %1262, %1267 : vector<16x256xf32>
    %c133 = arith.constant 133 : index
    %1269 = memref.load %arg4[%c133] : memref<256xf32, #tpu.memory_space<smem>>
    %1270 = vector.extract_strided_slice %4 {offsets = [2, 0, 0], sizes = [1, 16, 256], strides = [1, 1, 1]} : vector<4x16x256xf32> to vector<1x16x256xf32>
    %1271 = vector.shape_cast %1270 : vector<1x16x256xf32> to vector<16x256xf32>
    %1272 = vector.broadcast %1269 : f32 to vector<16x256xf32>
    %1273 = arith.mulf %1272, %1271 : vector<16x256xf32>
    %1274 = arith.addf %1268, %1273 : vector<16x256xf32>
    %c129 = arith.constant 129 : index
    %1275 = memref.load %arg4[%c129] : memref<256xf32, #tpu.memory_space<smem>>
    %1276 = vector.extract_strided_slice %9 {offsets = [2, 0, 0], sizes = [1, 16, 256], strides = [1, 1, 1]} : vector<4x16x256xf32> to vector<1x16x256xf32>
    %1277 = vector.shape_cast %1276 : vector<1x16x256xf32> to vector<16x256xf32>
    %1278 = vector.broadcast %1275 : f32 to vector<16x256xf32>
    %1279 = arith.mulf %1278, %1277 : vector<16x256xf32>
    %1280 = arith.addf %1274, %1279 : vector<16x256xf32>
    %c197 = arith.constant 197 : index
    %1281 = memref.load %arg4[%c197] : memref<256xf32, #tpu.memory_space<smem>>
    %1282 = vector.extract_strided_slice %4 {offsets = [3, 0, 0], sizes = [1, 16, 256], strides = [1, 1, 1]} : vector<4x16x256xf32> to vector<1x16x256xf32>
    %1283 = vector.shape_cast %1282 : vector<1x16x256xf32> to vector<16x256xf32>
    %1284 = vector.broadcast %1281 : f32 to vector<16x256xf32>
    %1285 = arith.mulf %1284, %1283 : vector<16x256xf32>
    %1286 = arith.addf %1280, %1285 : vector<16x256xf32>
    %c193 = arith.constant 193 : index
    %1287 = memref.load %arg4[%c193] : memref<256xf32, #tpu.memory_space<smem>>
    %1288 = vector.extract_strided_slice %9 {offsets = [3, 0, 0], sizes = [1, 16, 256], strides = [1, 1, 1]} : vector<4x16x256xf32> to vector<1x16x256xf32>
    %1289 = vector.shape_cast %1288 : vector<1x16x256xf32> to vector<16x256xf32>
    %1290 = vector.broadcast %1287 : f32 to vector<16x256xf32>
    %1291 = arith.mulf %1290, %1289 : vector<16x256xf32>
    %1292 = arith.addf %1286, %1291 : vector<16x256xf32>
    %c0_47 = arith.constant 0 : index
    %1293 = memref.load %arg5[%c0_47] : memref<8xf32, #tpu.memory_space<smem>>
    %1294 = vector.broadcast %1293 : f32 to vector<16x256xf32>
    %1295 = arith.addf %1292, %1294 : vector<16x256xf32>
    %c13 = arith.constant 13 : index
    %1296 = memref.load %arg4[%c13] : memref<256xf32, #tpu.memory_space<smem>>
    %1297 = vector.extract_strided_slice %4 {offsets = [0, 0, 0], sizes = [1, 16, 256], strides = [1, 1, 1]} : vector<4x16x256xf32> to vector<1x16x256xf32>
    %1298 = vector.shape_cast %1297 : vector<1x16x256xf32> to vector<16x256xf32>
    %1299 = vector.broadcast %1296 : f32 to vector<16x256xf32>
    %1300 = arith.mulf %1299, %1298 : vector<16x256xf32>
    %c9 = arith.constant 9 : index
    %1301 = memref.load %arg4[%c9] : memref<256xf32, #tpu.memory_space<smem>>
    %1302 = vector.extract_strided_slice %9 {offsets = [0, 0, 0], sizes = [1, 16, 256], strides = [1, 1, 1]} : vector<4x16x256xf32> to vector<1x16x256xf32>
    %1303 = vector.shape_cast %1302 : vector<1x16x256xf32> to vector<16x256xf32>
    %1304 = vector.broadcast %1301 : f32 to vector<16x256xf32>
    %1305 = arith.mulf %1304, %1303 : vector<16x256xf32>
    %1306 = arith.addf %1300, %1305 : vector<16x256xf32>
    %c77 = arith.constant 77 : index
    %1307 = memref.load %arg4[%c77] : memref<256xf32, #tpu.memory_space<smem>>
    %1308 = vector.extract_strided_slice %4 {offsets = [1, 0, 0], sizes = [1, 16, 256], strides = [1, 1, 1]} : vector<4x16x256xf32> to vector<1x16x256xf32>
    %1309 = vector.shape_cast %1308 : vector<1x16x256xf32> to vector<16x256xf32>
    %1310 = vector.broadcast %1307 : f32 to vector<16x256xf32>
    %1311 = arith.mulf %1310, %1309 : vector<16x256xf32>
    %1312 = arith.addf %1306, %1311 : vector<16x256xf32>
    %c73 = arith.constant 73 : index
    %1313 = memref.load %arg4[%c73] : memref<256xf32, #tpu.memory_space<smem>>
    %1314 = vector.extract_strided_slice %9 {offsets = [1, 0, 0], sizes = [1, 16, 256], strides = [1, 1, 1]} : vector<4x16x256xf32> to vector<1x16x256xf32>
    %1315 = vector.shape_cast %1314 : vector<1x16x256xf32> to vector<16x256xf32>
    %1316 = vector.broadcast %1313 : f32 to vector<16x256xf32>
    %1317 = arith.mulf %1316, %1315 : vector<16x256xf32>
    %1318 = arith.addf %1312, %1317 : vector<16x256xf32>
    %c141 = arith.constant 141 : index
    %1319 = memref.load %arg4[%c141] : memref<256xf32, #tpu.memory_space<smem>>
    %1320 = vector.extract_strided_slice %4 {offsets = [2, 0, 0], sizes = [1, 16, 256], strides = [1, 1, 1]} : vector<4x16x256xf32> to vector<1x16x256xf32>
    %1321 = vector.shape_cast %1320 : vector<1x16x256xf32> to vector<16x256xf32>
    %1322 = vector.broadcast %1319 : f32 to vector<16x256xf32>
    %1323 = arith.mulf %1322, %1321 : vector<16x256xf32>
    %1324 = arith.addf %1318, %1323 : vector<16x256xf32>
    %c137 = arith.constant 137 : index
    %1325 = memref.load %arg4[%c137] : memref<256xf32, #tpu.memory_space<smem>>
    %1326 = vector.extract_strided_slice %9 {offsets = [2, 0, 0], sizes = [1, 16, 256], strides = [1, 1, 1]} : vector<4x16x256xf32> to vector<1x16x256xf32>
    %1327 = vector.shape_cast %1326 : vector<1x16x256xf32> to vector<16x256xf32>
    %1328 = vector.broadcast %1325 : f32 to vector<16x256xf32>
    %1329 = arith.mulf %1328, %1327 : vector<16x256xf32>
    %1330 = arith.addf %1324, %1329 : vector<16x256xf32>
    %c205 = arith.constant 205 : index
    %1331 = memref.load %arg4[%c205] : memref<256xf32, #tpu.memory_space<smem>>
    %1332 = vector.extract_strided_slice %4 {offsets = [3, 0, 0], sizes = [1, 16, 256], strides = [1, 1, 1]} : vector<4x16x256xf32> to vector<1x16x256xf32>
    %1333 = vector.shape_cast %1332 : vector<1x16x256xf32> to vector<16x256xf32>
    %1334 = vector.broadcast %1331 : f32 to vector<16x256xf32>
    %1335 = arith.mulf %1334, %1333 : vector<16x256xf32>
    %1336 = arith.addf %1330, %1335 : vector<16x256xf32>
    %c201 = arith.constant 201 : index
    %1337 = memref.load %arg4[%c201] : memref<256xf32, #tpu.memory_space<smem>>
    %1338 = vector.extract_strided_slice %9 {offsets = [3, 0, 0], sizes = [1, 16, 256], strides = [1, 1, 1]} : vector<4x16x256xf32> to vector<1x16x256xf32>
    %1339 = vector.shape_cast %1338 : vector<1x16x256xf32> to vector<16x256xf32>
    %1340 = vector.broadcast %1337 : f32 to vector<16x256xf32>
    %1341 = arith.mulf %1340, %1339 : vector<16x256xf32>
    %1342 = arith.addf %1336, %1341 : vector<16x256xf32>
    %c1_48 = arith.constant 1 : index
    %1343 = memref.load %arg5[%c1_48] : memref<8xf32, #tpu.memory_space<smem>>
    %1344 = vector.broadcast %1343 : f32 to vector<16x256xf32>
    %1345 = arith.addf %1342, %1344 : vector<16x256xf32>
    %c21 = arith.constant 21 : index
    %1346 = memref.load %arg4[%c21] : memref<256xf32, #tpu.memory_space<smem>>
    %1347 = vector.extract_strided_slice %4 {offsets = [0, 0, 0], sizes = [1, 16, 256], strides = [1, 1, 1]} : vector<4x16x256xf32> to vector<1x16x256xf32>
    %1348 = vector.shape_cast %1347 : vector<1x16x256xf32> to vector<16x256xf32>
    %1349 = vector.broadcast %1346 : f32 to vector<16x256xf32>
    %1350 = arith.mulf %1349, %1348 : vector<16x256xf32>
    %c17 = arith.constant 17 : index
    %1351 = memref.load %arg4[%c17] : memref<256xf32, #tpu.memory_space<smem>>
    %1352 = vector.extract_strided_slice %9 {offsets = [0, 0, 0], sizes = [1, 16, 256], strides = [1, 1, 1]} : vector<4x16x256xf32> to vector<1x16x256xf32>
    %1353 = vector.shape_cast %1352 : vector<1x16x256xf32> to vector<16x256xf32>
    %1354 = vector.broadcast %1351 : f32 to vector<16x256xf32>
    %1355 = arith.mulf %1354, %1353 : vector<16x256xf32>
    %1356 = arith.addf %1350, %1355 : vector<16x256xf32>
    %c85 = arith.constant 85 : index
    %1357 = memref.load %arg4[%c85] : memref<256xf32, #tpu.memory_space<smem>>
    %1358 = vector.extract_strided_slice %4 {offsets = [1, 0, 0], sizes = [1, 16, 256], strides = [1, 1, 1]} : vector<4x16x256xf32> to vector<1x16x256xf32>
    %1359 = vector.shape_cast %1358 : vector<1x16x256xf32> to vector<16x256xf32>
    %1360 = vector.broadcast %1357 : f32 to vector<16x256xf32>
    %1361 = arith.mulf %1360, %1359 : vector<16x256xf32>
    %1362 = arith.addf %1356, %1361 : vector<16x256xf32>
    %c81 = arith.constant 81 : index
    %1363 = memref.load %arg4[%c81] : memref<256xf32, #tpu.memory_space<smem>>
    %1364 = vector.extract_strided_slice %9 {offsets = [1, 0, 0], sizes = [1, 16, 256], strides = [1, 1, 1]} : vector<4x16x256xf32> to vector<1x16x256xf32>
    %1365 = vector.shape_cast %1364 : vector<1x16x256xf32> to vector<16x256xf32>
    %1366 = vector.broadcast %1363 : f32 to vector<16x256xf32>
    %1367 = arith.mulf %1366, %1365 : vector<16x256xf32>
    %1368 = arith.addf %1362, %1367 : vector<16x256xf32>
    %c149 = arith.constant 149 : index
    %1369 = memref.load %arg4[%c149] : memref<256xf32, #tpu.memory_space<smem>>
    %1370 = vector.extract_strided_slice %4 {offsets = [2, 0, 0], sizes = [1, 16, 256], strides = [1, 1, 1]} : vector<4x16x256xf32> to vector<1x16x256xf32>
    %1371 = vector.shape_cast %1370 : vector<1x16x256xf32> to vector<16x256xf32>
    %1372 = vector.broadcast %1369 : f32 to vector<16x256xf32>
    %1373 = arith.mulf %1372, %1371 : vector<16x256xf32>
    %1374 = arith.addf %1368, %1373 : vector<16x256xf32>
    %c145 = arith.constant 145 : index
    %1375 = memref.load %arg4[%c145] : memref<256xf32, #tpu.memory_space<smem>>
    %1376 = vector.extract_strided_slice %9 {offsets = [2, 0, 0], sizes = [1, 16, 256], strides = [1, 1, 1]} : vector<4x16x256xf32> to vector<1x16x256xf32>
    %1377 = vector.shape_cast %1376 : vector<1x16x256xf32> to vector<16x256xf32>
    %1378 = vector.broadcast %1375 : f32 to vector<16x256xf32>
    %1379 = arith.mulf %1378, %1377 : vector<16x256xf32>
    %1380 = arith.addf %1374, %1379 : vector<16x256xf32>
    %c213 = arith.constant 213 : index
    %1381 = memref.load %arg4[%c213] : memref<256xf32, #tpu.memory_space<smem>>
    %1382 = vector.extract_strided_slice %4 {offsets = [3, 0, 0], sizes = [1, 16, 256], strides = [1, 1, 1]} : vector<4x16x256xf32> to vector<1x16x256xf32>
    %1383 = vector.shape_cast %1382 : vector<1x16x256xf32> to vector<16x256xf32>
    %1384 = vector.broadcast %1381 : f32 to vector<16x256xf32>
    %1385 = arith.mulf %1384, %1383 : vector<16x256xf32>
    %1386 = arith.addf %1380, %1385 : vector<16x256xf32>
    %c209 = arith.constant 209 : index
    %1387 = memref.load %arg4[%c209] : memref<256xf32, #tpu.memory_space<smem>>
    %1388 = vector.extract_strided_slice %9 {offsets = [3, 0, 0], sizes = [1, 16, 256], strides = [1, 1, 1]} : vector<4x16x256xf32> to vector<1x16x256xf32>
    %1389 = vector.shape_cast %1388 : vector<1x16x256xf32> to vector<16x256xf32>
    %1390 = vector.broadcast %1387 : f32 to vector<16x256xf32>
    %1391 = arith.mulf %1390, %1389 : vector<16x256xf32>
    %1392 = arith.addf %1386, %1391 : vector<16x256xf32>
    %c2_49 = arith.constant 2 : index
    %1393 = memref.load %arg5[%c2_49] : memref<8xf32, #tpu.memory_space<smem>>
    %1394 = vector.broadcast %1393 : f32 to vector<16x256xf32>
    %1395 = arith.addf %1392, %1394 : vector<16x256xf32>
    %c29 = arith.constant 29 : index
    %1396 = memref.load %arg4[%c29] : memref<256xf32, #tpu.memory_space<smem>>
    %1397 = vector.extract_strided_slice %4 {offsets = [0, 0, 0], sizes = [1, 16, 256], strides = [1, 1, 1]} : vector<4x16x256xf32> to vector<1x16x256xf32>
    %1398 = vector.shape_cast %1397 : vector<1x16x256xf32> to vector<16x256xf32>
    %1399 = vector.broadcast %1396 : f32 to vector<16x256xf32>
    %1400 = arith.mulf %1399, %1398 : vector<16x256xf32>
    %c25 = arith.constant 25 : index
    %1401 = memref.load %arg4[%c25] : memref<256xf32, #tpu.memory_space<smem>>
    %1402 = vector.extract_strided_slice %9 {offsets = [0, 0, 0], sizes = [1, 16, 256], strides = [1, 1, 1]} : vector<4x16x256xf32> to vector<1x16x256xf32>
    %1403 = vector.shape_cast %1402 : vector<1x16x256xf32> to vector<16x256xf32>
    %1404 = vector.broadcast %1401 : f32 to vector<16x256xf32>
    %1405 = arith.mulf %1404, %1403 : vector<16x256xf32>
    %1406 = arith.addf %1400, %1405 : vector<16x256xf32>
    %c93 = arith.constant 93 : index
    %1407 = memref.load %arg4[%c93] : memref<256xf32, #tpu.memory_space<smem>>
    %1408 = vector.extract_strided_slice %4 {offsets = [1, 0, 0], sizes = [1, 16, 256], strides = [1, 1, 1]} : vector<4x16x256xf32> to vector<1x16x256xf32>
    %1409 = vector.shape_cast %1408 : vector<1x16x256xf32> to vector<16x256xf32>
    %1410 = vector.broadcast %1407 : f32 to vector<16x256xf32>
    %1411 = arith.mulf %1410, %1409 : vector<16x256xf32>
    %1412 = arith.addf %1406, %1411 : vector<16x256xf32>
    %c89 = arith.constant 89 : index
    %1413 = memref.load %arg4[%c89] : memref<256xf32, #tpu.memory_space<smem>>
    %1414 = vector.extract_strided_slice %9 {offsets = [1, 0, 0], sizes = [1, 16, 256], strides = [1, 1, 1]} : vector<4x16x256xf32> to vector<1x16x256xf32>
    %1415 = vector.shape_cast %1414 : vector<1x16x256xf32> to vector<16x256xf32>
    %1416 = vector.broadcast %1413 : f32 to vector<16x256xf32>
    %1417 = arith.mulf %1416, %1415 : vector<16x256xf32>
    %1418 = arith.addf %1412, %1417 : vector<16x256xf32>
    %c157 = arith.constant 157 : index
    %1419 = memref.load %arg4[%c157] : memref<256xf32, #tpu.memory_space<smem>>
    %1420 = vector.extract_strided_slice %4 {offsets = [2, 0, 0], sizes = [1, 16, 256], strides = [1, 1, 1]} : vector<4x16x256xf32> to vector<1x16x256xf32>
    %1421 = vector.shape_cast %1420 : vector<1x16x256xf32> to vector<16x256xf32>
    %1422 = vector.broadcast %1419 : f32 to vector<16x256xf32>
    %1423 = arith.mulf %1422, %1421 : vector<16x256xf32>
    %1424 = arith.addf %1418, %1423 : vector<16x256xf32>
    %c153 = arith.constant 153 : index
    %1425 = memref.load %arg4[%c153] : memref<256xf32, #tpu.memory_space<smem>>
    %1426 = vector.extract_strided_slice %9 {offsets = [2, 0, 0], sizes = [1, 16, 256], strides = [1, 1, 1]} : vector<4x16x256xf32> to vector<1x16x256xf32>
    %1427 = vector.shape_cast %1426 : vector<1x16x256xf32> to vector<16x256xf32>
    %1428 = vector.broadcast %1425 : f32 to vector<16x256xf32>
    %1429 = arith.mulf %1428, %1427 : vector<16x256xf32>
    %1430 = arith.addf %1424, %1429 : vector<16x256xf32>
    %c221 = arith.constant 221 : index
    %1431 = memref.load %arg4[%c221] : memref<256xf32, #tpu.memory_space<smem>>
    %1432 = vector.extract_strided_slice %4 {offsets = [3, 0, 0], sizes = [1, 16, 256], strides = [1, 1, 1]} : vector<4x16x256xf32> to vector<1x16x256xf32>
    %1433 = vector.shape_cast %1432 : vector<1x16x256xf32> to vector<16x256xf32>
    %1434 = vector.broadcast %1431 : f32 to vector<16x256xf32>
    %1435 = arith.mulf %1434, %1433 : vector<16x256xf32>
    %1436 = arith.addf %1430, %1435 : vector<16x256xf32>
    %c217 = arith.constant 217 : index
    %1437 = memref.load %arg4[%c217] : memref<256xf32, #tpu.memory_space<smem>>
    %1438 = vector.extract_strided_slice %9 {offsets = [3, 0, 0], sizes = [1, 16, 256], strides = [1, 1, 1]} : vector<4x16x256xf32> to vector<1x16x256xf32>
    %1439 = vector.shape_cast %1438 : vector<1x16x256xf32> to vector<16x256xf32>
    %1440 = vector.broadcast %1437 : f32 to vector<16x256xf32>
    %1441 = arith.mulf %1440, %1439 : vector<16x256xf32>
    %1442 = arith.addf %1436, %1441 : vector<16x256xf32>
    %c3_50 = arith.constant 3 : index
    %1443 = memref.load %arg5[%c3_50] : memref<8xf32, #tpu.memory_space<smem>>
    %1444 = vector.broadcast %1443 : f32 to vector<16x256xf32>
    %1445 = arith.addf %1442, %1444 : vector<16x256xf32>
    %c37 = arith.constant 37 : index
    %1446 = memref.load %arg4[%c37] : memref<256xf32, #tpu.memory_space<smem>>
    %1447 = vector.extract_strided_slice %4 {offsets = [0, 0, 0], sizes = [1, 16, 256], strides = [1, 1, 1]} : vector<4x16x256xf32> to vector<1x16x256xf32>
    %1448 = vector.shape_cast %1447 : vector<1x16x256xf32> to vector<16x256xf32>
    %1449 = vector.broadcast %1446 : f32 to vector<16x256xf32>
    %1450 = arith.mulf %1449, %1448 : vector<16x256xf32>
    %c33 = arith.constant 33 : index
    %1451 = memref.load %arg4[%c33] : memref<256xf32, #tpu.memory_space<smem>>
    %1452 = vector.extract_strided_slice %9 {offsets = [0, 0, 0], sizes = [1, 16, 256], strides = [1, 1, 1]} : vector<4x16x256xf32> to vector<1x16x256xf32>
    %1453 = vector.shape_cast %1452 : vector<1x16x256xf32> to vector<16x256xf32>
    %1454 = vector.broadcast %1451 : f32 to vector<16x256xf32>
    %1455 = arith.mulf %1454, %1453 : vector<16x256xf32>
    %1456 = arith.addf %1450, %1455 : vector<16x256xf32>
    %c101 = arith.constant 101 : index
    %1457 = memref.load %arg4[%c101] : memref<256xf32, #tpu.memory_space<smem>>
    %1458 = vector.extract_strided_slice %4 {offsets = [1, 0, 0], sizes = [1, 16, 256], strides = [1, 1, 1]} : vector<4x16x256xf32> to vector<1x16x256xf32>
    %1459 = vector.shape_cast %1458 : vector<1x16x256xf32> to vector<16x256xf32>
    %1460 = vector.broadcast %1457 : f32 to vector<16x256xf32>
    %1461 = arith.mulf %1460, %1459 : vector<16x256xf32>
    %1462 = arith.addf %1456, %1461 : vector<16x256xf32>
    %c97 = arith.constant 97 : index
    %1463 = memref.load %arg4[%c97] : memref<256xf32, #tpu.memory_space<smem>>
    %1464 = vector.extract_strided_slice %9 {offsets = [1, 0, 0], sizes = [1, 16, 256], strides = [1, 1, 1]} : vector<4x16x256xf32> to vector<1x16x256xf32>
    %1465 = vector.shape_cast %1464 : vector<1x16x256xf32> to vector<16x256xf32>
    %1466 = vector.broadcast %1463 : f32 to vector<16x256xf32>
    %1467 = arith.mulf %1466, %1465 : vector<16x256xf32>
    %1468 = arith.addf %1462, %1467 : vector<16x256xf32>
    %c165 = arith.constant 165 : index
    %1469 = memref.load %arg4[%c165] : memref<256xf32, #tpu.memory_space<smem>>
    %1470 = vector.extract_strided_slice %4 {offsets = [2, 0, 0], sizes = [1, 16, 256], strides = [1, 1, 1]} : vector<4x16x256xf32> to vector<1x16x256xf32>
    %1471 = vector.shape_cast %1470 : vector<1x16x256xf32> to vector<16x256xf32>
    %1472 = vector.broadcast %1469 : f32 to vector<16x256xf32>
    %1473 = arith.mulf %1472, %1471 : vector<16x256xf32>
    %1474 = arith.addf %1468, %1473 : vector<16x256xf32>
    %c161 = arith.constant 161 : index
    %1475 = memref.load %arg4[%c161] : memref<256xf32, #tpu.memory_space<smem>>
    %1476 = vector.extract_strided_slice %9 {offsets = [2, 0, 0], sizes = [1, 16, 256], strides = [1, 1, 1]} : vector<4x16x256xf32> to vector<1x16x256xf32>
    %1477 = vector.shape_cast %1476 : vector<1x16x256xf32> to vector<16x256xf32>
    %1478 = vector.broadcast %1475 : f32 to vector<16x256xf32>
    %1479 = arith.mulf %1478, %1477 : vector<16x256xf32>
    %1480 = arith.addf %1474, %1479 : vector<16x256xf32>
    %c229 = arith.constant 229 : index
    %1481 = memref.load %arg4[%c229] : memref<256xf32, #tpu.memory_space<smem>>
    %1482 = vector.extract_strided_slice %4 {offsets = [3, 0, 0], sizes = [1, 16, 256], strides = [1, 1, 1]} : vector<4x16x256xf32> to vector<1x16x256xf32>
    %1483 = vector.shape_cast %1482 : vector<1x16x256xf32> to vector<16x256xf32>
    %1484 = vector.broadcast %1481 : f32 to vector<16x256xf32>
    %1485 = arith.mulf %1484, %1483 : vector<16x256xf32>
    %1486 = arith.addf %1480, %1485 : vector<16x256xf32>
    %c225 = arith.constant 225 : index
    %1487 = memref.load %arg4[%c225] : memref<256xf32, #tpu.memory_space<smem>>
    %1488 = vector.extract_strided_slice %9 {offsets = [3, 0, 0], sizes = [1, 16, 256], strides = [1, 1, 1]} : vector<4x16x256xf32> to vector<1x16x256xf32>
    %1489 = vector.shape_cast %1488 : vector<1x16x256xf32> to vector<16x256xf32>
    %1490 = vector.broadcast %1487 : f32 to vector<16x256xf32>
    %1491 = arith.mulf %1490, %1489 : vector<16x256xf32>
    %1492 = arith.addf %1486, %1491 : vector<16x256xf32>
    %c4_51 = arith.constant 4 : index
    %1493 = memref.load %arg5[%c4_51] : memref<8xf32, #tpu.memory_space<smem>>
    %1494 = vector.broadcast %1493 : f32 to vector<16x256xf32>
    %1495 = arith.addf %1492, %1494 : vector<16x256xf32>
    %c45 = arith.constant 45 : index
    %1496 = memref.load %arg4[%c45] : memref<256xf32, #tpu.memory_space<smem>>
    %1497 = vector.extract_strided_slice %4 {offsets = [0, 0, 0], sizes = [1, 16, 256], strides = [1, 1, 1]} : vector<4x16x256xf32> to vector<1x16x256xf32>
    %1498 = vector.shape_cast %1497 : vector<1x16x256xf32> to vector<16x256xf32>
    %1499 = vector.broadcast %1496 : f32 to vector<16x256xf32>
    %1500 = arith.mulf %1499, %1498 : vector<16x256xf32>
    %c41 = arith.constant 41 : index
    %1501 = memref.load %arg4[%c41] : memref<256xf32, #tpu.memory_space<smem>>
    %1502 = vector.extract_strided_slice %9 {offsets = [0, 0, 0], sizes = [1, 16, 256], strides = [1, 1, 1]} : vector<4x16x256xf32> to vector<1x16x256xf32>
    %1503 = vector.shape_cast %1502 : vector<1x16x256xf32> to vector<16x256xf32>
    %1504 = vector.broadcast %1501 : f32 to vector<16x256xf32>
    %1505 = arith.mulf %1504, %1503 : vector<16x256xf32>
    %1506 = arith.addf %1500, %1505 : vector<16x256xf32>
    %c109 = arith.constant 109 : index
    %1507 = memref.load %arg4[%c109] : memref<256xf32, #tpu.memory_space<smem>>
    %1508 = vector.extract_strided_slice %4 {offsets = [1, 0, 0], sizes = [1, 16, 256], strides = [1, 1, 1]} : vector<4x16x256xf32> to vector<1x16x256xf32>
    %1509 = vector.shape_cast %1508 : vector<1x16x256xf32> to vector<16x256xf32>
    %1510 = vector.broadcast %1507 : f32 to vector<16x256xf32>
    %1511 = arith.mulf %1510, %1509 : vector<16x256xf32>
    %1512 = arith.addf %1506, %1511 : vector<16x256xf32>
    %c105 = arith.constant 105 : index
    %1513 = memref.load %arg4[%c105] : memref<256xf32, #tpu.memory_space<smem>>
    %1514 = vector.extract_strided_slice %9 {offsets = [1, 0, 0], sizes = [1, 16, 256], strides = [1, 1, 1]} : vector<4x16x256xf32> to vector<1x16x256xf32>
    %1515 = vector.shape_cast %1514 : vector<1x16x256xf32> to vector<16x256xf32>
    %1516 = vector.broadcast %1513 : f32 to vector<16x256xf32>
    %1517 = arith.mulf %1516, %1515 : vector<16x256xf32>
    %1518 = arith.addf %1512, %1517 : vector<16x256xf32>
    %c173 = arith.constant 173 : index
    %1519 = memref.load %arg4[%c173] : memref<256xf32, #tpu.memory_space<smem>>
    %1520 = vector.extract_strided_slice %4 {offsets = [2, 0, 0], sizes = [1, 16, 256], strides = [1, 1, 1]} : vector<4x16x256xf32> to vector<1x16x256xf32>
    %1521 = vector.shape_cast %1520 : vector<1x16x256xf32> to vector<16x256xf32>
    %1522 = vector.broadcast %1519 : f32 to vector<16x256xf32>
    %1523 = arith.mulf %1522, %1521 : vector<16x256xf32>
    %1524 = arith.addf %1518, %1523 : vector<16x256xf32>
    %c169 = arith.constant 169 : index
    %1525 = memref.load %arg4[%c169] : memref<256xf32, #tpu.memory_space<smem>>
    %1526 = vector.extract_strided_slice %9 {offsets = [2, 0, 0], sizes = [1, 16, 256], strides = [1, 1, 1]} : vector<4x16x256xf32> to vector<1x16x256xf32>
    %1527 = vector.shape_cast %1526 : vector<1x16x256xf32> to vector<16x256xf32>
    %1528 = vector.broadcast %1525 : f32 to vector<16x256xf32>
    %1529 = arith.mulf %1528, %1527 : vector<16x256xf32>
    %1530 = arith.addf %1524, %1529 : vector<16x256xf32>
    %c237 = arith.constant 237 : index
    %1531 = memref.load %arg4[%c237] : memref<256xf32, #tpu.memory_space<smem>>
    %1532 = vector.extract_strided_slice %4 {offsets = [3, 0, 0], sizes = [1, 16, 256], strides = [1, 1, 1]} : vector<4x16x256xf32> to vector<1x16x256xf32>
    %1533 = vector.shape_cast %1532 : vector<1x16x256xf32> to vector<16x256xf32>
    %1534 = vector.broadcast %1531 : f32 to vector<16x256xf32>
    %1535 = arith.mulf %1534, %1533 : vector<16x256xf32>
    %1536 = arith.addf %1530, %1535 : vector<16x256xf32>
    %c233 = arith.constant 233 : index
    %1537 = memref.load %arg4[%c233] : memref<256xf32, #tpu.memory_space<smem>>
    %1538 = vector.extract_strided_slice %9 {offsets = [3, 0, 0], sizes = [1, 16, 256], strides = [1, 1, 1]} : vector<4x16x256xf32> to vector<1x16x256xf32>
    %1539 = vector.shape_cast %1538 : vector<1x16x256xf32> to vector<16x256xf32>
    %1540 = vector.broadcast %1537 : f32 to vector<16x256xf32>
    %1541 = arith.mulf %1540, %1539 : vector<16x256xf32>
    %1542 = arith.addf %1536, %1541 : vector<16x256xf32>
    %c5_52 = arith.constant 5 : index
    %1543 = memref.load %arg5[%c5_52] : memref<8xf32, #tpu.memory_space<smem>>
    %1544 = vector.broadcast %1543 : f32 to vector<16x256xf32>
    %1545 = arith.addf %1542, %1544 : vector<16x256xf32>
    %c53 = arith.constant 53 : index
    %1546 = memref.load %arg4[%c53] : memref<256xf32, #tpu.memory_space<smem>>
    %1547 = vector.extract_strided_slice %4 {offsets = [0, 0, 0], sizes = [1, 16, 256], strides = [1, 1, 1]} : vector<4x16x256xf32> to vector<1x16x256xf32>
    %1548 = vector.shape_cast %1547 : vector<1x16x256xf32> to vector<16x256xf32>
    %1549 = vector.broadcast %1546 : f32 to vector<16x256xf32>
    %1550 = arith.mulf %1549, %1548 : vector<16x256xf32>
    %c49 = arith.constant 49 : index
    %1551 = memref.load %arg4[%c49] : memref<256xf32, #tpu.memory_space<smem>>
    %1552 = vector.extract_strided_slice %9 {offsets = [0, 0, 0], sizes = [1, 16, 256], strides = [1, 1, 1]} : vector<4x16x256xf32> to vector<1x16x256xf32>
    %1553 = vector.shape_cast %1552 : vector<1x16x256xf32> to vector<16x256xf32>
    %1554 = vector.broadcast %1551 : f32 to vector<16x256xf32>
    %1555 = arith.mulf %1554, %1553 : vector<16x256xf32>
    %1556 = arith.addf %1550, %1555 : vector<16x256xf32>
    %c117 = arith.constant 117 : index
    %1557 = memref.load %arg4[%c117] : memref<256xf32, #tpu.memory_space<smem>>
    %1558 = vector.extract_strided_slice %4 {offsets = [1, 0, 0], sizes = [1, 16, 256], strides = [1, 1, 1]} : vector<4x16x256xf32> to vector<1x16x256xf32>
    %1559 = vector.shape_cast %1558 : vector<1x16x256xf32> to vector<16x256xf32>
    %1560 = vector.broadcast %1557 : f32 to vector<16x256xf32>
    %1561 = arith.mulf %1560, %1559 : vector<16x256xf32>
    %1562 = arith.addf %1556, %1561 : vector<16x256xf32>
    %c113 = arith.constant 113 : index
    %1563 = memref.load %arg4[%c113] : memref<256xf32, #tpu.memory_space<smem>>
    %1564 = vector.extract_strided_slice %9 {offsets = [1, 0, 0], sizes = [1, 16, 256], strides = [1, 1, 1]} : vector<4x16x256xf32> to vector<1x16x256xf32>
    %1565 = vector.shape_cast %1564 : vector<1x16x256xf32> to vector<16x256xf32>
    %1566 = vector.broadcast %1563 : f32 to vector<16x256xf32>
    %1567 = arith.mulf %1566, %1565 : vector<16x256xf32>
    %1568 = arith.addf %1562, %1567 : vector<16x256xf32>
    %c181 = arith.constant 181 : index
    %1569 = memref.load %arg4[%c181] : memref<256xf32, #tpu.memory_space<smem>>
    %1570 = vector.extract_strided_slice %4 {offsets = [2, 0, 0], sizes = [1, 16, 256], strides = [1, 1, 1]} : vector<4x16x256xf32> to vector<1x16x256xf32>
    %1571 = vector.shape_cast %1570 : vector<1x16x256xf32> to vector<16x256xf32>
    %1572 = vector.broadcast %1569 : f32 to vector<16x256xf32>
    %1573 = arith.mulf %1572, %1571 : vector<16x256xf32>
    %1574 = arith.addf %1568, %1573 : vector<16x256xf32>
    %c177 = arith.constant 177 : index
    %1575 = memref.load %arg4[%c177] : memref<256xf32, #tpu.memory_space<smem>>
    %1576 = vector.extract_strided_slice %9 {offsets = [2, 0, 0], sizes = [1, 16, 256], strides = [1, 1, 1]} : vector<4x16x256xf32> to vector<1x16x256xf32>
    %1577 = vector.shape_cast %1576 : vector<1x16x256xf32> to vector<16x256xf32>
    %1578 = vector.broadcast %1575 : f32 to vector<16x256xf32>
    %1579 = arith.mulf %1578, %1577 : vector<16x256xf32>
    %1580 = arith.addf %1574, %1579 : vector<16x256xf32>
    %c245 = arith.constant 245 : index
    %1581 = memref.load %arg4[%c245] : memref<256xf32, #tpu.memory_space<smem>>
    %1582 = vector.extract_strided_slice %4 {offsets = [3, 0, 0], sizes = [1, 16, 256], strides = [1, 1, 1]} : vector<4x16x256xf32> to vector<1x16x256xf32>
    %1583 = vector.shape_cast %1582 : vector<1x16x256xf32> to vector<16x256xf32>
    %1584 = vector.broadcast %1581 : f32 to vector<16x256xf32>
    %1585 = arith.mulf %1584, %1583 : vector<16x256xf32>
    %1586 = arith.addf %1580, %1585 : vector<16x256xf32>
    %c241 = arith.constant 241 : index
    %1587 = memref.load %arg4[%c241] : memref<256xf32, #tpu.memory_space<smem>>
    %1588 = vector.extract_strided_slice %9 {offsets = [3, 0, 0], sizes = [1, 16, 256], strides = [1, 1, 1]} : vector<4x16x256xf32> to vector<1x16x256xf32>
    %1589 = vector.shape_cast %1588 : vector<1x16x256xf32> to vector<16x256xf32>
    %1590 = vector.broadcast %1587 : f32 to vector<16x256xf32>
    %1591 = arith.mulf %1590, %1589 : vector<16x256xf32>
    %1592 = arith.addf %1586, %1591 : vector<16x256xf32>
    %c6_53 = arith.constant 6 : index
    %1593 = memref.load %arg5[%c6_53] : memref<8xf32, #tpu.memory_space<smem>>
    %1594 = vector.broadcast %1593 : f32 to vector<16x256xf32>
    %1595 = arith.addf %1592, %1594 : vector<16x256xf32>
    %c61 = arith.constant 61 : index
    %1596 = memref.load %arg4[%c61] : memref<256xf32, #tpu.memory_space<smem>>
    %1597 = vector.extract_strided_slice %4 {offsets = [0, 0, 0], sizes = [1, 16, 256], strides = [1, 1, 1]} : vector<4x16x256xf32> to vector<1x16x256xf32>
    %1598 = vector.shape_cast %1597 : vector<1x16x256xf32> to vector<16x256xf32>
    %1599 = vector.broadcast %1596 : f32 to vector<16x256xf32>
    %1600 = arith.mulf %1599, %1598 : vector<16x256xf32>
    %c57 = arith.constant 57 : index
    %1601 = memref.load %arg4[%c57] : memref<256xf32, #tpu.memory_space<smem>>
    %1602 = vector.extract_strided_slice %9 {offsets = [0, 0, 0], sizes = [1, 16, 256], strides = [1, 1, 1]} : vector<4x16x256xf32> to vector<1x16x256xf32>
    %1603 = vector.shape_cast %1602 : vector<1x16x256xf32> to vector<16x256xf32>
    %1604 = vector.broadcast %1601 : f32 to vector<16x256xf32>
    %1605 = arith.mulf %1604, %1603 : vector<16x256xf32>
    %1606 = arith.addf %1600, %1605 : vector<16x256xf32>
    %c125 = arith.constant 125 : index
    %1607 = memref.load %arg4[%c125] : memref<256xf32, #tpu.memory_space<smem>>
    %1608 = vector.extract_strided_slice %4 {offsets = [1, 0, 0], sizes = [1, 16, 256], strides = [1, 1, 1]} : vector<4x16x256xf32> to vector<1x16x256xf32>
    %1609 = vector.shape_cast %1608 : vector<1x16x256xf32> to vector<16x256xf32>
    %1610 = vector.broadcast %1607 : f32 to vector<16x256xf32>
    %1611 = arith.mulf %1610, %1609 : vector<16x256xf32>
    %1612 = arith.addf %1606, %1611 : vector<16x256xf32>
    %c121 = arith.constant 121 : index
    %1613 = memref.load %arg4[%c121] : memref<256xf32, #tpu.memory_space<smem>>
    %1614 = vector.extract_strided_slice %9 {offsets = [1, 0, 0], sizes = [1, 16, 256], strides = [1, 1, 1]} : vector<4x16x256xf32> to vector<1x16x256xf32>
    %1615 = vector.shape_cast %1614 : vector<1x16x256xf32> to vector<16x256xf32>
    %1616 = vector.broadcast %1613 : f32 to vector<16x256xf32>
    %1617 = arith.mulf %1616, %1615 : vector<16x256xf32>
    %1618 = arith.addf %1612, %1617 : vector<16x256xf32>
    %c189 = arith.constant 189 : index
    %1619 = memref.load %arg4[%c189] : memref<256xf32, #tpu.memory_space<smem>>
    %1620 = vector.extract_strided_slice %4 {offsets = [2, 0, 0], sizes = [1, 16, 256], strides = [1, 1, 1]} : vector<4x16x256xf32> to vector<1x16x256xf32>
    %1621 = vector.shape_cast %1620 : vector<1x16x256xf32> to vector<16x256xf32>
    %1622 = vector.broadcast %1619 : f32 to vector<16x256xf32>
    %1623 = arith.mulf %1622, %1621 : vector<16x256xf32>
    %1624 = arith.addf %1618, %1623 : vector<16x256xf32>
    %c185 = arith.constant 185 : index
    %1625 = memref.load %arg4[%c185] : memref<256xf32, #tpu.memory_space<smem>>
    %1626 = vector.extract_strided_slice %9 {offsets = [2, 0, 0], sizes = [1, 16, 256], strides = [1, 1, 1]} : vector<4x16x256xf32> to vector<1x16x256xf32>
    %1627 = vector.shape_cast %1626 : vector<1x16x256xf32> to vector<16x256xf32>
    %1628 = vector.broadcast %1625 : f32 to vector<16x256xf32>
    %1629 = arith.mulf %1628, %1627 : vector<16x256xf32>
    %1630 = arith.addf %1624, %1629 : vector<16x256xf32>
    %c253 = arith.constant 253 : index
    %1631 = memref.load %arg4[%c253] : memref<256xf32, #tpu.memory_space<smem>>
    %1632 = vector.extract_strided_slice %4 {offsets = [3, 0, 0], sizes = [1, 16, 256], strides = [1, 1, 1]} : vector<4x16x256xf32> to vector<1x16x256xf32>
    %1633 = vector.shape_cast %1632 : vector<1x16x256xf32> to vector<16x256xf32>
    %1634 = vector.broadcast %1631 : f32 to vector<16x256xf32>
    %1635 = arith.mulf %1634, %1633 : vector<16x256xf32>
    %1636 = arith.addf %1630, %1635 : vector<16x256xf32>
    %c249 = arith.constant 249 : index
    %1637 = memref.load %arg4[%c249] : memref<256xf32, #tpu.memory_space<smem>>
    %1638 = vector.extract_strided_slice %9 {offsets = [3, 0, 0], sizes = [1, 16, 256], strides = [1, 1, 1]} : vector<4x16x256xf32> to vector<1x16x256xf32>
    %1639 = vector.shape_cast %1638 : vector<1x16x256xf32> to vector<16x256xf32>
    %1640 = vector.broadcast %1637 : f32 to vector<16x256xf32>
    %1641 = arith.mulf %1640, %1639 : vector<16x256xf32>
    %1642 = arith.addf %1636, %1641 : vector<16x256xf32>
    %c7_54 = arith.constant 7 : index
    %1643 = memref.load %arg5[%c7_54] : memref<8xf32, #tpu.memory_space<smem>>
    %1644 = vector.broadcast %1643 : f32 to vector<16x256xf32>
    %1645 = arith.addf %1642, %1644 : vector<16x256xf32>
    %1646 = vector.shape_cast %1295 : vector<16x256xf32> to vector<1x16x256xf32>
    %1647 = vector.shape_cast %1345 : vector<16x256xf32> to vector<1x16x256xf32>
    %1648 = vector.shape_cast %1395 : vector<16x256xf32> to vector<1x16x256xf32>
    %1649 = vector.shape_cast %1445 : vector<16x256xf32> to vector<1x16x256xf32>
    %1650 = vector.shape_cast %1495 : vector<16x256xf32> to vector<1x16x256xf32>
    %1651 = vector.shape_cast %1545 : vector<16x256xf32> to vector<1x16x256xf32>
    %1652 = vector.shape_cast %1595 : vector<16x256xf32> to vector<1x16x256xf32>
    %1653 = vector.shape_cast %1645 : vector<16x256xf32> to vector<1x16x256xf32>
    %1654 = tpu.concatenate %1646, %1647, %1648, %1649, %1650, %1651, %1652, %1653 in 0 : vector<1x16x256xf32>, vector<1x16x256xf32>, vector<1x16x256xf32>, vector<1x16x256xf32>, vector<1x16x256xf32>, vector<1x16x256xf32>, vector<1x16x256xf32>, vector<1x16x256xf32> -> vector<8x16x256xf32>
    %c0_55 = arith.constant 0 : index
    %c0_56 = arith.constant 0 : index
    %c0_57 = arith.constant 0 : index
    %c3_58 = arith.constant 3 : index
    %c0_59 = arith.constant 0 : index
    %1655 = vector.load %arg6[%c0_55, %c0_56, %c0_57, %c3_58, %c0_59] : memref<1x8x16x4x256xf32, #tpu.memory_space<vmem>>, vector<1x8x16x1x256xf32>
    %1656 = vector.shape_cast %1655 : vector<1x8x16x1x256xf32> to vector<8x16x256xf32>
    %1657 = vector.shape_cast %1654 : vector<8x16x256xf32> to vector<1x8x16x1x256xf32>
    tpu.vector_store %arg6[%c0_55, %c0_56, %c0_57, %c3_58, %c0_59], %1657 {strides = array<i32>} : memref<1x8x16x4x256xf32, #tpu.memory_space<vmem>>, vector<1x8x16x1x256xf32>,
    return
  }
  func.func @transform_0(%arg0: i32, %arg1: i32) -> (i32, i32, i32, i32) {
    %c0_i32 = arith.constant 0 : i32
    %c0_i32_0 = arith.constant 0 : i32
    %c0_i32_1 = arith.constant 0 : i32
    return %arg0, %c0_i32, %c0_i32_0, %arg1 : i32, i32, i32, i32
  }
  func.func @transform_1(%arg0: i32, %arg1: i32) -> (i32, i32, i32, i32) {
    %c0_i32 = arith.constant 0 : i32
    %c0_i32_0 = arith.constant 0 : i32
    %c0_i32_1 = arith.constant 0 : i32
    return %arg0, %c0_i32, %c0_i32_0, %arg1 : i32, i32, i32, i32
  }
  func.func @transform_2(%arg0: i32, %arg1: i32) -> i32 {
    %c0_i32 = arith.constant 0 : i32
    %c0_i32_0 = arith.constant 0 : i32
    return %c0_i32 : i32
  }
  func.func @transform_3(%arg0: i32, %arg1: i32) -> i32 {
    %c0_i32 = arith.constant 0 : i32
    %c0_i32_0 = arith.constant 0 : i32
    return %c0_i32 : i32
  }
  func.func @transform_4(%arg0: i32, %arg1: i32) -> (i32, i32, i32, i32, i32) {
    %c0_i32 = arith.constant 0 : i32
    %c0_i32_0 = arith.constant 0 : i32
    %c0_i32_1 = arith.constant 0 : i32
    %c0_i32_2 = arith.constant 0 : i32
    return %arg0, %c0_i32, %c0_i32_0, %c0_i32_1, %arg1 : i32, i32, i32, i32, i32
  }
}

</mosaic_0001>

<bundles_post_ra>
// kernel: decoder_forward.1
= control target key start
LH: loop header
LB: loop body
LE: loop exit
PB: predicated region body
PF: predicated region fallthrough
CT: control target
= control target key end

     0   :  { %s13743_s0 = inlined_call_operand.hbm [shape: f32[2,4,16,1024], index: 0, kind: input, shape index: {}]   ;;  %s13744_s1 = inlined_call_operand.hbm [shape: f32[2,4,16,1024], index: 1, kind: input, shape index: {}]   ;;  %s13745_s2 = inlined_call_operand.vmem [shape: f32[256], index: 2, kind: input, shape index: {}]   ;;  %s13746_s3 = inlined_call_operand.hbm [shape: f32[8], index: 3, kind: input, shape index: {}]   ;;  %s13747_s4 = inlined_call_operand.vmem [shape: f32[2,8,16,4,1024], index: 4, kind: output, shape index: {}]  }
   0x1   :  { %13809 = sst [smem:[#allocation26_spill]] %s13745_s2 }
   0x2   :  { %13810 = sst [smem:[#allocation27_spill]] %s13746_s3 }
   0x3   :  { %13811 = sst [smem:[#allocation28_spill]] %s13747_s4 }
   0x4   :  { %9 = vsyncpa [#allocation3], 0 }
   0x5   :  { %11 = vsyncpa [#allocation3 + $0x1], 0 }
   0x6   :  { %12 = vsyncpa [#allocation7], 0 }
   0x7   :  { %14 = vsyncpa [#allocation7 + $0x1], 0 }
   0x8   :  { %15 = vsyncpa [#allocation5], 0 }
   0x9   :  { %16 = vsyncpa [#allocation4], 0  ;;  %s7593_s15 = smov 0   ;;  %s7595_s16 = smov 0  }
   0xa   :  { %s7597_s17 = smov 0   ;;  %s7599_s18 = smov 0  }
   0xb   :  { %s7601_s19 = smov 0   ;;  %s7603_s20 = smov 0  }
   0xc   :  { %s7605_s21 = smov 0   ;;  %s7607_s22 = smov 0  }
   0xd LB: > { %13812 = sst [smem:[#allocation15_spill]] %s7553_s20  ;;  %s6473_s23 = sadd.s32 4294967295, %s7561_s22   ;;  %s7561_s22 = sphi %s7607_s22, %s13937_s22   ;;  %s7557_s21 = sphi %s7605_s21, %s13936_s21   ;;  %s7553_s20 = sphi %s7603_s20, %s13931_s20   ;;  %s7549_s19 = sphi %s7601_s19, %s13935_s19   ;;  %s7545_s18 = sphi %s7599_s18, %s13930_s18   ;;  %s7541_s17 = sphi %s7597_s17, %s13934_s17   ;;  %s7537_s16 = sphi %s7595_s16, %s13933_s16   ;;  %s7533_s15 = sphi %s7593_s15, %s13932_s15  }
   0xe   : > { %13813 = sst [smem:[#allocation16_spill]] %s7561_s22  ;;  %p50_p0 = scmp.ne.s32.totalorder %s7541_s17, %s7537_s16 }
   0xf   : > { %p51_p1 = scmp.eq.s32.totalorder %s7561_s22, 0  ;;  %p56_p2 = scmp.ne.s32.totalorder %s7537_s16, %s7533_s15 }
  0x10   : > { %p7637_p3 = scmp.eq.s32.totalorder %s6473_s23, 0  ;;  %p152_p5 = scmp.eq.s32.totalorder %s6473_s23, 7 }
  0x11   : > { %p7641_p4 = por %p51_p1, %p50_p0  ;;  %p6475_p7 = scmp.ge.s32.totalorder %s7561_s22, 1 }
  0x12   : > { %p7647_p6 = por %p7637_p3, %p56_p2  ;;  %p7652_p8 = por %p152_p5, %p50_p0 }
  0x13   : > { %p165_p9 = scmp.lt.s32.totalorder %s7561_s22, 9  ;;  %s13818_s2 = sld [smem:[#allocation26_spill]] }
  0x14   : > { %p7321_p12 = scmp.lt.s32.totalorder %s7561_s22, 8  ;;  %s13820_s3 = sld [smem:[#allocation27_spill]] }
  0x15   : > { %p7660_p10 = pnand %p6475_p7, %p165_p9  ;;  %s7563_s11 = smov [#allocation8]  }
  0x16   : > { %p7674_p0 = pnand %p7321_p12, %p7641_p4  ;;  %s7564_s12 = smov [#allocation9]  }
  0x17   : > { %p7305_p11 = pneg %p7660_p10  ;;  %s31_s13 = sadd.s32 1, %s7553_s20 }
  0x18   : > { %p32_p1 = scmp.ge.s32.totalorder %s31_s13, 4  ;;  %s34_s14 = sadd.s32 1, %s7557_s21 }
  0x19   : > { %s177_s5 = sshll.u32 %s13818_s2, 4  ;;  %p7306_p13 = pnand %p7305_p11, %p7637_p3  ;;  %s178_s5 = int_to_ptr.vmem [resolvable:$true] %s177_s5 }
  0x1a   : > { %s187_s9 = sshll.u32 %s13820_s3, 4  ;;  %s7681_s15 = sand.u32 1, %s7541_s17   ;;  %s188_s9 = int_to_ptr.hbm [resolvable:$true] %s187_s9 }
  0x1b   : > { %7308 = dma.vmem_to_smem (!%p7306_p13), %s178_s5, 32, %s7563_s11, [#allocation5]  }
  0x1c   : > { %7311 = dma.hbm_to_smem (!%p7306_p13), %s188_s9, 16, %s7564_s12, [#allocation4]  }
  0x1d   : > { %s6480_s23 = sshll.u32 %s7553_s20, 1  ;;  %s13939_s13 = smov (%p32_p1, %s31_s13), 0 }
  0x1e   : > { %13822 = sst [smem:[#allocation17_spill]] %s13939_s13  ;;  %s13941_s14 = smov (!%p32_p1, %s34_s14), %s7557_s21 }
  0x1f   : > { %s39_s26 = ssub.s32 %s7553_s20, %s13939_s13  ;;  %p36_p2 = scmp.ge.s32.totalorder %s13941_s14, 2 }
  0x20   : > { %s6479_s29 = sshll.u32 %s7681_s15, 7  ;;  %s6481_s30 = sshll.u32 %s7557_s21, 6 }
  0x21   : > { %s13943_s14 = smov (%p36_p2, %s13941_s14), 0  ;;  %s207_s5 = sadd.s32 %s6481_s30, %s6480_s23 }
  0x22   : > { %s202_s7 = scalar_lea.vmem [#allocation2], %s6479_s29  ;;  %s38_s9 = ssub.s32 %s7557_s21, %s13943_s14 }
  0x23   : > { %s212_s8 = sshll.u32 %s202_s7, 4  ;;  %s6482_s11 = sshll.u32 %s207_s5, 3  ;;  %s213_s8 = int_to_ptr.vmem [resolvable:$true] %s212_s8 }
  0x24   : > { %s40_s12 = sor.u32 %s39_s26, %s38_s9  ;;  %s209_s3 = scalar_lea.hbm %s13743_s0, %s6482_s11 }
  0x25   : > { %p41_p4 = scmp.eq.s32.totalorder %s40_s12, 0  ;;  %s210_s13 = sshll.u32 %s209_s3, 4  ;;  %s211_s13 = int_to_ptr.hbm [resolvable:$true] %s210_s13 }
  0x26   : > { %s13823_s20 = sadd.s32 1, %s7541_s17  ;;  %s199_s23 = scalar_lea.sflag [#allocation3], %s7681_s15 }
  0x27   : > { %s7701_s22 = scalar_select %p41_p4, %s7541_s17, %s13823_s20  }
  0x28   : > { %s7565_s30 = smov 1024   ;;  %s7566_s4 = smov 256  }
  0x29   : > { %s7567_s7 = smov 16   ;;  %s233_s2 = scalar_lea.hbm %s13744_s1, %s6482_s11 }
  0x2a   : > { %7315 = dma.hbm_to_vmem [thread:$0]  (!%p7674_p0), %s211_s13, 2048, %s213_s8, %s199_s23, %s7565_s30, %s7566_s4, %s7567_s7  }
  0x2b   : > { %s234_s24 = sshll.u32 %s233_s2, 4  ;;  %s226_s9 = scalar_lea.vmem [#allocation6], %s6479_s29  ;;  %s235_s24 = int_to_ptr.hbm [resolvable:$true] %s234_s24 }
  0x2c   : > { %s236_s12 = sshll.u32 %s226_s9, 4  ;;  %s223_s3 = scalar_lea.sflag [#allocation7], %s7681_s15  ;;  %s237_s12 = int_to_ptr.vmem [resolvable:$true] %s236_s12 }
  0x2d   : > { %7318 = dma.hbm_to_vmem [thread:$0]  (!%p7674_p0), %s235_s24, 2048, %s237_s12, %s223_s3, %s7565_s30, %s7566_s4, %s7567_s7  }
  0x2e   : > { %248 = sbr.rel (%p7660_p10) target bundleno = 1063 (0x427), region = 36 }
  0x33   : > { %s7715_s20 = sand.u32 1, %s7537_s16  }
  0x34   : > { %s6488_s13 = sshll.u32 %s7715_s20, 7  ;;  %s251_s8 = scalar_lea.sflag [#allocation3], %s7715_s20 }
  0x35   : > { %s7719_s11 = scalar_lea.vmem [#allocation2], %s6488_s13 }
  0x36   : > { %7516 = dma.done.wait (%p7647_p6), %s251_s8, 2048  }
  0x37   : > { %7518 = vsyncadd (%p7647_p6), %s251_s8, 4294965248  ;;  %s261_s4 = scalar_lea.sflag [#allocation7], %s7715_s20  ;;  %s7726_s6 = scalar_lea.vmem [#allocation6], %s6488_s13 }
  0x38   : > { %7520 = dma.done.wait (%p7647_p6), %s261_s4, 2048  }
  0x39   : > { %7522 = vsyncadd (%p7647_p6), %s261_s4, 4294965248 }
  0x3a   : > { %7524 = dma.done.wait (%p7637_p3), [#allocation5], 32  }
  0x3b   : > { %7526 = vsyncadd (%p7637_p3), [#allocation5], 4294967264 }
  0x3c   : > { %7528 = dma.done.wait (%p7637_p3), [#allocation4], 16  }
  0x3d   : > { %7530 = vsyncadd (%p7637_p3), [#allocation4], 4294967280 }
  0x3e   : > { %280 = sfence }
  0x3f   : > { %v308_v0 = vld [vmem:[%s7719_s11] sm:$0xff]  ;;  %v309_v1 = vld [vmem:[%s7719_s11 + $0x8] sm:$0xff]  ;;  %s7746_s25 = sld [smem:[#allocation8 + $0x2]]  ;;  %vm372_vm0 = vcmask 1040384   ;;  %v310_v58 = vld [vmem:[%s7719_s11 + $0x10] sm:$0xff]  ;;  %vm1175_vm1 = vcmask 1041409  }
  0x40   : > { %v312_v2 = vld [vmem:[%s7719_s11 + $0x20] sm:$0xff]  ;;  %v313_v3 = vld [vmem:[%s7719_s11 + $0x28] sm:$0xff]  ;;  %s7751_s27 = sld [smem:[#allocation8 + $0x6]]  ;;  %v311_v59 = vld [vmem:[%s7719_s11 + $0x18] sm:$0xff]  ;;  %vm1178_vm2 = vcmask 1042434   ;;  %vm1181_vm3 = vcmask 1043459  }
  0x41   : > { %v316_v4 = vld [vmem:[%s7719_s11 + $0x40] sm:$0xff]  ;;  %v317_v5 = vld [vmem:[%s7719_s11 + $0x48] sm:$0xff]  ;;  %s7758_s10 = sld [smem:[#allocation8 + $0x42]]  ;;  %v314_v60 = vld [vmem:[%s7719_s11 + $0x30] sm:$0xff]  ;;  %vm1184_vm5 = vcmask 1044484   ;;  %vm1187_vm6 = vcmask 1045509  }
  0x42   : > { %v320_v6 = vld [vmem:[%s7719_s11 + $0x60] sm:$0xff]  ;;  %v321_v7 = vld [vmem:[%s7719_s11 + $0x68] sm:$0xff]  ;;  %s7769_s15 = sld [smem:[#allocation8 + $0x46]]  ;;  %vm1190_vm7 = vcmask 1046534   ;;  %vm421_vm8 = vcmask 1046528   ;;  %s6492_s5 = sshll.u32 %s7715_s20, 10 }
  0x43   : > { %v324_v8 = vld [vmem:[%s7726_s6] sm:$0xff]  ;;  %v325_v9 = vld [vmem:[%s7726_s6 + $0x8] sm:$0xff]  ;;  %s7779_s29 = sld [smem:[#allocation8 + $0x82]]  ;;  %s8017_s20 = scalar_lea.vmem [#allocation10], %s6492_s5 }
  0x44   : > { %v328_v10 = vld [vmem:[%s7726_s6 + $0x20] sm:$0xff]  ;;  %v329_v11 = vld [vmem:[%s7726_s6 + $0x28] sm:$0xff]  ;;  %v7756_v12 = vadd.f32 %v324_v8, %v308_v0  ;;  %v7763_v16 = vadd.f32 %v325_v9, %v309_v1  ;;  %s6498_s23 = sld [smem:[#allocation8 + $0x86]]  ;;  %v315_v1 = vld [vmem:[%s7719_s11 + $0x38] sm:$0xff]  ;;  %v1548_v8 = vlaneseq }
  0x45   : > { %v332_v13 = vld [vmem:[%s7726_s6 + $0x40] sm:$0xff]  ;;  %v333_v14 = vld [vmem:[%s7726_s6 + $0x48] sm:$0xff]  ;;  %v7765_v17 = vadd.f32 %v328_v10, %v312_v2  ;;  %v7767_v18 = vadd.f32 %v329_v11, %v313_v3  ;;  %s7788_s30 = sld [smem:[#allocation8 + $0xc2]]  ;;  %v7820_v37 = vstv %s7746_s25  ;;  %v318_v2 = vld [vmem:[%s7719_s11 + $0x50] sm:$0xff] }
  0x46   : > { %v336_v15 = vld [vmem:[%s7726_s6 + $0x60] sm:$0xff]  ;;  %13824 = vst [vmem:[#allocation18_spill] sm:$0xff] %v7763_v16  ;;  %v337_v19 = vld [vmem:[%s7726_s6 + $0x68] sm:$0xff]  ;;  %v7772_v20 = vadd.f32 %v332_v13, %v316_v4  ;;  %v7774_v21 = vadd.f32 %v333_v14, %v317_v5  ;;  %v373_v23 = vrot.slane %v7756_v12, 7  ;;  %v374_v25 = vrot.slane %v7763_v16, 7  ;;  %s7802_s7 = sld [smem:[#allocation8 + $0xc6]] }
  0x47   : > { %v7776_v22 = vadd.f32 %v336_v15, %v320_v6  ;;  %v7781_v24 = vadd.f32 %v337_v19, %v321_v7  ;;  %v13756_v26 = vrot.slane %v7765_v17, 7  ;;  %v13755_v27 = vrot.slane %v7767_v18, 7  ;;  %s7834_s26 = sld [smem:[#allocation9]]  ;;  %v319_v3 = vld [vmem:[%s7719_s11 + $0x58] sm:$0xff]  ;;  %v322_v4 = vld [vmem:[%s7719_s11 + $0x70] sm:$0xff] }
  0x48   : > { %v13754_v28 = vrot.slane %v7772_v20, 7  ;;  %v13753_v29 = vrot.slane %v7774_v21, 7  ;;  %v7795_v32 = vsel %vm372_vm0, 0.0, %v373_v23  ;;  %v7800_v33 = vsel %vm372_vm0, 0.0, %v374_v25  ;;  %v326_v5 = vld [vmem:[%s7726_s6 + $0x10] sm:$0xff]  ;;  %v327_v9 = vld [vmem:[%s7726_s6 + $0x18] sm:$0xff] }
  0x49   : > { %v13752_v30 = vrot.slane %v7776_v22, 7  ;;  %v13751_v31 = vrot.slane %v7781_v24, 7  ;;  %v7807_v34 = vsel %vm372_vm0, 0.0, %v13756_v26  ;;  %v7812_v35 = vsel %vm372_vm0, 0.0, %v13755_v27  ;;  %v330_v10 = vld [vmem:[%s7726_s6 + $0x30] sm:$0xff]  ;;  %v331_v11 = vld [vmem:[%s7726_s6 + $0x38] sm:$0xff] }
  0x4a   : > { %v7817_v36 = vsel %vm372_vm0, 0.0, %v13754_v28  ;;  %v7825_v38 = vsel %vm372_vm0, 0.0, %v13753_v29  ;;  %v472_v39 = vmul.f32 %v7820_v37, %v7756_v12  ;;  %v473_v40 = vmul.f32 %v7820_v37, %v7763_v16  ;;  %s7984_s2 = sld [smem:[#allocation8 + $0xa]] }
  0x4b   : > { %v7832_v41 = vstv %s7751_s27  ;;  %v7841_v44 = vstv %s7758_s10  ;;  %v7844_v45 = vstv %s7769_s15  ;;  %v7855_v52 = vstv %s7779_s29  ;;  %s7995_s24 = sld [smem:[#allocation8 + $0xe]] }
  0x4c   : > { %v478_v42 = vmul.f32 %v7832_v41, %v7795_v32  ;;  %v479_v43 = vmul.f32 %v7832_v41, %v7800_v33  ;;  %v488_v46 = vmul.f32 %v7841_v44, %v7765_v17  ;;  %v489_v47 = vmul.f32 %v7841_v44, %v7767_v18  ;;  %s8001_s9 = sld [smem:[#allocation8 + $0x4a]] }
  0x4d   : > { %v498_v48 = vmul.f32 %v7844_v45, %v7807_v34  ;;  %v499_v49 = vmul.f32 %v7844_v45, %v7812_v35  ;;  %v7857_v53 = vstv %s6498_s23  ;;  %v7862_v54 = vsel %vm372_vm0, 0.0, %v13752_v30  ;;  %s8009_s12 = sld [smem:[#allocation8 + $0x4e]] }
  0x4e   : > { %v482_v50 = vadd.f32 %v478_v42, %v472_v39  ;;  %v483_v51 = vadd.f32 %v479_v43, %v473_v40  ;;  %v7867_v55 = vsel %vm372_vm0, 0.0, %v13751_v31  ;;  %v508_v56 = vmul.f32 %v7855_v52, %v7772_v20  ;;  %v334_v39 = vld [vmem:[%s7726_s6 + $0x50] sm:$0xff]  ;;  %v335_v40 = vld [vmem:[%s7726_s6 + $0x58] sm:$0xff]  ;;  %s8015_s3 = sld [smem:[#allocation8 + $0x8a]] }
  0x4f   : > { %13825 = vst [vmem:[#allocation19_spill] sm:$0xff] %v7867_v55  ;;  %v509_v57 = vmul.f32 %v7855_v52, %v7774_v21  ;;  %v7877_v63 = vstv %s7788_s30  ;;  %v7880_v0 = vstv %s7802_s7  ;;  %v518_v6 = vmul.f32 %v7857_v53, %v7817_v36  ;;  %v338_v42 = vld [vmem:[%s7726_s6 + $0x70] sm:$0xff]  ;;  %s8026_s13 = sld [smem:[#allocation8 + $0x8e]] }
  0x50   : > { %v492_v61 = vadd.f32 %v488_v46, %v482_v50  ;;  %v493_v62 = vadd.f32 %v489_v47, %v483_v51  ;;  %v519_v7 = vmul.f32 %v7857_v53, %v7825_v38  ;;  %v528_v15 = vmul.f32 %v7877_v63, %v7776_v22  ;;  %v323_v50 = vld [vmem:[%s7719_s11 + $0x78] sm:$0xff]  ;;  %s8048_s8 = sld [smem:[#allocation8 + $0xca]] }
  0x51   : > { %v529_v19 = vmul.f32 %v7877_v63, %v7781_v24  ;;  %v538_v43 = vmul.f32 %v7880_v0, %v7862_v54  ;;  %v539_v46 = vmul.f32 %v7880_v0, %v7867_v55  ;;  %v7906_v47 = vstv %s7834_s26  ;;  %s8056_s11 = sld [smem:[#allocation8 + $0xce]] }
  0x52   : > { %v502_v13 = vadd.f32 %v498_v48, %v492_v61  ;;  %v503_v14 = vadd.f32 %v499_v49, %v493_v62  ;;  %v339_v48 = vld [vmem:[%s7726_s6 + $0x78] sm:$0xff]  ;;  %v7910_v49 = vadd.f32 %v326_v5, %v310_v58  ;;  %v7912_v62 = vadd.f32 %v327_v9, %v311_v59  ;;  %s8072_s4 = sld [smem:[#allocation9 + $0x1]] }
  0x53   : > { %v7914_v31 = vadd.f32 %v330_v10, %v314_v60  ;;  %v7916_v30 = vadd.f32 %v331_v11, %v315_v1  ;;  %v7918_v29 = vadd.f32 %v334_v39, %v318_v2  ;;  %v7920_v28 = vadd.f32 %v335_v40, %v319_v3  ;;  %s8112_s6 = sld [smem:[#allocation8 + $0x12]] }
  0x54   : > { %13826 = vst [vmem:[#allocation20_spill] sm:$0xff] %v7910_v49  ;;  %v512_v51 = vadd.f32 %v508_v56, %v502_v13  ;;  %v513_v61 = vadd.f32 %v509_v57, %v503_v14  ;;  %v7922_v27 = vadd.f32 %v338_v42, %v322_v4  ;;  %vm7924_vm4 = vcmp.lt.s32.totalorder %v1548_v8, 256  ;;  %s8118_s25 = sld [smem:[#allocation8 + $0x16]] }
  0x55   : > { %13827 = vst [vmem:[#allocation21_spill] sm:$0xff] %v7912_v62  ;;  %v7928_v57 = vadd.f32 %v339_v48, %v323_v50  ;;  %v375_v59 = vrot.slane %v7910_v49, 7  ;;  %v377_v60 = vrot.slane %v7912_v62, 7  ;;  %v381_v1 = vrot.slane %v7914_v31, 7  ;;  %s8124_s27 = sld [smem:[#allocation8 + $0x52]] }
  0x56   : > { %13828 = vst [vmem:[#allocation22_spill] sm:$0xff] %v7914_v31  ;;  %v522_v26 = vadd.f32 %v518_v6, %v512_v51  ;;  %v523_v58 = vadd.f32 %v519_v7, %v513_v61  ;;  %v383_v2 = vrot.slane %v7916_v30, 7  ;;  %v387_v3 = vrot.slane %v7918_v29, 7  ;;  %s8163_s10 = sld [smem:[#allocation8 + $0x56]] }
  0x57   : > { %13829 = vst [vmem:[#allocation23_spill] sm:$0xff] %v7916_v30  ;;  %v7938_v6 = vsel %vm372_vm0, %v373_v23, %v375_v59  ;;  %v389_v7 = vrot.slane %v7920_v28, 7  ;;  %v7944_v8 = vsel %vm372_vm0, %v374_v25, %v377_v60  ;;  %v13834_v9 = vrot.slane %v7765_v17, 7  ;;  %s8171_s15 = sld [smem:[#allocation8 + $0x92]] }
  0x58   : > { %v532_v4 = vadd.f32 %v528_v15, %v522_v26  ;;  %v533_v5 = vadd.f32 %v529_v19, %v523_v58  ;;  %13832 = vst [vmem:[#allocation24_spill] sm:$0xff] %v7938_v6  ;;  %v13835_v26 = vrot.slane %v7767_v18, 7  ;;  %v13836_v23 = vrot.slane %v7772_v20, 7  ;;  %s8187_s29 = sld [smem:[#allocation8 + $0x96]] }
  0x59   : > { %13833 = vst [vmem:[#allocation25_spill] sm:$0xff] %v7944_v8  ;;  %v7949_v10 = vsel %vm372_vm0, %v13834_v9, %v381_v1  ;;  %v13837_v25 = vrot.slane %v7774_v21, 7  ;;  %v393_v39 = vrot.slane %v7922_v27, 7  ;;  %v395_v40 = vrot.slane %v7928_v57, 7  ;;  %s8199_s23 = sld [smem:[#allocation8 + $0xd2]] }
  0x5a   : > { %v7954_v11 = vsel %vm372_vm0, %v13835_v26, %v383_v2  ;;  %v7959_v13 = vsel %vm372_vm0, %v13836_v23, %v387_v3  ;;  %v542_v14 = vadd.f32 %v538_v43, %v532_v4  ;;  %v543_v15 = vadd.f32 %v539_v46, %v533_v5  ;;  %s8205_s30 = sld [smem:[#allocation8 + $0xd6]] }
  0x5b   : > { %v7964_v19 = vsel %vm372_vm0, %v13837_v25, %v389_v7  ;;  %v474_v42 = vmul.f32 %v7820_v37, %v7910_v49  ;;  %v475_v50 = vmul.f32 %v7820_v37, %v7912_v62  ;;  %v480_v43 = vmul.f32 %v7832_v41, %v7938_v6  ;;  %s8214_s7 = sld [smem:[#allocation9 + $0x2]] }
  0x5c   : > { %v548_v46 = vadd.f32 %v7906_v47, %v542_v14  ;;  %v549_v48 = vadd.f32 %v7906_v47, %v543_v15  ;;  %v13838_v51 = vrot.slane %v7776_v22, 7  ;;  %v481_v58 = vmul.f32 %v7832_v41, %v7944_v8  ;;  %s8289_s26 = sld [smem:[#allocation8 + $0x1a]] }
  0x5d   : > { %v13839_v59 = vrot.slane %v7781_v24, 7  ;;  %v484_v60 = vadd.f32 %v480_v43, %v474_v42  ;;  %v490_v1 = vmul.f32 %v7841_v44, %v7914_v31  ;;  %v491_v2 = vmul.f32 %v7841_v44, %v7916_v30  ;;  %s8295_s5 = sld [smem:[#allocation8 + $0x1e]] }
  0x5e   : > { %v7980_v61 = vsel %vm372_vm0, %v13838_v51, %v393_v39  ;;  %v1158_v3 = vrot.slane %v549_v48, 7  ;;  %v485_v4 = vadd.f32 %v481_v58, %v475_v50  ;;  %v500_v41 = vmul.f32 %v7844_v45, %v7949_v10 }
  0x5f   : > { %v7989_v37 = vsel %vm372_vm0, %v13839_v59, %v395_v40  ;;  %v501_v5 = vmul.f32 %v7844_v45, %v7954_v11  ;;  %v494_v7 = vadd.f32 %v490_v1, %v484_v60  ;;  %v510_v9 = vmul.f32 %v7855_v52, %v7918_v29 }
  0x60   : > { %v511_v26 = vmul.f32 %v7855_v52, %v7920_v28  ;;  %v520_v44 = vmul.f32 %v7857_v53, %v7959_v13  ;;  %v1174_v23 = vsel %vm372_vm0, %v548_v46, %v1158_v3  ;;  %v1176_v14 = vsel %vm1175_vm1, %v548_v46, %v1158_v3 }
  0x61   : > { %v1179_v45 = vsel %vm1178_vm2, %v548_v46, %v1158_v3  ;;  %v1182_v15 = vsel %vm1181_vm3, %v548_v46, %v1158_v3  ;;  %1552 = vst.msk [vmem:[%s8017_s20] ss:$4 sm:$0x3] %vm7924_vm4, %v1174_v23  ;;  %v1177_v52 = vrot.slane %v1176_v14, 1  ;;  %v1185_v40 = vsel %vm1184_vm5, %v548_v46, %v1158_v3 }
  0x62   : > { %v1180_v25 = vrot.slane %v1179_v45, 2  ;;  %v1183_v39 = vrot.slane %v1182_v15, 3  ;;  %v1186_v42 = vrot.slane %v1185_v40, 4  ;;  %v1188_v50 = vsel %vm1187_vm6, %v548_v46, %v1158_v3 }
  0x63   : > { %v1191_v43 = vsel %vm1190_vm7, %v548_v46, %v1158_v3  ;;  %v1193_v48 = vsel %vm421_vm8, %v1158_v3, %v548_v46  ;;  %6564 = vst.msk [vmem:[%s8017_s20 + $0x8] ss:$4 sm:$0x3] %vm7924_vm4, %v1177_v52  ;;  %v1189_v51 = vrot.slane %v1188_v50, 5  ;;  %v495_v60 = vadd.f32 %v491_v2, %v485_v4 }
  0x64   : > { %v1192_v58 = vrot.slane %v1191_v43, 6  ;;  %v1194_v59 = vrot.slane %v1193_v48, 7  ;;  %6565 = vst.msk [vmem:[%s8017_s20 + $0x10] ss:$4 sm:$0x3] %vm7924_vm4, %v1180_v25  ;;  %v504_v1 = vadd.f32 %v500_v41, %v494_v7  ;;  %v521_v46 = vmul.f32 %v7857_v53, %v7964_v19 }
  0x65   : > { %v530_v3 = vmul.f32 %v7877_v63, %v7922_v27  ;;  %v531_v23 = vmul.f32 %v7877_v63, %v7928_v57  ;;  %6566 = vst.msk [vmem:[%s8017_s20 + $0x18] ss:$4 sm:$0x3] %vm7924_vm4, %v1183_v39  ;;  %v505_v2 = vadd.f32 %v501_v5, %v495_v60  ;;  %v540_v4 = vmul.f32 %v7880_v0, %v7980_v61 }
  0x66   : > { %v541_v41 = vmul.f32 %v7880_v0, %v7989_v37  ;;  %v553_v7 = vstv %s7984_s2  ;;  %6567 = vst.msk [vmem:[%s8017_s20 + $0x20] ss:$4 sm:$0x3] %vm7924_vm4, %v1186_v42  ;;  %v514_v53 = vadd.f32 %v510_v9, %v504_v1  ;;  %v559_v14 = vstv %s7995_s24  ;;  %s8304_s2 = sld [smem:[#allocation8 + $0x5a]] }
  0x67   : > { %v554_v63 = vmul.f32 %v553_v7, %v7756_v12  ;;  %v555_v5 = vmul.f32 %v553_v7, %v7763_v16  ;;  %6568 = vst.msk [vmem:[%s8017_s20 + $0x28] ss:$4 sm:$0x3] %vm7924_vm4, %v1189_v51  ;;  %v515_v0 = vadd.f32 %v511_v26, %v505_v2  ;;  %v560_v45 = vmul.f32 %v559_v14, %v7795_v32  ;;  %s8344_s24 = sld [smem:[#allocation8 + $0x5e]] }
  0x68   : > { %v561_v15 = vmul.f32 %v559_v14, %v7800_v33  ;;  %v569_v52 = vstv %s8001_s9  ;;  %6569 = vst.msk [vmem:[%s8017_s20 + $0x30] ss:$4 sm:$0x3] %vm7924_vm4, %v1192_v58  ;;  %v524_v9 = vadd.f32 %v520_v44, %v514_v53  ;;  %v8070_v40 = vstv %s8009_s12  ;;  %s8359_s9 = sld [smem:[#allocation8 + $0x9a]] }
  0x69   : > { %v570_v25 = vmul.f32 %v569_v52, %v7765_v17  ;;  %v571_v39 = vmul.f32 %v569_v52, %v7767_v18  ;;  %6570 = vst.msk [vmem:[%s8017_s20 + $0x38] ss:$4 sm:$0x3] %vm7924_vm4, %v1194_v59  ;;  %v525_v26 = vadd.f32 %v521_v46, %v515_v0  ;;  %v564_v42 = vadd.f32 %v560_v45, %v554_v63  ;;  %s8363_s12 = sld [smem:[#allocation8 + $0x9e]] }
  0x6a   : > { %v565_v50 = vadd.f32 %v561_v15, %v555_v5  ;;  %v580_v43 = vmul.f32 %v8070_v40, %v7807_v34  ;;  %v534_v48 = vadd.f32 %v530_v3, %v524_v9  ;;  %v581_v44 = vmul.f32 %v8070_v40, %v7812_v35 }
  0x6b   : > { %v8082_v51 = vstv %s8015_s3  ;;  %v8085_v58 = vstv %s8026_s13  ;;  %v535_v60 = vadd.f32 %v531_v23, %v525_v26  ;;  %v574_v1 = vadd.f32 %v570_v25, %v564_v42  ;;  %s8374_s3 = sld [smem:[#allocation8 + $0xda]] }
  0x6c   : > { %v575_v2 = vadd.f32 %v571_v39, %v565_v50  ;;  %v590_v59 = vmul.f32 %v8082_v51, %v7772_v20  ;;  %v544_v46 = vadd.f32 %v540_v4, %v534_v48  ;;  %v591_v53 = vmul.f32 %v8082_v51, %v7774_v21  ;;  %s8380_s13 = sld [smem:[#allocation8 + $0xde]] }
  0x6d   : > { %v600_v3 = vmul.f32 %v8085_v58, %v7817_v36  ;;  %v601_v63 = vmul.f32 %v8085_v58, %v7825_v38  ;;  %v545_v5 = vadd.f32 %v541_v41, %v535_v60  ;;  %v584_v0 = vadd.f32 %v580_v43, %v574_v1 }
  0x6e   : > { %v585_v45 = vadd.f32 %v581_v44, %v575_v2  ;;  %v609_v23 = vstv %s8048_s8  ;;  %v550_v15 = vadd.f32 %v7906_v47, %v544_v46  ;;  %v8099_v25 = vstv %s8056_s11  ;;  %s8389_s8 = sld [smem:[#allocation9 + $0x3]] }
  0x6f   : > { %v610_v9 = vmul.f32 %v609_v23, %v7776_v22  ;;  %v551_v4 = vadd.f32 %v7906_v47, %v545_v5  ;;  %v594_v39 = vadd.f32 %v590_v59, %v584_v0  ;;  %v611_v42 = vmul.f32 %v609_v23, %v7781_v24  ;;  %s8454_s11 = sld [smem:[#allocation8 + $0x22]] }
  0x70   : > { %v595_v26 = vadd.f32 %v591_v53, %v585_v45  ;;  %v620_v50 = vmul.f32 %v8099_v25, %v7862_v54  ;;  %v621_v41 = vmul.f32 %v8099_v25, %v7867_v55  ;;  %v8108_v43 = vstv %s8072_s4  ;;  %s8462_s4 = sld [smem:[#allocation8 + $0x26]] }
  0x71   : > { %v556_v48 = vmul.f32 %v553_v7, %v7910_v49  ;;  %v1159_v44 = vrot.slane %v551_v4, 7  ;;  %v604_v60 = vadd.f32 %v600_v3, %v594_v39  ;;  %v557_v47 = vmul.f32 %v553_v7, %v7912_v62 }
  0x72   : > { %v605_v1 = vadd.f32 %v601_v63, %v595_v26  ;;  %v562_v2 = vmul.f32 %v559_v14, %v7938_v6  ;;  %v563_v59 = vmul.f32 %v559_v14, %v7944_v8  ;;  %v572_v46 = vmul.f32 %v569_v52, %v7914_v31 }
  0x73   : > { %v573_v53 = vmul.f32 %v569_v52, %v7916_v30  ;;  %v1195_v5 = vsel %vm372_vm0, %v550_v15, %v1159_v44  ;;  %v1196_v3 = vsel %vm1175_vm1, %v550_v15, %v1159_v44  ;;  %v1198_v63 = vsel %vm1178_vm2, %v550_v15, %v1159_v44 }
  0x74   : > { %v1200_v7 = vsel %vm1181_vm3, %v550_v15, %v1159_v44  ;;  %6571 = vst.msk [vmem:[%s8017_s20 + $0x40] ss:$4 sm:$0x3] %vm7924_vm4, %v1195_v5  ;;  %v1197_v14 = vrot.slane %v1196_v3, 1  ;;  %v1199_v0 = vrot.slane %v1198_v63, 2  ;;  %v1202_v45 = vsel %vm1184_vm5, %v550_v15, %v1159_v44 }
  0x75   : > { %v1201_v52 = vrot.slane %v1200_v7, 3  ;;  %v1203_v4 = vrot.slane %v1202_v45, 4  ;;  %v1204_v39 = vsel %vm1187_vm6, %v550_v15, %v1159_v44  ;;  %v1206_v26 = vsel %vm1190_vm7, %v550_v15, %v1159_v44 }
  0x76   : > { %v1208_v30 = vsel %vm421_vm8, %v1159_v44, %v550_v15  ;;  %6572 = vst.msk [vmem:[%s8017_s20 + $0x48] ss:$4 sm:$0x3] %vm7924_vm4, %v1197_v14  ;;  %v1205_v31 = vrot.slane %v1204_v39, 5  ;;  %v1207_v8 = vrot.slane %v1206_v26, 6  ;;  %v614_v5 = vadd.f32 %v610_v9, %v604_v60 }
  0x77   : > { %v582_v3 = vmul.f32 %v8070_v40, %v7949_v10  ;;  %6573 = vst.msk [vmem:[%s8017_s20 + $0x50] ss:$4 sm:$0x3] %vm7924_vm4, %v1199_v0  ;;  %v615_v63 = vadd.f32 %v611_v42, %v605_v1  ;;  %v566_v7 = vadd.f32 %v562_v2, %v556_v48  ;;  %v567_v45 = vadd.f32 %v563_v59, %v557_v47 }
  0x78   : > { %v583_v15 = vmul.f32 %v8070_v40, %v7954_v11  ;;  %6574 = vst.msk [vmem:[%s8017_s20 + $0x58] ss:$4 sm:$0x3] %vm7924_vm4, %v1201_v52  ;;  %v1209_v44 = vrot.slane %v1208_v30, 7  ;;  %v624_v14 = vadd.f32 %v620_v50, %v614_v5  ;;  %v592_v9 = vmul.f32 %v8082_v51, %v7918_v29 }
  0x79   : > { %v593_v60 = vmul.f32 %v8082_v51, %v7920_v28  ;;  %6575 = vst.msk [vmem:[%s8017_s20 + $0x60] ss:$4 sm:$0x3] %vm7924_vm4, %v1203_v4  ;;  %v625_v42 = vadd.f32 %v621_v41, %v615_v63  ;;  %v576_v48 = vadd.f32 %v572_v46, %v566_v7  ;;  %v577_v1 = vadd.f32 %v573_v53, %v567_v45 }
  0x7a   : > { %v602_v40 = vmul.f32 %v8085_v58, %v7959_v13  ;;  %6576 = vst.msk [vmem:[%s8017_s20 + $0x68] ss:$4 sm:$0x3] %vm7924_vm4, %v1205_v31  ;;  %v630_v30 = vadd.f32 %v8108_v43, %v624_v14  ;;  %v603_v51 = vmul.f32 %v8085_v58, %v7964_v19  ;;  %v612_v50 = vmul.f32 %v609_v23, %v7922_v27 }
  0x7b   : > { %v613_v41 = vmul.f32 %v609_v23, %v7928_v57  ;;  %6577 = vst.msk [vmem:[%s8017_s20 + $0x70] ss:$4 sm:$0x3] %vm7924_vm4, %v1207_v8  ;;  %v631_v47 = vadd.f32 %v8108_v43, %v625_v42  ;;  %v586_v2 = vadd.f32 %v582_v3, %v576_v48  ;;  %v587_v59 = vadd.f32 %v583_v15, %v577_v1 }
  0x7c   : > { %v622_v31 = vmul.f32 %v8099_v25, %v7980_v61  ;;  %6578 = vst.msk [vmem:[%s8017_s20 + $0x78] ss:$4 sm:$0x3] %vm7924_vm4, %v1209_v44  ;;  %v623_v58 = vmul.f32 %v8099_v25, %v7989_v37  ;;  %v8179_v23 = vstv %s8112_s6  ;;  %v8182_v46 = vstv %s8118_s25  ;;  %s8468_s6 = sld [smem:[#allocation8 + $0x62]] }
  0x7d   : > { %v8185_v8 = vstv %s8124_s27  ;;  %v1160_v53 = vrot.slane %v631_v47, 7  ;;  %v596_v0 = vadd.f32 %v592_v9, %v586_v2  ;;  %v597_v52 = vadd.f32 %v593_v60, %v587_v59  ;;  %s8477_s25 = sld [smem:[#allocation8 + $0x66]] }
  0x7e   : > { %v636_v4 = vmul.f32 %v8179_v23, %v7756_v12  ;;  %v637_v39 = vmul.f32 %v8179_v23, %v7763_v16  ;;  %v642_v25 = vmul.f32 %v8182_v46, %v7795_v32  ;;  %v643_v26 = vmul.f32 %v8182_v46, %v7800_v33  ;;  %s8527_s27 = sld [smem:[#allocation8 + $0xa2]] }
  0x7f   : > { %v652_v5 = vmul.f32 %v8185_v8, %v7765_v17  ;;  %v1210_v3 = vsel %vm372_vm0, %v630_v30, %v1160_v53  ;;  %v1211_v63 = vsel %vm1175_vm1, %v630_v30, %v1160_v53  ;;  %v1213_v7 = vsel %vm1178_vm2, %v630_v30, %v1160_v53 }
  0x80   : > { %v1215_v45 = vsel %vm1181_vm3, %v630_v30, %v1160_v53  ;;  %6579 = vst.msk [vmem:[%s8017_s20 + $0x80] ss:$4 sm:$0x3] %vm7924_vm4, %v1210_v3  ;;  %v1212_v15 = vrot.slane %v1211_v63, 1  ;;  %v1214_v44 = vrot.slane %v1213_v7, 2  ;;  %v1217_v9 = vsel %vm1184_vm5, %v630_v30, %v1160_v53 }
  0x81   : > { %v1216_v14 = vrot.slane %v1215_v45, 3  ;;  %v1218_v60 = vrot.slane %v1217_v9, 4  ;;  %v1219_v42 = vsel %vm1187_vm6, %v630_v30, %v1160_v53  ;;  %v1221_v48 = vsel %vm1190_vm7, %v630_v30, %v1160_v53 }
  0x82   : > { %v1223_v1 = vsel %vm421_vm8, %v1160_v53, %v630_v30  ;;  %6580 = vst.msk [vmem:[%s8017_s20 + $0x88] ss:$4 sm:$0x3] %vm7924_vm4, %v1212_v15  ;;  %v1220_v47 = vrot.slane %v1219_v42, 5  ;;  %v1222_v2 = vrot.slane %v1221_v48, 6  ;;  %v606_v3 = vadd.f32 %v602_v40, %v596_v0 }
  0x83   : > { %v1224_v59 = vrot.slane %v1223_v1, 7  ;;  %6581 = vst.msk [vmem:[%s8017_s20 + $0x90] ss:$4 sm:$0x3] %vm7924_vm4, %v1214_v44  ;;  %v607_v63 = vadd.f32 %v603_v51, %v597_v52  ;;  %v646_v7 = vadd.f32 %v642_v25, %v636_v4  ;;  %v647_v45 = vadd.f32 %v643_v26, %v637_v39 }
  0x84   : > { %v653_v30 = vmul.f32 %v8185_v8, %v7767_v18  ;;  %6582 = vst.msk [vmem:[%s8017_s20 + $0x98] ss:$4 sm:$0x3] %vm7924_vm4, %v1216_v14  ;;  %v616_v53 = vadd.f32 %v612_v50, %v606_v3  ;;  %v8228_v15 = vstv %s8163_s10  ;;  %v8231_v9 = vstv %s8171_s15  ;;  %s8533_s10 = sld [smem:[#allocation8 + $0xa6]] }
  0x85   : > { %v8234_v40 = vstv %s8187_s29  ;;  %6583 = vst.msk [vmem:[%s8017_s20 + $0xa0] ss:$4 sm:$0x3] %vm7924_vm4, %v1218_v60  ;;  %v617_v51 = vadd.f32 %v613_v41, %v607_v63  ;;  %v656_v0 = vadd.f32 %v652_v5, %v646_v7  ;;  %v662_v4 = vmul.f32 %v8228_v15, %v7807_v34  ;;  %s8544_s15 = sld [smem:[#allocation8 + $0xe2]] }
  0x86   : > { %v657_v52 = vadd.f32 %v653_v30, %v647_v45  ;;  %6584 = vst.msk [vmem:[%s8017_s20 + $0xa8] ss:$4 sm:$0x3] %vm7924_vm4, %v1220_v47  ;;  %v626_v50 = vadd.f32 %v622_v31, %v616_v53  ;;  %v663_v39 = vmul.f32 %v8228_v15, %v7812_v35  ;;  %v672_v25 = vmul.f32 %v8231_v9, %v7772_v20  ;;  %s8550_s29 = sld [smem:[#allocation8 + $0xe6]] }
  0x87   : > { %v673_v41 = vmul.f32 %v8231_v9, %v7774_v21  ;;  %6585 = vst.msk [vmem:[%s8017_s20 + $0xb0] ss:$4 sm:$0x3] %vm7924_vm4, %v1222_v2  ;;  %v627_v26 = vadd.f32 %v623_v58, %v617_v51  ;;  %v666_v5 = vadd.f32 %v662_v4, %v656_v0  ;;  %v682_v44 = vmul.f32 %v8234_v40, %v7817_v36 }
  0x88   : > { %v683_v31 = vmul.f32 %v8234_v40, %v7825_v38  ;;  %6586 = vst.msk [vmem:[%s8017_s20 + $0xb8] ss:$4 sm:$0x3] %vm7924_vm4, %v1224_v59  ;;  %v632_v14 = vadd.f32 %v8108_v43, %v626_v50  ;;  %v667_v60 = vadd.f32 %v663_v39, %v657_v52  ;;  %v8262_v42 = vstv %s8199_s23  ;;  %v13840_v52 = vld [vmem:[#allocation25_spill] sm:$0xff]  ;;  %v13841_v50 = vld [vmem:[#allocation22_spill] sm:$0xff]  ;;  %s8559_s23 = sld [smem:[#allocation9 + $0x4]] }
  0x89   : > { %v8265_v48 = vstv %s8205_s30  ;;  %v633_v58 = vadd.f32 %v8108_v43, %v627_v26  ;;  %v676_v1 = vadd.f32 %v672_v25, %v666_v5  ;;  %v692_v47 = vmul.f32 %v8262_v42, %v7776_v22  ;;  %s8629_s30 = sld [smem:[#allocation8 + $0x2a]] }
  0x8a   : > { %v693_v2 = vmul.f32 %v8262_v42, %v7781_v24  ;;  %v677_v3 = vadd.f32 %v673_v41, %v667_v60  ;;  %v702_v59 = vmul.f32 %v8265_v48, %v7862_v54  ;;  %v703_v63 = vmul.f32 %v8265_v48, %v7867_v55 }
  0x8b   : > { %v8277_v7 = vstv %s8214_s7  ;;  %v1161_v45 = vrot.slane %v633_v58, 7  ;;  %v686_v30 = vadd.f32 %v682_v44, %v676_v1  ;;  %v638_v43 = vmul.f32 %v8179_v23, %v7910_v49  ;;  %s8639_s7 = sld [smem:[#allocation8 + $0x2e]] }
  0x8c   : > { %v639_v53 = vmul.f32 %v8179_v23, %v7912_v62  ;;  %v687_v51 = vadd.f32 %v683_v31, %v677_v3  ;;  %v644_v0 = vmul.f32 %v8182_v46, %v7938_v6  ;;  %v645_v4 = vmul.f32 %v8182_v46, %v13840_v52  ;;  %v13842_v6 = vld [vmem:[#allocation23_spill] sm:$0xff] }
  0x8d   : > { %v654_v39 = vmul.f32 %v8185_v8, %v13841_v50  ;;  %v1225_v25 = vsel %vm372_vm0, %v632_v14, %v1161_v45  ;;  %v1226_v41 = vsel %vm1175_vm1, %v632_v14, %v1161_v45  ;;  %v1228_v26 = vsel %vm1178_vm2, %v632_v14, %v1161_v45 }
  0x8e   : > { %v1230_v23 = vsel %vm1181_vm3, %v632_v14, %v1161_v45  ;;  %6587 = vst.msk [vmem:[%s8017_s20 + $0xc0] ss:$4 sm:$0x3] %vm7924_vm4, %v1225_v25  ;;  %v1227_v46 = vrot.slane %v1226_v41, 1  ;;  %v1229_v5 = vrot.slane %v1228_v26, 2  ;;  %v1232_v31 = vsel %vm1184_vm5, %v632_v14, %v1161_v45 }
  0x8f   : > { %v1231_v44 = vrot.slane %v1230_v23, 3  ;;  %v1233_v60 = vrot.slane %v1232_v31, 4  ;;  %v1234_v58 = vsel %vm1187_vm6, %v632_v14, %v1161_v45  ;;  %v1236_v1 = vsel %vm1190_vm7, %v632_v14, %v1161_v45 }
  0x90   : > { %v1238_v3 = vsel %vm421_vm8, %v1161_v45, %v632_v14  ;;  %6588 = vst.msk [vmem:[%s8017_s20 + $0xc8] ss:$4 sm:$0x3] %vm7924_vm4, %v1227_v46  ;;  %v1235_v25 = vrot.slane %v1234_v58, 5  ;;  %v1237_v41 = vrot.slane %v1236_v1, 6  ;;  %v696_v23 = vadd.f32 %v692_v47, %v686_v30 }
  0x91   : > { %v1239_v26 = vrot.slane %v1238_v3, 7  ;;  %6589 = vst.msk [vmem:[%s8017_s20 + $0xd0] ss:$4 sm:$0x3] %vm7924_vm4, %v1229_v5  ;;  %v697_v31 = vadd.f32 %v693_v2, %v687_v51  ;;  %v648_v50 = vadd.f32 %v644_v0, %v638_v43  ;;  %v649_v52 = vadd.f32 %v645_v4, %v639_v53 }
  0x92   : > { %v655_v14 = vmul.f32 %v8185_v8, %v13842_v6  ;;  %6590 = vst.msk [vmem:[%s8017_s20 + $0xd8] ss:$4 sm:$0x3] %vm7924_vm4, %v1231_v44  ;;  %v706_v45 = vadd.f32 %v702_v59, %v696_v23  ;;  %v664_v46 = vmul.f32 %v8228_v15, %v7949_v10  ;;  %v665_v47 = vmul.f32 %v8228_v15, %v7954_v11 }
  0x93   : > { %v674_v30 = vmul.f32 %v8231_v9, %v7918_v29  ;;  %6591 = vst.msk [vmem:[%s8017_s20 + $0xe0] ss:$4 sm:$0x3] %vm7924_vm4, %v1233_v60  ;;  %v707_v2 = vadd.f32 %v703_v63, %v697_v31  ;;  %v658_v8 = vadd.f32 %v654_v39, %v648_v50  ;;  %v675_v59 = vmul.f32 %v8231_v9, %v7920_v28 }
  0x94   : > { %v659_v43 = vadd.f32 %v655_v14, %v649_v52  ;;  %6592 = vst.msk [vmem:[%s8017_s20 + $0xe8] ss:$4 sm:$0x3] %vm7924_vm4, %v1235_v25  ;;  %v712_v15 = vadd.f32 %v8277_v7, %v706_v45  ;;  %v684_v53 = vmul.f32 %v8234_v40, %v7959_v13  ;;  %v685_v51 = vmul.f32 %v8234_v40, %v7964_v19 }
  0x95   : > { %v694_v63 = vmul.f32 %v8262_v42, %v7922_v27  ;;  %6593 = vst.msk [vmem:[%s8017_s20 + $0xf0] ss:$4 sm:$0x3] %vm7924_vm4, %v1237_v41  ;;  %v713_v9 = vadd.f32 %v8277_v7, %v707_v2  ;;  %v668_v0 = vadd.f32 %v664_v46, %v658_v8  ;;  %v695_v4 = vmul.f32 %v8262_v42, %v7928_v57 }
  0x96   : > { %v669_v52 = vadd.f32 %v665_v47, %v659_v43  ;;  %6594 = vst.msk [vmem:[%s8017_s20 + $0xf8] ss:$4 sm:$0x3] %vm7924_vm4, %v1239_v26  ;;  %v704_v40 = vmul.f32 %v8265_v48, %v7980_v61  ;;  %v705_v50 = vmul.f32 %v8265_v48, %v7989_v37  ;;  %v8354_v39 = vstv %s8289_s26  ;;  %s8645_s26 = sld [smem:[#allocation8 + $0x6a]] }
  0x97   : > { %v8357_v5 = vstv %s8295_s5  ;;  %v1162_v42 = vrot.slane %v713_v9, 7  ;;  %v678_v44 = vadd.f32 %v674_v30, %v668_v0  ;;  %v718_v58 = vmul.f32 %v8354_v39, %v7756_v12  ;;  %s8654_s5 = sld [smem:[#allocation8 + $0x6e]] }
  0x98   : > { %v679_v60 = vadd.f32 %v675_v59, %v669_v52  ;;  %v719_v1 = vmul.f32 %v8354_v39, %v7763_v16  ;;  %v724_v48 = vmul.f32 %v8357_v5, %v7795_v32  ;;  %v725_v3 = vmul.f32 %v8357_v5, %v7800_v33 }
  0x99   : > { %v8372_v25 = vstv %s8304_s2  ;;  %v1240_v41 = vsel %vm372_vm0, %v712_v15, %v1162_v42  ;;  %v1241_v26 = vsel %vm1175_vm1, %v712_v15, %v1162_v42  ;;  %v1243_v23 = vsel %vm1178_vm2, %v712_v15, %v1162_v42  ;;  %s8703_s2 = sld [smem:[#allocation8 + $0xaa]] }
  0x9a   : > { %v1245_v31 = vsel %vm1181_vm3, %v712_v15, %v1162_v42  ;;  %6595 = vst.msk [vmem:[%s8017_s20 + $0x100] ss:$4 sm:$0x3] %vm7924_vm4, %v1240_v41  ;;  %v1242_v14 = vrot.slane %v1241_v26, 1  ;;  %v1244_v45 = vrot.slane %v1243_v23, 2  ;;  %v1247_v47 = vsel %vm1184_vm5, %v712_v15, %v1162_v42 }
  0x9b   : > { %v1246_v46 = vrot.slane %v1245_v31, 3  ;;  %v1248_v30 = vrot.slane %v1247_v47, 4  ;;  %v1249_v2 = vsel %vm1187_vm6, %v712_v15, %v1162_v42  ;;  %v1251_v8 = vsel %vm1190_vm7, %v712_v15, %v1162_v42 }
  0x9c   : > { %v1253_v43 = vsel %vm421_vm8, %v1162_v42, %v712_v15  ;;  %6596 = vst.msk [vmem:[%s8017_s20 + $0x108] ss:$4 sm:$0x3] %vm7924_vm4, %v1242_v14  ;;  %v1250_v59 = vrot.slane %v1249_v2, 5  ;;  %v1252_v9 = vrot.slane %v1251_v8, 6  ;;  %v688_v52 = vadd.f32 %v684_v53, %v678_v44 }
  0x9d   : > { %v1254_v0 = vrot.slane %v1253_v43, 7  ;;  %6597 = vst.msk [vmem:[%s8017_s20 + $0x110] ss:$4 sm:$0x3] %vm7924_vm4, %v1244_v45  ;;  %v689_v41 = vadd.f32 %v685_v51, %v679_v60  ;;  %v728_v26 = vadd.f32 %v724_v48, %v718_v58  ;;  %v729_v23 = vadd.f32 %v725_v3, %v719_v1 }
  0x9e   : > { %v734_v15 = vmul.f32 %v8372_v25, %v7765_v17  ;;  %6598 = vst.msk [vmem:[%s8017_s20 + $0x118] ss:$4 sm:$0x3] %vm7924_vm4, %v1246_v46  ;;  %v698_v42 = vadd.f32 %v694_v63, %v688_v52  ;;  %v735_v31 = vmul.f32 %v8372_v25, %v7767_v18  ;;  %v8405_v53 = vstv %s8344_s24  ;;  %s8708_s24 = sld [smem:[#allocation8 + $0xae]] }
  0x9f   : > { %v8408_v44 = vstv %s8359_s9  ;;  %6599 = vst.msk [vmem:[%s8017_s20 + $0x120] ss:$4 sm:$0x3] %vm7924_vm4, %v1248_v30  ;;  %v699_v51 = vadd.f32 %v695_v4, %v689_v41  ;;  %v744_v58 = vmul.f32 %v8405_v53, %v7807_v34  ;;  %v745_v63 = vmul.f32 %v8405_v53, %v7812_v35  ;;  %s8721_s9 = sld [smem:[#allocation8 + $0xea]] }
  0xa0   : > { %v738_v60 = vadd.f32 %v734_v15, %v728_v26  ;;  %6600 = vst.msk [vmem:[%s8017_s20 + $0x128] ss:$4 sm:$0x3] %vm7924_vm4, %v1250_v59  ;;  %v708_v1 = vadd.f32 %v704_v40, %v698_v42  ;;  %v739_v48 = vadd.f32 %v735_v31, %v729_v23  ;;  %v754_v3 = vmul.f32 %v8408_v44, %v7772_v20 }
  0xa1   : > { %v755_v14 = vmul.f32 %v8408_v44, %v7774_v21  ;;  %6601 = vst.msk [vmem:[%s8017_s20 + $0x130] ss:$4 sm:$0x3] %vm7924_vm4, %v1252_v9  ;;  %v709_v4 = vadd.f32 %v705_v50, %v699_v51  ;;  %v8428_v46 = vstv %s8363_s12  ;;  %v8431_v47 = vstv %s8374_s3  ;;  %s8733_s12 = sld [smem:[#allocation8 + $0xee]] }
  0xa2   : > { %v748_v45 = vadd.f32 %v744_v58, %v738_v60  ;;  %6602 = vst.msk [vmem:[%s8017_s20 + $0x138] ss:$4 sm:$0x3] %vm7924_vm4, %v1254_v0  ;;  %v714_v40 = vadd.f32 %v8277_v7, %v708_v1  ;;  %v749_v30 = vadd.f32 %v745_v63, %v739_v48  ;;  %v764_v2 = vmul.f32 %v8428_v46, %v7817_v36  ;;  %v13843_v60 = vld [vmem:[#allocation24_spill] sm:$0xff]  ;;  %v13844_v63 = vld [vmem:[#allocation25_spill] sm:$0xff]  ;;  %s8739_s3 = sld [smem:[#allocation9 + $0x5]] }
  0xa3   : > { %v765_v8 = vmul.f32 %v8428_v46, %v7825_v38  ;;  %v715_v43 = vadd.f32 %v8277_v7, %v709_v4  ;;  %v774_v59 = vmul.f32 %v8431_v47, %v7776_v22  ;;  %v775_v9 = vmul.f32 %v8431_v47, %v7781_v24 }
  0xa4   : > { %v758_v50 = vadd.f32 %v754_v3, %v748_v45  ;;  %v759_v52 = vadd.f32 %v755_v14, %v749_v30  ;;  %v783_v0 = vstv %s8380_s13  ;;  %v8448_v41 = vstv %s8389_s8  ;;  %s8812_s13 = sld [smem:[#allocation8 + $0x32]] }
  0xa5   : > { %v720_v26 = vmul.f32 %v8354_v39, %v7910_v49  ;;  %v1163_v23 = vrot.slane %v715_v43, 7  ;;  %v784_v42 = vmul.f32 %v783_v0, %v7862_v54  ;;  %v785_v7 = vmul.f32 %v783_v0, %v7867_v55  ;;  %s8821_s8 = sld [smem:[#allocation8 + $0x36]] }
  0xa6   : > { %v768_v15 = vadd.f32 %v764_v2, %v758_v50  ;;  %v769_v31 = vadd.f32 %v765_v8, %v759_v52  ;;  %v721_v51 = vmul.f32 %v8354_v39, %v7912_v62  ;;  %v726_v58 = vmul.f32 %v8357_v5, %v13843_v60  ;;  %v13845_v60 = vld [vmem:[#allocation22_spill] sm:$0xff] }
  0xa7   : > { %v727_v1 = vmul.f32 %v8357_v5, %v13844_v63  ;;  %v1255_v48 = vsel %vm372_vm0, %v714_v40, %v1163_v23  ;;  %v1256_v3 = vsel %vm1175_vm1, %v714_v40, %v1163_v23  ;;  %v1258_v14 = vsel %vm1178_vm2, %v714_v40, %v1163_v23 }
  0xa8   : > { %v1260_v4 = vsel %vm1181_vm3, %v714_v40, %v1163_v23  ;;  %6603 = vst.msk [vmem:[%s8017_s20 + $0x140] ss:$4 sm:$0x3] %vm7924_vm4, %v1255_v48  ;;  %v1257_v39 = vrot.slane %v1256_v3, 1  ;;  %v1259_v45 = vrot.slane %v1258_v14, 2  ;;  %v1262_v30 = vsel %vm1184_vm5, %v714_v40, %v1163_v23 }
  0xa9   : > { %v1261_v5 = vrot.slane %v1260_v4, 3  ;;  %v1263_v2 = vrot.slane %v1262_v30, 4  ;;  %v1264_v8 = vsel %vm1187_vm6, %v714_v40, %v1163_v23  ;;  %v1266_v43 = vsel %vm1190_vm7, %v714_v40, %v1163_v23 }
  0xaa   : > { %v1268_v50 = vsel %vm421_vm8, %v1163_v23, %v714_v40  ;;  %6604 = vst.msk [vmem:[%s8017_s20 + $0x148] ss:$4 sm:$0x3] %vm7924_vm4, %v1257_v39  ;;  %v1265_v52 = vrot.slane %v1264_v8, 5  ;;  %v1267_v48 = vrot.slane %v1266_v43, 6  ;;  %v778_v14 = vadd.f32 %v774_v59, %v768_v15 }
  0xab   : > { %v1269_v3 = vrot.slane %v1268_v50, 7  ;;  %6605 = vst.msk [vmem:[%s8017_s20 + $0x150] ss:$4 sm:$0x3] %vm7924_vm4, %v1259_v45  ;;  %v779_v4 = vadd.f32 %v775_v9, %v769_v31  ;;  %v730_v30 = vadd.f32 %v726_v58, %v720_v26  ;;  %v731_v63 = vadd.f32 %v727_v1, %v721_v51 }
  0xac   : > { %v736_v40 = vmul.f32 %v8372_v25, %v13845_v60  ;;  %6606 = vst.msk [vmem:[%s8017_s20 + $0x158] ss:$4 sm:$0x3] %vm7924_vm4, %v1261_v5  ;;  %v788_v23 = vadd.f32 %v784_v42, %v778_v14  ;;  %v737_v39 = vmul.f32 %v8372_v25, %v13842_v6  ;;  %v746_v59 = vmul.f32 %v8405_v53, %v7949_v10 }
  0xad   : > { %v747_v15 = vmul.f32 %v8405_v53, %v7954_v11  ;;  %6607 = vst.msk [vmem:[%s8017_s20 + $0x160] ss:$4 sm:$0x3] %vm7924_vm4, %v1263_v2  ;;  %v789_v9 = vadd.f32 %v785_v7, %v779_v4  ;;  %v756_v31 = vmul.f32 %v8408_v44, %v7918_v29  ;;  %v757_v42 = vmul.f32 %v8408_v44, %v7920_v28 }
  0xae   : > { %v740_v26 = vadd.f32 %v736_v40, %v730_v30  ;;  %6608 = vst.msk [vmem:[%s8017_s20 + $0x168] ss:$4 sm:$0x3] %vm7924_vm4, %v1265_v52  ;;  %v794_v25 = vadd.f32 %v8448_v41, %v788_v23  ;;  %v741_v51 = vadd.f32 %v737_v39, %v731_v63  ;;  %v766_v53 = vmul.f32 %v8428_v46, %v7959_v13 }
  0xaf   : > { %v767_v7 = vmul.f32 %v8428_v46, %v7964_v19  ;;  %6609 = vst.msk [vmem:[%s8017_s20 + $0x170] ss:$4 sm:$0x3] %vm7924_vm4, %v1267_v48  ;;  %v795_v58 = vadd.f32 %v8448_v41, %v789_v9  ;;  %v776_v44 = vmul.f32 %v8431_v47, %v7922_v27  ;;  %v777_v63 = vmul.f32 %v8431_v47, %v7928_v57 }
  0xb0   : > { %v750_v1 = vadd.f32 %v746_v59, %v740_v26  ;;  %6610 = vst.msk [vmem:[%s8017_s20 + $0x178] ss:$4 sm:$0x3] %vm7924_vm4, %v1269_v3  ;;  %v751_v45 = vadd.f32 %v747_v15, %v741_v51  ;;  %v786_v46 = vmul.f32 %v783_v0, %v7980_v61  ;;  %v787_v5 = vmul.f32 %v783_v0, %v7989_v37 }
  0xb1   : > { %v8525_v2 = vstv %s8454_s11  ;;  %v1164_v8 = vrot.slane %v795_v58, 7  ;;  %v8536_v48 = vstv %s8462_s4  ;;  %v8539_v3 = vstv %s8468_s6  ;;  %s8831_s11 = sld [smem:[#allocation8 + $0x72]] }
  0xb2   : > { %v760_v43 = vadd.f32 %v756_v31, %v750_v1  ;;  %v800_v50 = vmul.f32 %v8525_v2, %v7756_v12  ;;  %v801_v47 = vmul.f32 %v8525_v2, %v7763_v16  ;;  %v761_v52 = vadd.f32 %v757_v42, %v751_v45  ;;  %s8876_s4 = sld [smem:[#allocation8 + $0x76]] }
  0xb3   : > { %v8542_v0 = vstv %s8477_s25  ;;  %v1270_v14 = vsel %vm372_vm0, %v794_v25, %v1164_v8  ;;  %v1271_v4 = vsel %vm1175_vm1, %v794_v25, %v1164_v8  ;;  %v1273_v30 = vsel %vm1178_vm2, %v794_v25, %v1164_v8  ;;  %s8884_s6 = sld [smem:[#allocation8 + $0xb2]] }
  0xb4   : > { %v1275_v40 = vsel %vm1181_vm3, %v794_v25, %v1164_v8  ;;  %6611 = vst.msk [vmem:[%s8017_s20 + $0x180] ss:$4 sm:$0x3] %vm7924_vm4, %v1270_v14  ;;  %v1272_v23 = vrot.slane %v1271_v4, 1  ;;  %v1274_v39 = vrot.slane %v1273_v30, 2  ;;  %v1277_v15 = vsel %vm1184_vm5, %v794_v25, %v1164_v8  ;;  %s8891_s25 = sld [smem:[#allocation8 + $0xb6]] }
  0xb5   : > { %v1276_v59 = vrot.slane %v1275_v40, 3  ;;  %v1278_v9 = vrot.slane %v1277_v15, 4  ;;  %v1279_v26 = vsel %vm1187_vm6, %v794_v25, %v1164_v8  ;;  %v1281_v31 = vsel %vm1190_vm7, %v794_v25, %v1164_v8 }
  0xb6   : > { %v1283_v42 = vsel %vm421_vm8, %v1164_v8, %v794_v25  ;;  %6612 = vst.msk [vmem:[%s8017_s20 + $0x188] ss:$4 sm:$0x3] %vm7924_vm4, %v1272_v23  ;;  %v1280_v51 = vrot.slane %v1279_v26, 5  ;;  %v1282_v58 = vrot.slane %v1281_v31, 6  ;;  %v770_v45 = vadd.f32 %v766_v53, %v760_v43 }
  0xb7   : > { %v1284_v1 = vrot.slane %v1283_v42, 7  ;;  %6613 = vst.msk [vmem:[%s8017_s20 + $0x190] ss:$4 sm:$0x3] %vm7924_vm4, %v1274_v39  ;;  %v771_v14 = vadd.f32 %v767_v7, %v761_v52  ;;  %v806_v4 = vmul.f32 %v8536_v48, %v7795_v32  ;;  %v807_v25 = vmul.f32 %v8536_v48, %v7800_v33 }
  0xb8   : > { %v816_v8 = vmul.f32 %v8539_v3, %v7765_v17  ;;  %6614 = vst.msk [vmem:[%s8017_s20 + $0x198] ss:$4 sm:$0x3] %vm7924_vm4, %v1276_v59  ;;  %v780_v53 = vadd.f32 %v776_v44, %v770_v45  ;;  %v817_v43 = vmul.f32 %v8539_v3, %v7767_v18  ;;  %v826_v7 = vmul.f32 %v8542_v0, %v7807_v34 }
  0xb9   : > { %v827_v52 = vmul.f32 %v8542_v0, %v7812_v35  ;;  %6615 = vst.msk [vmem:[%s8017_s20 + $0x1a0] ss:$4 sm:$0x3] %vm7924_vm4, %v1278_v9  ;;  %v781_v30 = vadd.f32 %v777_v63, %v771_v14  ;;  %v810_v40 = vadd.f32 %v806_v4, %v800_v50  ;;  %v811_v23 = vadd.f32 %v807_v25, %v801_v47 }
  0xba   : > { %v8586_v39 = vstv %s8527_s27  ;;  %6616 = vst.msk [vmem:[%s8017_s20 + $0x1a8] ss:$4 sm:$0x3] %vm7924_vm4, %v1280_v51  ;;  %v790_v44 = vadd.f32 %v786_v46, %v780_v53  ;;  %v8596_v26 = vstv %s8533_s10  ;;  %v8610_v42 = vstv %s8544_s15  ;;  %s8897_s27 = sld [smem:[#allocation8 + $0xf2]] }
  0xbb   : > { %v836_v59 = vmul.f32 %v8586_v39, %v7772_v20  ;;  %v837_v15 = vmul.f32 %v8586_v39, %v7774_v21  ;;  %6617 = vst.msk [vmem:[%s8017_s20 + $0x1b0] ss:$4 sm:$0x3] %vm7924_vm4, %v1282_v58  ;;  %v791_v63 = vadd.f32 %v787_v5, %v781_v30  ;;  %v820_v50 = vadd.f32 %v816_v8, %v810_v40  ;;  %v13846_v30 = vld [vmem:[#allocation24_spill] sm:$0xff]  ;;  %s8903_s10 = sld [smem:[#allocation8 + $0xf6]] }
  0xbc   : > { %v821_v47 = vadd.f32 %v817_v43, %v811_v23  ;;  %v846_v9 = vmul.f32 %v8596_v26, %v7817_v36  ;;  %6618 = vst.msk [vmem:[%s8017_s20 + $0x1b8] ss:$4 sm:$0x3] %vm7924_vm4, %v1284_v1  ;;  %v796_v46 = vadd.f32 %v8448_v41, %v790_v44  ;;  %v847_v31 = vmul.f32 %v8596_v26, %v7825_v38  ;;  %v13847_v23 = vld [vmem:[#allocation25_spill] sm:$0xff]  ;;  %s8912_s15 = sld [smem:[#allocation9 + $0x6]] }
  0xbd   : > { %v8613_v51 = vstv %s8550_s29  ;;  %v797_v5 = vadd.f32 %v8448_v41, %v791_v63  ;;  %v830_v58 = vadd.f32 %v826_v7, %v820_v50  ;;  %v856_v14 = vmul.f32 %v8610_v42, %v7776_v22  ;;  %s8975_s29 = sld [smem:[#allocation8 + $0x3a]] }
  0xbe   : > { %v831_v45 = vadd.f32 %v827_v52, %v821_v47  ;;  %v857_v4 = vmul.f32 %v8610_v42, %v7781_v24  ;;  %v866_v1 = vmul.f32 %v8613_v51, %v7862_v54  ;;  %v867_v25 = vmul.f32 %v8613_v51, %v7867_v55 }
  0xbf   : > { %v8625_v8 = vstv %s8559_s23  ;;  %v1165_v53 = vrot.slane %v797_v5, 7  ;;  %v840_v43 = vadd.f32 %v836_v59, %v830_v58  ;;  %v802_v7 = vmul.f32 %v8525_v2, %v7910_v49  ;;  %s8984_s23 = sld [smem:[#allocation8 + $0x3e]] }
  0xc0   : > { %v841_v41 = vadd.f32 %v837_v15, %v831_v45  ;;  %v803_v52 = vmul.f32 %v8525_v2, %v7912_v62  ;;  %v808_v40 = vmul.f32 %v8536_v48, %v13846_v30  ;;  %v809_v44 = vmul.f32 %v8536_v48, %v13847_v23 }
  0xc1   : > { %v818_v63 = vmul.f32 %v8539_v3, %v13845_v60  ;;  %v1285_v59 = vsel %vm372_vm0, %v796_v46, %v1165_v53  ;;  %v1286_v15 = vsel %vm1175_vm1, %v796_v46, %v1165_v53  ;;  %v1288_v50 = vsel %vm1178_vm2, %v796_v46, %v1165_v53 }
  0xc2   : > { %v1290_v2 = vsel %vm1181_vm3, %v796_v46, %v1165_v53  ;;  %6619 = vst.msk [vmem:[%s8017_s20 + $0x1c0] ss:$4 sm:$0x3] %vm7924_vm4, %v1285_v59  ;;  %v1287_v48 = vrot.slane %v1286_v15, 1  ;;  %v1289_v47 = vrot.slane %v1288_v50, 2  ;;  %v1292_v58 = vsel %vm1184_vm5, %v796_v46, %v1165_v53 }
  0xc3   : > { %v1291_v5 = vrot.slane %v1290_v2, 3  ;;  %v1293_v45 = vrot.slane %v1292_v58, 4  ;;  %v1294_v60 = vsel %vm1187_vm6, %v796_v46, %v1165_v53  ;;  %v1296_v23 = vsel %vm1190_vm7, %v796_v46, %v1165_v53 }
  0xc4   : > { %v1298_v30 = vsel %vm421_vm8, %v1165_v53, %v796_v46  ;;  %6620 = vst.msk [vmem:[%s8017_s20 + $0x1c8] ss:$4 sm:$0x3] %vm7924_vm4, %v1287_v48  ;;  %v1295_v59 = vrot.slane %v1294_v60, 5  ;;  %v1297_v15 = vrot.slane %v1296_v23, 6  ;;  %v850_v2 = vadd.f32 %v846_v9, %v840_v43 }
  0xc5   : > { %v1299_v50 = vrot.slane %v1298_v30, 7  ;;  %6621 = vst.msk [vmem:[%s8017_s20 + $0x1d0] ss:$4 sm:$0x3] %vm7924_vm4, %v1289_v47  ;;  %v851_v58 = vadd.f32 %v847_v31, %v841_v41  ;;  %v812_v62 = vadd.f32 %v808_v40, %v802_v7  ;;  %v813_v55 = vadd.f32 %v809_v44, %v803_v52 }
  0xc6   : > { %v819_v46 = vmul.f32 %v8539_v3, %v13842_v6  ;;  %6622 = vst.msk [vmem:[%s8017_s20 + $0x1d8] ss:$4 sm:$0x3] %vm7924_vm4, %v1291_v5  ;;  %v860_v53 = vadd.f32 %v856_v14, %v850_v2  ;;  %v828_v60 = vmul.f32 %v8542_v0, %v7949_v10  ;;  %v829_v9 = vmul.f32 %v8542_v0, %v7954_v11 }
  0xc7   : > { %v838_v43 = vmul.f32 %v8586_v39, %v7918_v29  ;;  %6623 = vst.msk [vmem:[%s8017_s20 + $0x1e0] ss:$4 sm:$0x3] %vm7924_vm4, %v1293_v45  ;;  %v861_v31 = vadd.f32 %v857_v4, %v851_v58  ;;  %v822_v3 = vadd.f32 %v818_v63, %v812_v62  ;;  %v839_v14 = vmul.f32 %v8586_v39, %v7920_v28 }
  0xc8   : > { %v823_v41 = vadd.f32 %v819_v46, %v813_v55  ;;  %6624 = vst.msk [vmem:[%s8017_s20 + $0x1e8] ss:$4 sm:$0x3] %vm7924_vm4, %v1295_v59  ;;  %v870_v7 = vadd.f32 %v866_v1, %v860_v53  ;;  %v848_v0 = vmul.f32 %v8596_v26, %v7959_v13  ;;  %v849_v52 = vmul.f32 %v8596_v26, %v7964_v19 }
  0xc9   : > { %v858_v30 = vmul.f32 %v8610_v42, %v7922_v27  ;;  %6625 = vst.msk [vmem:[%s8017_s20 + $0x1f0] ss:$4 sm:$0x3] %vm7924_vm4, %v1297_v15  ;;  %v871_v55 = vadd.f32 %v867_v25, %v861_v31  ;;  %v832_v62 = vadd.f32 %v828_v60, %v822_v3  ;;  %v859_v4 = vmul.f32 %v8610_v42, %v7928_v57 }
  0xca   : > { %v833_v39 = vadd.f32 %v829_v9, %v823_v41  ;;  %6626 = vst.msk [vmem:[%s8017_s20 + $0x1f8] ss:$4 sm:$0x3] %vm7924_vm4, %v1299_v50  ;;  %v876_v26 = vadd.f32 %v8625_v8, %v870_v7  ;;  %v868_v1 = vmul.f32 %v8613_v51, %v7980_v61  ;;  %v869_v40 = vmul.f32 %v8613_v51, %v7989_v37 }
  0xcb   : > { %v8701_v25 = vstv %s8629_s30  ;;  %v877_v23 = vadd.f32 %v8625_v8, %v871_v55  ;;  %v842_v44 = vadd.f32 %v838_v43, %v832_v62  ;;  %v8713_v47 = vstv %s8639_s7  ;;  %s8998_s30 = sld [smem:[#allocation8 + $0x7a]] }
  0xcc   : > { %v843_v63 = vadd.f32 %v839_v14, %v833_v39  ;;  %v882_v42 = vmul.f32 %v8701_v25, %v7756_v12  ;;  %v883_v48 = vmul.f32 %v8701_v25, %v7763_v16  ;;  %v8716_v5 = vstv %s8645_s26  ;;  %s9035_s7 = sld [smem:[#allocation8 + $0x7e]] }
  0xcd   : > { %v8719_v51 = vstv %s8654_s5  ;;  %v1166_v45 = vrot.slane %v877_v23, 7  ;;  %v852_v59 = vadd.f32 %v848_v0, %v842_v44  ;;  %v888_v50 = vmul.f32 %v8713_v47, %v7795_v32  ;;  %s9043_s26 = sld [smem:[#allocation8 + $0xba]] }
  0xce   : > { %v853_v15 = vadd.f32 %v849_v52, %v843_v63  ;;  %v889_v2 = vmul.f32 %v8713_v47, %v7800_v33  ;;  %v898_v58 = vmul.f32 %v8716_v5, %v7765_v17  ;;  %v899_v46 = vmul.f32 %v8716_v5, %v7767_v18  ;;  %s9051_s5 = sld [smem:[#allocation8 + $0xbe]] }
  0xcf   : > { %v908_v53 = vmul.f32 %v8719_v51, %v7807_v34  ;;  %v1300_v60 = vsel %vm372_vm0, %v876_v26, %v1166_v45  ;;  %v1301_v9 = vsel %vm1175_vm1, %v876_v26, %v1166_v45  ;;  %v1303_v43 = vsel %vm1178_vm2, %v876_v26, %v1166_v45 }
  0xd0   : > { %v1305_v31 = vsel %vm1181_vm3, %v876_v26, %v1166_v45  ;;  %6627 = vst.msk [vmem:[%s8017_s20 + $0x200] ss:$4 sm:$0x3] %vm7924_vm4, %v1300_v60  ;;  %v1302_v3 = vrot.slane %v1301_v9, 1  ;;  %v1304_v41 = vrot.slane %v1303_v43, 2  ;;  %v1307_v7 = vsel %vm1184_vm5, %v876_v26, %v1166_v45 }
  0xd1   : > { %v1306_v14 = vrot.slane %v1305_v31, 3  ;;  %v1308_v0 = vrot.slane %v1307_v7, 4  ;;  %v1309_v52 = vsel %vm1187_vm6, %v876_v26, %v1166_v45  ;;  %v1311_v55 = vsel %vm1190_vm7, %v876_v26, %v1166_v45 }
  0xd2   : > { %v1313_v62 = vsel %vm421_vm8, %v1166_v45, %v876_v26  ;;  %6628 = vst.msk [vmem:[%s8017_s20 + $0x208] ss:$4 sm:$0x3] %vm7924_vm4, %v1302_v3  ;;  %v1310_v39 = vrot.slane %v1309_v52, 5  ;;  %v1312_v23 = vrot.slane %v1311_v55, 6  ;;  %v862_v63 = vadd.f32 %v858_v30, %v852_v59 }
  0xd3   : > { %v1314_v44 = vrot.slane %v1313_v62, 7  ;;  %6629 = vst.msk [vmem:[%s8017_s20 + $0x210] ss:$4 sm:$0x3] %vm7924_vm4, %v1304_v41  ;;  %v863_v60 = vadd.f32 %v859_v4, %v853_v15  ;;  %v892_v9 = vadd.f32 %v888_v50, %v882_v42  ;;  %v893_v43 = vadd.f32 %v889_v2, %v883_v48 }
  0xd4   : > { %v909_v31 = vmul.f32 %v8719_v51, %v7812_v35  ;;  %6630 = vst.msk [vmem:[%s8017_s20 + $0x218] ss:$4 sm:$0x3] %vm7924_vm4, %v1306_v14  ;;  %v872_v26 = vadd.f32 %v868_v1, %v862_v63  ;;  %v8760_v45 = vstv %s8703_s2  ;;  %v8763_v3 = vstv %s8708_s24  ;;  %v13849_v63 = vld [vmem:[#allocation21_spill] sm:$0xff]  ;;  %s9058_s2 = sld [smem:[#allocation8 + $0xfa]] }
  0xd5   : > { %v8766_v30 = vstv %s8721_s9  ;;  %6631 = vst.msk [vmem:[%s8017_s20 + $0x220] ss:$4 sm:$0x3] %vm7924_vm4, %v1308_v0  ;;  %v873_v4 = vadd.f32 %v869_v40, %v863_v60  ;;  %v902_v42 = vadd.f32 %v898_v58, %v892_v9  ;;  %v903_v48 = vadd.f32 %v899_v46, %v893_v43  ;;  %v13850_v60 = vld [vmem:[#allocation24_spill] sm:$0xff]  ;;  %v13851_v43 = vld [vmem:[#allocation25_spill] sm:$0xff]  ;;  %s9064_s24 = sld [smem:[#allocation8 + $0xfe]] }
  0xd6   : > { %v918_v59 = vmul.f32 %v8760_v45, %v7772_v20  ;;  %6632 = vst.msk [vmem:[%s8017_s20 + $0x228] ss:$4 sm:$0x3] %vm7924_vm4, %v1310_v39  ;;  %v878_v1 = vadd.f32 %v8625_v8, %v872_v26  ;;  %v919_v15 = vmul.f32 %v8760_v45, %v7774_v21  ;;  %v928_v50 = vmul.f32 %v8763_v3, %v7817_v36  ;;  %v13848_v39 = vld [vmem:[#allocation19_spill] sm:$0xff]  ;;  %s9073_s9 = sld [smem:[#allocation9 + $0x7]] }
  0xd7   : > { %v929_v40 = vmul.f32 %v8763_v3, %v7825_v38  ;;  %6633 = vst.msk [vmem:[%s8017_s20 + $0x230] ss:$4 sm:$0x3] %vm7924_vm4, %v1312_v23  ;;  %v879_v2 = vadd.f32 %v8625_v8, %v873_v4  ;;  %v912_v58 = vadd.f32 %v908_v53, %v902_v42  ;;  %v913_v46 = vadd.f32 %v909_v31, %v903_v48 }
  0xd8   : > { %v938_v41 = vmul.f32 %v8766_v30, %v7776_v22  ;;  %6634 = vst.msk [vmem:[%s8017_s20 + $0x238] ss:$4 sm:$0x3] %vm7924_vm4, %v1314_v44  ;;  %v939_v14 = vmul.f32 %v8766_v30, %v7781_v24  ;;  %v947_v7 = vstv %s8733_s12  ;;  %v8796_v0 = vstv %s8739_s3  ;;  %s9138_s12 = sld [smem:[#allocation8 + $0x3]] }
  0xd9   : > { %v884_v52 = vmul.f32 %v8701_v25, %v7910_v49  ;;  %v1167_v55 = vrot.slane %v879_v2, 7  ;;  %v922_v8 = vadd.f32 %v918_v59, %v912_v58  ;;  %v923_v53 = vadd.f32 %v919_v15, %v913_v46  ;;  %v13852_v49 = vld [vmem:[#allocation22_spill] sm:$0xff]  ;;  %s9146_s3 = sld [smem:[#allocation8 + $0x7]] }
  0xda   : > { %v948_v62 = vmul.f32 %v947_v7, %v7862_v54  ;;  %v949_v23 = vmul.f32 %v947_v7, %v13848_v39  ;;  %v885_v44 = vmul.f32 %v8701_v25, %v13849_v63  ;;  %v890_v9 = vmul.f32 %v8713_v47, %v13850_v60 }
  0xdb   : > { %v891_v31 = vmul.f32 %v8713_v47, %v13851_v43  ;;  %v1315_v26 = vsel %vm372_vm0, %v878_v1, %v1167_v55  ;;  %v1316_v4 = vsel %vm1175_vm1, %v878_v1, %v1167_v55  ;;  %v1318_v42 = vsel %vm1178_vm2, %v878_v1, %v1167_v55 }
  0xdc   : > { %v1320_v48 = vsel %vm1181_vm3, %v878_v1, %v1167_v55  ;;  %6635 = vst.msk [vmem:[%s8017_s20 + $0x240] ss:$4 sm:$0x3] %vm7924_vm4, %v1315_v26  ;;  %v1317_v25 = vrot.slane %v1316_v4, 1  ;;  %v1319_v59 = vrot.slane %v1318_v42, 2  ;;  %v1322_v47 = vsel %vm1184_vm5, %v878_v1, %v1167_v55 }
  0xdd   : > { %v1321_v15 = vrot.slane %v1320_v48, 3  ;;  %v1323_v2 = vrot.slane %v1322_v47, 4  ;;  %v1324_v58 = vsel %vm1187_vm6, %v878_v1, %v1167_v55  ;;  %v1326_v46 = vsel %vm1190_vm7, %v878_v1, %v1167_v55 }
  0xde   : > { %v1328_v43 = vsel %vm421_vm8, %v1167_v55, %v878_v1  ;;  %6636 = vst.msk [vmem:[%s8017_s20 + $0x248] ss:$4 sm:$0x3] %vm7924_vm4, %v1317_v25  ;;  %v1325_v26 = vrot.slane %v1324_v58, 5  ;;  %v1327_v4 = vrot.slane %v1326_v46, 6  ;;  %v932_v48 = vadd.f32 %v928_v50, %v922_v8 }
  0xdf   : > { %v1329_v42 = vrot.slane %v1328_v43, 7  ;;  %6637 = vst.msk [vmem:[%s8017_s20 + $0x250] ss:$4 sm:$0x3] %vm7924_vm4, %v1319_v59  ;;  %v933_v47 = vadd.f32 %v929_v40, %v923_v53  ;;  %v894_v60 = vadd.f32 %v890_v9, %v884_v52  ;;  %v895_v63 = vadd.f32 %v891_v31, %v885_v44 }
  0xe0   : > { %v900_v1 = vmul.f32 %v8716_v5, %v13852_v49  ;;  %6638 = vst.msk [vmem:[%s8017_s20 + $0x258] ss:$4 sm:$0x3] %vm7924_vm4, %v1321_v15  ;;  %v942_v55 = vadd.f32 %v938_v41, %v932_v48  ;;  %v901_v50 = vmul.f32 %v8716_v5, %v13842_v6  ;;  %v910_v8 = vmul.f32 %v8719_v51, %v7949_v10 }
  0xe1   : > { %v911_v40 = vmul.f32 %v8719_v51, %v7954_v11  ;;  %6639 = vst.msk [vmem:[%s8017_s20 + $0x260] ss:$4 sm:$0x3] %vm7924_vm4, %v1323_v2  ;;  %v943_v52 = vadd.f32 %v939_v14, %v933_v47  ;;  %v920_v44 = vmul.f32 %v8760_v45, %v7918_v29  ;;  %v921_v41 = vmul.f32 %v8760_v45, %v7920_v28 }
  0xe2   : > { %v904_v53 = vadd.f32 %v900_v1, %v894_v60  ;;  %6640 = vst.msk [vmem:[%s8017_s20 + $0x268] ss:$4 sm:$0x3] %vm7924_vm4, %v1325_v26  ;;  %v952_v5 = vadd.f32 %v948_v62, %v942_v55  ;;  %v905_v9 = vadd.f32 %v901_v50, %v895_v63  ;;  %v930_v51 = vmul.f32 %v8763_v3, %v7959_v13 }
  0xe3   : > { %v931_v14 = vmul.f32 %v8763_v3, %v7964_v19  ;;  %6641 = vst.msk [vmem:[%s8017_s20 + $0x270] ss:$4 sm:$0x3] %vm7924_vm4, %v1327_v4  ;;  %v953_v60 = vadd.f32 %v949_v23, %v943_v52  ;;  %v940_v45 = vmul.f32 %v8766_v30, %v7922_v27  ;;  %v941_v62 = vmul.f32 %v8766_v30, %v7928_v57 }
  0xe4   : > { %v914_v43 = vadd.f32 %v910_v8, %v904_v53  ;;  %6642 = vst.msk [vmem:[%s8017_s20 + $0x278] ss:$4 sm:$0x3] %vm7924_vm4, %v1329_v42  ;;  %v958_v63 = vadd.f32 %v8796_v0, %v952_v5  ;;  %v915_v31 = vadd.f32 %v911_v40, %v905_v9  ;;  %v950_v3 = vmul.f32 %v947_v7, %v7980_v61 }
  0xe5   : > { %v951_v25 = vmul.f32 %v947_v7, %v7989_v37  ;;  %v959_v23 = vadd.f32 %v8796_v0, %v953_v60  ;;  %v8871_v15 = vstv %s8812_s13  ;;  %v8874_v2 = vstv %s8821_s8  ;;  %s9152_s13 = sld [smem:[#allocation8 + $0x43]] }
  0xe6   : > { %v924_v59 = vadd.f32 %v920_v44, %v914_v43  ;;  %v925_v30 = vadd.f32 %v921_v41, %v915_v31  ;;  %v964_v58 = vmul.f32 %v8871_v15, %v7756_v12  ;;  %v965_v46 = vmul.f32 %v8871_v15, %v7763_v16  ;;  %s9161_s8 = sld [smem:[#allocation8 + $0x47]] }
  0xe7   : > { %v970_v26 = vmul.f32 %v8874_v2, %v7795_v32  ;;  %v1168_v7 = vrot.slane %v959_v23, 7  ;;  %v971_v42 = vmul.f32 %v8874_v2, %v7800_v33  ;;  %v8889_v48 = vstv %s8831_s11  ;;  %s9211_s11 = sld [smem:[#allocation8 + $0x83]] }
  0xe8   : > { %v934_v4 = vadd.f32 %v930_v51, %v924_v59  ;;  %v935_v47 = vadd.f32 %v931_v14, %v925_v30  ;;  %v980_v55 = vmul.f32 %v8889_v48, %v7765_v17  ;;  %v981_v50 = vmul.f32 %v8889_v48, %v7767_v18 }
  0xe9   : > { %v974_v1 = vadd.f32 %v970_v26, %v964_v58  ;;  %v1330_v8 = vsel %vm372_vm0, %v958_v63, %v1168_v7  ;;  %v1331_v40 = vsel %vm1175_vm1, %v958_v63, %v1168_v7  ;;  %v1333_v52 = vsel %vm1178_vm2, %v958_v63, %v1168_v7 }
  0xea   : > { %v1335_v53 = vsel %vm1181_vm3, %v958_v63, %v1168_v7  ;;  %6643 = vst.msk [vmem:[%s8017_s20 + $0x280] ss:$4 sm:$0x3] %vm7924_vm4, %v1330_v8  ;;  %v1332_v44 = vrot.slane %v1331_v40, 1  ;;  %v1334_v41 = vrot.slane %v1333_v52, 2  ;;  %v1337_v9 = vsel %vm1184_vm5, %v958_v63, %v1168_v7 }
  0xeb   : > { %v1336_v5 = vrot.slane %v1335_v53, 3  ;;  %v1338_v51 = vrot.slane %v1337_v9, 4  ;;  %v1339_v14 = vsel %vm1187_vm6, %v958_v63, %v1168_v7  ;;  %v1341_v60 = vsel %vm1190_vm7, %v958_v63, %v1168_v7 }
  0xec   : > { %v1343_v43 = vsel %vm421_vm8, %v1168_v7, %v958_v63  ;;  %6644 = vst.msk [vmem:[%s8017_s20 + $0x288] ss:$4 sm:$0x3] %vm7924_vm4, %v1332_v44  ;;  %v1340_v31 = vrot.slane %v1339_v14, 5  ;;  %v1342_v23 = vrot.slane %v1341_v60, 6  ;;  %v944_v30 = vadd.f32 %v940_v45, %v934_v4 }
  0xed   : > { %v1344_v59 = vrot.slane %v1343_v43, 7  ;;  %6645 = vst.msk [vmem:[%s8017_s20 + $0x290] ss:$4 sm:$0x3] %vm7924_vm4, %v1334_v41  ;;  %v945_v58 = vadd.f32 %v941_v62, %v935_v47  ;;  %v975_v26 = vadd.f32 %v971_v42, %v965_v46  ;;  %v984_v8 = vadd.f32 %v980_v55, %v974_v1 }
  0xee   : > { %v8921_v63 = vstv %s8876_s4  ;;  %6646 = vst.msk [vmem:[%s8017_s20 + $0x298] ss:$4 sm:$0x3] %vm7924_vm4, %v1336_v5  ;;  %v954_v7 = vadd.f32 %v950_v3, %v944_v30  ;;  %v8931_v4 = vstv %s8884_s6  ;;  %v1009_v55 = vstv %s8891_s25  ;;  %v13853_v30 = vld [vmem:[#allocation20_spill] sm:$0xff]  ;;  %s9217_s4 = sld [smem:[#allocation8 + $0x87]] }
  0xef   : > { %v990_v40 = vmul.f32 %v8921_v63, %v7807_v34  ;;  %v991_v45 = vmul.f32 %v8921_v63, %v7812_v35  ;;  %6647 = vst.msk [vmem:[%s8017_s20 + $0x2a0] ss:$4 sm:$0x3] %vm7924_vm4, %v1338_v51  ;;  %v955_v62 = vadd.f32 %v951_v25, %v945_v58  ;;  %v985_v46 = vadd.f32 %v981_v50, %v975_v26  ;;  %v13854_v58 = vld [vmem:[#allocation21_spill] sm:$0xff]  ;;  %s9228_s6 = sld [smem:[#allocation8 + $0xc3]] }
  0xf0   : > { %v1000_v42 = vmul.f32 %v8931_v4, %v7772_v20  ;;  %v1001_v3 = vmul.f32 %v8931_v4, %v7774_v21  ;;  %6648 = vst.msk [vmem:[%s8017_s20 + $0x2a8] ss:$4 sm:$0x3] %vm7924_vm4, %v1340_v31  ;;  %v960_v47 = vadd.f32 %v8796_v0, %v954_v7  ;;  %v8946_v52 = vstv %s8897_s27  ;;  %s9234_s25 = sld [smem:[#allocation8 + $0xc7]] }
  0xf1   : > { %v994_v1 = vadd.f32 %v990_v40, %v984_v8  ;;  %6649 = vst.msk [vmem:[%s8017_s20 + $0x2b0] ss:$4 sm:$0x3] %vm7924_vm4, %v1342_v23  ;;  %v961_v25 = vadd.f32 %v8796_v0, %v955_v62  ;;  %v995_v50 = vadd.f32 %v991_v45, %v985_v46  ;;  %v1010_v53 = vmul.f32 %v1009_v55, %v7817_v36  ;;  %s9243_s27 = sld [smem:[#allocation9]] }
  0xf2   : > { %v1011_v44 = vmul.f32 %v1009_v55, %v7825_v38  ;;  %6650 = vst.msk [vmem:[%s8017_s20 + $0x2b8] ss:$4 sm:$0x3] %vm7924_vm4, %v1344_v59  ;;  %v1020_v5 = vmul.f32 %v8946_v52, %v7776_v22  ;;  %v1021_v9 = vmul.f32 %v8946_v52, %v7781_v24  ;;  %v1029_v51 = vstv %s8903_s10  ;;  %s9313_s10 = sld [smem:[#allocation8 + $0xb]] }
  0xf3   : > { %v1004_v41 = vadd.f32 %v1000_v42, %v994_v1  ;;  %v1169_v14 = vrot.slane %v961_v25, 7  ;;  %v1005_v60 = vadd.f32 %v1001_v3, %v995_v50  ;;  %v1030_v0 = vmul.f32 %v1029_v51, %v7862_v54 }
  0xf4   : > { %v1031_v43 = vmul.f32 %v1029_v51, %v13848_v39  ;;  %v8965_v23 = vstv %s8912_s15  ;;  %v966_v59 = vmul.f32 %v8871_v15, %v13853_v30  ;;  %v967_v26 = vmul.f32 %v8871_v15, %v13854_v58  ;;  %v13856_v58 = vld [vmem:[#allocation25_spill] sm:$0xff]  ;;  %s9323_s15 = sld [smem:[#allocation8 + $0xf]] }
  0xf5   : > { %v1014_v31 = vadd.f32 %v1010_v53, %v1004_v41  ;;  %v1345_v8 = vsel %vm372_vm0, %v960_v47, %v1169_v14  ;;  %v1346_v7 = vsel %vm1175_vm1, %v960_v47, %v1169_v14  ;;  %v1348_v40 = vsel %vm1178_vm2, %v960_v47, %v1169_v14 }
  0xf6   : > { %v1350_v45 = vsel %vm1181_vm3, %v960_v47, %v1169_v14  ;;  %6651 = vst.msk [vmem:[%s8017_s20 + $0x2c0] ss:$4 sm:$0x3] %vm7924_vm4, %v1345_v8  ;;  %v1347_v62 = vrot.slane %v1346_v7, 1  ;;  %v1349_v46 = vrot.slane %v1348_v40, 2  ;;  %v1352_v15 = vsel %vm1184_vm5, %v960_v47, %v1169_v14 }
  0xf7   : > { %v1351_v42 = vrot.slane %v1350_v45, 3  ;;  %v1353_v3 = vrot.slane %v1352_v15, 4  ;;  %v1354_v1 = vsel %vm1187_vm6, %v960_v47, %v1169_v14  ;;  %v1356_v25 = vsel %vm1190_vm7, %v960_v47, %v1169_v14  ;;  %v13855_v45 = vld [vmem:[#allocation24_spill] sm:$0xff] }
  0xf8   : > { %v1358_v50 = vsel %vm421_vm8, %v1169_v14, %v960_v47  ;;  %6652 = vst.msk [vmem:[%s8017_s20 + $0x2c8] ss:$4 sm:$0x3] %vm7924_vm4, %v1347_v62  ;;  %v1355_v53 = vrot.slane %v1354_v1, 5  ;;  %v1357_v41 = vrot.slane %v1356_v25, 6  ;;  %v1015_v7 = vadd.f32 %v1011_v44, %v1005_v60 }
  0xf9   : > { %v1359_v8 = vrot.slane %v1358_v50, 7  ;;  %6653 = vst.msk [vmem:[%s8017_s20 + $0x2d0] ss:$4 sm:$0x3] %vm7924_vm4, %v1349_v46  ;;  %v1024_v40 = vadd.f32 %v1020_v5, %v1014_v31  ;;  %v972_v15 = vmul.f32 %v8874_v2, %v13855_v45  ;;  %v973_v47 = vmul.f32 %v8874_v2, %v13856_v58 }
  0xfa   : > { %v982_v14 = vmul.f32 %v8889_v48, %v13852_v49  ;;  %6654 = vst.msk [vmem:[%s8017_s20 + $0x2d8] ss:$4 sm:$0x3] %vm7924_vm4, %v1351_v42  ;;  %v1025_v44 = vadd.f32 %v1021_v9, %v1015_v7  ;;  %v983_v60 = vmul.f32 %v8889_v48, %v13842_v6  ;;  %v992_v5 = vmul.f32 %v8921_v63, %v7949_v10 }
  0xfb   : > { %v993_v31 = vmul.f32 %v8921_v63, %v7954_v11  ;;  %6655 = vst.msk [vmem:[%s8017_s20 + $0x2e0] ss:$4 sm:$0x3] %vm7924_vm4, %v1353_v3  ;;  %v1034_v2 = vadd.f32 %v1030_v0, %v1024_v40  ;;  %v976_v62 = vadd.f32 %v972_v15, %v966_v59  ;;  %v977_v46 = vadd.f32 %v973_v47, %v967_v26 }
  0xfc   : > { %v1002_v42 = vmul.f32 %v8931_v4, %v7918_v29  ;;  %6656 = vst.msk [vmem:[%s8017_s20 + $0x2e8] ss:$4 sm:$0x3] %vm7924_vm4, %v1355_v53  ;;  %v1035_v48 = vadd.f32 %v1031_v43, %v1025_v44  ;;  %v1003_v9 = vmul.f32 %v8931_v4, %v7920_v28  ;;  %v1012_v63 = vmul.f32 %v1009_v55, %v7959_v13 }
  0xfd   : > { %v1013_v1 = vmul.f32 %v1009_v55, %v7964_v19  ;;  %6657 = vst.msk [vmem:[%s8017_s20 + $0x2f0] ss:$4 sm:$0x3] %vm7924_vm4, %v1357_v41  ;;  %v1040_v0 = vadd.f32 %v8965_v23, %v1034_v2  ;;  %v986_v59 = vadd.f32 %v982_v14, %v976_v62  ;;  %v987_v26 = vadd.f32 %v983_v60, %v977_v46 }
  0xfe   : > { %v1022_v3 = vmul.f32 %v8946_v52, %v7922_v27  ;;  %6658 = vst.msk [vmem:[%s8017_s20 + $0x2f8] ss:$4 sm:$0x3] %vm7924_vm4, %v1359_v8  ;;  %v1041_v4 = vadd.f32 %v8965_v23, %v1035_v48  ;;  %v1023_v43 = vmul.f32 %v8946_v52, %v7928_v57  ;;  %v1032_v55 = vmul.f32 %v1029_v51, %v7980_v61 }
  0xff   : > { %v1033_v25 = vmul.f32 %v1029_v51, %v7989_v37  ;;  %v996_v50 = vadd.f32 %v992_v5, %v986_v59  ;;  %v997_v53 = vadd.f32 %v993_v31, %v987_v26  ;;  %v9038_v41 = vstv %s8975_s29  ;;  %s9329_s29 = sld [smem:[#allocation8 + $0x4b]] }
 0x100   : > { %v9041_v7 = vstv %s8984_s23  ;;  %v1170_v8 = vrot.slane %v1041_v4, 7  ;;  %v1046_v52 = vmul.f32 %v9038_v41, %v7756_v12  ;;  %v1047_v40 = vmul.f32 %v9038_v41, %v7763_v16  ;;  %s9338_s23 = sld [smem:[#allocation8 + $0x4f]] }
 0x101   : > { %v1052_v51 = vmul.f32 %v9041_v7, %v7795_v32  ;;  %v1006_v15 = vadd.f32 %v1002_v42, %v996_v50  ;;  %v1007_v47 = vadd.f32 %v1003_v9, %v997_v53  ;;  %v1053_v14 = vmul.f32 %v9041_v7, %v7800_v33 }
 0x102   : > { %v9056_v44 = vstv %s8998_s30  ;;  %v1360_v60 = vsel %vm372_vm0, %v1040_v0, %v1170_v8  ;;  %v1361_v5 = vsel %vm1175_vm1, %v1040_v0, %v1170_v8  ;;  %v1363_v31 = vsel %vm1178_vm2, %v1040_v0, %v1170_v8  ;;  %s9387_s30 = sld [smem:[#allocation8 + $0x8b]] }
 0x103   : > { %v1365_v2 = vsel %vm1181_vm3, %v1040_v0, %v1170_v8  ;;  %6659 = vst.msk [vmem:[%s8017_s20 + $0x300] ss:$4 sm:$0x3] %vm7924_vm4, %v1360_v60  ;;  %v1362_v62 = vrot.slane %v1361_v5, 1  ;;  %v1364_v46 = vrot.slane %v1363_v31, 2  ;;  %v1367_v48 = vsel %vm1184_vm5, %v1040_v0, %v1170_v8 }
 0x104   : > { %v1366_v42 = vrot.slane %v1365_v2, 3  ;;  %v1368_v9 = vrot.slane %v1367_v48, 4  ;;  %v1369_v59 = vsel %vm1187_vm6, %v1040_v0, %v1170_v8  ;;  %v1371_v26 = vsel %vm1190_vm7, %v1040_v0, %v1170_v8 }
 0x105   : > { %v1373_v4 = vsel %vm421_vm8, %v1170_v8, %v1040_v0  ;;  %6660 = vst.msk [vmem:[%s8017_s20 + $0x308] ss:$4 sm:$0x3] %vm7924_vm4, %v1362_v62  ;;  %v1370_v50 = vrot.slane %v1369_v59, 5  ;;  %v1372_v53 = vrot.slane %v1371_v26, 6  ;;  %v1016_v5 = vadd.f32 %v1012_v63, %v1006_v15 }
 0x106   : > { %v1374_v60 = vrot.slane %v1373_v4, 7  ;;  %6661 = vst.msk [vmem:[%s8017_s20 + $0x310] ss:$4 sm:$0x3] %vm7924_vm4, %v1364_v46  ;;  %v1017_v31 = vadd.f32 %v1013_v1, %v1007_v47  ;;  %v1056_v2 = vadd.f32 %v1052_v51, %v1046_v52  ;;  %v1057_v48 = vadd.f32 %v1053_v14, %v1047_v40 }
 0x107   : > { %v1062_v0 = vmul.f32 %v9056_v44, %v7765_v17  ;;  %6662 = vst.msk [vmem:[%s8017_s20 + $0x318] ss:$4 sm:$0x3] %vm7924_vm4, %v1366_v42  ;;  %v1026_v8 = vadd.f32 %v1022_v3, %v1016_v5  ;;  %v1063_v62 = vmul.f32 %v9056_v44, %v7767_v18  ;;  %v9089_v63 = vstv %s9035_s7  ;;  %s9392_s7 = sld [smem:[#allocation8 + $0x8f]] }
 0x108   : > { %v9092_v15 = vstv %s9043_s26  ;;  %6663 = vst.msk [vmem:[%s8017_s20 + $0x320] ss:$4 sm:$0x3] %vm7924_vm4, %v1368_v9  ;;  %v1027_v1 = vadd.f32 %v1023_v43, %v1017_v31  ;;  %v1072_v40 = vmul.f32 %v9089_v63, %v7807_v34  ;;  %v1073_v3 = vmul.f32 %v9089_v63, %v7812_v35  ;;  %s9405_s26 = sld [smem:[#allocation8 + $0xcb]] }
 0x109   : > { %v1066_v52 = vadd.f32 %v1062_v0, %v1056_v2  ;;  %6664 = vst.msk [vmem:[%s8017_s20 + $0x328] ss:$4 sm:$0x3] %vm7924_vm4, %v1370_v50  ;;  %v1036_v51 = vadd.f32 %v1032_v55, %v1026_v8  ;;  %v1067_v47 = vadd.f32 %v1063_v62, %v1057_v48  ;;  %v1082_v14 = vmul.f32 %v9092_v15, %v7772_v20 }
 0x10a   : > { %v1083_v46 = vmul.f32 %v9092_v15, %v7774_v21  ;;  %6665 = vst.msk [vmem:[%s8017_s20 + $0x330] ss:$4 sm:$0x3] %vm7924_vm4, %v1372_v53  ;;  %v1037_v43 = vadd.f32 %v1033_v25, %v1027_v1  ;;  %v9112_v9 = vstv %s9051_s5  ;;  %v9115_v59 = vstv %s9058_s2  ;;  %s9417_s5 = sld [smem:[#allocation8 + $0xcf]] }
 0x10b   : > { %v1076_v42 = vadd.f32 %v1072_v40, %v1066_v52  ;;  %6666 = vst.msk [vmem:[%s8017_s20 + $0x338] ss:$4 sm:$0x3] %vm7924_vm4, %v1374_v60  ;;  %v1042_v55 = vadd.f32 %v8965_v23, %v1036_v51  ;;  %v1077_v26 = vadd.f32 %v1073_v3, %v1067_v47  ;;  %v1092_v4 = vmul.f32 %v9112_v9, %v7817_v36  ;;  %v13857_v40 = vld [vmem:[#allocation21_spill] sm:$0xff]  ;;  %s9423_s2 = sld [smem:[#allocation9 + $0x1]] }
 0x10c   : > { %v1093_v50 = vmul.f32 %v9112_v9, %v7825_v38  ;;  %v1043_v53 = vadd.f32 %v8965_v23, %v1037_v43  ;;  %v1102_v5 = vmul.f32 %v9115_v59, %v7776_v22  ;;  %v1103_v31 = vmul.f32 %v9115_v59, %v7781_v24 }
 0x10d   : > { %v1086_v25 = vadd.f32 %v1082_v14, %v1076_v42  ;;  %v1087_v2 = vadd.f32 %v1083_v46, %v1077_v26  ;;  %v1111_v60 = vstv %s9064_s24  ;;  %v9132_v48 = vstv %s9073_s9  ;;  %s9496_s24 = sld [smem:[#allocation8 + $0x13]] }
 0x10e   : > { %v1048_v0 = vmul.f32 %v9038_v41, %v13853_v30  ;;  %v1171_v8 = vrot.slane %v1043_v53, 7  ;;  %v1112_v1 = vmul.f32 %v1111_v60, %v7862_v54  ;;  %v1113_v23 = vmul.f32 %v1111_v60, %v13848_v39  ;;  %s9505_s9 = sld [smem:[#allocation8 + $0x17]] }
 0x10f   : > { %v1096_v62 = vadd.f32 %v1092_v4, %v1086_v25  ;;  %v1097_v52 = vadd.f32 %v1093_v50, %v1087_v2  ;;  %v1049_v3 = vmul.f32 %v9038_v41, %v13857_v40  ;;  %v1054_v51 = vmul.f32 %v9041_v7, %v13855_v45 }
 0x110   : > { %v1055_v47 = vmul.f32 %v9041_v7, %v13856_v58  ;;  %v1375_v14 = vsel %vm372_vm0, %v1042_v55, %v1171_v8  ;;  %v1376_v46 = vsel %vm1175_vm1, %v1042_v55, %v1171_v8  ;;  %v1378_v43 = vsel %vm1178_vm2, %v1042_v55, %v1171_v8 }
 0x111   : > { %v1380_v42 = vsel %vm1181_vm3, %v1042_v55, %v1171_v8  ;;  %6667 = vst.msk [vmem:[%s8017_s20 + $0x340] ss:$4 sm:$0x3] %vm7924_vm4, %v1375_v14  ;;  %v1377_v41 = vrot.slane %v1376_v46, 1  ;;  %v1379_v26 = vrot.slane %v1378_v43, 2  ;;  %v1382_v4 = vsel %vm1184_vm5, %v1042_v55, %v1171_v8 }
 0x112   : > { %v1381_v7 = vrot.slane %v1380_v42, 3  ;;  %v1383_v50 = vrot.slane %v1382_v4, 4  ;;  %v1384_v53 = vsel %vm1187_vm6, %v1042_v55, %v1171_v8  ;;  %v1386_v25 = vsel %vm1190_vm7, %v1042_v55, %v1171_v8 }
 0x113   : > { %v1388_v2 = vsel %vm421_vm8, %v1171_v8, %v1042_v55  ;;  %6668 = vst.msk [vmem:[%s8017_s20 + $0x348] ss:$4 sm:$0x3] %vm7924_vm4, %v1377_v41  ;;  %v1385_v14 = vrot.slane %v1384_v53, 5  ;;  %v1387_v46 = vrot.slane %v1386_v25, 6  ;;  %v1106_v42 = vadd.f32 %v1102_v5, %v1096_v62 }
 0x114   : > { %v1389_v43 = vrot.slane %v1388_v2, 7  ;;  %6669 = vst.msk [vmem:[%s8017_s20 + $0x350] ss:$4 sm:$0x3] %vm7924_vm4, %v1379_v26  ;;  %v1107_v4 = vadd.f32 %v1103_v31, %v1097_v52  ;;  %v1058_v58 = vadd.f32 %v1054_v51, %v1048_v0  ;;  %v1059_v45 = vadd.f32 %v1055_v47, %v1049_v3 }
 0x115   : > { %v1064_v55 = vmul.f32 %v9056_v44, %v13852_v49  ;;  %6670 = vst.msk [vmem:[%s8017_s20 + $0x358] ss:$4 sm:$0x3] %vm7924_vm4, %v1381_v7  ;;  %v1116_v8 = vadd.f32 %v1112_v1, %v1106_v42  ;;  %v1065_v41 = vmul.f32 %v9056_v44, %v13842_v6  ;;  %v1074_v5 = vmul.f32 %v9089_v63, %v7949_v10 }
 0x116   : > { %v1075_v62 = vmul.f32 %v9089_v63, %v7954_v11  ;;  %6671 = vst.msk [vmem:[%s8017_s20 + $0x360] ss:$4 sm:$0x3] %vm7924_vm4, %v1383_v50  ;;  %v1117_v31 = vadd.f32 %v1113_v23, %v1107_v4  ;;  %v1084_v52 = vmul.f32 %v9092_v15, %v7918_v29  ;;  %v1085_v1 = vmul.f32 %v9092_v15, %v7920_v28 }
 0x117   : > { %v1068_v0 = vadd.f32 %v1064_v55, %v1058_v58  ;;  %6672 = vst.msk [vmem:[%s8017_s20 + $0x368] ss:$4 sm:$0x3] %vm7924_vm4, %v1385_v14  ;;  %v1122_v44 = vadd.f32 %v9132_v48, %v1116_v8  ;;  %v1069_v3 = vadd.f32 %v1065_v41, %v1059_v45  ;;  %v1094_v63 = vmul.f32 %v9112_v9, %v7959_v13 }
 0x118   : > { %v1095_v23 = vmul.f32 %v9112_v9, %v7964_v19  ;;  %6673 = vst.msk [vmem:[%s8017_s20 + $0x370] ss:$4 sm:$0x3] %vm7924_vm4, %v1387_v46  ;;  %v1123_v58 = vadd.f32 %v9132_v48, %v1117_v31  ;;  %v1104_v15 = vmul.f32 %v9115_v59, %v7922_v27  ;;  %v1105_v45 = vmul.f32 %v9115_v59, %v7928_v57 }
 0x119   : > { %v1078_v51 = vadd.f32 %v1074_v5, %v1068_v0  ;;  %6674 = vst.msk [vmem:[%s8017_s20 + $0x378] ss:$4 sm:$0x3] %vm7924_vm4, %v1389_v43  ;;  %v1079_v47 = vadd.f32 %v1075_v62, %v1069_v3  ;;  %v1114_v9 = vmul.f32 %v1111_v60, %v7980_v61  ;;  %v1115_v26 = vmul.f32 %v1111_v60, %v7989_v37 }
 0x11a   : > { %v9209_v7 = vstv %s9138_s12  ;;  %v1172_v50 = vrot.slane %v1123_v58, 7  ;;  %v9220_v14 = vstv %s9146_s3  ;;  %v9223_v46 = vstv %s9152_s13  ;;  %s9515_s12 = sld [smem:[#allocation8 + $0x53]] }
 0x11b   : > { %v1088_v53 = vadd.f32 %v1084_v52, %v1078_v51  ;;  %v1809_v25 = vmul.f32 %v9209_v7, %v7756_v12  ;;  %v1810_v59 = vmul.f32 %v9209_v7, %v7763_v16  ;;  %v1089_v2 = vadd.f32 %v1085_v1, %v1079_v47  ;;  %s9560_s3 = sld [smem:[#allocation8 + $0x57]] }
 0x11c   : > { %v9226_v60 = vstv %s9161_s8  ;;  %v1390_v43 = vsel %vm372_vm0, %v1122_v44, %v1172_v50  ;;  %v1391_v42 = vsel %vm1175_vm1, %v1122_v44, %v1172_v50  ;;  %v1393_v4 = vsel %vm1178_vm2, %v1122_v44, %v1172_v50  ;;  %s9568_s13 = sld [smem:[#allocation8 + $0x93]] }
 0x11d   : > { %v1395_v55 = vsel %vm1181_vm3, %v1122_v44, %v1172_v50  ;;  %6675 = vst.msk [vmem:[%s8017_s20 + $0x380] ss:$4 sm:$0x3] %vm7924_vm4, %v1390_v43  ;;  %v1392_v8 = vrot.slane %v1391_v42, 1  ;;  %v1394_v41 = vrot.slane %v1393_v4, 2  ;;  %v1397_v62 = vsel %vm1184_vm5, %v1122_v44, %v1172_v50  ;;  %s9575_s8 = sld [smem:[#allocation8 + $0x97]] }
 0x11e   : > { %v1396_v5 = vrot.slane %v1395_v55, 3  ;;  %v1398_v31 = vrot.slane %v1397_v62, 4  ;;  %v1399_v0 = vsel %vm1187_vm6, %v1122_v44, %v1172_v50  ;;  %v1401_v52 = vsel %vm1190_vm7, %v1122_v44, %v1172_v50 }
 0x11f   : > { %v1403_v1 = vsel %vm421_vm8, %v1172_v50, %v1122_v44  ;;  %6676 = vst.msk [vmem:[%s8017_s20 + $0x388] ss:$4 sm:$0x3] %vm7924_vm4, %v1392_v8  ;;  %v1400_v3 = vrot.slane %v1399_v0, 5  ;;  %v1402_v58 = vrot.slane %v1401_v52, 6  ;;  %v1098_v47 = vadd.f32 %v1094_v63, %v1088_v53 }
 0x120   : > { %v1404_v51 = vrot.slane %v1403_v1, 7  ;;  %6677 = vst.msk [vmem:[%s8017_s20 + $0x390] ss:$4 sm:$0x3] %vm7924_vm4, %v1394_v41  ;;  %v1099_v43 = vadd.f32 %v1095_v23, %v1089_v2  ;;  %v1815_v42 = vmul.f32 %v9220_v14, %v7795_v32  ;;  %v1816_v44 = vmul.f32 %v9220_v14, %v7800_v33 }
 0x121   : > { %v1825_v50 = vmul.f32 %v9223_v46, %v7765_v17  ;;  %6678 = vst.msk [vmem:[%s8017_s20 + $0x398] ss:$4 sm:$0x3] %vm7924_vm4, %v1396_v5  ;;  %v1108_v63 = vadd.f32 %v1104_v15, %v1098_v47  ;;  %v1826_v53 = vmul.f32 %v9223_v46, %v7767_v18  ;;  %v1835_v23 = vmul.f32 %v9226_v60, %v7807_v34 }
 0x122   : > { %v1836_v2 = vmul.f32 %v9226_v60, %v7812_v35  ;;  %6679 = vst.msk [vmem:[%s8017_s20 + $0x3a0] ss:$4 sm:$0x3] %vm7924_vm4, %v1398_v31  ;;  %v1109_v4 = vadd.f32 %v1105_v45, %v1099_v43  ;;  %v1819_v55 = vadd.f32 %v1815_v42, %v1809_v25  ;;  %v1820_v8 = vadd.f32 %v1816_v44, %v1810_v59 }
 0x123   : > { %v9270_v41 = vstv %s9211_s11  ;;  %6680 = vst.msk [vmem:[%s8017_s20 + $0x3a8] ss:$4 sm:$0x3] %vm7924_vm4, %v1400_v3  ;;  %v1118_v15 = vadd.f32 %v1114_v9, %v1108_v63  ;;  %v9280_v0 = vstv %s9217_s4  ;;  %v9294_v1 = vstv %s9228_s6  ;;  %s9581_s11 = sld [smem:[#allocation8 + $0xd3]] }
 0x124   : > { %v1845_v5 = vmul.f32 %v9270_v41, %v7772_v20  ;;  %v1846_v62 = vmul.f32 %v9270_v41, %v7774_v21  ;;  %6681 = vst.msk [vmem:[%s8017_s20 + $0x3b0] ss:$4 sm:$0x3] %vm7924_vm4, %v1402_v58  ;;  %v1119_v45 = vadd.f32 %v1115_v26, %v1109_v4  ;;  %v1829_v25 = vadd.f32 %v1825_v50, %v1819_v55  ;;  %v13858_v4 = vld [vmem:[#allocation24_spill] sm:$0xff]  ;;  %s9587_s4 = sld [smem:[#allocation8 + $0xd7]] }
 0x125   : > { %v1830_v59 = vadd.f32 %v1826_v53, %v1820_v8  ;;  %v1855_v31 = vmul.f32 %v9280_v0, %v7817_v36  ;;  %6682 = vst.msk [vmem:[%s8017_s20 + $0x3b8] ss:$4 sm:$0x3] %vm7924_vm4, %v1404_v51  ;;  %v1124_v9 = vadd.f32 %v9132_v48, %v1118_v15  ;;  %v1856_v52 = vmul.f32 %v9280_v0, %v7825_v38  ;;  %v13859_v8 = vld [vmem:[#allocation25_spill] sm:$0xff]  ;;  %s9596_s6 = sld [smem:[#allocation9 + $0x2]] }
 0x126   : > { %v9297_v3 = vstv %s9234_s25  ;;  %v1125_v26 = vadd.f32 %v9132_v48, %v1119_v45  ;;  %v1839_v58 = vadd.f32 %v1835_v23, %v1829_v25  ;;  %v1865_v43 = vmul.f32 %v9294_v1, %v7776_v22  ;;  %s9659_s25 = sld [smem:[#allocation8 + $0x1b]] }
 0x127   : > { %v1840_v47 = vadd.f32 %v1836_v2, %v1830_v59  ;;  %v1866_v42 = vmul.f32 %v9294_v1, %v7781_v24  ;;  %v1875_v51 = vmul.f32 %v9297_v3, %v7862_v54  ;;  %v1876_v44 = vmul.f32 %v9297_v3, %v13848_v39 }
 0x128   : > { %v9309_v50 = vstv %s9243_s27  ;;  %v1173_v63 = vrot.slane %v1125_v26, 7  ;;  %v1849_v53 = vadd.f32 %v1845_v5, %v1839_v58  ;;  %v1811_v23 = vmul.f32 %v9209_v7, %v13853_v30  ;;  %s9668_s27 = sld [smem:[#allocation8 + $0x1f]] }
 0x129   : > { %v1850_v48 = vadd.f32 %v1846_v62, %v1840_v47  ;;  %v1812_v2 = vmul.f32 %v9209_v7, %v13857_v40  ;;  %v1817_v55 = vmul.f32 %v9220_v14, %v13858_v4  ;;  %v1818_v15 = vmul.f32 %v9220_v14, %v13859_v8 }
 0x12a   : > { %v1827_v45 = vmul.f32 %v9223_v46, %v13852_v49  ;;  %v1405_v5 = vsel %vm372_vm0, %v1124_v9, %v1173_v63  ;;  %v1406_v62 = vsel %vm1175_vm1, %v1124_v9, %v1173_v63  ;;  %v1408_v25 = vsel %vm1178_vm2, %v1124_v9, %v1173_v63 }
 0x12b   : > { %v1410_v7 = vsel %vm1181_vm3, %v1124_v9, %v1173_v63  ;;  %6683 = vst.msk [vmem:[%s8017_s20 + $0x3c0] ss:$4 sm:$0x3] %vm7924_vm4, %v1405_v5  ;;  %v1407_v14 = vrot.slane %v1406_v62, 1  ;;  %v1409_v59 = vrot.slane %v1408_v25, 2  ;;  %v1412_v58 = vsel %vm1184_vm5, %v1124_v9, %v1173_v63 }
 0x12c   : > { %v1411_v26 = vrot.slane %v1410_v7, 3  ;;  %v1413_v47 = vrot.slane %v1412_v58, 4  ;;  %v1414_v49 = vsel %vm1187_vm6, %v1124_v9, %v1173_v63  ;;  %v1416_v8 = vsel %vm1190_vm7, %v1124_v9, %v1173_v63 }
 0x12d   : > { %v1418_v4 = vsel %vm421_vm8, %v1173_v63, %v1124_v9  ;;  %6684 = vst.msk [vmem:[%s8017_s20 + $0x3c8] ss:$4 sm:$0x3] %vm7924_vm4, %v1407_v14  ;;  %v1415_v5 = vrot.slane %v1414_v49, 5  ;;  %v1417_v62 = vrot.slane %v1416_v8, 6  ;;  %v1859_v7 = vadd.f32 %v1855_v31, %v1849_v53 }
 0x12e   : > { %v1419_v25 = vrot.slane %v1418_v4, 7  ;;  %6685 = vst.msk [vmem:[%s8017_s20 + $0x3d0] ss:$4 sm:$0x3] %vm7924_vm4, %v1409_v59  ;;  %v1860_v58 = vadd.f32 %v1856_v52, %v1850_v48  ;;  %v1821_v40 = vadd.f32 %v1817_v55, %v1811_v23  ;;  %v1822_v39 = vadd.f32 %v1818_v15, %v1812_v2 }
 0x12f   : > { %v1828_v9 = vmul.f32 %v9223_v46, %v13842_v6  ;;  %6686 = vst.msk [vmem:[%s8017_s20 + $0x3d8] ss:$4 sm:$0x3] %vm7924_vm4, %v1411_v26  ;;  %v1869_v63 = vadd.f32 %v1865_v43, %v1859_v7  ;;  %v1837_v49 = vmul.f32 %v9226_v60, %v7949_v10  ;;  %v1838_v31 = vmul.f32 %v9226_v60, %v7954_v11 }
 0x130   : > { %v1847_v53 = vmul.f32 %v9270_v41, %v7918_v29  ;;  %6687 = vst.msk [vmem:[%s8017_s20 + $0x3e0] ss:$4 sm:$0x3] %vm7924_vm4, %v1413_v47  ;;  %v1870_v52 = vadd.f32 %v1866_v42, %v1860_v58  ;;  %v1831_v46 = vadd.f32 %v1827_v45, %v1821_v40  ;;  %v1848_v43 = vmul.f32 %v9270_v41, %v7920_v28 }
 0x131   : > { %v1832_v48 = vadd.f32 %v1828_v9, %v1822_v39  ;;  %6688 = vst.msk [vmem:[%s8017_s20 + $0x3e8] ss:$4 sm:$0x3] %vm7924_vm4, %v1415_v5  ;;  %v1879_v23 = vadd.f32 %v1875_v51, %v1869_v63  ;;  %v1857_v60 = vmul.f32 %v9280_v0, %v7959_v13  ;;  %v1858_v2 = vmul.f32 %v9280_v0, %v7964_v19 }
 0x132   : > { %v1867_v4 = vmul.f32 %v9294_v1, %v7922_v27  ;;  %6689 = vst.msk [vmem:[%s8017_s20 + $0x3f0] ss:$4 sm:$0x3] %vm7924_vm4, %v1417_v62  ;;  %v1880_v39 = vadd.f32 %v1876_v44, %v1870_v52  ;;  %v1841_v40 = vadd.f32 %v1837_v49, %v1831_v46  ;;  %v1868_v42 = vmul.f32 %v9294_v1, %v7928_v57 }
 0x133   : > { %v1842_v41 = vadd.f32 %v1838_v31, %v1832_v48  ;;  %6690 = vst.msk [vmem:[%s8017_s20 + $0x3f8] ss:$4 sm:$0x3] %vm7924_vm4, %v1419_v25  ;;  %v1885_v0 = vadd.f32 %v9309_v50, %v1879_v23  ;;  %v1877_v51 = vmul.f32 %v9297_v3, %v7980_v61  ;;  %v1878_v55 = vmul.f32 %v9297_v3, %v7989_v37 }
 0x134   : > { %v9385_v44 = vstv %s9313_s10  ;;  %v1886_v8 = vadd.f32 %v9309_v50, %v1880_v39  ;;  %v1851_v15 = vadd.f32 %v1847_v53, %v1841_v40  ;;  %v9397_v59 = vstv %s9323_s15  ;;  %s9682_s10 = sld [smem:[#allocation8 + $0x5b]] }
 0x135   : > { %v1852_v45 = vadd.f32 %v1848_v43, %v1842_v41  ;;  %v1891_v1 = vmul.f32 %v9385_v44, %v7756_v12  ;;  %v1892_v14 = vmul.f32 %v9385_v44, %v7763_v16  ;;  %v9400_v26 = vstv %s9329_s29  ;;  %s9719_s15 = sld [smem:[#allocation8 + $0x5f]] }
 0x136   : > { %v9403_v3 = vstv %s9338_s23  ;;  %v2495_v47 = vrot.slane %v1886_v8, 7  ;;  %v1861_v5 = vadd.f32 %v1857_v60, %v1851_v15  ;;  %v1897_v25 = vmul.f32 %v9397_v59, %v7795_v32  ;;  %s9727_s29 = sld [smem:[#allocation8 + $0x9b]] }
 0x137   : > { %v1862_v62 = vadd.f32 %v1858_v2, %v1852_v45  ;;  %v1898_v7 = vmul.f32 %v9397_v59, %v7800_v33  ;;  %v1907_v58 = vmul.f32 %v9400_v26, %v7765_v17  ;;  %v1908_v9 = vmul.f32 %v9400_v26, %v7767_v18  ;;  %s9735_s23 = sld [smem:[#allocation8 + $0x9f]] }
 0x138   : > { %v1917_v63 = vmul.f32 %v9403_v3, %v7807_v34  ;;  %v2511_v49 = vsel %vm372_vm0, %v1885_v0, %v2495_v47  ;;  %v2512_v31 = vsel %vm1175_vm1, %v1885_v0, %v2495_v47  ;;  %v2514_v53 = vsel %vm1178_vm2, %v1885_v0, %v2495_v47 }
 0x139   : > { %v2516_v52 = vsel %vm1181_vm3, %v1885_v0, %v2495_v47  ;;  %6762 = vst.msk [vmem:[%s8017_s20 + $0x1] ss:$4 sm:$0x3] %vm7924_vm4, %v2511_v49  ;;  %v2513_v46 = vrot.slane %v2512_v31, 1  ;;  %v2515_v48 = vrot.slane %v2514_v53, 2  ;;  %v2518_v23 = vsel %vm1184_vm5, %v1885_v0, %v2495_v47 }
 0x13a   : > { %v2517_v43 = vrot.slane %v2516_v52, 3  ;;  %v2519_v60 = vrot.slane %v2518_v23, 4  ;;  %v2520_v2 = vsel %vm1187_vm6, %v1885_v0, %v2495_v47  ;;  %v2522_v39 = vsel %vm1190_vm7, %v1885_v0, %v2495_v47 }
 0x13b   : > { %v2524_v40 = vsel %vm421_vm8, %v2495_v47, %v1885_v0  ;;  %6763 = vst.msk [vmem:[%s8017_s20 + $0x9] ss:$4 sm:$0x3] %vm7924_vm4, %v2513_v46  ;;  %v2521_v41 = vrot.slane %v2520_v2, 5  ;;  %v2523_v8 = vrot.slane %v2522_v39, 6  ;;  %v1871_v45 = vadd.f32 %v1867_v4, %v1861_v5 }
 0x13c   : > { %v2525_v15 = vrot.slane %v2524_v40, 7  ;;  %6764 = vst.msk [vmem:[%s8017_s20 + $0x11] ss:$4 sm:$0x3] %vm7924_vm4, %v2515_v48  ;;  %v1872_v49 = vadd.f32 %v1868_v42, %v1862_v62  ;;  %v1901_v31 = vadd.f32 %v1897_v25, %v1891_v1  ;;  %v1902_v53 = vadd.f32 %v1898_v7, %v1892_v14 }
 0x13d   : > { %v1918_v52 = vmul.f32 %v9403_v3, %v7812_v35  ;;  %6765 = vst.msk [vmem:[%s8017_s20 + $0x19] ss:$4 sm:$0x3] %vm7924_vm4, %v2517_v43  ;;  %v1881_v0 = vadd.f32 %v1877_v51, %v1871_v45  ;;  %v9444_v47 = vstv %s9387_s30  ;;  %v9447_v46 = vstv %s9392_s7  ;;  %v13861_v45 = vld [vmem:[#allocation21_spill] sm:$0xff]  ;;  %s9742_s30 = sld [smem:[#allocation8 + $0xdb]] }
 0x13e   : > { %v9450_v4 = vstv %s9405_s26  ;;  %6766 = vst.msk [vmem:[%s8017_s20 + $0x21] ss:$4 sm:$0x3] %vm7924_vm4, %v2519_v60  ;;  %v1882_v42 = vadd.f32 %v1878_v55, %v1872_v49  ;;  %v1911_v1 = vadd.f32 %v1907_v58, %v1901_v31  ;;  %v1912_v14 = vadd.f32 %v1908_v9, %v1902_v53  ;;  %v13862_v49 = vld [vmem:[#allocation24_spill] sm:$0xff]  ;;  %v13863_v53 = vld [vmem:[#allocation25_spill] sm:$0xff]  ;;  %s9748_s7 = sld [smem:[#allocation8 + $0xdf]] }
 0x13f   : > { %v1927_v5 = vmul.f32 %v9444_v47, %v7772_v20  ;;  %6767 = vst.msk [vmem:[%s8017_s20 + $0x29] ss:$4 sm:$0x3] %vm7924_vm4, %v2521_v41  ;;  %v1887_v51 = vadd.f32 %v9309_v50, %v1881_v0  ;;  %v1928_v62 = vmul.f32 %v9444_v47, %v7774_v21  ;;  %v1937_v25 = vmul.f32 %v9447_v46, %v7817_v36  ;;  %v13860_v41 = vld [vmem:[#allocation19_spill] sm:$0xff]  ;;  %s9757_s26 = sld [smem:[#allocation9 + $0x3]] }
 0x140   : > { %v1938_v55 = vmul.f32 %v9447_v46, %v7825_v38  ;;  %6768 = vst.msk [vmem:[%s8017_s20 + $0x31] ss:$4 sm:$0x3] %vm7924_vm4, %v2523_v8  ;;  %v1888_v7 = vadd.f32 %v9309_v50, %v1882_v42  ;;  %v1921_v58 = vadd.f32 %v1917_v63, %v1911_v1  ;;  %v1922_v9 = vadd.f32 %v1918_v52, %v1912_v14 }
 0x141   : > { %v1947_v48 = vmul.f32 %v9450_v4, %v7776_v22  ;;  %6769 = vst.msk [vmem:[%s8017_s20 + $0x39] ss:$4 sm:$0x3] %vm7924_vm4, %v2525_v15  ;;  %v1948_v43 = vmul.f32 %v9450_v4, %v7781_v24  ;;  %v1956_v23 = vstv %s9417_s5  ;;  %v9480_v60 = vstv %s9423_s2  ;;  %s9822_s5 = sld [smem:[#allocation8 + $0x23]] }
 0x142   : > { %v1893_v2 = vmul.f32 %v9385_v44, %v13853_v30  ;;  %v2496_v39 = vrot.slane %v1888_v7, 7  ;;  %v1931_v50 = vadd.f32 %v1927_v5, %v1921_v58  ;;  %v1932_v63 = vadd.f32 %v1928_v62, %v1922_v9  ;;  %v13864_v30 = vld [vmem:[#allocation22_spill] sm:$0xff]  ;;  %s9830_s2 = sld [smem:[#allocation8 + $0x27]] }
 0x143   : > { %v1957_v40 = vmul.f32 %v1956_v23, %v7862_v54  ;;  %v1958_v8 = vmul.f32 %v1956_v23, %v13860_v41  ;;  %v1894_v15 = vmul.f32 %v9385_v44, %v13861_v45  ;;  %v1899_v31 = vmul.f32 %v9397_v59, %v13862_v49 }
 0x144   : > { %v1900_v52 = vmul.f32 %v9397_v59, %v13863_v53  ;;  %v2526_v0 = vsel %vm372_vm0, %v1887_v51, %v2496_v39  ;;  %v2527_v42 = vsel %vm1175_vm1, %v1887_v51, %v2496_v39  ;;  %v2529_v1 = vsel %vm1178_vm2, %v1887_v51, %v2496_v39 }
 0x145   : > { %v2531_v14 = vsel %vm1181_vm3, %v1887_v51, %v2496_v39  ;;  %6770 = vst.msk [vmem:[%s8017_s20 + $0x41] ss:$4 sm:$0x3] %vm7924_vm4, %v2526_v0  ;;  %v2528_v44 = vrot.slane %v2527_v42, 1  ;;  %v2530_v5 = vrot.slane %v2529_v1, 2  ;;  %v2533_v59 = vsel %vm1184_vm5, %v1887_v51, %v2496_v39 }
 0x146   : > { %v2532_v62 = vrot.slane %v2531_v14, 3  ;;  %v2534_v7 = vrot.slane %v2533_v59, 4  ;;  %v2535_v58 = vsel %vm1187_vm6, %v1887_v51, %v2496_v39  ;;  %v2537_v9 = vsel %vm1190_vm7, %v1887_v51, %v2496_v39 }
 0x147   : > { %v2539_v53 = vsel %vm421_vm8, %v2496_v39, %v1887_v51  ;;  %6771 = vst.msk [vmem:[%s8017_s20 + $0x49] ss:$4 sm:$0x3] %vm7924_vm4, %v2528_v44  ;;  %v2536_v0 = vrot.slane %v2535_v58, 5  ;;  %v2538_v42 = vrot.slane %v2537_v9, 6  ;;  %v1941_v14 = vadd.f32 %v1937_v25, %v1931_v50 }
 0x148   : > { %v2540_v1 = vrot.slane %v2539_v53, 7  ;;  %6772 = vst.msk [vmem:[%s8017_s20 + $0x51] ss:$4 sm:$0x3] %vm7924_vm4, %v2530_v5  ;;  %v1942_v59 = vadd.f32 %v1938_v55, %v1932_v63  ;;  %v1903_v49 = vadd.f32 %v1899_v31, %v1893_v2  ;;  %v1904_v45 = vadd.f32 %v1900_v52, %v1894_v15 }
 0x149   : > { %v1909_v51 = vmul.f32 %v9400_v26, %v13864_v30  ;;  %6773 = vst.msk [vmem:[%s8017_s20 + $0x59] ss:$4 sm:$0x3] %vm7924_vm4, %v2532_v62  ;;  %v1951_v39 = vadd.f32 %v1947_v48, %v1941_v14  ;;  %v1910_v25 = vmul.f32 %v9400_v26, %v13842_v6  ;;  %v1919_v50 = vmul.f32 %v9403_v3, %v7949_v10 }
 0x14a   : > { %v1920_v55 = vmul.f32 %v9403_v3, %v7954_v11  ;;  %6774 = vst.msk [vmem:[%s8017_s20 + $0x61] ss:$4 sm:$0x3] %vm7924_vm4, %v2534_v7  ;;  %v1952_v2 = vadd.f32 %v1948_v43, %v1942_v59  ;;  %v1929_v15 = vmul.f32 %v9444_v47, %v7918_v29  ;;  %v1930_v48 = vmul.f32 %v9444_v47, %v7920_v28 }
 0x14b   : > { %v1913_v63 = vadd.f32 %v1909_v51, %v1903_v49  ;;  %6775 = vst.msk [vmem:[%s8017_s20 + $0x69] ss:$4 sm:$0x3] %vm7924_vm4, %v2536_v0  ;;  %v1961_v26 = vadd.f32 %v1957_v40, %v1951_v39  ;;  %v1914_v31 = vadd.f32 %v1910_v25, %v1904_v45  ;;  %v1939_v3 = vmul.f32 %v9447_v46, %v7959_v13 }
 0x14c   : > { %v1940_v43 = vmul.f32 %v9447_v46, %v7964_v19  ;;  %6776 = vst.msk [vmem:[%s8017_s20 + $0x71] ss:$4 sm:$0x3] %vm7924_vm4, %v2538_v42  ;;  %v1962_v49 = vadd.f32 %v1958_v8, %v1952_v2  ;;  %v1949_v47 = vmul.f32 %v9450_v4, %v7922_v27  ;;  %v1950_v40 = vmul.f32 %v9450_v4, %v7928_v57 }
 0x14d   : > { %v1923_v53 = vadd.f32 %v1919_v50, %v1913_v63  ;;  %6777 = vst.msk [vmem:[%s8017_s20 + $0x79] ss:$4 sm:$0x3] %vm7924_vm4, %v2540_v1  ;;  %v1967_v45 = vadd.f32 %v9480_v60, %v1961_v26  ;;  %v1924_v52 = vadd.f32 %v1920_v55, %v1914_v31  ;;  %v1959_v46 = vmul.f32 %v1956_v23, %v7980_v61 }
 0x14e   : > { %v1960_v44 = vmul.f32 %v1956_v23, %v7989_v37  ;;  %v1968_v8 = vadd.f32 %v9480_v60, %v1962_v49  ;;  %v9555_v62 = vstv %s9496_s24  ;;  %v9558_v7 = vstv %s9505_s9  ;;  %s9836_s24 = sld [smem:[#allocation8 + $0x63]] }
 0x14f   : > { %v1933_v5 = vadd.f32 %v1929_v15, %v1923_v53  ;;  %v1934_v4 = vadd.f32 %v1930_v48, %v1924_v52  ;;  %v1973_v58 = vmul.f32 %v9555_v62, %v7756_v12  ;;  %v1974_v9 = vmul.f32 %v9555_v62, %v7763_v16  ;;  %s9845_s9 = sld [smem:[#allocation8 + $0x67]] }
 0x150   : > { %v1979_v0 = vmul.f32 %v9558_v7, %v7795_v32  ;;  %v2497_v23 = vrot.slane %v1968_v8, 7  ;;  %v1980_v1 = vmul.f32 %v9558_v7, %v7800_v33  ;;  %v9573_v14 = vstv %s9515_s12  ;;  %s9895_s12 = sld [smem:[#allocation8 + $0xa3]] }
 0x151   : > { %v1943_v42 = vadd.f32 %v1939_v3, %v1933_v5  ;;  %v1944_v59 = vadd.f32 %v1940_v43, %v1934_v4  ;;  %v1989_v39 = vmul.f32 %v9573_v14, %v7765_v17  ;;  %v1990_v25 = vmul.f32 %v9573_v14, %v7767_v18 }
 0x152   : > { %v1983_v51 = vadd.f32 %v1979_v0, %v1973_v58  ;;  %v2541_v50 = vsel %vm372_vm0, %v1967_v45, %v2497_v23  ;;  %v2542_v55 = vsel %vm1175_vm1, %v1967_v45, %v2497_v23  ;;  %v2544_v2 = vsel %vm1178_vm2, %v1967_v45, %v2497_v23 }
 0x153   : > { %v2546_v63 = vsel %vm1181_vm3, %v1967_v45, %v2497_v23  ;;  %6778 = vst.msk [vmem:[%s8017_s20 + $0x81] ss:$4 sm:$0x3] %vm7924_vm4, %v2541_v50  ;;  %v2543_v15 = vrot.slane %v2542_v55, 1  ;;  %v2545_v48 = vrot.slane %v2544_v2, 2  ;;  %v2548_v31 = vsel %vm1184_vm5, %v1967_v45, %v2497_v23 }
 0x154   : > { %v2547_v26 = vrot.slane %v2546_v63, 3  ;;  %v2549_v3 = vrot.slane %v2548_v31, 4  ;;  %v2550_v43 = vsel %vm1187_vm6, %v1967_v45, %v2497_v23  ;;  %v2552_v49 = vsel %vm1190_vm7, %v1967_v45, %v2497_v23 }
 0x155   : > { %v2554_v53 = vsel %vm421_vm8, %v2497_v23, %v1967_v45  ;;  %6779 = vst.msk [vmem:[%s8017_s20 + $0x89] ss:$4 sm:$0x3] %vm7924_vm4, %v2543_v15  ;;  %v2551_v52 = vrot.slane %v2550_v43, 5  ;;  %v2553_v8 = vrot.slane %v2552_v49, 6  ;;  %v1953_v4 = vadd.f32 %v1949_v47, %v1943_v42 }
 0x156   : > { %v2555_v5 = vrot.slane %v2554_v53, 7  ;;  %6780 = vst.msk [vmem:[%s8017_s20 + $0x91] ss:$4 sm:$0x3] %vm7924_vm4, %v2545_v48  ;;  %v1954_v58 = vadd.f32 %v1950_v40, %v1944_v59  ;;  %v1984_v0 = vadd.f32 %v1980_v1, %v1974_v9  ;;  %v1993_v50 = vadd.f32 %v1989_v39, %v1983_v51 }
 0x157   : > { %v9605_v45 = vstv %s9560_s3  ;;  %6781 = vst.msk [vmem:[%s8017_s20 + $0x99] ss:$4 sm:$0x3] %vm7924_vm4, %v2547_v26  ;;  %v1963_v23 = vadd.f32 %v1959_v46, %v1953_v4  ;;  %v9615_v42 = vstv %s9568_s13  ;;  %v2018_v39 = vstv %s9575_s8  ;;  %v13865_v4 = vld [vmem:[#allocation20_spill] sm:$0xff]  ;;  %s9901_s3 = sld [smem:[#allocation8 + $0xa7]] }
 0x158   : > { %v1999_v55 = vmul.f32 %v9605_v45, %v7807_v34  ;;  %v2000_v47 = vmul.f32 %v9605_v45, %v7812_v35  ;;  %6782 = vst.msk [vmem:[%s8017_s20 + $0xa1] ss:$4 sm:$0x3] %vm7924_vm4, %v2549_v3  ;;  %v1964_v40 = vadd.f32 %v1960_v44, %v1954_v58  ;;  %v1994_v9 = vadd.f32 %v1990_v25, %v1984_v0  ;;  %v13866_v58 = vld [vmem:[#allocation21_spill] sm:$0xff]  ;;  %s9912_s13 = sld [smem:[#allocation8 + $0xe3]] }
 0x159   : > { %v2009_v1 = vmul.f32 %v9615_v42, %v7772_v20  ;;  %v2010_v46 = vmul.f32 %v9615_v42, %v7774_v21  ;;  %6783 = vst.msk [vmem:[%s8017_s20 + $0xa9] ss:$4 sm:$0x3] %vm7924_vm4, %v2551_v52  ;;  %v1969_v59 = vadd.f32 %v9480_v60, %v1963_v23  ;;  %v9630_v2 = vstv %s9581_s11  ;;  %s9918_s8 = sld [smem:[#allocation8 + $0xe7]] }
 0x15a   : > { %v2003_v51 = vadd.f32 %v1999_v55, %v1993_v50  ;;  %6784 = vst.msk [vmem:[%s8017_s20 + $0xb1] ss:$4 sm:$0x3] %vm7924_vm4, %v2553_v8  ;;  %v1970_v44 = vadd.f32 %v9480_v60, %v1964_v40  ;;  %v2004_v25 = vadd.f32 %v2000_v47, %v1994_v9  ;;  %v2019_v63 = vmul.f32 %v2018_v39, %v7817_v36  ;;  %s9927_s11 = sld [smem:[#allocation9 + $0x4]] }
 0x15b   : > { %v2020_v15 = vmul.f32 %v2018_v39, %v7825_v38  ;;  %6785 = vst.msk [vmem:[%s8017_s20 + $0xb9] ss:$4 sm:$0x3] %vm7924_vm4, %v2555_v5  ;;  %v2029_v26 = vmul.f32 %v9630_v2, %v7776_v22  ;;  %v2030_v31 = vmul.f32 %v9630_v2, %v7781_v24  ;;  %v2038_v3 = vstv %s9587_s4  ;;  %s9997_s4 = sld [smem:[#allocation8 + $0x2b]] }
 0x15c   : > { %v2013_v48 = vadd.f32 %v2009_v1, %v2003_v51  ;;  %v2498_v43 = vrot.slane %v1970_v44, 7  ;;  %v2014_v49 = vadd.f32 %v2010_v46, %v2004_v25  ;;  %v2039_v60 = vmul.f32 %v2038_v3, %v7862_v54 }
 0x15d   : > { %v2040_v53 = vmul.f32 %v2038_v3, %v13860_v41  ;;  %v9649_v8 = vstv %s9596_s6  ;;  %v1975_v5 = vmul.f32 %v9555_v62, %v13865_v4  ;;  %v1976_v0 = vmul.f32 %v9555_v62, %v13866_v58  ;;  %v13868_v58 = vld [vmem:[#allocation25_spill] sm:$0xff]  ;;  %s10007_s6 = sld [smem:[#allocation8 + $0x2f]] }
 0x15e   : > { %v2023_v52 = vadd.f32 %v2019_v63, %v2013_v48  ;;  %v2556_v50 = vsel %vm372_vm0, %v1969_v59, %v2498_v43  ;;  %v2557_v23 = vsel %vm1175_vm1, %v1969_v59, %v2498_v43  ;;  %v2559_v55 = vsel %vm1178_vm2, %v1969_v59, %v2498_v43 }
 0x15f   : > { %v2561_v47 = vsel %vm1181_vm3, %v1969_v59, %v2498_v43  ;;  %6786 = vst.msk [vmem:[%s8017_s20 + $0xc1] ss:$4 sm:$0x3] %vm7924_vm4, %v2556_v50  ;;  %v2558_v40 = vrot.slane %v2557_v23, 1  ;;  %v2560_v9 = vrot.slane %v2559_v55, 2  ;;  %v2563_v62 = vsel %vm1184_vm5, %v1969_v59, %v2498_v43 }
 0x160   : > { %v2562_v1 = vrot.slane %v2561_v47, 3  ;;  %v2564_v46 = vrot.slane %v2563_v62, 4  ;;  %v2565_v51 = vsel %vm1187_vm6, %v1969_v59, %v2498_v43  ;;  %v2567_v44 = vsel %vm1190_vm7, %v1969_v59, %v2498_v43  ;;  %v13867_v47 = vld [vmem:[#allocation24_spill] sm:$0xff] }
 0x161   : > { %v2569_v25 = vsel %vm421_vm8, %v2498_v43, %v1969_v59  ;;  %6787 = vst.msk [vmem:[%s8017_s20 + $0xc9] ss:$4 sm:$0x3] %vm7924_vm4, %v2558_v40  ;;  %v2566_v63 = vrot.slane %v2565_v51, 5  ;;  %v2568_v48 = vrot.slane %v2567_v44, 6  ;;  %v2024_v23 = vadd.f32 %v2020_v15, %v2014_v49 }
 0x162   : > { %v2570_v50 = vrot.slane %v2569_v25, 7  ;;  %6788 = vst.msk [vmem:[%s8017_s20 + $0xd1] ss:$4 sm:$0x3] %vm7924_vm4, %v2560_v9  ;;  %v2033_v55 = vadd.f32 %v2029_v26, %v2023_v52  ;;  %v1981_v62 = vmul.f32 %v9558_v7, %v13867_v47  ;;  %v1982_v59 = vmul.f32 %v9558_v7, %v13868_v58 }
 0x163   : > { %v1991_v43 = vmul.f32 %v9573_v14, %v13864_v30  ;;  %6789 = vst.msk [vmem:[%s8017_s20 + $0xd9] ss:$4 sm:$0x3] %vm7924_vm4, %v2562_v1  ;;  %v2034_v15 = vadd.f32 %v2030_v31, %v2024_v23  ;;  %v1992_v49 = vmul.f32 %v9573_v14, %v13842_v6  ;;  %v2001_v26 = vmul.f32 %v9605_v45, %v7949_v10 }
 0x164   : > { %v2002_v52 = vmul.f32 %v9605_v45, %v7954_v11  ;;  %6790 = vst.msk [vmem:[%s8017_s20 + $0xe1] ss:$4 sm:$0x3] %vm7924_vm4, %v2564_v46  ;;  %v2043_v7 = vadd.f32 %v2039_v60, %v2033_v55  ;;  %v1985_v40 = vadd.f32 %v1981_v62, %v1975_v5  ;;  %v1986_v9 = vadd.f32 %v1982_v59, %v1976_v0 }
 0x165   : > { %v2011_v1 = vmul.f32 %v9615_v42, %v7918_v29  ;;  %6791 = vst.msk [vmem:[%s8017_s20 + $0xe9] ss:$4 sm:$0x3] %vm7924_vm4, %v2566_v63  ;;  %v2044_v14 = vadd.f32 %v2040_v53, %v2034_v15  ;;  %v2012_v31 = vmul.f32 %v9615_v42, %v7920_v28  ;;  %v2021_v45 = vmul.f32 %v2018_v39, %v7959_v13 }
 0x166   : > { %v2022_v51 = vmul.f32 %v2018_v39, %v7964_v19  ;;  %6792 = vst.msk [vmem:[%s8017_s20 + $0xf1] ss:$4 sm:$0x3] %vm7924_vm4, %v2568_v48  ;;  %v2049_v60 = vadd.f32 %v9649_v8, %v2043_v7  ;;  %v1995_v5 = vadd.f32 %v1991_v43, %v1985_v40  ;;  %v1996_v0 = vadd.f32 %v1992_v49, %v1986_v9 }
 0x167   : > { %v2031_v46 = vmul.f32 %v9630_v2, %v7922_v27  ;;  %6793 = vst.msk [vmem:[%s8017_s20 + $0xf9] ss:$4 sm:$0x3] %vm7924_vm4, %v2570_v50  ;;  %v2050_v42 = vadd.f32 %v9649_v8, %v2044_v14  ;;  %v2032_v53 = vmul.f32 %v9630_v2, %v7928_v57  ;;  %v2041_v39 = vmul.f32 %v2038_v3, %v7980_v61 }
 0x168   : > { %v2042_v44 = vmul.f32 %v2038_v3, %v7989_v37  ;;  %v2005_v25 = vadd.f32 %v2001_v26, %v1995_v5  ;;  %v2006_v63 = vadd.f32 %v2002_v52, %v1996_v0  ;;  %v9722_v48 = vstv %s9659_s25  ;;  %s10013_s25 = sld [smem:[#allocation8 + $0x6b]] }
 0x169   : > { %v9725_v23 = vstv %s9668_s27  ;;  %v2499_v50 = vrot.slane %v2050_v42, 7  ;;  %v2055_v2 = vmul.f32 %v9722_v48, %v7756_v12  ;;  %v2056_v55 = vmul.f32 %v9722_v48, %v7763_v16  ;;  %s10022_s27 = sld [smem:[#allocation8 + $0x6f]] }
 0x16a   : > { %v2061_v3 = vmul.f32 %v9725_v23, %v7795_v32  ;;  %v2015_v62 = vadd.f32 %v2011_v1, %v2005_v25  ;;  %v2016_v59 = vadd.f32 %v2012_v31, %v2006_v63  ;;  %v2062_v43 = vmul.f32 %v9725_v23, %v7800_v33 }
 0x16b   : > { %v9740_v15 = vstv %s9682_s10  ;;  %v2571_v49 = vsel %vm372_vm0, %v2049_v60, %v2499_v50  ;;  %v2572_v26 = vsel %vm1175_vm1, %v2049_v60, %v2499_v50  ;;  %v2574_v52 = vsel %vm1178_vm2, %v2049_v60, %v2499_v50  ;;  %s10071_s10 = sld [smem:[#allocation8 + $0xab]] }
 0x16c   : > { %v2576_v7 = vsel %vm1181_vm3, %v2049_v60, %v2499_v50  ;;  %6794 = vst.msk [vmem:[%s8017_s20 + $0x101] ss:$4 sm:$0x3] %vm7924_vm4, %v2571_v49  ;;  %v2573_v40 = vrot.slane %v2572_v26, 1  ;;  %v2575_v9 = vrot.slane %v2574_v52, 2  ;;  %v2578_v14 = vsel %vm1184_vm5, %v2049_v60, %v2499_v50 }
 0x16d   : > { %v2577_v1 = vrot.slane %v2576_v7, 3  ;;  %v2579_v31 = vrot.slane %v2578_v14, 4  ;;  %v2580_v5 = vsel %vm1187_vm6, %v2049_v60, %v2499_v50  ;;  %v2582_v0 = vsel %vm1190_vm7, %v2049_v60, %v2499_v50 }
 0x16e   : > { %v2584_v42 = vsel %vm421_vm8, %v2499_v50, %v2049_v60  ;;  %6795 = vst.msk [vmem:[%s8017_s20 + $0x109] ss:$4 sm:$0x3] %vm7924_vm4, %v2573_v40  ;;  %v2581_v25 = vrot.slane %v2580_v5, 5  ;;  %v2583_v63 = vrot.slane %v2582_v0, 6  ;;  %v2025_v26 = vadd.f32 %v2021_v45, %v2015_v62 }
 0x16f   : > { %v2585_v49 = vrot.slane %v2584_v42, 7  ;;  %6796 = vst.msk [vmem:[%s8017_s20 + $0x111] ss:$4 sm:$0x3] %vm7924_vm4, %v2575_v9  ;;  %v2026_v52 = vadd.f32 %v2022_v51, %v2016_v59  ;;  %v2065_v7 = vadd.f32 %v2061_v3, %v2055_v2  ;;  %v2066_v14 = vadd.f32 %v2062_v43, %v2056_v55 }
 0x170   : > { %v2071_v60 = vmul.f32 %v9740_v15, %v7765_v17  ;;  %6797 = vst.msk [vmem:[%s8017_s20 + $0x119] ss:$4 sm:$0x3] %vm7924_vm4, %v2577_v1  ;;  %v2035_v50 = vadd.f32 %v2031_v46, %v2025_v26  ;;  %v2072_v40 = vmul.f32 %v9740_v15, %v7767_v18  ;;  %v9773_v45 = vstv %s9719_s15  ;;  %s10076_s15 = sld [smem:[#allocation8 + $0xaf]] }
 0x171   : > { %v9776_v62 = vstv %s9727_s29  ;;  %6798 = vst.msk [vmem:[%s8017_s20 + $0x121] ss:$4 sm:$0x3] %vm7924_vm4, %v2579_v31  ;;  %v2036_v51 = vadd.f32 %v2032_v53, %v2026_v52  ;;  %v2081_v55 = vmul.f32 %v9773_v45, %v7807_v34  ;;  %v2082_v46 = vmul.f32 %v9773_v45, %v7812_v35  ;;  %s10089_s29 = sld [smem:[#allocation8 + $0xeb]] }
 0x172   : > { %v2075_v2 = vadd.f32 %v2071_v60, %v2065_v7  ;;  %6799 = vst.msk [vmem:[%s8017_s20 + $0x129] ss:$4 sm:$0x3] %vm7924_vm4, %v2581_v25  ;;  %v2045_v3 = vadd.f32 %v2041_v39, %v2035_v50  ;;  %v2076_v59 = vadd.f32 %v2072_v40, %v2066_v14  ;;  %v2091_v43 = vmul.f32 %v9776_v62, %v7772_v20 }
 0x173   : > { %v2092_v9 = vmul.f32 %v9776_v62, %v7774_v21  ;;  %6800 = vst.msk [vmem:[%s8017_s20 + $0x131] ss:$4 sm:$0x3] %vm7924_vm4, %v2583_v63  ;;  %v2046_v53 = vadd.f32 %v2042_v44, %v2036_v51  ;;  %v9796_v31 = vstv %s9735_s23  ;;  %v9799_v5 = vstv %s9742_s30  ;;  %s10101_s23 = sld [smem:[#allocation8 + $0xef]] }
 0x174   : > { %v2085_v1 = vadd.f32 %v2081_v55, %v2075_v2  ;;  %6801 = vst.msk [vmem:[%s8017_s20 + $0x139] ss:$4 sm:$0x3] %vm7924_vm4, %v2585_v49  ;;  %v2051_v39 = vadd.f32 %v9649_v8, %v2045_v3  ;;  %v2086_v0 = vadd.f32 %v2082_v46, %v2076_v59  ;;  %v2101_v42 = vmul.f32 %v9796_v31, %v7817_v36  ;;  %v13869_v55 = vld [vmem:[#allocation21_spill] sm:$0xff]  ;;  %s10107_s30 = sld [smem:[#allocation9 + $0x5]] }
 0x175   : > { %v2102_v25 = vmul.f32 %v9796_v31, %v7825_v38  ;;  %v2052_v63 = vadd.f32 %v9649_v8, %v2046_v53  ;;  %v2111_v26 = vmul.f32 %v9799_v5, %v7776_v22  ;;  %v2112_v52 = vmul.f32 %v9799_v5, %v7781_v24 }
 0x176   : > { %v2095_v44 = vadd.f32 %v2091_v43, %v2085_v1  ;;  %v2096_v7 = vadd.f32 %v2092_v9, %v2086_v0  ;;  %v2120_v49 = vstv %s9748_s7  ;;  %v9816_v14 = vstv %s9757_s26  ;;  %s10180_s7 = sld [smem:[#allocation8 + $0x33]] }
 0x177   : > { %v2057_v60 = vmul.f32 %v9722_v48, %v13865_v4  ;;  %v2500_v50 = vrot.slane %v2052_v63, 7  ;;  %v2121_v51 = vmul.f32 %v2120_v49, %v7862_v54  ;;  %v2122_v8 = vmul.f32 %v2120_v49, %v13860_v41  ;;  %s10189_s26 = sld [smem:[#allocation8 + $0x37]] }
 0x178   : > { %v2105_v40 = vadd.f32 %v2101_v42, %v2095_v44  ;;  %v2106_v2 = vadd.f32 %v2102_v25, %v2096_v7  ;;  %v2058_v46 = vmul.f32 %v9722_v48, %v13869_v55  ;;  %v2063_v3 = vmul.f32 %v9725_v23, %v13867_v47 }
 0x179   : > { %v2064_v59 = vmul.f32 %v9725_v23, %v13868_v58  ;;  %v2586_v43 = vsel %vm372_vm0, %v2051_v39, %v2500_v50  ;;  %v2587_v9 = vsel %vm1175_vm1, %v2051_v39, %v2500_v50  ;;  %v2589_v53 = vsel %vm1178_vm2, %v2051_v39, %v2500_v50 }
 0x17a   : > { %v2591_v1 = vsel %vm1181_vm3, %v2051_v39, %v2500_v50  ;;  %6802 = vst.msk [vmem:[%s8017_s20 + $0x141] ss:$4 sm:$0x3] %vm7924_vm4, %v2586_v43  ;;  %v2588_v48 = vrot.slane %v2587_v9, 1  ;;  %v2590_v0 = vrot.slane %v2589_v53, 2  ;;  %v2593_v42 = vsel %vm1184_vm5, %v2051_v39, %v2500_v50 }
 0x17b   : > { %v2592_v23 = vrot.slane %v2591_v1, 3  ;;  %v2594_v25 = vrot.slane %v2593_v42, 4  ;;  %v2595_v63 = vsel %vm1187_vm6, %v2051_v39, %v2500_v50  ;;  %v2597_v44 = vsel %vm1190_vm7, %v2051_v39, %v2500_v50 }
 0x17c   : > { %v2599_v7 = vsel %vm421_vm8, %v2500_v50, %v2051_v39  ;;  %6803 = vst.msk [vmem:[%s8017_s20 + $0x149] ss:$4 sm:$0x3] %vm7924_vm4, %v2588_v48  ;;  %v2596_v43 = vrot.slane %v2595_v63, 5  ;;  %v2598_v9 = vrot.slane %v2597_v44, 6  ;;  %v2115_v1 = vadd.f32 %v2111_v26, %v2105_v40 }
 0x17d   : > { %v2600_v53 = vrot.slane %v2599_v7, 7  ;;  %6804 = vst.msk [vmem:[%s8017_s20 + $0x151] ss:$4 sm:$0x3] %vm7924_vm4, %v2590_v0  ;;  %v2116_v42 = vadd.f32 %v2112_v52, %v2106_v2  ;;  %v2067_v58 = vadd.f32 %v2063_v3, %v2057_v60  ;;  %v2068_v47 = vadd.f32 %v2064_v59, %v2058_v46 }
 0x17e   : > { %v2073_v39 = vmul.f32 %v9740_v15, %v13864_v30  ;;  %6805 = vst.msk [vmem:[%s8017_s20 + $0x159] ss:$4 sm:$0x3] %vm7924_vm4, %v2592_v23  ;;  %v2125_v50 = vadd.f32 %v2121_v51, %v2115_v1  ;;  %v2074_v48 = vmul.f32 %v9740_v15, %v13842_v6  ;;  %v2083_v26 = vmul.f32 %v9773_v45, %v7949_v10 }
 0x17f   : > { %v2084_v40 = vmul.f32 %v9773_v45, %v7954_v11  ;;  %6806 = vst.msk [vmem:[%s8017_s20 + $0x161] ss:$4 sm:$0x3] %vm7924_vm4, %v2594_v25  ;;  %v2126_v52 = vadd.f32 %v2122_v8, %v2116_v42  ;;  %v2093_v2 = vmul.f32 %v9776_v62, %v7918_v29  ;;  %v2094_v51 = vmul.f32 %v9776_v62, %v7920_v28 }
 0x180   : > { %v2077_v60 = vadd.f32 %v2073_v39, %v2067_v58  ;;  %6807 = vst.msk [vmem:[%s8017_s20 + $0x169] ss:$4 sm:$0x3] %vm7924_vm4, %v2596_v43  ;;  %v2131_v15 = vadd.f32 %v9816_v14, %v2125_v50  ;;  %v2078_v46 = vadd.f32 %v2074_v48, %v2068_v47  ;;  %v2103_v45 = vmul.f32 %v9796_v31, %v7959_v13 }
 0x181   : > { %v2104_v8 = vmul.f32 %v9796_v31, %v7964_v19  ;;  %6808 = vst.msk [vmem:[%s8017_s20 + $0x171] ss:$4 sm:$0x3] %vm7924_vm4, %v2598_v9  ;;  %v2132_v58 = vadd.f32 %v9816_v14, %v2126_v52  ;;  %v2113_v62 = vmul.f32 %v9799_v5, %v7922_v27  ;;  %v2114_v47 = vmul.f32 %v9799_v5, %v7928_v57 }
 0x182   : > { %v2087_v3 = vadd.f32 %v2083_v26, %v2077_v60  ;;  %6809 = vst.msk [vmem:[%s8017_s20 + $0x179] ss:$4 sm:$0x3] %vm7924_vm4, %v2600_v53  ;;  %v2088_v59 = vadd.f32 %v2084_v40, %v2078_v46  ;;  %v2123_v31 = vmul.f32 %v2120_v49, %v7980_v61  ;;  %v2124_v0 = vmul.f32 %v2120_v49, %v7989_v37 }
 0x183   : > { %v9893_v23 = vstv %s9822_s5  ;;  %v2501_v25 = vrot.slane %v2132_v58, 7  ;;  %v9904_v43 = vstv %s9830_s2  ;;  %v9907_v9 = vstv %s9836_s24  ;;  %s10199_s5 = sld [smem:[#allocation8 + $0x73]] }
 0x184   : > { %v2097_v63 = vadd.f32 %v2093_v2, %v2087_v3  ;;  %v2137_v44 = vmul.f32 %v9893_v23, %v7756_v12  ;;  %v2138_v5 = vmul.f32 %v9893_v23, %v7763_v16  ;;  %v2098_v7 = vadd.f32 %v2094_v51, %v2088_v59  ;;  %s10244_s2 = sld [smem:[#allocation8 + $0x77]] }
 0x185   : > { %v9910_v49 = vstv %s9845_s9  ;;  %v2601_v53 = vsel %vm372_vm0, %v2131_v15, %v2501_v25  ;;  %v2602_v1 = vsel %vm1175_vm1, %v2131_v15, %v2501_v25  ;;  %v2604_v42 = vsel %vm1178_vm2, %v2131_v15, %v2501_v25  ;;  %s10252_s24 = sld [smem:[#allocation8 + $0xb3]] }
 0x186   : > { %v2606_v39 = vsel %vm1181_vm3, %v2131_v15, %v2501_v25  ;;  %6810 = vst.msk [vmem:[%s8017_s20 + $0x181] ss:$4 sm:$0x3] %vm7924_vm4, %v2601_v53  ;;  %v2603_v50 = vrot.slane %v2602_v1, 1  ;;  %v2605_v48 = vrot.slane %v2604_v42, 2  ;;  %v2608_v40 = vsel %vm1184_vm5, %v2131_v15, %v2501_v25  ;;  %s10259_s9 = sld [smem:[#allocation8 + $0xb7]] }
 0x187   : > { %v2607_v26 = vrot.slane %v2606_v39, 3  ;;  %v2609_v52 = vrot.slane %v2608_v40, 4  ;;  %v2610_v60 = vsel %vm1187_vm6, %v2131_v15, %v2501_v25  ;;  %v2612_v2 = vsel %vm1190_vm7, %v2131_v15, %v2501_v25 }
 0x188   : > { %v2614_v51 = vsel %vm421_vm8, %v2501_v25, %v2131_v15  ;;  %6811 = vst.msk [vmem:[%s8017_s20 + $0x189] ss:$4 sm:$0x3] %vm7924_vm4, %v2603_v50  ;;  %v2611_v46 = vrot.slane %v2610_v60, 5  ;;  %v2613_v58 = vrot.slane %v2612_v2, 6  ;;  %v2107_v59 = vadd.f32 %v2103_v45, %v2097_v63 }
 0x189   : > { %v2615_v3 = vrot.slane %v2614_v51, 7  ;;  %6812 = vst.msk [vmem:[%s8017_s20 + $0x191] ss:$4 sm:$0x3] %vm7924_vm4, %v2605_v48  ;;  %v2108_v53 = vadd.f32 %v2104_v8, %v2098_v7  ;;  %v2143_v1 = vmul.f32 %v9904_v43, %v7795_v32  ;;  %v2144_v15 = vmul.f32 %v9904_v43, %v7800_v33 }
 0x18a   : > { %v2153_v25 = vmul.f32 %v9907_v9, %v7765_v17  ;;  %6813 = vst.msk [vmem:[%s8017_s20 + $0x199] ss:$4 sm:$0x3] %vm7924_vm4, %v2607_v26  ;;  %v2117_v45 = vadd.f32 %v2113_v62, %v2107_v59  ;;  %v2154_v63 = vmul.f32 %v9907_v9, %v7767_v18  ;;  %v2163_v8 = vmul.f32 %v9910_v49, %v7807_v34 }
 0x18b   : > { %v2164_v7 = vmul.f32 %v9910_v49, %v7812_v35  ;;  %6814 = vst.msk [vmem:[%s8017_s20 + $0x1a1] ss:$4 sm:$0x3] %vm7924_vm4, %v2609_v52  ;;  %v2118_v42 = vadd.f32 %v2114_v47, %v2108_v53  ;;  %v2147_v39 = vadd.f32 %v2143_v1, %v2137_v44  ;;  %v2148_v50 = vadd.f32 %v2144_v15, %v2138_v5 }
 0x18c   : > { %v9954_v48 = vstv %s9895_s12  ;;  %6815 = vst.msk [vmem:[%s8017_s20 + $0x1a9] ss:$4 sm:$0x3] %vm7924_vm4, %v2611_v46  ;;  %v2127_v62 = vadd.f32 %v2123_v31, %v2117_v45  ;;  %v9964_v60 = vstv %s9901_s3  ;;  %v9978_v51 = vstv %s9912_s13  ;;  %s10265_s12 = sld [smem:[#allocation8 + $0xf3]] }
 0x18d   : > { %v2173_v26 = vmul.f32 %v9954_v48, %v7772_v20  ;;  %v2174_v40 = vmul.f32 %v9954_v48, %v7774_v21  ;;  %6816 = vst.msk [vmem:[%s8017_s20 + $0x1b1] ss:$4 sm:$0x3] %vm7924_vm4, %v2613_v58  ;;  %v2128_v47 = vadd.f32 %v2124_v0, %v2118_v42  ;;  %v2157_v44 = vadd.f32 %v2153_v25, %v2147_v39  ;;  %v13870_v42 = vld [vmem:[#allocation24_spill] sm:$0xff]  ;;  %s10271_s3 = sld [smem:[#allocation8 + $0xf7]] }
 0x18e   : > { %v2158_v5 = vadd.f32 %v2154_v63, %v2148_v50  ;;  %v2183_v52 = vmul.f32 %v9964_v60, %v7817_v36  ;;  %6817 = vst.msk [vmem:[%s8017_s20 + $0x1b9] ss:$4 sm:$0x3] %vm7924_vm4, %v2615_v3  ;;  %v2133_v31 = vadd.f32 %v9816_v14, %v2127_v62  ;;  %v2184_v2 = vmul.f32 %v9964_v60, %v7825_v38  ;;  %v13871_v50 = vld [vmem:[#allocation25_spill] sm:$0xff]  ;;  %s10280_s13 = sld [smem:[#allocation9 + $0x6]] }
 0x18f   : > { %v9981_v46 = vstv %s9918_s8  ;;  %v2134_v0 = vadd.f32 %v9816_v14, %v2128_v47  ;;  %v2167_v58 = vadd.f32 %v2163_v8, %v2157_v44  ;;  %v2193_v53 = vmul.f32 %v9978_v51, %v7776_v22  ;;  %s10343_s8 = sld [smem:[#allocation8 + $0x3b]] }
 0x190   : > { %v2168_v59 = vadd.f32 %v2164_v7, %v2158_v5  ;;  %v2194_v1 = vmul.f32 %v9978_v51, %v7781_v24  ;;  %v2203_v3 = vmul.f32 %v9981_v46, %v7862_v54  ;;  %v2204_v15 = vmul.f32 %v9981_v46, %v13860_v41 }
 0x191   : > { %v9993_v25 = vstv %s9927_s11  ;;  %v2502_v45 = vrot.slane %v2134_v0, 7  ;;  %v2177_v63 = vadd.f32 %v2173_v26, %v2167_v58  ;;  %v2139_v8 = vmul.f32 %v9893_v23, %v13865_v4  ;;  %s10352_s11 = sld [smem:[#allocation8 + $0x3f]] }
 0x192   : > { %v2178_v14 = vadd.f32 %v2174_v40, %v2168_v59  ;;  %v2140_v7 = vmul.f32 %v9893_v23, %v13869_v55  ;;  %v2145_v39 = vmul.f32 %v9904_v43, %v13870_v42  ;;  %v2146_v62 = vmul.f32 %v9904_v43, %v13871_v50 }
 0x193   : > { %v2155_v47 = vmul.f32 %v9907_v9, %v13864_v30  ;;  %v2616_v26 = vsel %vm372_vm0, %v2133_v31, %v2502_v45  ;;  %v2617_v40 = vsel %vm1175_vm1, %v2133_v31, %v2502_v45  ;;  %v2619_v44 = vsel %vm1178_vm2, %v2133_v31, %v2502_v45 }
 0x194   : > { %v2621_v23 = vsel %vm1181_vm3, %v2133_v31, %v2502_v45  ;;  %6818 = vst.msk [vmem:[%s8017_s20 + $0x1c1] ss:$4 sm:$0x3] %vm7924_vm4, %v2616_v26  ;;  %v2618_v43 = vrot.slane %v2617_v40, 1  ;;  %v2620_v5 = vrot.slane %v2619_v44, 2  ;;  %v2623_v58 = vsel %vm1184_vm5, %v2133_v31, %v2502_v45 }
 0x195   : > { %v2622_v0 = vrot.slane %v2621_v23, 3  ;;  %v2624_v59 = vrot.slane %v2623_v58, 4  ;;  %v2625_v30 = vsel %vm1187_vm6, %v2133_v31, %v2502_v45  ;;  %v2627_v50 = vsel %vm1190_vm7, %v2133_v31, %v2502_v45 }
 0x196   : > { %v2629_v42 = vsel %vm421_vm8, %v2502_v45, %v2133_v31  ;;  %6819 = vst.msk [vmem:[%s8017_s20 + $0x1c9] ss:$4 sm:$0x3] %vm7924_vm4, %v2618_v43  ;;  %v2626_v26 = vrot.slane %v2625_v30, 5  ;;  %v2628_v40 = vrot.slane %v2627_v50, 6  ;;  %v2187_v23 = vadd.f32 %v2183_v52, %v2177_v63 }
 0x197   : > { %v2630_v44 = vrot.slane %v2629_v42, 7  ;;  %6820 = vst.msk [vmem:[%s8017_s20 + $0x1d1] ss:$4 sm:$0x3] %vm7924_vm4, %v2620_v5  ;;  %v2188_v58 = vadd.f32 %v2184_v2, %v2178_v14  ;;  %v2149_v55 = vadd.f32 %v2145_v39, %v2139_v8  ;;  %v2150_v41 = vadd.f32 %v2146_v62, %v2140_v7 }
 0x198   : > { %v2156_v31 = vmul.f32 %v9907_v9, %v13842_v6  ;;  %6821 = vst.msk [vmem:[%s8017_s20 + $0x1d9] ss:$4 sm:$0x3] %vm7924_vm4, %v2622_v0  ;;  %v2197_v45 = vadd.f32 %v2193_v53, %v2187_v23  ;;  %v2165_v30 = vmul.f32 %v9910_v49, %v7949_v10  ;;  %v2166_v52 = vmul.f32 %v9910_v49, %v7954_v11 }
 0x199   : > { %v2175_v63 = vmul.f32 %v9954_v48, %v7918_v29  ;;  %6822 = vst.msk [vmem:[%s8017_s20 + $0x1e1] ss:$4 sm:$0x3] %vm7924_vm4, %v2624_v59  ;;  %v2198_v2 = vadd.f32 %v2194_v1, %v2188_v58  ;;  %v2159_v9 = vadd.f32 %v2155_v47, %v2149_v55  ;;  %v2176_v53 = vmul.f32 %v9954_v48, %v7920_v28 }
 0x19a   : > { %v2160_v14 = vadd.f32 %v2156_v31, %v2150_v41  ;;  %6823 = vst.msk [vmem:[%s8017_s20 + $0x1e9] ss:$4 sm:$0x3] %vm7924_vm4, %v2626_v26  ;;  %v2207_v8 = vadd.f32 %v2203_v3, %v2197_v45  ;;  %v2185_v49 = vmul.f32 %v9964_v60, %v7959_v13  ;;  %v2186_v7 = vmul.f32 %v9964_v60, %v7964_v19 }
 0x19b   : > { %v2195_v42 = vmul.f32 %v9978_v51, %v7922_v27  ;;  %6824 = vst.msk [vmem:[%s8017_s20 + $0x1f1] ss:$4 sm:$0x3] %vm7924_vm4, %v2628_v40  ;;  %v2208_v41 = vadd.f32 %v2204_v15, %v2198_v2  ;;  %v2169_v55 = vadd.f32 %v2165_v30, %v2159_v9  ;;  %v2196_v1 = vmul.f32 %v9978_v51, %v7928_v57 }
 0x19c   : > { %v2170_v48 = vadd.f32 %v2166_v52, %v2160_v14  ;;  %6825 = vst.msk [vmem:[%s8017_s20 + $0x1f9] ss:$4 sm:$0x3] %vm7924_vm4, %v2630_v44  ;;  %v2213_v60 = vadd.f32 %v9993_v25, %v2207_v8  ;;  %v2205_v3 = vmul.f32 %v9981_v46, %v7980_v61  ;;  %v2206_v39 = vmul.f32 %v9981_v46, %v7989_v37 }
 0x19d   : > { %v10069_v15 = vstv %s9997_s4  ;;  %v2214_v50 = vadd.f32 %v9993_v25, %v2208_v41  ;;  %v2179_v62 = vadd.f32 %v2175_v63, %v2169_v55  ;;  %v10081_v5 = vstv %s10007_s6  ;;  %s10366_s4 = sld [smem:[#allocation8 + $0x7b]] }
 0x19e   : > { %v2180_v47 = vadd.f32 %v2176_v53, %v2170_v48  ;;  %v2219_v51 = vmul.f32 %v10069_v15, %v7756_v12  ;;  %v2220_v43 = vmul.f32 %v10069_v15, %v7763_v16  ;;  %v10084_v0 = vstv %s10013_s25  ;;  %s10403_s6 = sld [smem:[#allocation8 + $0x7f]] }
 0x19f   : > { %v10087_v46 = vstv %s10022_s27  ;;  %v2503_v59 = vrot.slane %v2214_v50, 7  ;;  %v2189_v26 = vadd.f32 %v2185_v49, %v2179_v62  ;;  %v2225_v44 = vmul.f32 %v10081_v5, %v7795_v32  ;;  %s10411_s25 = sld [smem:[#allocation8 + $0xbb]] }
 0x1a0   : > { %v2190_v40 = vadd.f32 %v2186_v7, %v2180_v47  ;;  %v2226_v23 = vmul.f32 %v10081_v5, %v7800_v33  ;;  %v2235_v58 = vmul.f32 %v10084_v0, %v7765_v17  ;;  %v2236_v31 = vmul.f32 %v10084_v0, %v7767_v18  ;;  %s10419_s27 = sld [smem:[#allocation8 + $0xbf]] }
 0x1a1   : > { %v2245_v45 = vmul.f32 %v10087_v46, %v7807_v34  ;;  %v2631_v30 = vsel %vm372_vm0, %v2213_v60, %v2503_v59  ;;  %v2632_v52 = vsel %vm1175_vm1, %v2213_v60, %v2503_v59  ;;  %v2634_v63 = vsel %vm1178_vm2, %v2213_v60, %v2503_v59 }
 0x1a2   : > { %v2636_v2 = vsel %vm1181_vm3, %v2213_v60, %v2503_v59  ;;  %6826 = vst.msk [vmem:[%s8017_s20 + $0x201] ss:$4 sm:$0x3] %vm7924_vm4, %v2631_v30  ;;  %v2633_v9 = vrot.slane %v2632_v52, 1  ;;  %v2635_v14 = vrot.slane %v2634_v63, 2  ;;  %v2638_v8 = vsel %vm1184_vm5, %v2213_v60, %v2503_v59 }
 0x1a3   : > { %v2637_v53 = vrot.slane %v2636_v2, 3  ;;  %v2639_v49 = vrot.slane %v2638_v8, 4  ;;  %v2640_v7 = vsel %vm1187_vm6, %v2213_v60, %v2503_v59  ;;  %v2642_v41 = vsel %vm1190_vm7, %v2213_v60, %v2503_v59 }
 0x1a4   : > { %v2644_v55 = vsel %vm421_vm8, %v2503_v59, %v2213_v60  ;;  %6827 = vst.msk [vmem:[%s8017_s20 + $0x209] ss:$4 sm:$0x3] %vm7924_vm4, %v2633_v9  ;;  %v2641_v48 = vrot.slane %v2640_v7, 5  ;;  %v2643_v50 = vrot.slane %v2642_v41, 6  ;;  %v2199_v47 = vadd.f32 %v2195_v42, %v2189_v26 }
 0x1a5   : > { %v2645_v62 = vrot.slane %v2644_v55, 7  ;;  %6828 = vst.msk [vmem:[%s8017_s20 + $0x211] ss:$4 sm:$0x3] %vm7924_vm4, %v2635_v14  ;;  %v2200_v30 = vadd.f32 %v2196_v1, %v2190_v40  ;;  %v2229_v52 = vadd.f32 %v2225_v44, %v2219_v51  ;;  %v2230_v63 = vadd.f32 %v2226_v23, %v2220_v43 }
 0x1a6   : > { %v2246_v2 = vmul.f32 %v10087_v46, %v7812_v35  ;;  %6829 = vst.msk [vmem:[%s8017_s20 + $0x219] ss:$4 sm:$0x3] %vm7924_vm4, %v2637_v53  ;;  %v2209_v60 = vadd.f32 %v2205_v3, %v2199_v47  ;;  %v10128_v59 = vstv %s10071_s10  ;;  %v10131_v9 = vstv %s10076_s15  ;;  %v13873_v47 = vld [vmem:[#allocation21_spill] sm:$0xff]  ;;  %s10426_s10 = sld [smem:[#allocation8 + $0xfb]] }
 0x1a7   : > { %v10134_v42 = vstv %s10089_s29  ;;  %6830 = vst.msk [vmem:[%s8017_s20 + $0x221] ss:$4 sm:$0x3] %vm7924_vm4, %v2639_v49  ;;  %v2210_v1 = vadd.f32 %v2206_v39, %v2200_v30  ;;  %v2239_v51 = vadd.f32 %v2235_v58, %v2229_v52  ;;  %v2240_v43 = vadd.f32 %v2236_v31, %v2230_v63  ;;  %v13874_v30 = vld [vmem:[#allocation24_spill] sm:$0xff]  ;;  %v13875_v63 = vld [vmem:[#allocation25_spill] sm:$0xff]  ;;  %s10432_s15 = sld [smem:[#allocation8 + $0xff]] }
 0x1a8   : > { %v2255_v26 = vmul.f32 %v10128_v59, %v7772_v20  ;;  %6831 = vst.msk [vmem:[%s8017_s20 + $0x229] ss:$4 sm:$0x3] %vm7924_vm4, %v2641_v48  ;;  %v2215_v3 = vadd.f32 %v9993_v25, %v2209_v60  ;;  %v2256_v40 = vmul.f32 %v10128_v59, %v7774_v21  ;;  %v2265_v44 = vmul.f32 %v10131_v9, %v7817_v36  ;;  %v13872_v48 = vld [vmem:[#allocation19_spill] sm:$0xff]  ;;  %s10441_s29 = sld [smem:[#allocation9 + $0x7]] }
 0x1a9   : > { %v2266_v39 = vmul.f32 %v10131_v9, %v7825_v38  ;;  %6832 = vst.msk [vmem:[%s8017_s20 + $0x231] ss:$4 sm:$0x3] %vm7924_vm4, %v2643_v50  ;;  %v2216_v23 = vadd.f32 %v9993_v25, %v2210_v1  ;;  %v2249_v58 = vadd.f32 %v2245_v45, %v2239_v51  ;;  %v2250_v31 = vadd.f32 %v2246_v2, %v2240_v43 }
 0x1aa   : > { %v2275_v14 = vmul.f32 %v10134_v42, %v7776_v22  ;;  %6833 = vst.msk [vmem:[%s8017_s20 + $0x239] ss:$4 sm:$0x3] %vm7924_vm4, %v2645_v62  ;;  %v2276_v53 = vmul.f32 %v10134_v42, %v7781_v24  ;;  %v2284_v8 = vstv %s10101_s23  ;;  %v10164_v49 = vstv %s10107_s30  ;;  %s10568_s23 = sld [smem:[#allocation8 + $0x4]] }
 0x1ab   : > { %v2221_v7 = vmul.f32 %v10069_v15, %v13865_v4  ;;  %v2504_v41 = vrot.slane %v2216_v23, 7  ;;  %v2259_v25 = vadd.f32 %v2255_v26, %v2249_v58  ;;  %v2260_v45 = vadd.f32 %v2256_v40, %v2250_v31  ;;  %v13876_v4 = vld [vmem:[#allocation22_spill] sm:$0xff]  ;;  %s10574_s30 = sld [smem:[#allocation8]] }
 0x1ac   : > { %v2285_v55 = vmul.f32 %v2284_v8, %v7862_v54  ;;  %v2286_v50 = vmul.f32 %v2284_v8, %v13872_v48  ;;  %v2222_v62 = vmul.f32 %v10069_v15, %v13873_v47  ;;  %v2227_v52 = vmul.f32 %v10081_v5, %v13874_v30 }
 0x1ad   : > { %v2228_v2 = vmul.f32 %v10081_v5, %v13875_v63  ;;  %v2646_v60 = vsel %vm372_vm0, %v2215_v3, %v2504_v41  ;;  %v2647_v1 = vsel %vm1175_vm1, %v2215_v3, %v2504_v41  ;;  %v2649_v51 = vsel %vm1178_vm2, %v2215_v3, %v2504_v41 }
 0x1ae   : > { %v2651_v43 = vsel %vm1181_vm3, %v2215_v3, %v2504_v41  ;;  %6834 = vst.msk [vmem:[%s8017_s20 + $0x241] ss:$4 sm:$0x3] %vm7924_vm4, %v2646_v60  ;;  %v2648_v15 = vrot.slane %v2647_v1, 1  ;;  %v2650_v26 = vrot.slane %v2649_v51, 2  ;;  %v2653_v5 = vsel %vm1184_vm5, %v2215_v3, %v2504_v41 }
 0x1af   : > { %v2652_v40 = vrot.slane %v2651_v43, 3  ;;  %v2654_v23 = vrot.slane %v2653_v5, 4  ;;  %v2655_v58 = vsel %vm1187_vm6, %v2215_v3, %v2504_v41  ;;  %v2657_v31 = vsel %vm1190_vm7, %v2215_v3, %v2504_v41 }
 0x1b0   : > { %v2659_v63 = vsel %vm421_vm8, %v2504_v41, %v2215_v3  ;;  %6835 = vst.msk [vmem:[%s8017_s20 + $0x249] ss:$4 sm:$0x3] %vm7924_vm4, %v2648_v15  ;;  %v2656_v60 = vrot.slane %v2655_v58, 5  ;;  %v2658_v1 = vrot.slane %v2657_v31, 6  ;;  %v2269_v43 = vadd.f32 %v2265_v44, %v2259_v25 }
 0x1b1   : > { %v2660_v51 = vrot.slane %v2659_v63, 7  ;;  %6836 = vst.msk [vmem:[%s8017_s20 + $0x251] ss:$4 sm:$0x3] %vm7924_vm4, %v2650_v26  ;;  %v2270_v5 = vadd.f32 %v2266_v39, %v2260_v45  ;;  %v2231_v30 = vadd.f32 %v2227_v52, %v2221_v7  ;;  %v2232_v47 = vadd.f32 %v2228_v2, %v2222_v62 }
 0x1b2   : > { %v2237_v3 = vmul.f32 %v10084_v0, %v13876_v4  ;;  %6837 = vst.msk [vmem:[%s8017_s20 + $0x259] ss:$4 sm:$0x3] %vm7924_vm4, %v2652_v40  ;;  %v2279_v41 = vadd.f32 %v2275_v14, %v2269_v43  ;;  %v2238_v44 = vmul.f32 %v10084_v0, %v13842_v6  ;;  %v2247_v25 = vmul.f32 %v10087_v46, %v7949_v10 }
 0x1b3   : > { %v2248_v39 = vmul.f32 %v10087_v46, %v7954_v11  ;;  %6838 = vst.msk [vmem:[%s8017_s20 + $0x261] ss:$4 sm:$0x3] %vm7924_vm4, %v2654_v23  ;;  %v2280_v7 = vadd.f32 %v2276_v53, %v2270_v5  ;;  %v2257_v62 = vmul.f32 %v10128_v59, %v7918_v29  ;;  %v2258_v14 = vmul.f32 %v10128_v59, %v7920_v28 }
 0x1b4   : > { %v2241_v45 = vadd.f32 %v2237_v3, %v2231_v30  ;;  %6839 = vst.msk [vmem:[%s8017_s20 + $0x269] ss:$4 sm:$0x3] %vm7924_vm4, %v2656_v60  ;;  %v2289_v0 = vadd.f32 %v2285_v55, %v2279_v41  ;;  %v2242_v52 = vadd.f32 %v2238_v44, %v2232_v47  ;;  %v2267_v46 = vmul.f32 %v10131_v9, %v7959_v13 }
 0x1b5   : > { %v2268_v53 = vmul.f32 %v10131_v9, %v7964_v19  ;;  %6840 = vst.msk [vmem:[%s8017_s20 + $0x271] ss:$4 sm:$0x3] %vm7924_vm4, %v2658_v1  ;;  %v2290_v30 = vadd.f32 %v2286_v50, %v2280_v7  ;;  %v2277_v59 = vmul.f32 %v10134_v42, %v7922_v27  ;;  %v2278_v55 = vmul.f32 %v10134_v42, %v7928_v57 }
 0x1b6   : > { %v2251_v63 = vadd.f32 %v2247_v25, %v2241_v45  ;;  %6841 = vst.msk [vmem:[%s8017_s20 + $0x279] ss:$4 sm:$0x3] %vm7924_vm4, %v2660_v51  ;;  %v2295_v47 = vadd.f32 %v10164_v49, %v2289_v0  ;;  %v2252_v2 = vadd.f32 %v2248_v39, %v2242_v52  ;;  %v2287_v9 = vmul.f32 %v2284_v8, %v7980_v61 }
 0x1b7   : > { %v2288_v15 = vmul.f32 %v2284_v8, %v7989_v37  ;;  %v2296_v50 = vadd.f32 %v10164_v49, %v2290_v30  ;;  %v10239_v40 = vstv %s10180_s7  ;;  %v10242_v23 = vstv %s10189_s26  ;;  %s10583_s7 = sld [smem:[#allocation8 + $0x44]] }
 0x1b8   : > { %v2261_v26 = vadd.f32 %v2257_v62, %v2251_v63  ;;  %v2262_v42 = vadd.f32 %v2258_v14, %v2252_v2  ;;  %v2301_v58 = vmul.f32 %v10239_v40, %v7756_v12  ;;  %v2302_v31 = vmul.f32 %v10239_v40, %v7763_v16  ;;  %s10606_s26 = sld [smem:[#allocation8 + $0x40]] }
 0x1b9   : > { %v2307_v60 = vmul.f32 %v10242_v23, %v7795_v32  ;;  %v2505_v8 = vrot.slane %v2296_v50, 7  ;;  %v2308_v51 = vmul.f32 %v10242_v23, %v7800_v33  ;;  %v10257_v43 = vstv %s10199_s5  ;;  %s10644_s5 = sld [smem:[#allocation8 + $0x84]] }
 0x1ba   : > { %v2271_v1 = vadd.f32 %v2267_v46, %v2261_v26  ;;  %v2272_v5 = vadd.f32 %v2268_v53, %v2262_v42  ;;  %v2317_v41 = vmul.f32 %v10257_v43, %v7765_v17  ;;  %v2318_v44 = vmul.f32 %v10257_v43, %v7767_v18 }
 0x1bb   : > { %v2311_v3 = vadd.f32 %v2307_v60, %v2301_v58  ;;  %v2661_v25 = vsel %vm372_vm0, %v2295_v47, %v2505_v8  ;;  %v2662_v39 = vsel %vm1175_vm1, %v2295_v47, %v2505_v8  ;;  %v2664_v7 = vsel %vm1178_vm2, %v2295_v47, %v2505_v8 }
 0x1bc   : > { %v2666_v45 = vsel %vm1181_vm3, %v2295_v47, %v2505_v8  ;;  %6842 = vst.msk [vmem:[%s8017_s20 + $0x281] ss:$4 sm:$0x3] %vm7924_vm4, %v2661_v25  ;;  %v2663_v62 = vrot.slane %v2662_v39, 1  ;;  %v2665_v14 = vrot.slane %v2664_v7, 2  ;;  %v2668_v52 = vsel %vm1184_vm5, %v2295_v47, %v2505_v8 }
 0x1bd   : > { %v2667_v0 = vrot.slane %v2666_v45, 3  ;;  %v2669_v46 = vrot.slane %v2668_v52, 4  ;;  %v2670_v53 = vsel %vm1187_vm6, %v2295_v47, %v2505_v8  ;;  %v2672_v30 = vsel %vm1190_vm7, %v2295_v47, %v2505_v8 }
 0x1be   : > { %v2674_v63 = vsel %vm421_vm8, %v2505_v8, %v2295_v47  ;;  %6843 = vst.msk [vmem:[%s8017_s20 + $0x289] ss:$4 sm:$0x3] %vm7924_vm4, %v2663_v62  ;;  %v2671_v2 = vrot.slane %v2670_v53, 5  ;;  %v2673_v50 = vrot.slane %v2672_v30, 6  ;;  %v2281_v42 = vadd.f32 %v2277_v59, %v2271_v1 }
 0x1bf   : > { %v2675_v26 = vrot.slane %v2674_v63, 7  ;;  %6844 = vst.msk [vmem:[%s8017_s20 + $0x291] ss:$4 sm:$0x3] %vm7924_vm4, %v2665_v14  ;;  %v2282_v58 = vadd.f32 %v2278_v55, %v2272_v5  ;;  %v2312_v60 = vadd.f32 %v2308_v51, %v2302_v31  ;;  %v2321_v25 = vadd.f32 %v2317_v41, %v2311_v3 }
 0x1c0   : > { %v10289_v47 = vstv %s10244_s2  ;;  %6845 = vst.msk [vmem:[%s8017_s20 + $0x299] ss:$4 sm:$0x3] %vm7924_vm4, %v2667_v0  ;;  %v2291_v8 = vadd.f32 %v2287_v9, %v2281_v42  ;;  %v10299_v1 = vstv %s10252_s24  ;;  %v2346_v41 = vstv %s10259_s9  ;;  %v13877_v42 = vld [vmem:[#allocation20_spill] sm:$0xff]  ;;  %s10659_s2 = sld [smem:[#allocation8 + $0x80]] }
 0x1c1   : > { %v2327_v39 = vmul.f32 %v10289_v47, %v7807_v34  ;;  %v2328_v59 = vmul.f32 %v10289_v47, %v7812_v35  ;;  %6846 = vst.msk [vmem:[%s8017_s20 + $0x2a1] ss:$4 sm:$0x3] %vm7924_vm4, %v2669_v46  ;;  %v2292_v55 = vadd.f32 %v2288_v15, %v2282_v58  ;;  %v2322_v31 = vadd.f32 %v2318_v44, %v2312_v60  ;;  %v13878_v58 = vld [vmem:[#allocation21_spill] sm:$0xff]  ;;  %s10669_s24 = sld [smem:[#allocation8 + $0xc4]] }
 0x1c2   : > { %v2337_v51 = vmul.f32 %v10299_v1, %v7772_v20  ;;  %v2338_v9 = vmul.f32 %v10299_v1, %v7774_v21  ;;  %6847 = vst.msk [vmem:[%s8017_s20 + $0x2a9] ss:$4 sm:$0x3] %vm7924_vm4, %v2671_v2  ;;  %v2297_v5 = vadd.f32 %v10164_v49, %v2291_v8  ;;  %v10314_v7 = vstv %s10265_s12  ;;  %s10690_s9 = sld [smem:[#allocation8 + $0xc0]] }
 0x1c3   : > { %v2331_v3 = vadd.f32 %v2327_v39, %v2321_v25  ;;  %6848 = vst.msk [vmem:[%s8017_s20 + $0x2b1] ss:$4 sm:$0x3] %vm7924_vm4, %v2673_v50  ;;  %v2298_v15 = vadd.f32 %v10164_v49, %v2292_v55  ;;  %v2332_v44 = vadd.f32 %v2328_v59, %v2322_v31  ;;  %v2347_v45 = vmul.f32 %v2346_v41, %v7817_v36  ;;  %s10696_s12 = sld [smem:[#allocation9]] }
 0x1c4   : > { %v2348_v62 = vmul.f32 %v2346_v41, %v7825_v38  ;;  %6849 = vst.msk [vmem:[%s8017_s20 + $0x2b9] ss:$4 sm:$0x3] %vm7924_vm4, %v2675_v26  ;;  %v2357_v0 = vmul.f32 %v10314_v7, %v7776_v22  ;;  %v2358_v52 = vmul.f32 %v10314_v7, %v7781_v24  ;;  %v2366_v46 = vstv %s10271_s3  ;;  %s10742_s3 = sld [smem:[#allocation8 + $0xc]] }
 0x1c5   : > { %v2341_v14 = vadd.f32 %v2337_v51, %v2331_v3  ;;  %v2506_v53 = vrot.slane %v2298_v15, 7  ;;  %v2342_v30 = vadd.f32 %v2338_v9, %v2332_v44  ;;  %v2367_v49 = vmul.f32 %v2366_v46, %v7862_v54 }
 0x1c6   : > { %v2368_v63 = vmul.f32 %v2366_v46, %v13872_v48  ;;  %v10333_v50 = vstv %s10280_s13  ;;  %v2303_v26 = vmul.f32 %v10239_v40, %v13877_v42  ;;  %v2304_v60 = vmul.f32 %v10239_v40, %v13878_v58  ;;  %v13880_v58 = vld [vmem:[#allocation25_spill] sm:$0xff]  ;;  %s10754_s13 = sld [smem:[#allocation8 + $0x8]] }
 0x1c7   : > { %v2351_v2 = vadd.f32 %v2347_v45, %v2341_v14  ;;  %v2676_v25 = vsel %vm372_vm0, %v2297_v5, %v2506_v53  ;;  %v2677_v8 = vsel %vm1175_vm1, %v2297_v5, %v2506_v53  ;;  %v2679_v39 = vsel %vm1178_vm2, %v2297_v5, %v2506_v53 }
 0x1c8   : > { %v2681_v59 = vsel %vm1181_vm3, %v2297_v5, %v2506_v53  ;;  %6850 = vst.msk [vmem:[%s8017_s20 + $0x2c1] ss:$4 sm:$0x3] %vm7924_vm4, %v2676_v25  ;;  %v2678_v55 = vrot.slane %v2677_v8, 1  ;;  %v2680_v31 = vrot.slane %v2679_v39, 2  ;;  %v2683_v40 = vsel %vm1184_vm5, %v2297_v5, %v2506_v53 }
 0x1c9   : > { %v2682_v51 = vrot.slane %v2681_v59, 3  ;;  %v2684_v9 = vrot.slane %v2683_v40, 4  ;;  %v2685_v3 = vsel %vm1187_vm6, %v2297_v5, %v2506_v53  ;;  %v2687_v15 = vsel %vm1190_vm7, %v2297_v5, %v2506_v53  ;;  %v13879_v59 = vld [vmem:[#allocation24_spill] sm:$0xff] }
 0x1ca   : > { %v2689_v44 = vsel %vm421_vm8, %v2506_v53, %v2297_v5  ;;  %6851 = vst.msk [vmem:[%s8017_s20 + $0x2c9] ss:$4 sm:$0x3] %vm7924_vm4, %v2678_v55  ;;  %v2686_v45 = vrot.slane %v2685_v3, 5  ;;  %v2688_v14 = vrot.slane %v2687_v15, 6  ;;  %v2352_v8 = vadd.f32 %v2348_v62, %v2342_v30 }
 0x1cb   : > { %v2690_v25 = vrot.slane %v2689_v44, 7  ;;  %6852 = vst.msk [vmem:[%s8017_s20 + $0x2d1] ss:$4 sm:$0x3] %vm7924_vm4, %v2680_v31  ;;  %v2361_v39 = vadd.f32 %v2357_v0, %v2351_v2  ;;  %v2309_v40 = vmul.f32 %v10242_v23, %v13879_v59  ;;  %v2310_v5 = vmul.f32 %v10242_v23, %v13880_v58 }
 0x1cc   : > { %v2319_v53 = vmul.f32 %v10257_v43, %v13876_v4  ;;  %6853 = vst.msk [vmem:[%s8017_s20 + $0x2d9] ss:$4 sm:$0x3] %vm7924_vm4, %v2682_v51  ;;  %v2362_v62 = vadd.f32 %v2358_v52, %v2352_v8  ;;  %v2320_v30 = vmul.f32 %v10257_v43, %v13842_v6  ;;  %v2329_v0 = vmul.f32 %v10289_v47, %v7949_v10 }
 0x1cd   : > { %v2330_v2 = vmul.f32 %v10289_v47, %v7954_v11  ;;  %6854 = vst.msk [vmem:[%s8017_s20 + $0x2e1] ss:$4 sm:$0x3] %vm7924_vm4, %v2684_v9  ;;  %v2371_v23 = vadd.f32 %v2367_v49, %v2361_v39  ;;  %v2313_v55 = vadd.f32 %v2309_v40, %v2303_v26  ;;  %v2314_v31 = vadd.f32 %v2310_v5, %v2304_v60 }
 0x1ce   : > { %v2339_v51 = vmul.f32 %v10299_v1, %v7918_v29  ;;  %6855 = vst.msk [vmem:[%s8017_s20 + $0x2e9] ss:$4 sm:$0x3] %vm7924_vm4, %v2686_v45  ;;  %v2372_v43 = vadd.f32 %v2368_v63, %v2362_v62  ;;  %v2340_v52 = vmul.f32 %v10299_v1, %v7920_v28  ;;  %v2349_v47 = vmul.f32 %v2346_v41, %v7959_v13 }
 0x1cf   : > { %v2350_v3 = vmul.f32 %v2346_v41, %v7964_v19  ;;  %6856 = vst.msk [vmem:[%s8017_s20 + $0x2f1] ss:$4 sm:$0x3] %vm7924_vm4, %v2688_v14  ;;  %v2377_v49 = vadd.f32 %v10333_v50, %v2371_v23  ;;  %v2323_v26 = vadd.f32 %v2319_v53, %v2313_v55  ;;  %v2324_v60 = vadd.f32 %v2320_v30, %v2314_v31 }
 0x1d0   : > { %v2359_v9 = vmul.f32 %v10314_v7, %v7922_v27  ;;  %6857 = vst.msk [vmem:[%s8017_s20 + $0x2f9] ss:$4 sm:$0x3] %vm7924_vm4, %v2690_v25  ;;  %v2378_v1 = vadd.f32 %v10333_v50, %v2372_v43  ;;  %v2360_v63 = vmul.f32 %v10314_v7, %v7928_v57  ;;  %v2369_v41 = vmul.f32 %v2366_v46, %v7980_v61 }
 0x1d1   : > { %v2370_v15 = vmul.f32 %v2366_v46, %v7989_v37  ;;  %v2333_v44 = vadd.f32 %v2329_v0, %v2323_v26  ;;  %v2334_v45 = vadd.f32 %v2330_v2, %v2324_v60  ;;  %v10406_v14 = vstv %s10343_s8  ;;  %s10789_s8 = sld [smem:[#allocation8 + $0x4c]] }
 0x1d2   : > { %v10409_v8 = vstv %s10352_s11  ;;  %v2507_v25 = vrot.slane %v2378_v1, 7  ;;  %v2383_v7 = vmul.f32 %v10406_v14, %v7756_v12  ;;  %v2384_v39 = vmul.f32 %v10406_v14, %v7763_v16  ;;  %s10797_s11 = sld [smem:[#allocation8 + $0x48]] }
 0x1d3   : > { %v2389_v46 = vmul.f32 %v10409_v8, %v7795_v32  ;;  %v2343_v40 = vadd.f32 %v2339_v51, %v2333_v44  ;;  %v2344_v5 = vadd.f32 %v2340_v52, %v2334_v45  ;;  %v2390_v53 = vmul.f32 %v10409_v8, %v7800_v33 }
 0x1d4   : > { %v10424_v62 = vstv %s10366_s4  ;;  %v2691_v30 = vsel %vm372_vm0, %v2377_v49, %v2507_v25  ;;  %v2692_v0 = vsel %vm1175_vm1, %v2377_v49, %v2507_v25  ;;  %v2694_v2 = vsel %vm1178_vm2, %v2377_v49, %v2507_v25  ;;  %s10822_s4 = sld [smem:[#allocation8 + $0x8c]] }
 0x1d5   : > { %v2696_v32 = vsel %vm1181_vm3, %v2377_v49, %v2507_v25  ;;  %6858 = vst.msk [vmem:[%s8017_s20 + $0x301] ss:$4 sm:$0x3] %vm7924_vm4, %v2691_v30  ;;  %v2693_v33 = vrot.slane %v2692_v0, 1  ;;  %v2695_v23 = vrot.slane %v2694_v2, 2  ;;  %v2698_v31 = vsel %vm1184_vm5, %v2377_v49, %v2507_v25 }
 0x1d6   : > { %v2697_v55 = vrot.slane %v2696_v32, 3  ;;  %v2699_v51 = vrot.slane %v2698_v31, 4  ;;  %v2700_v43 = vsel %vm1187_vm6, %v2377_v49, %v2507_v25  ;;  %v2702_v52 = vsel %vm1190_vm7, %v2377_v49, %v2507_v25 }
 0x1d7   : > { %v2704_v26 = vsel %vm421_vm8, %v2507_v25, %v2377_v49  ;;  %6859 = vst.msk [vmem:[%s8017_s20 + $0x309] ss:$4 sm:$0x3] %vm7924_vm4, %v2693_v33  ;;  %v2701_v60 = vrot.slane %v2700_v43, 5  ;;  %v2703_v1 = vrot.slane %v2702_v52, 6  ;;  %v2353_v45 = vadd.f32 %v2349_v47, %v2343_v40 }
 0x1d8   : > { %v2705_v44 = vrot.slane %v2704_v26, 7  ;;  %6860 = vst.msk [vmem:[%s8017_s20 + $0x311] ss:$4 sm:$0x3] %vm7924_vm4, %v2695_v23  ;;  %v2354_v30 = vadd.f32 %v2350_v3, %v2344_v5  ;;  %v2393_v0 = vadd.f32 %v2389_v46, %v2383_v7  ;;  %v2394_v2 = vadd.f32 %v2390_v53, %v2384_v39 }
 0x1d9   : > { %v2399_v49 = vmul.f32 %v10424_v62, %v7765_v17  ;;  %6861 = vst.msk [vmem:[%s8017_s20 + $0x319] ss:$4 sm:$0x3] %vm7924_vm4, %v2697_v55  ;;  %v2363_v25 = vadd.f32 %v2359_v9, %v2353_v45  ;;  %v2400_v32 = vmul.f32 %v10424_v62, %v7767_v18  ;;  %v10457_v47 = vstv %s10403_s6  ;;  %s10828_s6 = sld [smem:[#allocation8 + $0x88]] }
 0x1da   : > { %v10460_v40 = vstv %s10411_s25  ;;  %6862 = vst.msk [vmem:[%s8017_s20 + $0x321] ss:$4 sm:$0x3] %vm7924_vm4, %v2699_v51  ;;  %v2364_v3 = vadd.f32 %v2360_v63, %v2354_v30  ;;  %v2409_v39 = vmul.f32 %v10457_v47, %v7807_v34  ;;  %v2410_v9 = vmul.f32 %v10457_v47, %v7812_v35  ;;  %s10839_s25 = sld [smem:[#allocation8 + $0xcc]] }
 0x1db   : > { %v2403_v7 = vadd.f32 %v2399_v49, %v2393_v0  ;;  %6863 = vst.msk [vmem:[%s8017_s20 + $0x329] ss:$4 sm:$0x3] %vm7924_vm4, %v2701_v60  ;;  %v2373_v46 = vadd.f32 %v2369_v41, %v2363_v25  ;;  %v2404_v5 = vadd.f32 %v2400_v32, %v2394_v2  ;;  %v2419_v53 = vmul.f32 %v10460_v40, %v7772_v20  ;;  %v13881_v2 = vld [vmem:[#allocation21_spill] sm:$0xff] }
 0x1dc   : > { %v2420_v33 = vmul.f32 %v10460_v40, %v7774_v21  ;;  %6864 = vst.msk [vmem:[%s8017_s20 + $0x331] ss:$4 sm:$0x3] %vm7924_vm4, %v2703_v1  ;;  %v2374_v34 = vadd.f32 %v2370_v15, %v2364_v3  ;;  %v2428_v23 = vstv %s10419_s27  ;;  %v10481_v35 = vstv %s10426_s10  ;;  %s10845_s27 = sld [smem:[#allocation8 + $0xc8]] }
 0x1dd   : > { %v2413_v63 = vadd.f32 %v2409_v39, %v2403_v7  ;;  %6865 = vst.msk [vmem:[%s8017_s20 + $0x339] ss:$4 sm:$0x3] %vm7924_vm4, %v2705_v44  ;;  %v2379_v41 = vadd.f32 %v10333_v50, %v2373_v46  ;;  %v2414_v55 = vadd.f32 %v2410_v9, %v2404_v5  ;;  %v2429_v31 = vmul.f32 %v2428_v23, %v7817_v36  ;;  %s10866_s10 = sld [smem:[#allocation9 + $0x1]] }
 0x1de   : > { %v2430_v51 = vmul.f32 %v2428_v23, %v7825_v38  ;;  %v2380_v43 = vadd.f32 %v10333_v50, %v2374_v34  ;;  %v2439_v15 = vmul.f32 %v10481_v35, %v7776_v22  ;;  %v2440_v26 = vmul.f32 %v10481_v35, %v7781_v24 }
 0x1df   : > { %v2423_v52 = vadd.f32 %v2419_v53, %v2413_v63  ;;  %v2424_v60 = vadd.f32 %v2420_v33, %v2414_v55  ;;  %v2448_v1 = vstv %s10432_s15  ;;  %v10496_v44 = vstv %s10441_s29  ;;  %s10926_s15 = sld [smem:[#allocation8 + $0x14]] }
 0x1e0   : > { %v2385_v45 = vmul.f32 %v10406_v14, %v13877_v42  ;;  %v2508_v36 = vrot.slane %v2380_v43, 7  ;;  %v2449_v38 = vmul.f32 %v2448_v1, %v7862_v54  ;;  %v2450_v50 = vmul.f32 %v2448_v1, %v13872_v48  ;;  %s10932_s29 = sld [smem:[#allocation8 + $0x10]] }
 0x1e1   : > { %v2433_v30 = vadd.f32 %v2429_v31, %v2423_v52  ;;  %v2434_v0 = vadd.f32 %v2430_v51, %v2424_v60  ;;  %v2386_v49 = vmul.f32 %v10406_v14, %v13881_v2  ;;  %v2391_v25 = vmul.f32 %v10409_v8, %v13879_v59 }
 0x1e2   : > { %v2392_v32 = vmul.f32 %v10409_v8, %v13880_v58  ;;  %v2706_v3 = vsel %vm372_vm0, %v2379_v41, %v2508_v36  ;;  %v2707_v7 = vsel %vm1175_vm1, %v2379_v41, %v2508_v36  ;;  %v2709_v39 = vsel %vm1178_vm2, %v2379_v41, %v2508_v36 }
 0x1e3   : > { %v2711_v54 = vsel %vm1181_vm3, %v2379_v41, %v2508_v36  ;;  %6866 = vst.msk [vmem:[%s8017_s20 + $0x341] ss:$4 sm:$0x3] %vm7924_vm4, %v2706_v3  ;;  %v2708_v48 = vrot.slane %v2707_v7, 1  ;;  %v2710_v14 = vrot.slane %v2709_v39, 2  ;;  %v2713_v59 = vsel %vm1184_vm5, %v2379_v41, %v2508_v36 }
 0x1e4   : > { %v2712_v9 = vrot.slane %v2711_v54, 3  ;;  %v2714_v46 = vrot.slane %v2713_v59, 4  ;;  %v2715_v58 = vsel %vm1187_vm6, %v2379_v41, %v2508_v36  ;;  %v2717_v8 = vsel %vm1190_vm7, %v2379_v41, %v2508_v36 }
 0x1e5   : > { %v2719_v5 = vsel %vm421_vm8, %v2508_v36, %v2379_v41  ;;  %6867 = vst.msk [vmem:[%s8017_s20 + $0x349] ss:$4 sm:$0x3] %vm7924_vm4, %v2708_v48  ;;  %v2716_v53 = vrot.slane %v2715_v58, 5  ;;  %v2718_v33 = vrot.slane %v2717_v8, 6  ;;  %v2443_v63 = vadd.f32 %v2439_v15, %v2433_v30 }
 0x1e6   : > { %v2720_v34 = vrot.slane %v2719_v5, 7  ;;  %6868 = vst.msk [vmem:[%s8017_s20 + $0x351] ss:$4 sm:$0x3] %vm7924_vm4, %v2710_v14  ;;  %v2444_v55 = vadd.f32 %v2440_v26, %v2434_v0  ;;  %v2395_v31 = vadd.f32 %v2391_v25, %v2385_v45  ;;  %v2396_v51 = vadd.f32 %v2392_v32, %v2386_v49 }
 0x1e7   : > { %v2401_v43 = vmul.f32 %v10424_v62, %v13876_v4  ;;  %6869 = vst.msk [vmem:[%s8017_s20 + $0x359] ss:$4 sm:$0x3] %vm7924_vm4, %v2712_v9  ;;  %v2453_v41 = vadd.f32 %v2449_v38, %v2443_v63  ;;  %v2402_v52 = vmul.f32 %v10424_v62, %v13842_v6  ;;  %v2411_v15 = vmul.f32 %v10457_v47, %v7949_v10 }
 0x1e8   : > { %v2412_v60 = vmul.f32 %v10457_v47, %v7954_v11  ;;  %6870 = vst.msk [vmem:[%s8017_s20 + $0x361] ss:$4 sm:$0x3] %vm7924_vm4, %v2714_v46  ;;  %v2454_v26 = vadd.f32 %v2450_v50, %v2444_v55  ;;  %v2421_v36 = vmul.f32 %v10460_v40, %v7918_v29  ;;  %v2422_v30 = vmul.f32 %v10460_v40, %v7920_v28 }
 0x1e9   : > { %v2405_v45 = vadd.f32 %v2401_v43, %v2395_v31  ;;  %6871 = vst.msk [vmem:[%s8017_s20 + $0x369] ss:$4 sm:$0x3] %vm7924_vm4, %v2716_v53  ;;  %v2459_v10 = vadd.f32 %v10496_v44, %v2453_v41  ;;  %v2406_v62 = vadd.f32 %v2402_v52, %v2396_v51  ;;  %v2431_v11 = vmul.f32 %v2428_v23, %v7959_v13 }
 0x1ea   : > { %v2432_v47 = vmul.f32 %v2428_v23, %v7964_v19  ;;  %6872 = vst.msk [vmem:[%s8017_s20 + $0x371] ss:$4 sm:$0x3] %vm7924_vm4, %v2718_v33  ;;  %v2460_v38 = vadd.f32 %v10496_v44, %v2454_v26  ;;  %v2441_v0 = vmul.f32 %v10481_v35, %v7922_v27  ;;  %v2442_v40 = vmul.f32 %v10481_v35, %v7928_v57 }
 0x1eb   : > { %v2415_v50 = vadd.f32 %v2411_v15, %v2405_v45  ;;  %6873 = vst.msk [vmem:[%s8017_s20 + $0x379] ss:$4 sm:$0x3] %vm7924_vm4, %v2720_v34  ;;  %v2416_v49 = vadd.f32 %v2412_v60, %v2406_v62  ;;  %v2451_v13 = vmul.f32 %v2448_v1, %v7980_v61  ;;  %v2452_v19 = vmul.f32 %v2448_v1, %v7989_v37 }
 0x1ec   : > { %v422_v23 = vrot.slane %v7756_v12, 1  ;;  %v2509_v25 = vrot.slane %v2460_v38, 7  ;;  %v423_v3 = vrot.slane %v13877_v42, 1  ;;  %v425_v7 = vrot.slane %v7763_v16, 1 }
 0x1ed   : > { %v2425_v32 = vadd.f32 %v2421_v36, %v2415_v50  ;;  %v2426_v39 = vadd.f32 %v2422_v30, %v2416_v49  ;;  %v426_v35 = vrot.slane %v13881_v2, 1  ;;  %v428_v54 = vrot.slane %v7765_v17, 1 }
 0x1ee   : > { %v429_v48 = vrot.slane %v13876_v4, 1  ;;  %v2721_v61 = vsel %vm372_vm0, %v2459_v10, %v2509_v25  ;;  %v2722_v37 = vsel %vm1175_vm1, %v2459_v10, %v2509_v25  ;;  %v2724_v1 = vsel %vm1178_vm2, %v2459_v10, %v2509_v25 }
 0x1ef   : > { %v2726_v14 = vsel %vm1181_vm3, %v2459_v10, %v2509_v25  ;;  %6874 = vst.msk [vmem:[%s8017_s20 + $0x381] ss:$4 sm:$0x3] %vm7924_vm4, %v2721_v61  ;;  %v2723_v9 = vrot.slane %v2722_v37, 1  ;;  %v2725_v59 = vrot.slane %v2724_v1, 2  ;;  %v2728_v58 = vsel %vm1184_vm5, %v2459_v10, %v2509_v25 }
 0x1f0   : > { %v2727_v46 = vrot.slane %v2726_v14, 3  ;;  %v2729_v8 = vrot.slane %v2728_v58, 4  ;;  %v2730_v5 = vsel %vm1187_vm6, %v2459_v10, %v2509_v25  ;;  %v2732_v53 = vsel %vm1190_vm7, %v2459_v10, %v2509_v25 }
 0x1f1   : > { %v2734_v33 = vsel %vm421_vm8, %v2509_v25, %v2459_v10  ;;  %6875 = vst.msk [vmem:[%s8017_s20 + $0x389] ss:$4 sm:$0x3] %vm7924_vm4, %v2723_v9  ;;  %v2731_v34 = vrot.slane %v2730_v5, 5  ;;  %v2733_v63 = vrot.slane %v2732_v53, 6  ;;  %v2435_v31 = vadd.f32 %v2431_v11, %v2425_v32 }
 0x1f2   : > { %v2735_v55 = vrot.slane %v2734_v33, 7  ;;  %6876 = vst.msk [vmem:[%s8017_s20 + $0x391] ss:$4 sm:$0x3] %vm7924_vm4, %v2725_v59  ;;  %v2436_v51 = vadd.f32 %v2432_v47, %v2426_v39  ;;  %v10594_v43 = vsel %vm421_vm8, %v422_v23, %v423_v3  ;;  %v10599_v41 = vsel %vm421_vm8, %v425_v7, %v426_v35 }
 0x1f3   : > { %v10604_v52 = vsel %vm421_vm8, %v428_v54, %v429_v48  ;;  %6877 = vst.msk [vmem:[%s8017_s20 + $0x399] ss:$4 sm:$0x3] %vm7924_vm4, %v2727_v46  ;;  %v2445_v15 = vadd.f32 %v2441_v0, %v2435_v31  ;;  %v431_v60 = vrot.slane %v7767_v18, 1  ;;  %v432_v26 = vrot.slane %v13842_v6, 1 }
 0x1f4   : > { %v434_v45 = vrot.slane %v7772_v20, 1  ;;  %6878 = vst.msk [vmem:[%s8017_s20 + $0x3a1] ss:$4 sm:$0x3] %vm7924_vm4, %v2729_v8  ;;  %v2446_v36 = vadd.f32 %v2442_v40, %v2436_v51  ;;  %v435_v30 = vrot.slane %v7918_v29, 1  ;;  %v437_v10 = vrot.slane %v7774_v21, 1 }
 0x1f5   : > { %v438_v62 = vrot.slane %v7920_v28, 1  ;;  %6879 = vst.msk [vmem:[%s8017_s20 + $0x3a9] ss:$4 sm:$0x3] %vm7924_vm4, %v2731_v34  ;;  %v2455_v11 = vadd.f32 %v2451_v13, %v2445_v15  ;;  %v10626_v47 = vsel %vm421_vm8, %v431_v60, %v432_v26  ;;  %v440_v38 = vrot.slane %v7776_v22, 1 }
 0x1f6   : > { %v441_v50 = vrot.slane %v7922_v27, 1  ;;  %6880 = vst.msk [vmem:[%s8017_s20 + $0x3b1] ss:$4 sm:$0x3] %vm7924_vm4, %v2733_v63  ;;  %v2456_v0 = vadd.f32 %v2452_v19, %v2446_v36  ;;  %v10636_v40 = vsel %vm421_vm8, %v434_v45, %v435_v30  ;;  %v443_v13 = vrot.slane %v7781_v24, 1 }
 0x1f7   : > { %v10641_v49 = vsel %vm421_vm8, %v437_v10, %v438_v62  ;;  %6881 = vst.msk [vmem:[%s8017_s20 + $0x3b9] ss:$4 sm:$0x3] %vm7924_vm4, %v2735_v55  ;;  %v2461_v19 = vadd.f32 %v10496_v44, %v2455_v11  ;;  %v444_v25 = vrot.slane %v7928_v57, 1  ;;  %v10657_v32 = vstv %s10568_s23  ;;  %s10938_s23 = sld [smem:[#allocation8 + $0x54]] }
 0x1f8   : > { %v10653_v23 = vsel %vm421_vm8, %v440_v38, %v441_v50  ;;  %v2462_v7 = vadd.f32 %v10496_v44, %v2456_v0  ;;  %v3137_v39 = vmul.f32 %v10657_v32, %v7756_v12  ;;  %v3138_v54 = vmul.f32 %v10657_v32, %v7763_v16 }
 0x1f9   : > { %v10667_v61 = vstv %s10574_s30  ;;  %v10674_v37 = vsel %vm421_vm8, %v443_v13, %v444_v25  ;;  %v10681_v14 = vstv %s10583_s7  ;;  %v10688_v58 = vstv %s10606_s26  ;;  %s10977_s30 = sld [smem:[#allocation8 + $0x50]] }
 0x1fa   : > { %13882 = vst [vmem:[#allocation19_spill] sm:$0xff] %v10674_v37  ;;  %v3143_v1 = vmul.f32 %v10667_v61, %v10594_v43  ;;  %v3144_v44 = vmul.f32 %v10667_v61, %v10599_v41  ;;  %v2510_v9 = vrot.slane %v2462_v7, 7  ;;  %v3153_v59 = vmul.f32 %v10681_v14, %v7765_v17  ;;  %s10985_s7 = sld [smem:[#allocation8 + $0x94]] }
 0x1fb   : > { %v3154_v46 = vmul.f32 %v10681_v14, %v7767_v18  ;;  %v3163_v53 = vmul.f32 %v10688_v58, %v10604_v52  ;;  %v3164_v33 = vmul.f32 %v10688_v58, %v10626_v47  ;;  %s11001_s26 = sld [smem:[#allocation8 + $0x90]] }
 0x1fc   : > { %v3147_v8 = vadd.f32 %v3143_v1, %v3137_v39  ;;  %v3148_v5 = vadd.f32 %v3144_v44, %v3138_v54  ;;  %v2736_v34 = vsel %vm372_vm0, %v2461_v19, %v2510_v9  ;;  %v2737_v63 = vsel %vm1175_vm1, %v2461_v19, %v2510_v9 }
 0x1fd   : > { %v2739_v55 = vsel %vm1178_vm2, %v2461_v19, %v2510_v9  ;;  %v2741_v31 = vsel %vm1181_vm3, %v2461_v19, %v2510_v9  ;;  %6882 = vst.msk [vmem:[%s8017_s20 + $0x3c1] ss:$4 sm:$0x3] %vm7924_vm4, %v2736_v34  ;;  %v2738_v51 = vrot.slane %v2737_v63, 1  ;;  %v2743_v45 = vsel %vm1184_vm5, %v2461_v19, %v2510_v9 }
 0x1fe   : > { %v2740_v15 = vrot.slane %v2739_v55, 2  ;;  %v2742_v60 = vrot.slane %v2741_v31, 3  ;;  %v2744_v36 = vrot.slane %v2743_v45, 4  ;;  %v2745_v10 = vsel %vm1187_vm6, %v2461_v19, %v2510_v9 }
 0x1ff   : > { %v2747_v11 = vsel %vm1190_vm7, %v2461_v19, %v2510_v9  ;;  %v2749_v38 = vsel %vm421_vm8, %v2510_v9, %v2461_v19  ;;  %6883 = vst.msk [vmem:[%s8017_s20 + $0x3c9] ss:$4 sm:$0x3] %vm7924_vm4, %v2738_v51  ;;  %v2746_v0 = vrot.slane %v2745_v10, 5  ;;  %v3157_v39 = vadd.f32 %v3153_v59, %v3147_v8 }
 0x200   : > { %v2748_v13 = vrot.slane %v2747_v11, 6  ;;  %v2750_v7 = vrot.slane %v2749_v38, 7  ;;  %6884 = vst.msk [vmem:[%s8017_s20 + $0x3d1] ss:$4 sm:$0x3] %vm7924_vm4, %v2740_v15  ;;  %v3158_v54 = vadd.f32 %v3154_v46, %v3148_v5  ;;  %v3172_v1 = vstv %s10644_s5  ;;  %s11013_s5 = sld [smem:[#allocation8 + $0xd4]] }
 0x201   : > { %v3182_v44 = vstv %s10659_s2  ;;  %v3192_v34 = vstv %s10669_s24  ;;  %6885 = vst.msk [vmem:[%s8017_s20 + $0x3d9] ss:$4 sm:$0x3] %vm7924_vm4, %v2742_v60  ;;  %v3167_v19 = vadd.f32 %v3163_v53, %v3157_v39  ;;  %v3173_v9 = vmul.f32 %v3172_v1, %v7772_v20  ;;  %s11019_s2 = sld [smem:[#allocation8 + $0xd0]] }
 0x202   : > { %v3174_v63 = vmul.f32 %v3172_v1, %v7774_v21  ;;  %v3183_v59 = vmul.f32 %v3182_v44, %v10636_v40  ;;  %6886 = vst.msk [vmem:[%s8017_s20 + $0x3e1] ss:$4 sm:$0x3] %vm7924_vm4, %v2744_v36  ;;  %v3168_v46 = vadd.f32 %v3164_v33, %v3158_v54  ;;  %v3184_v8 = vmul.f32 %v3182_v44, %v10641_v49  ;;  %s11028_s24 = sld [smem:[#allocation9 + $0x2]] }
 0x203   : > { %v3193_v5 = vmul.f32 %v3192_v34, %v7776_v22  ;;  %v3194_v55 = vmul.f32 %v3192_v34, %v7781_v24  ;;  %6887 = vst.msk [vmem:[%s8017_s20 + $0x3e9] ss:$4 sm:$0x3] %vm7924_vm4, %v2746_v0  ;;  %v3177_v53 = vadd.f32 %v3173_v9, %v3167_v19  ;;  %v3202_v31 = vstv %s10690_s9  ;;  %s11103_s9 = sld [smem:[#allocation8 + $0x1c]] }
 0x204   : > { %v10735_v51 = vstv %s10696_s12  ;;  %v10740_v15 = vsel %vm421_vm8, %v423_v3, 0.0  ;;  %6888 = vst.msk [vmem:[%s8017_s20 + $0x3f1] ss:$4 sm:$0x3] %vm7924_vm4, %v2748_v13  ;;  %v3178_v33 = vadd.f32 %v3174_v63, %v3168_v46  ;;  %v3203_v60 = vmul.f32 %v3202_v31, %v10653_v23  ;;  %s11109_s12 = sld [smem:[#allocation8 + $0x18]] }
 0x205   : > { %13883 = vst [vmem:[#allocation24_spill] sm:$0xff] %v10740_v15  ;;  %v3204_v45 = vmul.f32 %v3202_v31, %v10674_v37  ;;  %v10752_v36 = vsel %vm421_vm8, %v426_v35, 0.0  ;;  %v3187_v3 = vadd.f32 %v3183_v59, %v3177_v53  ;;  %v10762_v10 = vsel %vm421_vm8, %v429_v48, 0.0 }
 0x206   : > { %13884 = vst [vmem:[#allocation25_spill] sm:$0xff] %v10752_v36  ;;  %v10767_v11 = vsel %vm421_vm8, %v432_v26, 0.0  ;;  %v10772_v35 = vsel %vm421_vm8, %v435_v30, 0.0  ;;  %v3188_v38 = vadd.f32 %v3184_v8, %v3178_v33  ;;  %v10777_v0 = vsel %vm421_vm8, %v438_v62, 0.0 }
 0x207   : > { %6889 = vst.msk [vmem:[%s8017_s20 + $0x3f9] ss:$4 sm:$0x3] %vm7924_vm4, %v2750_v7  ;;  %v10782_v48 = vsel %vm421_vm8, %v441_v50, 0.0  ;;  %v10787_v26 = vsel %vm421_vm8, %v444_v25, 0.0  ;;  %v3197_v30 = vadd.f32 %v3193_v5, %v3187_v3  ;;  %v3139_v13 = vmul.f32 %v10657_v32, %v13877_v42 }
 0x208   : > { %v3140_v62 = vmul.f32 %v10657_v32, %v13881_v2  ;;  %v3145_v7 = vmul.f32 %v10667_v61, %v10740_v15  ;;  %v3198_v50 = vadd.f32 %v3194_v55, %v3188_v38  ;;  %v3146_v39 = vmul.f32 %v10667_v61, %v10752_v36 }
 0x209   : > { %v3155_v25 = vmul.f32 %v10681_v14, %v13876_v4  ;;  %v3156_v54 = vmul.f32 %v10681_v14, %v13842_v6  ;;  %v3207_v19 = vadd.f32 %v3203_v60, %v3197_v30  ;;  %v3165_v32 = vmul.f32 %v10688_v58, %v10762_v10 }
 0x20a   : > { %v3149_v9 = vadd.f32 %v3145_v7, %v3139_v13  ;;  %v3166_v63 = vmul.f32 %v10688_v58, %v10767_v11  ;;  %v3208_v59 = vadd.f32 %v3204_v45, %v3198_v50  ;;  %v3150_v46 = vadd.f32 %v3146_v39, %v3140_v62 }
 0x20b   : > { %v3175_v8 = vmul.f32 %v3172_v1, %v7918_v29  ;;  %v3176_v61 = vmul.f32 %v3172_v1, %v7920_v28  ;;  %v3213_v5 = vadd.f32 %v10735_v51, %v3207_v19  ;;  %v3185_v14 = vmul.f32 %v3182_v44, %v10772_v35 }
 0x20c   : > { %v3159_v55 = vadd.f32 %v3155_v25, %v3149_v9  ;;  %v3186_v53 = vmul.f32 %v3182_v44, %v10777_v0  ;;  %v3214_v33 = vadd.f32 %v10735_v51, %v3208_v59  ;;  %v3160_v60 = vadd.f32 %v3156_v54, %v3150_v46 }
 0x20d   : > { %v3195_v58 = vmul.f32 %v3192_v34, %v7922_v27  ;;  %v3196_v45 = vmul.f32 %v3192_v34, %v7928_v57  ;;  %v3205_v1 = vmul.f32 %v3202_v31, %v10782_v48  ;;  %v3206_v38 = vmul.f32 %v3202_v31, %v10787_v26 }
 0x20e   : > { %v3169_v3 = vadd.f32 %v3165_v32, %v3159_v55  ;;  %v10820_v30 = vstv %s10742_s3  ;;  %v3823_v44 = vrot.slane %v3214_v33, 7  ;;  %v3170_v13 = vadd.f32 %v3166_v63, %v3160_v60  ;;  %s11118_s3 = sld [smem:[#allocation8 + $0x5c]] }
 0x20f   : > { %v3219_v62 = vmul.f32 %v10820_v30, %v7756_v12  ;;  %v3220_v7 = vmul.f32 %v10820_v30, %v7763_v16  ;;  %v10831_v50 = vstv %s10754_s13  ;;  %v10834_v39 = vstv %s10789_s8  ;;  %s11158_s13 = sld [smem:[#allocation8 + $0x58]] }
 0x210   : > { %v3179_v34 = vadd.f32 %v3175_v8, %v3169_v3  ;;  %v10837_v31 = vstv %s10797_s11  ;;  %v3839_v25 = vsel %vm372_vm0, %v3213_v5, %v3823_v44  ;;  %v3840_v54 = vsel %vm1175_vm1, %v3213_v5, %v3823_v44  ;;  %s11173_s8 = sld [smem:[#allocation8 + $0x9c]] }
 0x211   : > { %v3842_v19 = vsel %vm1178_vm2, %v3213_v5, %v3823_v44  ;;  %v3844_v9 = vsel %vm1181_vm3, %v3213_v5, %v3823_v44  ;;  %6960 = vst.msk [vmem:[%s8017_s20 + $0x2] ss:$4 sm:$0x3] %vm7924_vm4, %v3839_v25  ;;  %v3841_v32 = vrot.slane %v3840_v54, 1  ;;  %v3846_v46 = vsel %vm1184_vm5, %v3213_v5, %v3823_v44  ;;  %s11177_s11 = sld [smem:[#allocation8 + $0x98]] }
 0x212   : > { %v3843_v63 = vrot.slane %v3842_v19, 2  ;;  %v3845_v59 = vrot.slane %v3844_v9, 3  ;;  %v3847_v8 = vrot.slane %v3846_v46, 4  ;;  %v3848_v55 = vsel %vm1187_vm6, %v3213_v5, %v3823_v44 }
 0x213   : > { %v3850_v33 = vsel %vm1190_vm7, %v3213_v5, %v3823_v44  ;;  %v3852_v60 = vsel %vm421_vm8, %v3823_v44, %v3213_v5  ;;  %6961 = vst.msk [vmem:[%s8017_s20 + $0xa] ss:$4 sm:$0x3] %vm7924_vm4, %v3841_v32  ;;  %v3849_v3 = vrot.slane %v3848_v55, 5  ;;  %v3180_v54 = vadd.f32 %v3176_v61, %v3170_v13 }
 0x214   : > { %v3851_v16 = vrot.slane %v3850_v33, 6  ;;  %v3853_v25 = vrot.slane %v3852_v60, 7  ;;  %6962 = vst.msk [vmem:[%s8017_s20 + $0x12] ss:$4 sm:$0x3] %vm7924_vm4, %v3843_v63  ;;  %v3189_v19 = vadd.f32 %v3185_v14, %v3179_v34  ;;  %v3225_v9 = vmul.f32 %v10831_v50, %v10594_v43 }
 0x215   : > { %v3226_v5 = vmul.f32 %v10831_v50, %v10599_v41  ;;  %v3235_v44 = vmul.f32 %v10834_v39, %v7765_v17  ;;  %6963 = vst.msk [vmem:[%s8017_s20 + $0x1a] ss:$4 sm:$0x3] %vm7924_vm4, %v3845_v59  ;;  %v3190_v61 = vadd.f32 %v3186_v53, %v3180_v54  ;;  %v3236_v14 = vmul.f32 %v10834_v39, %v7767_v18 }
 0x216   : > { %v3245_v13 = vmul.f32 %v10837_v31, %v10604_v52  ;;  %v3246_v34 = vmul.f32 %v10837_v31, %v10626_v47  ;;  %6964 = vst.msk [vmem:[%s8017_s20 + $0x22] ss:$4 sm:$0x3] %vm7924_vm4, %v3847_v8  ;;  %v3199_v32 = vadd.f32 %v3195_v58, %v3189_v19  ;;  %v3229_v63 = vadd.f32 %v3225_v9, %v3219_v62 }
 0x217   : > { %v3230_v46 = vadd.f32 %v3226_v5, %v3220_v7  ;;  %v10881_v59 = vstv %s10822_s4  ;;  %6965 = vst.msk [vmem:[%s8017_s20 + $0x2a] ss:$4 sm:$0x3] %vm7924_vm4, %v3849_v3  ;;  %v3200_v53 = vadd.f32 %v3196_v45, %v3190_v61  ;;  %v10891_v60 = vstv %s10828_s6  ;;  %s11188_s4 = sld [smem:[#allocation8 + $0xdc]] }
 0x218   : > { %v3255_v55 = vmul.f32 %v10881_v59, %v7772_v20  ;;  %v3256_v33 = vmul.f32 %v10881_v59, %v7774_v21  ;;  %6966 = vst.msk [vmem:[%s8017_s20 + $0x32] ss:$4 sm:$0x3] %vm7924_vm4, %v3851_v16  ;;  %v3209_v58 = vadd.f32 %v3205_v1, %v3199_v32  ;;  %v3239_v62 = vadd.f32 %v3235_v44, %v3229_v63  ;;  %s11194_s6 = sld [smem:[#allocation8 + $0xd8]] }
 0x219   : > { %v3240_v7 = vadd.f32 %v3236_v14, %v3230_v46  ;;  %v3265_v8 = vmul.f32 %v10891_v60, %v10636_v40  ;;  %6967 = vst.msk [vmem:[%s8017_s20 + $0x3a] ss:$4 sm:$0x3] %vm7924_vm4, %v3853_v25  ;;  %v3210_v45 = vadd.f32 %v3206_v38, %v3200_v53  ;;  %v3266_v3 = vmul.f32 %v10891_v60, %v10641_v49 }
 0x21a   : > { %v3274_v54 = vstv %s10839_s25  ;;  %v10905_v19 = vstv %s10845_s27  ;;  %v3215_v9 = vadd.f32 %v10735_v51, %v3209_v58  ;;  %v3249_v16 = vadd.f32 %v3245_v13, %v3239_v62  ;;  %s11203_s25 = sld [smem:[#allocation9 + $0x3]] }
 0x21b   : > { %v3250_v1 = vadd.f32 %v3246_v34, %v3240_v7  ;;  %v3275_v5 = vmul.f32 %v3274_v54, %v7776_v22  ;;  %v3216_v44 = vadd.f32 %v10735_v51, %v3210_v45  ;;  %v3276_v61 = vmul.f32 %v3274_v54, %v7781_v24  ;;  %s11268_s27 = sld [smem:[#allocation8 + $0x24]] }
 0x21c   : > { %v3285_v25 = vmul.f32 %v10905_v19, %v10653_v23  ;;  %v3286_v38 = vmul.f32 %v10905_v19, %v10674_v37  ;;  %v3259_v14 = vadd.f32 %v3255_v55, %v3249_v16  ;;  %v10916_v63 = vstv %s10866_s10  ;;  %s11276_s10 = sld [smem:[#allocation8 + $0x20]] }
 0x21d   : > { %v3260_v32 = vadd.f32 %v3256_v33, %v3250_v1  ;;  %v3221_v13 = vmul.f32 %v10820_v30, %v13877_v42  ;;  %v3824_v34 = vrot.slane %v3216_v44, 7  ;;  %v3222_v51 = vmul.f32 %v10820_v30, %v13881_v2 }
 0x21e   : > { %v3227_v46 = vmul.f32 %v10831_v50, %v10740_v15  ;;  %v3228_v53 = vmul.f32 %v10831_v50, %v10752_v36  ;;  %v3269_v55 = vadd.f32 %v3265_v8, %v3259_v14  ;;  %v3237_v58 = vmul.f32 %v10834_v39, %v13876_v4 }
 0x21f   : > { %v3270_v33 = vadd.f32 %v3266_v3, %v3260_v32  ;;  %v3238_v62 = vmul.f32 %v10834_v39, %v13842_v6  ;;  %v3854_v30 = vsel %vm372_vm0, %v3215_v9, %v3824_v34  ;;  %v3855_v7 = vsel %vm1175_vm1, %v3215_v9, %v3824_v34 }
 0x220   : > { %v3857_v45 = vsel %vm1178_vm2, %v3215_v9, %v3824_v34  ;;  %v3859_v50 = vsel %vm1181_vm3, %v3215_v9, %v3824_v34  ;;  %6968 = vst.msk [vmem:[%s8017_s20 + $0x42] ss:$4 sm:$0x3] %vm7924_vm4, %v3854_v30  ;;  %v3856_v8 = vrot.slane %v3855_v7, 1  ;;  %v3861_v16 = vsel %vm1184_vm5, %v3215_v9, %v3824_v34 }
 0x221   : > { %v3858_v3 = vrot.slane %v3857_v45, 2  ;;  %v3860_v39 = vrot.slane %v3859_v50, 3  ;;  %v3862_v1 = vrot.slane %v3861_v16, 4  ;;  %v3863_v44 = vsel %vm1187_vm6, %v3215_v9, %v3824_v34 }
 0x222   : > { %v3865_v14 = vsel %vm1190_vm7, %v3215_v9, %v3824_v34  ;;  %v3867_v32 = vsel %vm421_vm8, %v3824_v34, %v3215_v9  ;;  %6969 = vst.msk [vmem:[%s8017_s20 + $0x4a] ss:$4 sm:$0x3] %vm7924_vm4, %v3856_v8  ;;  %v3864_v6 = vrot.slane %v3863_v44, 5  ;;  %v3279_v7 = vadd.f32 %v3275_v5, %v3269_v55 }
 0x223   : > { %v3866_v4 = vrot.slane %v3865_v14, 6  ;;  %v3868_v30 = vrot.slane %v3867_v32, 7  ;;  %6970 = vst.msk [vmem:[%s8017_s20 + $0x52] ss:$4 sm:$0x3] %vm7924_vm4, %v3858_v3  ;;  %v3280_v45 = vadd.f32 %v3276_v61, %v3270_v33  ;;  %v3231_v50 = vadd.f32 %v3227_v46, %v3221_v13 }
 0x224   : > { %v3232_v16 = vadd.f32 %v3228_v53, %v3222_v51  ;;  %v3247_v36 = vmul.f32 %v10837_v31, %v10762_v10  ;;  %6971 = vst.msk [vmem:[%s8017_s20 + $0x5a] ss:$4 sm:$0x3] %vm7924_vm4, %v3860_v39  ;;  %v3289_v9 = vadd.f32 %v3285_v25, %v3279_v7  ;;  %v3248_v34 = vmul.f32 %v10837_v31, %v10767_v11 }
 0x225   : > { %v3257_v5 = vmul.f32 %v10881_v59, %v7918_v29  ;;  %v3258_v55 = vmul.f32 %v10881_v59, %v7920_v28  ;;  %6972 = vst.msk [vmem:[%s8017_s20 + $0x62] ss:$4 sm:$0x3] %vm7924_vm4, %v3862_v1  ;;  %v3290_v61 = vadd.f32 %v3286_v38, %v3280_v45  ;;  %v3241_v13 = vadd.f32 %v3237_v58, %v3231_v50  ;;  %v13885_v1 = vld [vmem:[#allocation18_spill] sm:$0xff] }
 0x226   : > { %v3242_v51 = vadd.f32 %v3238_v62, %v3232_v16  ;;  %v3267_v25 = vmul.f32 %v10891_v60, %v10772_v35  ;;  %6973 = vst.msk [vmem:[%s8017_s20 + $0x6a] ss:$4 sm:$0x3] %vm7924_vm4, %v3864_v6  ;;  %v3295_v31 = vadd.f32 %v10916_v63, %v3289_v9  ;;  %v3268_v59 = vmul.f32 %v10891_v60, %v10777_v0 }
 0x227   : > { %v3277_v46 = vmul.f32 %v3274_v54, %v7922_v27  ;;  %v3278_v38 = vmul.f32 %v3274_v54, %v7928_v57  ;;  %6974 = vst.msk [vmem:[%s8017_s20 + $0x72] ss:$4 sm:$0x3] %vm7924_vm4, %v3866_v4  ;;  %v3296_v53 = vadd.f32 %v10916_v63, %v3290_v61  ;;  %v3251_v33 = vadd.f32 %v3247_v36, %v3241_v13 }
 0x228   : > { %v3252_v58 = vadd.f32 %v3248_v34, %v3242_v51  ;;  %v3287_v6 = vmul.f32 %v10905_v19, %v10782_v48  ;;  %6975 = vst.msk [vmem:[%s8017_s20 + $0x7a] ss:$4 sm:$0x3] %vm7924_vm4, %v3868_v30  ;;  %v3288_v60 = vmul.f32 %v10905_v19, %v10787_v26  ;;  %v10993_v54 = vstv %s10926_s15  ;;  %s11282_s15 = sld [smem:[#allocation8 + $0x64]] }
 0x229   : > { %v10996_v62 = vstv %s10932_s29  ;;  %v10999_v4 = vstv %s10938_s23  ;;  %v3825_v36 = vrot.slane %v3296_v53, 7  ;;  %v3261_v8 = vadd.f32 %v3257_v5, %v3251_v33  ;;  %s11291_s29 = sld [smem:[#allocation8 + $0x60]] }
 0x22a   : > { %v3262_v3 = vadd.f32 %v3258_v55, %v3252_v58  ;;  %v3301_v39 = vmul.f32 %v10993_v54, %v7756_v12  ;;  %v3302_v44 = vmul.f32 %v10993_v54, %v13885_v1  ;;  %v3307_v19 = vmul.f32 %v10996_v62, %v10594_v43  ;;  %s11341_s23 = sld [smem:[#allocation8 + $0xa4]] }
 0x22b   : > { %v3308_v14 = vmul.f32 %v10996_v62, %v10599_v41  ;;  %v3317_v32 = vmul.f32 %v10999_v4, %v7765_v17  ;;  %v3869_v30 = vsel %vm372_vm0, %v3295_v31, %v3825_v36  ;;  %v3870_v7 = vsel %vm1175_vm1, %v3295_v31, %v3825_v36 }
 0x22c   : > { %v3872_v45 = vsel %vm1178_vm2, %v3295_v31, %v3825_v36  ;;  %v3874_v50 = vsel %vm1181_vm3, %v3295_v31, %v3825_v36  ;;  %6976 = vst.msk [vmem:[%s8017_s20 + $0x82] ss:$4 sm:$0x3] %vm7924_vm4, %v3869_v30  ;;  %v3871_v16 = vrot.slane %v3870_v7, 1  ;;  %v3876_v5 = vsel %vm1184_vm5, %v3295_v31, %v3825_v36 }
 0x22d   : > { %v3873_v9 = vrot.slane %v3872_v45, 2  ;;  %v3875_v34 = vrot.slane %v3874_v50, 3  ;;  %v3877_v55 = vrot.slane %v3876_v5, 4  ;;  %v3878_v61 = vsel %vm1187_vm6, %v3295_v31, %v3825_v36 }
 0x22e   : > { %v3880_v13 = vsel %vm1190_vm7, %v3295_v31, %v3825_v36  ;;  %v3882_v51 = vsel %vm421_vm8, %v3825_v36, %v3295_v31  ;;  %6977 = vst.msk [vmem:[%s8017_s20 + $0x8a] ss:$4 sm:$0x3] %vm7924_vm4, %v3871_v16  ;;  %v3879_v53 = vrot.slane %v3878_v61, 5  ;;  %v3271_v30 = vadd.f32 %v3267_v25, %v3261_v8 }
 0x22f   : > { %v3881_v33 = vrot.slane %v3880_v13, 6  ;;  %v3883_v58 = vrot.slane %v3882_v51, 7  ;;  %6978 = vst.msk [vmem:[%s8017_s20 + $0x92] ss:$4 sm:$0x3] %vm7924_vm4, %v3873_v9  ;;  %v3272_v7 = vadd.f32 %v3268_v59, %v3262_v3  ;;  %v3311_v45 = vadd.f32 %v3307_v19, %v3301_v39 }
 0x230   : > { %v3312_v50 = vadd.f32 %v3308_v14, %v3302_v44  ;;  %v3318_v31 = vmul.f32 %v10999_v4, %v7767_v18  ;;  %6979 = vst.msk [vmem:[%s8017_s20 + $0x9a] ss:$4 sm:$0x3] %vm7924_vm4, %v3875_v34  ;;  %v3281_v36 = vadd.f32 %v3277_v46, %v3271_v30  ;;  %v11042_v16 = vstv %s10977_s30  ;;  %s11347_s30 = sld [smem:[#allocation8 + $0xa0]] }
 0x231   : > { %v11045_v5 = vstv %s10985_s7  ;;  %v11048_v25 = vstv %s11001_s26  ;;  %6980 = vst.msk [vmem:[%s8017_s20 + $0xa2] ss:$4 sm:$0x3] %vm7924_vm4, %v3877_v55  ;;  %v3282_v59 = vadd.f32 %v3278_v38, %v3272_v7  ;;  %v3321_v8 = vadd.f32 %v3317_v32, %v3311_v45  ;;  %s11358_s7 = sld [smem:[#allocation8 + $0xe4]] }
 0x232   : > { %v3322_v3 = vadd.f32 %v3318_v31, %v3312_v50  ;;  %v3327_v39 = vmul.f32 %v11042_v16, %v10604_v52  ;;  %6981 = vst.msk [vmem:[%s8017_s20 + $0xaa] ss:$4 sm:$0x3] %vm7924_vm4, %v3879_v53  ;;  %v3291_v46 = vadd.f32 %v3287_v6, %v3281_v36  ;;  %v3328_v44 = vmul.f32 %v11042_v16, %v10626_v47  ;;  %s11364_s26 = sld [smem:[#allocation8 + $0xe0]] }
 0x233   : > { %v3337_v19 = vmul.f32 %v11045_v5, %v7772_v20  ;;  %v3338_v38 = vmul.f32 %v11045_v5, %v7774_v21  ;;  %6982 = vst.msk [vmem:[%s8017_s20 + $0xb2] ss:$4 sm:$0x3] %vm7924_vm4, %v3881_v33  ;;  %v3292_v14 = vadd.f32 %v3288_v60, %v3282_v59  ;;  %v3347_v9 = vmul.f32 %v11048_v25, %v10636_v40 }
 0x234   : > { %v3331_v32 = vadd.f32 %v3327_v39, %v3321_v8  ;;  %v3348_v6 = vmul.f32 %v11048_v25, %v10641_v49  ;;  %6983 = vst.msk [vmem:[%s8017_s20 + $0xba] ss:$4 sm:$0x3] %vm7924_vm4, %v3883_v58  ;;  %v3297_v34 = vadd.f32 %v10916_v63, %v3291_v46  ;;  %v3332_v55 = vadd.f32 %v3328_v44, %v3322_v3  ;;  %v13886_v3 = vld [vmem:[#allocation25_spill] sm:$0xff]  ;;  %v13887_v46 = vld [vmem:[#allocation22_spill] sm:$0xff] }
 0x235   : > { %v11076_v61 = vstv %s11013_s5  ;;  %v11079_v13 = vstv %s11019_s2  ;;  %v3298_v60 = vadd.f32 %v10916_v63, %v3292_v14  ;;  %v11091_v45 = vstv %s11028_s24  ;;  %s11373_s5 = sld [smem:[#allocation9 + $0x4]] }
 0x236   : > { %v3341_v51 = vadd.f32 %v3337_v19, %v3331_v32  ;;  %v3357_v53 = vmul.f32 %v11076_v61, %v7776_v22  ;;  %v3358_v33 = vmul.f32 %v11076_v61, %v7781_v24  ;;  %v3342_v30 = vadd.f32 %v3338_v38, %v3332_v55  ;;  %s11443_s2 = sld [smem:[#allocation8 + $0x2c]] }
 0x237   : > { %v3367_v58 = vmul.f32 %v11079_v13, %v10653_v23  ;;  %v3368_v7 = vmul.f32 %v11079_v13, %v10674_v37  ;;  %v3826_v50 = vrot.slane %v3298_v60, 7  ;;  %v3303_v63 = vmul.f32 %v10993_v54, %v13877_v42  ;;  %s11453_s24 = sld [smem:[#allocation8 + $0x28]] }
 0x238   : > { %v3351_v31 = vadd.f32 %v3347_v9, %v3341_v51  ;;  %v3304_v36 = vmul.f32 %v10993_v54, %v13881_v2  ;;  %v3352_v59 = vadd.f32 %v3348_v6, %v3342_v30  ;;  %v3309_v8 = vmul.f32 %v10996_v62, %v10740_v15  ;;  %v13888_v15 = vld [vmem:[#allocation23_spill] sm:$0xff] }
 0x239   : > { %v3310_v39 = vmul.f32 %v10996_v62, %v13886_v3  ;;  %v3319_v44 = vmul.f32 %v10999_v4, %v13887_v46  ;;  %v3884_v19 = vsel %vm372_vm0, %v3297_v34, %v3826_v50  ;;  %v3885_v38 = vsel %vm1175_vm1, %v3297_v34, %v3826_v50 }
 0x23a   : > { %v3887_v14 = vsel %vm1178_vm2, %v3297_v34, %v3826_v50  ;;  %v3889_v54 = vsel %vm1181_vm3, %v3297_v34, %v3826_v50  ;;  %6984 = vst.msk [vmem:[%s8017_s20 + $0xc2] ss:$4 sm:$0x3] %vm7924_vm4, %v3884_v19  ;;  %v3886_v62 = vrot.slane %v3885_v38, 1  ;;  %v3891_v6 = vsel %vm1184_vm5, %v3297_v34, %v3826_v50 }
 0x23b   : > { %v3888_v32 = vrot.slane %v3887_v14, 2  ;;  %v3890_v9 = vrot.slane %v3889_v54, 3  ;;  %v3892_v55 = vrot.slane %v3891_v6, 4  ;;  %v3893_v60 = vsel %vm1187_vm6, %v3297_v34, %v3826_v50 }
 0x23c   : > { %v3895_v51 = vsel %vm1190_vm7, %v3297_v34, %v3826_v50  ;;  %v3897_v30 = vsel %vm421_vm8, %v3826_v50, %v3297_v34  ;;  %6985 = vst.msk [vmem:[%s8017_s20 + $0xca] ss:$4 sm:$0x3] %vm7924_vm4, %v3886_v62  ;;  %v3894_v19 = vrot.slane %v3893_v60, 5  ;;  %v3361_v54 = vadd.f32 %v3357_v53, %v3351_v31 }
 0x23d   : > { %v3896_v38 = vrot.slane %v3895_v51, 6  ;;  %v3898_v14 = vrot.slane %v3897_v30, 7  ;;  %6986 = vst.msk [vmem:[%s8017_s20 + $0xd2] ss:$4 sm:$0x3] %vm7924_vm4, %v3888_v32  ;;  %v3362_v6 = vadd.f32 %v3358_v33, %v3352_v59  ;;  %v3313_v46 = vadd.f32 %v3309_v8, %v3303_v63 }
 0x23e   : > { %v3314_v3 = vadd.f32 %v3310_v39, %v3304_v36  ;;  %v3320_v34 = vmul.f32 %v10999_v4, %v13888_v15  ;;  %6987 = vst.msk [vmem:[%s8017_s20 + $0xda] ss:$4 sm:$0x3] %vm7924_vm4, %v3890_v9  ;;  %v3371_v50 = vadd.f32 %v3367_v58, %v3361_v54  ;;  %v3329_v62 = vmul.f32 %v11042_v16, %v10762_v10 }
 0x23f   : > { %v3330_v53 = vmul.f32 %v11042_v16, %v10767_v11  ;;  %v3339_v31 = vmul.f32 %v11045_v5, %v7918_v29  ;;  %6988 = vst.msk [vmem:[%s8017_s20 + $0xe2] ss:$4 sm:$0x3] %vm7924_vm4, %v3892_v55  ;;  %v3372_v33 = vadd.f32 %v3368_v7, %v3362_v6  ;;  %v3323_v4 = vadd.f32 %v3319_v44, %v3313_v46 }
 0x240   : > { %v3324_v63 = vadd.f32 %v3320_v34, %v3314_v3  ;;  %v3340_v58 = vmul.f32 %v11045_v5, %v7920_v28  ;;  %6989 = vst.msk [vmem:[%s8017_s20 + $0xea] ss:$4 sm:$0x3] %vm7924_vm4, %v3894_v19  ;;  %v3377_v16 = vadd.f32 %v11091_v45, %v3371_v50  ;;  %v3349_v36 = vmul.f32 %v11048_v25, %v10772_v35 }
 0x241   : > { %v3350_v59 = vmul.f32 %v11048_v25, %v10777_v0  ;;  %v3359_v7 = vmul.f32 %v11076_v61, %v7922_v27  ;;  %6990 = vst.msk [vmem:[%s8017_s20 + $0xf2] ss:$4 sm:$0x3] %vm7924_vm4, %v3896_v38  ;;  %v3378_v5 = vadd.f32 %v11091_v45, %v3372_v33  ;;  %v3333_v8 = vadd.f32 %v3329_v62, %v3323_v4 }
 0x242   : > { %v3334_v3 = vadd.f32 %v3330_v53, %v3324_v63  ;;  %v3360_v39 = vmul.f32 %v11076_v61, %v7928_v57  ;;  %6991 = vst.msk [vmem:[%s8017_s20 + $0xfa] ss:$4 sm:$0x3] %vm7924_vm4, %v3898_v14  ;;  %v3369_v25 = vmul.f32 %v11079_v13, %v10782_v48  ;;  %v3370_v46 = vmul.f32 %v11079_v13, %v10787_v26 }
 0x243   : > { %v11168_v44 = vstv %s11103_s9  ;;  %v11171_v32 = vstv %s11109_s12  ;;  %v3827_v61 = vrot.slane %v3378_v5, 7  ;;  %v3343_v9 = vadd.f32 %v3339_v31, %v3333_v8  ;;  %s11459_s9 = sld [smem:[#allocation8 + $0x6c]] }
 0x244   : > { %v3344_v55 = vadd.f32 %v3340_v58, %v3334_v3  ;;  %v3383_v60 = vmul.f32 %v11168_v44, %v7756_v12  ;;  %v3384_v51 = vmul.f32 %v11168_v44, %v13885_v1  ;;  %v3389_v13 = vmul.f32 %v11171_v32, %v10594_v43  ;;  %s11468_s12 = sld [smem:[#allocation8 + $0x68]] }
 0x245   : > { %v3390_v30 = vmul.f32 %v11171_v32, %v10599_v41  ;;  %v11186_v19 = vstv %s11118_s3  ;;  %v3899_v38 = vsel %vm372_vm0, %v3377_v16, %v3827_v61  ;;  %v3900_v14 = vsel %vm1175_vm1, %v3377_v16, %v3827_v61  ;;  %s11517_s3 = sld [smem:[#allocation8 + $0xac]] }
 0x246   : > { %v3902_v54 = vsel %vm1178_vm2, %v3377_v16, %v3827_v61  ;;  %v3904_v6 = vsel %vm1181_vm3, %v3377_v16, %v3827_v61  ;;  %6992 = vst.msk [vmem:[%s8017_s20 + $0x102] ss:$4 sm:$0x3] %vm7924_vm4, %v3899_v38  ;;  %v3901_v34 = vrot.slane %v3900_v14, 1  ;;  %v3906_v53 = vsel %vm1184_vm5, %v3377_v16, %v3827_v61 }
 0x247   : > { %v3903_v50 = vrot.slane %v3902_v54, 2  ;;  %v3905_v62 = vrot.slane %v3904_v6, 3  ;;  %v3907_v31 = vrot.slane %v3906_v53, 4  ;;  %v3908_v33 = vsel %vm1187_vm6, %v3377_v16, %v3827_v61 }
 0x248   : > { %v3910_v4 = vsel %vm1190_vm7, %v3377_v16, %v3827_v61  ;;  %v3912_v63 = vsel %vm421_vm8, %v3827_v61, %v3377_v16  ;;  %6993 = vst.msk [vmem:[%s8017_s20 + $0x10a] ss:$4 sm:$0x3] %vm7924_vm4, %v3901_v34  ;;  %v3909_v58 = vrot.slane %v3908_v33, 5  ;;  %v3353_v3 = vadd.f32 %v3349_v36, %v3343_v9 }
 0x249   : > { %v3911_v5 = vrot.slane %v3910_v4, 6  ;;  %v3913_v8 = vrot.slane %v3912_v63, 7  ;;  %6994 = vst.msk [vmem:[%s8017_s20 + $0x112] ss:$4 sm:$0x3] %vm7924_vm4, %v3903_v50  ;;  %v3354_v38 = vadd.f32 %v3350_v59, %v3344_v55  ;;  %v3393_v14 = vadd.f32 %v3389_v13, %v3383_v60 }
 0x24a   : > { %v3394_v54 = vadd.f32 %v3390_v30, %v3384_v51  ;;  %v3399_v16 = vmul.f32 %v11186_v19, %v7765_v17  ;;  %6995 = vst.msk [vmem:[%s8017_s20 + $0x11a] ss:$4 sm:$0x3] %vm7924_vm4, %v3905_v62  ;;  %v3363_v61 = vadd.f32 %v3359_v7, %v3353_v3  ;;  %v3400_v6 = vmul.f32 %v11186_v19, %v7767_v18 }
 0x24b   : > { %v11219_v36 = vstv %s11158_s13  ;;  %v11222_v9 = vstv %s11173_s8  ;;  %6996 = vst.msk [vmem:[%s8017_s20 + $0x122] ss:$4 sm:$0x3] %vm7924_vm4, %v3907_v31  ;;  %v3364_v59 = vadd.f32 %v3360_v39, %v3354_v38  ;;  %v11242_v62 = vstv %s11177_s11  ;;  %s11522_s13 = sld [smem:[#allocation8 + $0xa8]] }
 0x24c   : > { %v3403_v55 = vadd.f32 %v3399_v16, %v3393_v14  ;;  %v3409_v60 = vmul.f32 %v11219_v36, %v10604_v52  ;;  %v3410_v7 = vmul.f32 %v11219_v36, %v10626_v47  ;;  %6997 = vst.msk [vmem:[%s8017_s20 + $0x12a] ss:$4 sm:$0x3] %vm7924_vm4, %v3909_v58  ;;  %v3373_v51 = vadd.f32 %v3369_v25, %v3363_v61  ;;  %s11535_s8 = sld [smem:[#allocation8 + $0xec]] }
 0x24d   : > { %v3404_v13 = vadd.f32 %v3400_v6, %v3394_v54  ;;  %v3419_v30 = vmul.f32 %v11222_v9, %v7772_v20  ;;  %v3420_v34 = vmul.f32 %v11222_v9, %v7774_v21  ;;  %6998 = vst.msk [vmem:[%s8017_s20 + $0x132] ss:$4 sm:$0x3] %vm7924_vm4, %v3911_v5  ;;  %v3374_v39 = vadd.f32 %v3370_v46, %v3364_v59  ;;  %s11547_s11 = sld [smem:[#allocation8 + $0xe8]] }
 0x24e   : > { %v3413_v50 = vadd.f32 %v3409_v60, %v3403_v55  ;;  %v11245_v53 = vstv %s11188_s4  ;;  %6999 = vst.msk [vmem:[%s8017_s20 + $0x13a] ss:$4 sm:$0x3] %vm7924_vm4, %v3913_v8  ;;  %v3379_v25 = vadd.f32 %v11091_v45, %v3373_v51  ;;  %v3429_v33 = vmul.f32 %v11242_v62, %v10636_v40  ;;  %v13889_v55 = vld [vmem:[#allocation24_spill] sm:$0xff]  ;;  %s11553_s4 = sld [smem:[#allocation9 + $0x5]] }
 0x24f   : > { %v3414_v31 = vadd.f32 %v3410_v7, %v3404_v13  ;;  %v3430_v4 = vmul.f32 %v11242_v62, %v10641_v49  ;;  %v3380_v63 = vadd.f32 %v11091_v45, %v3374_v39  ;;  %v3439_v58 = vmul.f32 %v11245_v53, %v7776_v22  ;;  %v13890_v7 = vld [vmem:[#allocation25_spill] sm:$0xff] }
 0x250   : > { %v3423_v46 = vadd.f32 %v3419_v30, %v3413_v50  ;;  %v3440_v5 = vmul.f32 %v11245_v53, %v7781_v24  ;;  %v3448_v8 = vstv %s11194_s6  ;;  %v11262_v38 = vstv %s11203_s25  ;;  %s11626_s6 = sld [smem:[#allocation8 + $0x34]] }
 0x251   : > { %v3424_v3 = vadd.f32 %v3420_v34, %v3414_v31  ;;  %v3385_v14 = vmul.f32 %v11168_v44, %v13877_v42  ;;  %v3828_v54 = vrot.slane %v3380_v63, 7  ;;  %v3449_v61 = vmul.f32 %v3448_v8, %v10653_v23  ;;  %s11635_s25 = sld [smem:[#allocation8 + $0x30]] }
 0x252   : > { %v3433_v16 = vadd.f32 %v3429_v33, %v3423_v46  ;;  %v3450_v45 = vmul.f32 %v3448_v8, %v10674_v37  ;;  %v3386_v59 = vmul.f32 %v11168_v44, %v13881_v2  ;;  %v3391_v60 = vmul.f32 %v11171_v32, %v13889_v55  ;;  %v13891_v55 = vld [vmem:[#allocation22_spill] sm:$0xff] }
 0x253   : > { %v3434_v6 = vadd.f32 %v3430_v4, %v3424_v3  ;;  %v3392_v51 = vmul.f32 %v11171_v32, %v13890_v7  ;;  %v3914_v13 = vsel %vm372_vm0, %v3379_v25, %v3828_v54  ;;  %v3915_v30 = vsel %vm1175_vm1, %v3379_v25, %v3828_v54 }
 0x254   : > { %v3917_v34 = vsel %vm1178_vm2, %v3379_v25, %v3828_v54  ;;  %v3919_v39 = vsel %vm1181_vm3, %v3379_v25, %v3828_v54  ;;  %7000 = vst.msk [vmem:[%s8017_s20 + $0x142] ss:$4 sm:$0x3] %vm7924_vm4, %v3914_v13  ;;  %v3916_v44 = vrot.slane %v3915_v30, 1  ;;  %v3921_v31 = vsel %vm1184_vm5, %v3379_v25, %v3828_v54 }
 0x255   : > { %v3918_v50 = vrot.slane %v3917_v34, 2  ;;  %v3920_v32 = vrot.slane %v3919_v39, 3  ;;  %v3922_v33 = vrot.slane %v3921_v31, 4  ;;  %v3923_v4 = vsel %vm1187_vm6, %v3379_v25, %v3828_v54 }
 0x256   : > { %v3925_v63 = vsel %vm1190_vm7, %v3379_v25, %v3828_v54  ;;  %v3927_v46 = vsel %vm421_vm8, %v3828_v54, %v3379_v25  ;;  %7001 = vst.msk [vmem:[%s8017_s20 + $0x14a] ss:$4 sm:$0x3] %vm7924_vm4, %v3916_v44  ;;  %v3924_v3 = vrot.slane %v3923_v4, 5  ;;  %v3443_v34 = vadd.f32 %v3439_v58, %v3433_v16 }
 0x257   : > { %v3926_v13 = vrot.slane %v3925_v63, 6  ;;  %v3928_v30 = vrot.slane %v3927_v46, 7  ;;  %7002 = vst.msk [vmem:[%s8017_s20 + $0x152] ss:$4 sm:$0x3] %vm7924_vm4, %v3918_v50  ;;  %v3444_v39 = vadd.f32 %v3440_v5, %v3434_v6  ;;  %v3395_v31 = vadd.f32 %v3391_v60, %v3385_v14 }
 0x258   : > { %v3396_v7 = vadd.f32 %v3392_v51, %v3386_v59  ;;  %v3401_v25 = vmul.f32 %v11186_v19, %v13891_v55  ;;  %7003 = vst.msk [vmem:[%s8017_s20 + $0x15a] ss:$4 sm:$0x3] %vm7924_vm4, %v3920_v32  ;;  %v3453_v54 = vadd.f32 %v3449_v61, %v3443_v34  ;;  %v3402_v44 = vmul.f32 %v11186_v19, %v13888_v15 }
 0x259   : > { %v3411_v58 = vmul.f32 %v11219_v36, %v10762_v10  ;;  %v3412_v16 = vmul.f32 %v11219_v36, %v10767_v11  ;;  %7004 = vst.msk [vmem:[%s8017_s20 + $0x162] ss:$4 sm:$0x3] %vm7924_vm4, %v3922_v33  ;;  %v3454_v5 = vadd.f32 %v3450_v45, %v3444_v39  ;;  %v3421_v6 = vmul.f32 %v11222_v9, %v7918_v29 }
 0x25a   : > { %v3405_v14 = vadd.f32 %v3401_v25, %v3395_v31  ;;  %v3422_v61 = vmul.f32 %v11222_v9, %v7920_v28  ;;  %7005 = vst.msk [vmem:[%s8017_s20 + $0x16a] ss:$4 sm:$0x3] %vm7924_vm4, %v3924_v3  ;;  %v3459_v19 = vadd.f32 %v11262_v38, %v3453_v54  ;;  %v3406_v59 = vadd.f32 %v3402_v44, %v3396_v7 }
 0x25b   : > { %v3431_v36 = vmul.f32 %v11242_v62, %v10772_v35  ;;  %v3432_v45 = vmul.f32 %v11242_v62, %v10777_v0  ;;  %7006 = vst.msk [vmem:[%s8017_s20 + $0x172] ss:$4 sm:$0x3] %vm7924_vm4, %v3926_v13  ;;  %v3460_v60 = vadd.f32 %v11262_v38, %v3454_v5  ;;  %v3441_v9 = vmul.f32 %v11245_v53, %v7922_v27 }
 0x25c   : > { %v3415_v51 = vadd.f32 %v3411_v58, %v3405_v14  ;;  %v3442_v7 = vmul.f32 %v11245_v53, %v7928_v57  ;;  %7007 = vst.msk [vmem:[%s8017_s20 + $0x17a] ss:$4 sm:$0x3] %vm7924_vm4, %v3928_v30  ;;  %v3416_v50 = vadd.f32 %v3412_v16, %v3406_v59  ;;  %v3451_v62 = vmul.f32 %v3448_v8, %v10782_v48 }
 0x25d   : > { %v3452_v32 = vmul.f32 %v3448_v8, %v10787_v26  ;;  %v11339_v33 = vstv %s11268_s27  ;;  %v3829_v4 = vrot.slane %v3460_v60, 7  ;;  %v11350_v13 = vstv %s11276_s10  ;;  %s11645_s27 = sld [smem:[#allocation8 + $0x74]] }
 0x25e   : > { %v3425_v63 = vadd.f32 %v3421_v6, %v3415_v51  ;;  %v3465_v46 = vmul.f32 %v11339_v33, %v7756_v12  ;;  %v3466_v53 = vmul.f32 %v11339_v33, %v13885_v1  ;;  %v3426_v3 = vadd.f32 %v3422_v61, %v3416_v50  ;;  %s11690_s10 = sld [smem:[#allocation8 + $0x70]] }
 0x25f   : > { %v11353_v30 = vstv %s11282_s15  ;;  %v11356_v8 = vstv %s11291_s29  ;;  %v3929_v34 = vsel %vm372_vm0, %v3459_v19, %v3829_v4  ;;  %v3930_v39 = vsel %vm1175_vm1, %v3459_v19, %v3829_v4  ;;  %s11698_s15 = sld [smem:[#allocation8 + $0xb4]] }
 0x260   : > { %v3932_v31 = vsel %vm1178_vm2, %v3459_v19, %v3829_v4  ;;  %v3934_v25 = vsel %vm1181_vm3, %v3459_v19, %v3829_v4  ;;  %7008 = vst.msk [vmem:[%s8017_s20 + $0x182] ss:$4 sm:$0x3] %vm7924_vm4, %v3929_v34  ;;  %v3931_v54 = vrot.slane %v3930_v39, 1  ;;  %v3936_v16 = vsel %vm1184_vm5, %v3459_v19, %v3829_v4  ;;  %s11705_s29 = sld [smem:[#allocation8 + $0xb0]] }
 0x261   : > { %v3933_v44 = vrot.slane %v3932_v31, 2  ;;  %v3935_v58 = vrot.slane %v3934_v25, 3  ;;  %v3937_v5 = vrot.slane %v3936_v16, 4  ;;  %v3938_v14 = vsel %vm1187_vm6, %v3459_v19, %v3829_v4 }
 0x262   : > { %v3940_v6 = vsel %vm1190_vm7, %v3459_v19, %v3829_v4  ;;  %v3942_v61 = vsel %vm421_vm8, %v3829_v4, %v3459_v19  ;;  %7009 = vst.msk [vmem:[%s8017_s20 + $0x18a] ss:$4 sm:$0x3] %vm7924_vm4, %v3931_v54  ;;  %v3939_v59 = vrot.slane %v3938_v14, 5  ;;  %v3435_v50 = vadd.f32 %v3431_v36, %v3425_v63 }
 0x263   : > { %v3941_v60 = vrot.slane %v3940_v6, 6  ;;  %v3943_v51 = vrot.slane %v3942_v61, 7  ;;  %7010 = vst.msk [vmem:[%s8017_s20 + $0x192] ss:$4 sm:$0x3] %vm7924_vm4, %v3933_v44  ;;  %v3436_v34 = vadd.f32 %v3432_v45, %v3426_v3  ;;  %v3471_v39 = vmul.f32 %v11350_v13, %v10594_v43 }
 0x264   : > { %v3472_v19 = vmul.f32 %v11350_v13, %v10599_v41  ;;  %v3481_v4 = vmul.f32 %v11353_v30, %v7765_v17  ;;  %7011 = vst.msk [vmem:[%s8017_s20 + $0x19a] ss:$4 sm:$0x3] %vm7924_vm4, %v3935_v58  ;;  %v3445_v36 = vadd.f32 %v3441_v9, %v3435_v50  ;;  %v3482_v63 = vmul.f32 %v11353_v30, %v7767_v18 }
 0x265   : > { %v3491_v45 = vmul.f32 %v11356_v8, %v10604_v52  ;;  %v3492_v3 = vmul.f32 %v11356_v8, %v10626_v47  ;;  %7012 = vst.msk [vmem:[%s8017_s20 + $0x1a2] ss:$4 sm:$0x3] %vm7924_vm4, %v3937_v5  ;;  %v3446_v31 = vadd.f32 %v3442_v7, %v3436_v34  ;;  %v3475_v25 = vadd.f32 %v3471_v39, %v3465_v46 }
 0x266   : > { %v3476_v54 = vadd.f32 %v3472_v19, %v3466_v53  ;;  %v11400_v44 = vstv %s11341_s23  ;;  %7013 = vst.msk [vmem:[%s8017_s20 + $0x1aa] ss:$4 sm:$0x3] %vm7924_vm4, %v3939_v59  ;;  %v3455_v9 = vadd.f32 %v3451_v62, %v3445_v36  ;;  %v11410_v14 = vstv %s11347_s30  ;;  %s11711_s23 = sld [smem:[#allocation8 + $0xf4]] }
 0x267   : > { %v3501_v58 = vmul.f32 %v11400_v44, %v7772_v20  ;;  %v3502_v16 = vmul.f32 %v11400_v44, %v7774_v21  ;;  %7014 = vst.msk [vmem:[%s8017_s20 + $0x1b2] ss:$4 sm:$0x3] %vm7924_vm4, %v3941_v60  ;;  %v3456_v7 = vadd.f32 %v3452_v32, %v3446_v31  ;;  %v3485_v46 = vadd.f32 %v3481_v4, %v3475_v25  ;;  %v13892_v31 = vld [vmem:[#allocation24_spill] sm:$0xff]  ;;  %s11717_s30 = sld [smem:[#allocation8 + $0xf0]] }
 0x268   : > { %v3486_v53 = vadd.f32 %v3482_v63, %v3476_v54  ;;  %v3511_v5 = vmul.f32 %v11410_v14, %v10636_v40  ;;  %7015 = vst.msk [vmem:[%s8017_s20 + $0x1ba] ss:$4 sm:$0x3] %vm7924_vm4, %v3943_v51  ;;  %v3461_v62 = vadd.f32 %v11262_v38, %v3455_v9  ;;  %v3512_v6 = vmul.f32 %v11410_v14, %v10641_v49  ;;  %v13893_v54 = vld [vmem:[#allocation25_spill] sm:$0xff] }
 0x269   : > { %v11424_v61 = vstv %s11358_s7  ;;  %v11427_v59 = vstv %s11364_s26  ;;  %v3462_v32 = vadd.f32 %v11262_v38, %v3456_v7  ;;  %v3495_v60 = vadd.f32 %v3491_v45, %v3485_v46  ;;  %s11726_s7 = sld [smem:[#allocation9 + $0x6]] }
 0x26a   : > { %v3496_v50 = vadd.f32 %v3492_v3, %v3486_v53  ;;  %v3521_v34 = vmul.f32 %v11424_v61, %v7776_v22  ;;  %v3522_v39 = vmul.f32 %v11424_v61, %v7781_v24  ;;  %v3531_v51 = vmul.f32 %v11427_v59, %v10653_v23  ;;  %s11789_s26 = sld [smem:[#allocation8 + $0x3c]] }
 0x26b   : > { %v3532_v19 = vmul.f32 %v11427_v59, %v10674_v37  ;;  %v11439_v4 = vstv %s11373_s5  ;;  %v3830_v36 = vrot.slane %v3462_v32, 7  ;;  %v3505_v63 = vadd.f32 %v3501_v58, %v3495_v60  ;;  %s11798_s5 = sld [smem:[#allocation8 + $0x38]] }
 0x26c   : > { %v3506_v38 = vadd.f32 %v3502_v16, %v3496_v50  ;;  %v3467_v45 = vmul.f32 %v11339_v33, %v13877_v42  ;;  %v3468_v3 = vmul.f32 %v11339_v33, %v13881_v2  ;;  %v3473_v25 = vmul.f32 %v11350_v13, %v13892_v31 }
 0x26d   : > { %v3474_v9 = vmul.f32 %v11350_v13, %v13893_v54  ;;  %v3483_v7 = vmul.f32 %v11353_v30, %v13891_v55  ;;  %v3944_v58 = vsel %vm372_vm0, %v3461_v62, %v3830_v36  ;;  %v3945_v16 = vsel %vm1175_vm1, %v3461_v62, %v3830_v36 }
 0x26e   : > { %v3947_v46 = vsel %vm1178_vm2, %v3461_v62, %v3830_v36  ;;  %v3949_v33 = vsel %vm1181_vm3, %v3461_v62, %v3830_v36  ;;  %7016 = vst.msk [vmem:[%s8017_s20 + $0x1c2] ss:$4 sm:$0x3] %vm7924_vm4, %v3944_v58  ;;  %v3946_v13 = vrot.slane %v3945_v16, 1  ;;  %v3951_v60 = vsel %vm1184_vm5, %v3461_v62, %v3830_v36 }
 0x26f   : > { %v3948_v53 = vrot.slane %v3947_v46, 2  ;;  %v3950_v32 = vrot.slane %v3949_v33, 3  ;;  %v3952_v50 = vrot.slane %v3951_v60, 4  ;;  %v3953_v55 = vsel %vm1187_vm6, %v3461_v62, %v3830_v36 }
 0x270   : > { %v3955_v54 = vsel %vm1190_vm7, %v3461_v62, %v3830_v36  ;;  %v3957_v31 = vsel %vm421_vm8, %v3830_v36, %v3461_v62  ;;  %7017 = vst.msk [vmem:[%s8017_s20 + $0x1ca] ss:$4 sm:$0x3] %vm7924_vm4, %v3946_v13  ;;  %v3954_v58 = vrot.slane %v3953_v55, 5  ;;  %v3515_v33 = vadd.f32 %v3511_v5, %v3505_v63 }
 0x271   : > { %v3956_v16 = vrot.slane %v3955_v54, 6  ;;  %v3958_v46 = vrot.slane %v3957_v31, 7  ;;  %7018 = vst.msk [vmem:[%s8017_s20 + $0x1d2] ss:$4 sm:$0x3] %vm7924_vm4, %v3948_v53  ;;  %v3516_v60 = vadd.f32 %v3512_v6, %v3506_v38  ;;  %v3477_v2 = vadd.f32 %v3473_v25, %v3467_v45 }
 0x272   : > { %v3478_v37 = vadd.f32 %v3474_v9, %v3468_v3  ;;  %v3484_v62 = vmul.f32 %v11353_v30, %v13888_v15  ;;  %7019 = vst.msk [vmem:[%s8017_s20 + $0x1da] ss:$4 sm:$0x3] %vm7924_vm4, %v3950_v32  ;;  %v3525_v36 = vadd.f32 %v3521_v34, %v3515_v33  ;;  %v3493_v55 = vmul.f32 %v11356_v8, %v10762_v10 }
 0x273   : > { %v3494_v5 = vmul.f32 %v11356_v8, %v10767_v11  ;;  %v3503_v63 = vmul.f32 %v11400_v44, %v7918_v29  ;;  %7020 = vst.msk [vmem:[%s8017_s20 + $0x1e2] ss:$4 sm:$0x3] %vm7924_vm4, %v3952_v50  ;;  %v3526_v6 = vadd.f32 %v3522_v39, %v3516_v60  ;;  %v3487_v30 = vadd.f32 %v3483_v7, %v3477_v2 }
 0x274   : > { %v3488_v38 = vadd.f32 %v3484_v62, %v3478_v37  ;;  %v3504_v34 = vmul.f32 %v11400_v44, %v7920_v28  ;;  %7021 = vst.msk [vmem:[%s8017_s20 + $0x1ea] ss:$4 sm:$0x3] %vm7924_vm4, %v3954_v58  ;;  %v3535_v45 = vadd.f32 %v3531_v51, %v3525_v36  ;;  %v3513_v8 = vmul.f32 %v11410_v14, %v10772_v35 }
 0x275   : > { %v3514_v3 = vmul.f32 %v11410_v14, %v10777_v0  ;;  %v3523_v31 = vmul.f32 %v11424_v61, %v7922_v27  ;;  %7022 = vst.msk [vmem:[%s8017_s20 + $0x1f2] ss:$4 sm:$0x3] %vm7924_vm4, %v3956_v16  ;;  %v3536_v2 = vadd.f32 %v3532_v19, %v3526_v6  ;;  %v3497_v37 = vadd.f32 %v3493_v55, %v3487_v30 }
 0x276   : > { %v3498_v44 = vadd.f32 %v3494_v5, %v3488_v38  ;;  %v3524_v39 = vmul.f32 %v11424_v61, %v7928_v57  ;;  %7023 = vst.msk [vmem:[%s8017_s20 + $0x1fa] ss:$4 sm:$0x3] %vm7924_vm4, %v3958_v46  ;;  %v3541_v14 = vadd.f32 %v11439_v4, %v3535_v45  ;;  %v3533_v51 = vmul.f32 %v11427_v59, %v10782_v48 }
 0x277   : > { %v3534_v25 = vmul.f32 %v11427_v59, %v10787_v26  ;;  %v11515_v19 = vstv %s11443_s2  ;;  %v3542_v54 = vadd.f32 %v11439_v4, %v3536_v2  ;;  %v3507_v9 = vadd.f32 %v3503_v63, %v3497_v37  ;;  %s11812_s2 = sld [smem:[#allocation8 + $0x7c]] }
 0x278   : > { %v3508_v7 = vadd.f32 %v3504_v34, %v3498_v44  ;;  %v3547_v61 = vmul.f32 %v11515_v19, %v7756_v12  ;;  %v3548_v13 = vmul.f32 %v11515_v19, %v13885_v1  ;;  %v11527_v53 = vstv %s11453_s24  ;;  %s11849_s24 = sld [smem:[#allocation8 + $0x78]] }
 0x279   : > { %v11530_v32 = vstv %s11459_s9  ;;  %v11533_v59 = vstv %s11468_s12  ;;  %v3831_v50 = vrot.slane %v3542_v54, 7  ;;  %v3517_v58 = vadd.f32 %v3513_v8, %v3507_v9  ;;  %s11857_s9 = sld [smem:[#allocation8 + $0xbc]] }
 0x27a   : > { %v3518_v16 = vadd.f32 %v3514_v3, %v3508_v7  ;;  %v3553_v46 = vmul.f32 %v11527_v53, %v10594_v43  ;;  %v3554_v33 = vmul.f32 %v11527_v53, %v10599_v41  ;;  %v3563_v60 = vmul.f32 %v11530_v32, %v7765_v17  ;;  %s11865_s12 = sld [smem:[#allocation8 + $0xb8]] }
 0x27b   : > { %v3564_v62 = vmul.f32 %v11530_v32, %v7767_v18  ;;  %v3573_v36 = vmul.f32 %v11533_v59, %v10604_v52  ;;  %v3959_v55 = vsel %vm372_vm0, %v3541_v14, %v3831_v50  ;;  %v3960_v5 = vsel %vm1175_vm1, %v3541_v14, %v3831_v50 }
 0x27c   : > { %v3962_v63 = vsel %vm1178_vm2, %v3541_v14, %v3831_v50  ;;  %v3964_v6 = vsel %vm1181_vm3, %v3541_v14, %v3831_v50  ;;  %7024 = vst.msk [vmem:[%s8017_s20 + $0x202] ss:$4 sm:$0x3] %vm7924_vm4, %v3959_v55  ;;  %v3961_v30 = vrot.slane %v3960_v5, 1  ;;  %v3966_v45 = vsel %vm1184_vm5, %v3541_v14, %v3831_v50 }
 0x27d   : > { %v3963_v38 = vrot.slane %v3962_v63, 2  ;;  %v3965_v34 = vrot.slane %v3964_v6, 3  ;;  %v3967_v8 = vrot.slane %v3966_v45, 4  ;;  %v3968_v3 = vsel %vm1187_vm6, %v3541_v14, %v3831_v50 }
 0x27e   : > { %v3970_v2 = vsel %vm1190_vm7, %v3541_v14, %v3831_v50  ;;  %v3972_v37 = vsel %vm421_vm8, %v3831_v50, %v3541_v14  ;;  %7025 = vst.msk [vmem:[%s8017_s20 + $0x20a] ss:$4 sm:$0x3] %vm7924_vm4, %v3961_v30  ;;  %v3969_v44 = vrot.slane %v3968_v3, 5  ;;  %v3527_v7 = vadd.f32 %v3523_v31, %v3517_v58 }
 0x27f   : > { %v3971_v54 = vrot.slane %v3970_v2, 6  ;;  %v3973_v9 = vrot.slane %v3972_v37, 7  ;;  %7026 = vst.msk [vmem:[%s8017_s20 + $0x212] ss:$4 sm:$0x3] %vm7924_vm4, %v3963_v38  ;;  %v3528_v55 = vadd.f32 %v3524_v39, %v3518_v16  ;;  %v3557_v5 = vadd.f32 %v3553_v46, %v3547_v61 }
 0x280   : > { %v3558_v63 = vadd.f32 %v3554_v33, %v3548_v13  ;;  %v3574_v6 = vmul.f32 %v11533_v59, %v10626_v47  ;;  %7027 = vst.msk [vmem:[%s8017_s20 + $0x21a] ss:$4 sm:$0x3] %vm7924_vm4, %v3965_v34  ;;  %v3537_v14 = vadd.f32 %v3533_v51, %v3527_v7  ;;  %v11574_v50 = vstv %s11517_s3  ;;  %v13895_v7 = vld [vmem:[#allocation21_spill] sm:$0xff]  ;;  %s11872_s3 = sld [smem:[#allocation8 + $0xfc]] }
 0x281   : > { %v11577_v30 = vstv %s11522_s13  ;;  %v11580_v31 = vstv %s11535_s8  ;;  %7028 = vst.msk [vmem:[%s8017_s20 + $0x222] ss:$4 sm:$0x3] %vm7924_vm4, %v3967_v8  ;;  %v3538_v39 = vadd.f32 %v3534_v25, %v3528_v55  ;;  %v3567_v61 = vadd.f32 %v3563_v60, %v3557_v5  ;;  %v13896_v55 = vld [vmem:[#allocation24_spill] sm:$0xff]  ;;  %s11878_s13 = sld [smem:[#allocation8 + $0xf8]] }
 0x282   : > { %v3568_v13 = vadd.f32 %v3564_v62, %v3558_v63  ;;  %v3583_v58 = vmul.f32 %v11574_v50, %v7772_v20  ;;  %7029 = vst.msk [vmem:[%s8017_s20 + $0x22a] ss:$4 sm:$0x3] %vm7924_vm4, %v3969_v44  ;;  %v3543_v51 = vadd.f32 %v11439_v4, %v3537_v14  ;;  %v3584_v16 = vmul.f32 %v11574_v50, %v7774_v21  ;;  %v13894_v44 = vld [vmem:[#allocation19_spill] sm:$0xff]  ;;  %v13897_v63 = vld [vmem:[#allocation25_spill] sm:$0xff]  ;;  %s11887_s8 = sld [smem:[#allocation9 + $0x7]] }
 0x283   : > { %v3593_v46 = vmul.f32 %v11577_v30, %v10636_v40  ;;  %v3594_v25 = vmul.f32 %v11577_v30, %v10641_v49  ;;  %7030 = vst.msk [vmem:[%s8017_s20 + $0x232] ss:$4 sm:$0x3] %vm7924_vm4, %v3971_v54  ;;  %v3544_v33 = vadd.f32 %v11439_v4, %v3538_v39  ;;  %v3577_v60 = vadd.f32 %v3573_v36, %v3567_v61 }
 0x284   : > { %v3578_v62 = vadd.f32 %v3574_v6, %v3568_v13  ;;  %v3603_v38 = vmul.f32 %v11580_v31, %v7776_v22  ;;  %7031 = vst.msk [vmem:[%s8017_s20 + $0x23a] ss:$4 sm:$0x3] %vm7924_vm4, %v3973_v9  ;;  %v3604_v34 = vmul.f32 %v11580_v31, %v7781_v24  ;;  %v3612_v45 = vstv %s11547_s11  ;;  %s11952_s11 = sld [smem:[#allocation8 + $0x5]] }
 0x285   : > { %v11610_v8 = vstv %s11553_s4  ;;  %v3549_v3 = vmul.f32 %v11515_v19, %v13877_v42  ;;  %v3832_v2 = vrot.slane %v3544_v33, 7  ;;  %v3587_v4 = vadd.f32 %v3583_v58, %v3577_v60  ;;  %v13898_v42 = vld [vmem:[#allocation22_spill] sm:$0xff]  ;;  %s11960_s4 = sld [smem:[#allocation8 + $0x1]] }
 0x286   : > { %v3588_v36 = vadd.f32 %v3584_v16, %v3578_v62  ;;  %v3613_v37 = vmul.f32 %v3612_v45, %v10653_v23  ;;  %v3614_v54 = vmul.f32 %v3612_v45, %v13894_v44  ;;  %v3550_v9 = vmul.f32 %v11515_v19, %v13895_v7 }
 0x287   : > { %v3555_v5 = vmul.f32 %v11527_v53, %v13896_v55  ;;  %v3556_v6 = vmul.f32 %v11527_v53, %v13897_v63  ;;  %v3974_v14 = vsel %vm372_vm0, %v3543_v51, %v3832_v2  ;;  %v3975_v39 = vsel %vm1175_vm1, %v3543_v51, %v3832_v2 }
 0x288   : > { %v3977_v61 = vsel %vm1178_vm2, %v3543_v51, %v3832_v2  ;;  %v3979_v13 = vsel %vm1181_vm3, %v3543_v51, %v3832_v2  ;;  %7032 = vst.msk [vmem:[%s8017_s20 + $0x242] ss:$4 sm:$0x3] %vm7924_vm4, %v3974_v14  ;;  %v3976_v19 = vrot.slane %v3975_v39, 1  ;;  %v3981_v53 = vsel %vm1184_vm5, %v3543_v51, %v3832_v2 }
 0x289   : > { %v3978_v58 = vrot.slane %v3977_v61, 2  ;;  %v3980_v16 = vrot.slane %v3979_v13, 3  ;;  %v3982_v33 = vrot.slane %v3981_v53, 4  ;;  %v3983_v60 = vsel %vm1187_vm6, %v3543_v51, %v3832_v2 }
 0x28a   : > { %v3985_v62 = vsel %vm1190_vm7, %v3543_v51, %v3832_v2  ;;  %v3987_v63 = vsel %vm421_vm8, %v3832_v2, %v3543_v51  ;;  %7033 = vst.msk [vmem:[%s8017_s20 + $0x24a] ss:$4 sm:$0x3] %vm7924_vm4, %v3976_v19  ;;  %v3984_v14 = vrot.slane %v3983_v60, 5  ;;  %v3597_v13 = vadd.f32 %v3593_v46, %v3587_v4 }
 0x28b   : > { %v3986_v39 = vrot.slane %v3985_v62, 6  ;;  %v3988_v61 = vrot.slane %v3987_v63, 7  ;;  %7034 = vst.msk [vmem:[%s8017_s20 + $0x252] ss:$4 sm:$0x3] %vm7924_vm4, %v3978_v58  ;;  %v3598_v53 = vadd.f32 %v3594_v25, %v3588_v36  ;;  %v3559_v55 = vadd.f32 %v3555_v5, %v3549_v3 }
 0x28c   : > { %v3560_v7 = vadd.f32 %v3556_v6, %v3550_v9  ;;  %v3565_v51 = vmul.f32 %v11530_v32, %v13898_v42  ;;  %7035 = vst.msk [vmem:[%s8017_s20 + $0x25a] ss:$4 sm:$0x3] %vm7924_vm4, %v3980_v16  ;;  %v3607_v2 = vadd.f32 %v3603_v38, %v3597_v13  ;;  %v3566_v46 = vmul.f32 %v11530_v32, %v13888_v15 }
 0x28d   : > { %v3575_v4 = vmul.f32 %v11533_v59, %v10762_v10  ;;  %v3576_v25 = vmul.f32 %v11533_v59, %v10767_v11  ;;  %7036 = vst.msk [vmem:[%s8017_s20 + $0x262] ss:$4 sm:$0x3] %vm7924_vm4, %v3982_v33  ;;  %v3608_v3 = vadd.f32 %v3604_v34, %v3598_v53  ;;  %v3585_v9 = vmul.f32 %v11574_v50, %v7918_v29 }
 0x28e   : > { %v3569_v36 = vadd.f32 %v3565_v51, %v3559_v55  ;;  %v3586_v38 = vmul.f32 %v11574_v50, %v7920_v28  ;;  %7037 = vst.msk [vmem:[%s8017_s20 + $0x26a] ss:$4 sm:$0x3] %vm7924_vm4, %v3984_v14  ;;  %v3617_v32 = vadd.f32 %v3613_v37, %v3607_v2  ;;  %v3570_v5 = vadd.f32 %v3566_v46, %v3560_v7 }
 0x28f   : > { %v3595_v59 = vmul.f32 %v11577_v30, %v10772_v35  ;;  %v3596_v34 = vmul.f32 %v11577_v30, %v10777_v0  ;;  %7038 = vst.msk [vmem:[%s8017_s20 + $0x272] ss:$4 sm:$0x3] %vm7924_vm4, %v3986_v39  ;;  %v3618_v55 = vadd.f32 %v3614_v54, %v3608_v3  ;;  %v3605_v50 = vmul.f32 %v11580_v31, %v7922_v27 }
 0x290   : > { %v3579_v63 = vadd.f32 %v3575_v4, %v3569_v36  ;;  %v3606_v37 = vmul.f32 %v11580_v31, %v7928_v57  ;;  %7039 = vst.msk [vmem:[%s8017_s20 + $0x27a] ss:$4 sm:$0x3] %vm7924_vm4, %v3988_v61  ;;  %v3623_v7 = vadd.f32 %v11610_v8, %v3617_v32  ;;  %v3580_v6 = vadd.f32 %v3576_v25, %v3570_v5 }
 0x291   : > { %v3615_v30 = vmul.f32 %v3612_v45, %v10782_v48  ;;  %v3616_v19 = vmul.f32 %v3612_v45, %v10787_v26  ;;  %v3624_v54 = vadd.f32 %v11610_v8, %v3618_v55  ;;  %v11685_v16 = vstv %s11626_s6  ;;  %s11966_s6 = sld [smem:[#allocation8 + $0x45]] }
 0x292   : > { %v3589_v58 = vadd.f32 %v3585_v9, %v3579_v63  ;;  %v11688_v33 = vstv %s11635_s25  ;;  %v3590_v31 = vadd.f32 %v3586_v38, %v3580_v6  ;;  %v3629_v60 = vmul.f32 %v11685_v16, %v7756_v12  ;;  %s11975_s25 = sld [smem:[#allocation8 + $0x41]] }
 0x293   : > { %v3630_v62 = vmul.f32 %v11685_v16, %v13885_v1  ;;  %v3635_v14 = vmul.f32 %v11688_v33, %v10594_v43  ;;  %v3833_v45 = vrot.slane %v3624_v54, 7  ;;  %v3636_v61 = vmul.f32 %v11688_v33, %v10599_v41 }
 0x294   : > { %v3599_v39 = vadd.f32 %v3595_v59, %v3589_v58  ;;  %v11703_v13 = vstv %s11645_s27  ;;  %v3600_v53 = vadd.f32 %v3596_v34, %v3590_v31  ;;  %s12025_s27 = sld [smem:[#allocation8 + $0x85]] }
 0x295   : > { %v3639_v51 = vadd.f32 %v3635_v14, %v3629_v60  ;;  %v3645_v2 = vmul.f32 %v11703_v13, %v7765_v17  ;;  %v3646_v46 = vmul.f32 %v11703_v13, %v7767_v18  ;;  %v3989_v4 = vsel %vm372_vm0, %v3623_v7, %v3833_v45 }
 0x296   : > { %v3990_v25 = vsel %vm1175_vm1, %v3623_v7, %v3833_v45  ;;  %v3992_v3 = vsel %vm1178_vm2, %v3623_v7, %v3833_v45  ;;  %v3994_v36 = vsel %vm1181_vm3, %v3623_v7, %v3833_v45  ;;  %7040 = vst.msk [vmem:[%s8017_s20 + $0x282] ss:$4 sm:$0x3] %vm7924_vm4, %v3989_v4  ;;  %v3996_v5 = vsel %vm1184_vm5, %v3623_v7, %v3833_v45 }
 0x297   : > { %v3991_v9 = vrot.slane %v3990_v25, 1  ;;  %v3993_v38 = vrot.slane %v3992_v3, 2  ;;  %v3995_v32 = vrot.slane %v3994_v36, 3  ;;  %v3997_v59 = vrot.slane %v3996_v5, 4 }
 0x298   : > { %v3998_v34 = vsel %vm1187_vm6, %v3623_v7, %v3833_v45  ;;  %v4000_v55 = vsel %vm1190_vm7, %v3623_v7, %v3833_v45  ;;  %v4002_v63 = vsel %vm421_vm8, %v3833_v45, %v3623_v7  ;;  %v3609_v31 = vadd.f32 %v3605_v50, %v3599_v39 }
 0x299   : > { %7041 = vst.msk [vmem:[%s8017_s20 + $0x28a] ss:$4 sm:$0x3] %vm7924_vm4, %v3991_v9  ;;  %v3999_v6 = vrot.slane %v3998_v34, 5  ;;  %v4001_v54 = vrot.slane %v4000_v55, 6  ;;  %v4003_v58 = vrot.slane %v4002_v63, 7  ;;  %v3610_v60 = vadd.f32 %v3606_v37, %v3600_v53 }
 0x29a   : > { %7042 = vst.msk [vmem:[%s8017_s20 + $0x292] ss:$4 sm:$0x3] %vm7924_vm4, %v3993_v38  ;;  %v3640_v14 = vadd.f32 %v3636_v61, %v3630_v62  ;;  %v3649_v4 = vadd.f32 %v3645_v2, %v3639_v51  ;;  %v11735_v7 = vstv %s11690_s10  ;;  %v3619_v45 = vadd.f32 %v3615_v30, %v3609_v31  ;;  %v13899_v31 = vld [vmem:[#allocation20_spill] sm:$0xff]  ;;  %s12031_s10 = sld [smem:[#allocation8 + $0x81]] }
 0x29b   : > { %7043 = vst.msk [vmem:[%s8017_s20 + $0x29a] ss:$4 sm:$0x3] %vm7924_vm4, %v3995_v32  ;;  %v3655_v25 = vmul.f32 %v11735_v7, %v10604_v52  ;;  %v3656_v50 = vmul.f32 %v11735_v7, %v10626_v47  ;;  %v11745_v39 = vstv %s11698_s15  ;;  %v3620_v37 = vadd.f32 %v3616_v19, %v3610_v60  ;;  %v13900_v60 = vld [vmem:[#allocation21_spill] sm:$0xff]  ;;  %s12042_s15 = sld [smem:[#allocation8 + $0xc5]] }
 0x29c   : > { %7044 = vst.msk [vmem:[%s8017_s20 + $0x2a2] ss:$4 sm:$0x3] %vm7924_vm4, %v3997_v59  ;;  %v3650_v62 = vadd.f32 %v3646_v46, %v3640_v14  ;;  %v3665_v61 = vmul.f32 %v11745_v39, %v7772_v20  ;;  %v3666_v30 = vmul.f32 %v11745_v39, %v7774_v21  ;;  %v3625_v53 = vadd.f32 %v11610_v8, %v3619_v45 }
 0x29d   : > { %7045 = vst.msk [vmem:[%s8017_s20 + $0x2aa] ss:$4 sm:$0x3] %vm7924_vm4, %v3999_v6  ;;  %v3659_v51 = vadd.f32 %v3655_v25, %v3649_v4  ;;  %v3674_v2 = vstv %s11705_s29  ;;  %v11760_v3 = vstv %s11711_s23  ;;  %v3626_v19 = vadd.f32 %v11610_v8, %v3620_v37  ;;  %s12048_s29 = sld [smem:[#allocation8 + $0xc1]] }
 0x29e   : > { %7046 = vst.msk [vmem:[%s8017_s20 + $0x2b2] ss:$4 sm:$0x3] %vm7924_vm4, %v4001_v54  ;;  %v3660_v46 = vadd.f32 %v3656_v50, %v3650_v62  ;;  %v3675_v36 = vmul.f32 %v3674_v2, %v10636_v40  ;;  %v3676_v9 = vmul.f32 %v3674_v2, %v10641_v49  ;;  %v3685_v32 = vmul.f32 %v11760_v3, %v7776_v22  ;;  %s12057_s23 = sld [smem:[#allocation9]] }
 0x29f   : > { %7047 = vst.msk [vmem:[%s8017_s20 + $0x2ba] ss:$4 sm:$0x3] %vm7924_vm4, %v4003_v58  ;;  %v3669_v38 = vadd.f32 %v3665_v61, %v3659_v51  ;;  %v3686_v5 = vmul.f32 %v11760_v3, %v7781_v24  ;;  %v3694_v59 = vstv %s11717_s30  ;;  %v3834_v34 = vrot.slane %v3626_v19, 7  ;;  %s12127_s30 = sld [smem:[#allocation8 + $0xd]] }
 0x2a0   : > { %v3670_v55 = vadd.f32 %v3666_v30, %v3660_v46  ;;  %v3695_v8 = vmul.f32 %v3694_v59, %v10653_v23  ;;  %v3696_v63 = vmul.f32 %v3694_v59, %v13894_v44  ;;  %v11779_v54 = vstv %s11726_s7  ;;  %s12137_s7 = sld [smem:[#allocation8 + $0x9]] }
 0x2a1   : > { %v3679_v6 = vadd.f32 %v3675_v36, %v3669_v38  ;;  %v3631_v58 = vmul.f32 %v11685_v16, %v13899_v31  ;;  %v3632_v14 = vmul.f32 %v11685_v16, %v13900_v60  ;;  %v4004_v4 = vsel %vm372_vm0, %v3625_v53, %v3834_v34  ;;  %v13902_v60 = vld [vmem:[#allocation25_spill] sm:$0xff] }
 0x2a2   : > { %v4005_v45 = vsel %vm1175_vm1, %v3625_v53, %v3834_v34  ;;  %v4007_v25 = vsel %vm1178_vm2, %v3625_v53, %v3834_v34  ;;  %v4009_v50 = vsel %vm1181_vm3, %v3625_v53, %v3834_v34  ;;  %7048 = vst.msk [vmem:[%s8017_s20 + $0x2c2] ss:$4 sm:$0x3] %vm7924_vm4, %v4004_v4  ;;  %v4011_v16 = vsel %vm1184_vm5, %v3625_v53, %v3834_v34 }
 0x2a3   : > { %v4006_v37 = vrot.slane %v4005_v45, 1  ;;  %v4008_v62 = vrot.slane %v4007_v25, 2  ;;  %v4010_v61 = vrot.slane %v4009_v50, 3  ;;  %v4012_v30 = vrot.slane %v4011_v16, 4  ;;  %v13901_v50 = vld [vmem:[#allocation24_spill] sm:$0xff] }
 0x2a4   : > { %v4013_v51 = vsel %vm1187_vm6, %v3625_v53, %v3834_v34  ;;  %v4015_v19 = vsel %vm1190_vm7, %v3625_v53, %v3834_v34  ;;  %v4017_v46 = vsel %vm421_vm8, %v3834_v34, %v3625_v53  ;;  %v3680_v45 = vadd.f32 %v3676_v9, %v3670_v55 }
 0x2a5   : > { %7049 = vst.msk [vmem:[%s8017_s20 + $0x2ca] ss:$4 sm:$0x3] %vm7924_vm4, %v4006_v37  ;;  %v4014_v36 = vrot.slane %v4013_v51, 5  ;;  %v4016_v38 = vrot.slane %v4015_v19, 6  ;;  %v4018_v4 = vrot.slane %v4017_v46, 7  ;;  %v3689_v25 = vadd.f32 %v3685_v32, %v3679_v6 }
 0x2a6   : > { %7050 = vst.msk [vmem:[%s8017_s20 + $0x2d2] ss:$4 sm:$0x3] %vm7924_vm4, %v4008_v62  ;;  %v3637_v16 = vmul.f32 %v11688_v33, %v13901_v50  ;;  %v3638_v53 = vmul.f32 %v11688_v33, %v13902_v60  ;;  %v3647_v34 = vmul.f32 %v11703_v13, %v13898_v42  ;;  %v3690_v9 = vadd.f32 %v3686_v5, %v3680_v45 }
 0x2a7   : > { %7051 = vst.msk [vmem:[%s8017_s20 + $0x2da] ss:$4 sm:$0x3] %vm7924_vm4, %v4010_v61  ;;  %v3648_v55 = vmul.f32 %v11703_v13, %v13888_v15  ;;  %v3657_v32 = vmul.f32 %v11735_v7, %v10762_v10  ;;  %v3658_v6 = vmul.f32 %v11735_v7, %v10767_v11  ;;  %v3699_v33 = vadd.f32 %v3695_v8, %v3689_v25 }
 0x2a8   : > { %7052 = vst.msk [vmem:[%s8017_s20 + $0x2e2] ss:$4 sm:$0x3] %vm7924_vm4, %v4012_v30  ;;  %v3641_v37 = vadd.f32 %v3637_v16, %v3631_v58  ;;  %v3642_v62 = vadd.f32 %v3638_v53, %v3632_v14  ;;  %v3667_v61 = vmul.f32 %v11745_v39, %v7918_v29  ;;  %v3700_v13 = vadd.f32 %v3696_v63, %v3690_v9 }
 0x2a9   : > { %7053 = vst.msk [vmem:[%s8017_s20 + $0x2ea] ss:$4 sm:$0x3] %vm7924_vm4, %v4014_v36  ;;  %v3668_v5 = vmul.f32 %v11745_v39, %v7920_v28  ;;  %v3677_v7 = vmul.f32 %v3674_v2, %v10772_v35  ;;  %v3678_v51 = vmul.f32 %v3674_v2, %v10777_v0  ;;  %v3705_v8 = vadd.f32 %v11779_v54, %v3699_v33 }
 0x2aa   : > { %7054 = vst.msk [vmem:[%s8017_s20 + $0x2f2] ss:$4 sm:$0x3] %vm7924_vm4, %v4016_v38  ;;  %v3651_v58 = vadd.f32 %v3647_v34, %v3641_v37  ;;  %v3652_v14 = vadd.f32 %v3648_v55, %v3642_v62  ;;  %v3687_v30 = vmul.f32 %v11760_v3, %v7922_v27  ;;  %v3706_v39 = vadd.f32 %v11779_v54, %v3700_v13 }
 0x2ab   : > { %7055 = vst.msk [vmem:[%s8017_s20 + $0x2fa] ss:$4 sm:$0x3] %vm7924_vm4, %v4018_v4  ;;  %v3688_v63 = vmul.f32 %v11760_v3, %v7928_v57  ;;  %v3697_v2 = vmul.f32 %v3694_v59, %v10782_v48  ;;  %v3698_v19 = vmul.f32 %v3694_v59, %v10787_v26  ;;  %v11852_v38 = vstv %s11789_s26  ;;  %s12143_s26 = sld [smem:[#allocation8 + $0x4d]] }
 0x2ac   : > { %v3661_v46 = vadd.f32 %v3657_v32, %v3651_v58  ;;  %v3662_v36 = vadd.f32 %v3658_v6, %v3652_v14  ;;  %v11855_v45 = vstv %s11798_s5  ;;  %v3835_v4 = vrot.slane %v3706_v39, 7  ;;  %s12152_s5 = sld [smem:[#allocation8 + $0x49]] }
 0x2ad   : > { %v3711_v3 = vmul.f32 %v11852_v38, %v7756_v12  ;;  %v3712_v25 = vmul.f32 %v11852_v38, %v13885_v1  ;;  %v3717_v59 = vmul.f32 %v11855_v45, %v10594_v43  ;;  %v3718_v34 = vmul.f32 %v11855_v45, %v10599_v41 }
 0x2ae   : > { %v3671_v16 = vadd.f32 %v3667_v61, %v3661_v46  ;;  %v3672_v53 = vadd.f32 %v3668_v5, %v3662_v36  ;;  %v11870_v9 = vstv %s11812_s2  ;;  %v4019_v55 = vsel %vm372_vm0, %v3705_v8, %v3835_v4  ;;  %s12201_s2 = sld [smem:[#allocation8 + $0x8d]] }
 0x2af   : > { %v4020_v32 = vsel %vm1175_vm1, %v3705_v8, %v3835_v4  ;;  %v4022_v6 = vsel %vm1178_vm2, %v3705_v8, %v3835_v4  ;;  %v4024_v33 = vsel %vm1181_vm3, %v3705_v8, %v3835_v4  ;;  %7056 = vst.msk [vmem:[%s8017_s20 + $0x302] ss:$4 sm:$0x3] %vm7924_vm4, %v4019_v55  ;;  %v4026_v13 = vsel %vm1184_vm5, %v3705_v8, %v3835_v4 }
 0x2b0   : > { %v4021_v37 = vrot.slane %v4020_v32, 1  ;;  %v4023_v62 = vrot.slane %v4022_v6, 2  ;;  %v4025_v61 = vrot.slane %v4024_v33, 3  ;;  %v4027_v5 = vrot.slane %v4026_v13, 4 }
 0x2b1   : > { %v4028_v58 = vsel %vm1187_vm6, %v3705_v8, %v3835_v4  ;;  %v4030_v14 = vsel %vm1190_vm7, %v3705_v8, %v3835_v4  ;;  %v4032_v39 = vsel %vm421_vm8, %v3835_v4, %v3705_v8  ;;  %v3681_v32 = vadd.f32 %v3677_v7, %v3671_v16 }
 0x2b2   : > { %7057 = vst.msk [vmem:[%s8017_s20 + $0x30a] ss:$4 sm:$0x3] %vm7924_vm4, %v4021_v37  ;;  %v4029_v46 = vrot.slane %v4028_v58, 5  ;;  %v4031_v36 = vrot.slane %v4030_v14, 6  ;;  %v4033_v55 = vrot.slane %v4032_v39, 7  ;;  %v3682_v6 = vadd.f32 %v3678_v51, %v3672_v53 }
 0x2b3   : > { %7058 = vst.msk [vmem:[%s8017_s20 + $0x312] ss:$4 sm:$0x3] %vm7924_vm4, %v4023_v62  ;;  %v3721_v33 = vadd.f32 %v3717_v59, %v3711_v3  ;;  %v3722_v13 = vadd.f32 %v3718_v34, %v3712_v25  ;;  %v3727_v8 = vmul.f32 %v11870_v9, %v7765_v17  ;;  %v3691_v4 = vadd.f32 %v3687_v30, %v3681_v32 }
 0x2b4   : > { %7059 = vst.msk [vmem:[%s8017_s20 + $0x31a] ss:$4 sm:$0x3] %vm7924_vm4, %v4025_v61  ;;  %v3728_v37 = vmul.f32 %v11870_v9, %v7767_v18  ;;  %v11903_v7 = vstv %s11849_s24  ;;  %v11906_v16 = vstv %s11857_s9  ;;  %v3692_v51 = vadd.f32 %v3688_v63, %v3682_v6  ;;  %s12206_s24 = sld [smem:[#allocation8 + $0x89]] }
 0x2b5   : > { %7060 = vst.msk [vmem:[%s8017_s20 + $0x322] ss:$4 sm:$0x3] %vm7924_vm4, %v4027_v5  ;;  %v3731_v3 = vadd.f32 %v3727_v8, %v3721_v33  ;;  %v3737_v25 = vmul.f32 %v11903_v7, %v10604_v52  ;;  %v3738_v30 = vmul.f32 %v11903_v7, %v10626_v47  ;;  %v3701_v59 = vadd.f32 %v3697_v2, %v3691_v4  ;;  %s12219_s9 = sld [smem:[#allocation8 + $0xcd]] }
 0x2b6   : > { %7061 = vst.msk [vmem:[%s8017_s20 + $0x32a] ss:$4 sm:$0x3] %vm7924_vm4, %v4029_v46  ;;  %v3732_v53 = vadd.f32 %v3728_v37, %v3722_v13  ;;  %v3747_v34 = vmul.f32 %v11906_v16, %v7772_v20  ;;  %v3748_v62 = vmul.f32 %v11906_v16, %v7774_v21  ;;  %v3702_v63 = vadd.f32 %v3698_v19, %v3692_v51 }
 0x2b7   : > { %7062 = vst.msk [vmem:[%s8017_s20 + $0x332] ss:$4 sm:$0x3] %vm7924_vm4, %v4031_v36  ;;  %v3741_v61 = vadd.f32 %v3737_v25, %v3731_v3  ;;  %v11926_v5 = vstv %s11865_s12  ;;  %v11929_v58 = vstv %s11872_s3  ;;  %v3707_v2 = vadd.f32 %v11779_v54, %v3701_v59  ;;  %v13903_v25 = vld [vmem:[#allocation21_spill] sm:$0xff]  ;;  %s12231_s12 = sld [smem:[#allocation8 + $0xc9]] }
 0x2b8   : > { %7063 = vst.msk [vmem:[%s8017_s20 + $0x33a] ss:$4 sm:$0x3] %vm7924_vm4, %v4033_v55  ;;  %v3742_v14 = vadd.f32 %v3738_v30, %v3732_v53  ;;  %v3757_v39 = vmul.f32 %v11926_v5, %v10636_v40  ;;  %v3758_v46 = vmul.f32 %v11926_v5, %v10641_v49  ;;  %v3708_v36 = vadd.f32 %v11779_v54, %v3702_v63  ;;  %s12237_s3 = sld [smem:[#allocation9 + $0x1]] }
 0x2b9   : > { %v3751_v19 = vadd.f32 %v3747_v34, %v3741_v61  ;;  %v3767_v32 = vmul.f32 %v11929_v58, %v7776_v22  ;;  %v3768_v6 = vmul.f32 %v11929_v58, %v7781_v24  ;;  %v3776_v55 = vstv %s11878_s13  ;;  %s12310_s13 = sld [smem:[#allocation8 + $0x15]] }
 0x2ba   : > { %v3752_v33 = vadd.f32 %v3748_v62, %v3742_v14  ;;  %v11946_v13 = vstv %s11887_s8  ;;  %v3713_v8 = vmul.f32 %v11852_v38, %v13899_v31  ;;  %v3836_v4 = vrot.slane %v3708_v36, 7  ;;  %s12319_s8 = sld [smem:[#allocation8 + $0x11]] }
 0x2bb   : > { %v3761_v37 = vadd.f32 %v3757_v39, %v3751_v19  ;;  %v3777_v51 = vmul.f32 %v3776_v55, %v10653_v23  ;;  %v3778_v54 = vmul.f32 %v3776_v55, %v13894_v44  ;;  %v3714_v30 = vmul.f32 %v11852_v38, %v13903_v25 }
 0x2bc   : > { %v3762_v3 = vadd.f32 %v3758_v46, %v3752_v33  ;;  %v3719_v59 = vmul.f32 %v11855_v45, %v13901_v50  ;;  %v3720_v53 = vmul.f32 %v11855_v45, %v13902_v60  ;;  %v4034_v34 = vsel %vm372_vm0, %v3707_v2, %v3836_v4 }
 0x2bd   : > { %v4035_v62 = vsel %vm1175_vm1, %v3707_v2, %v3836_v4  ;;  %v4037_v63 = vsel %vm1178_vm2, %v3707_v2, %v3836_v4  ;;  %v4039_v61 = vsel %vm1181_vm3, %v3707_v2, %v3836_v4  ;;  %7064 = vst.msk [vmem:[%s8017_s20 + $0x342] ss:$4 sm:$0x3] %vm7924_vm4, %v4034_v34  ;;  %v4041_v39 = vsel %vm1184_vm5, %v3707_v2, %v3836_v4 }
 0x2be   : > { %v4036_v38 = vrot.slane %v4035_v62, 1  ;;  %v4038_v14 = vrot.slane %v4037_v63, 2  ;;  %v4040_v45 = vrot.slane %v4039_v61, 3  ;;  %v4042_v46 = vrot.slane %v4041_v39, 4 }
 0x2bf   : > { %v4043_v36 = vsel %vm1187_vm6, %v3707_v2, %v3836_v4  ;;  %v4045_v19 = vsel %vm1190_vm7, %v3707_v2, %v3836_v4  ;;  %v4047_v33 = vsel %vm421_vm8, %v3836_v4, %v3707_v2  ;;  %v3771_v61 = vadd.f32 %v3767_v32, %v3761_v37 }
 0x2c0   : > { %7065 = vst.msk [vmem:[%s8017_s20 + $0x34a] ss:$4 sm:$0x3] %vm7924_vm4, %v4036_v38  ;;  %v4044_v34 = vrot.slane %v4043_v36, 5  ;;  %v4046_v62 = vrot.slane %v4045_v19, 6  ;;  %v4048_v63 = vrot.slane %v4047_v33, 7  ;;  %v3772_v39 = vadd.f32 %v3768_v6, %v3762_v3 }
 0x2c1   : > { %7066 = vst.msk [vmem:[%s8017_s20 + $0x352] ss:$4 sm:$0x3] %vm7924_vm4, %v4038_v14  ;;  %v3723_v60 = vadd.f32 %v3719_v59, %v3713_v8  ;;  %v3724_v50 = vadd.f32 %v3720_v53, %v3714_v30  ;;  %v3729_v2 = vmul.f32 %v11870_v9, %v13898_v42  ;;  %v3781_v4 = vadd.f32 %v3777_v51, %v3771_v61 }
 0x2c2   : > { %7067 = vst.msk [vmem:[%s8017_s20 + $0x35a] ss:$4 sm:$0x3] %vm7924_vm4, %v4040_v45  ;;  %v3730_v38 = vmul.f32 %v11870_v9, %v13888_v15  ;;  %v3739_v32 = vmul.f32 %v11903_v7, %v10762_v10  ;;  %v3740_v37 = vmul.f32 %v11903_v7, %v10767_v11  ;;  %v3782_v6 = vadd.f32 %v3778_v54, %v3772_v39 }
 0x2c3   : > { %7068 = vst.msk [vmem:[%s8017_s20 + $0x362] ss:$4 sm:$0x3] %vm7924_vm4, %v4042_v46  ;;  %v3733_v8 = vadd.f32 %v3729_v2, %v3723_v60  ;;  %v3749_v3 = vmul.f32 %v11906_v16, %v7918_v29  ;;  %v3750_v51 = vmul.f32 %v11906_v16, %v7920_v28  ;;  %v3787_v9 = vadd.f32 %v11946_v13, %v3781_v4 }
 0x2c4   : > { %7069 = vst.msk [vmem:[%s8017_s20 + $0x36a] ss:$4 sm:$0x3] %vm7924_vm4, %v4044_v34  ;;  %v3734_v30 = vadd.f32 %v3730_v38, %v3724_v50  ;;  %v3759_v7 = vmul.f32 %v11926_v5, %v10772_v35  ;;  %v3760_v54 = vmul.f32 %v11926_v5, %v10777_v0  ;;  %v3788_v60 = vadd.f32 %v11946_v13, %v3782_v6 }
 0x2c5   : > { %7070 = vst.msk [vmem:[%s8017_s20 + $0x372] ss:$4 sm:$0x3] %vm7924_vm4, %v4046_v62  ;;  %v3743_v59 = vadd.f32 %v3739_v32, %v3733_v8  ;;  %v3769_v16 = vmul.f32 %v11929_v58, %v7922_v27  ;;  %v3770_v50 = vmul.f32 %v11929_v58, %v7928_v57  ;;  %v3779_v5 = vmul.f32 %v3776_v55, %v10782_v48 }
 0x2c6   : > { %7071 = vst.msk [vmem:[%s8017_s20 + $0x37a] ss:$4 sm:$0x3] %vm7924_vm4, %v4048_v63  ;;  %v3744_v53 = vadd.f32 %v3740_v37, %v3734_v30  ;;  %v3780_v14 = vmul.f32 %v3776_v55, %v10787_v26  ;;  %v12023_v45 = vstv %s11952_s11  ;;  %v3837_v46 = vrot.slane %v3788_v60, 7  ;;  %s12329_s11 = sld [smem:[#allocation8 + $0x55]] }
 0x2c7   : > { %v3753_v36 = vadd.f32 %v3749_v3, %v3743_v59  ;;  %v4465_v19 = vmul.f32 %v12023_v45, %v7756_v12  ;;  %v4466_v58 = vmul.f32 %v12023_v45, %v13885_v1  ;;  %v12034_v34 = vstv %s11960_s4  ;;  %s12374_s4 = sld [smem:[#allocation8 + $0x51]] }
 0x2c8   : > { %v3754_v33 = vadd.f32 %v3750_v51, %v3744_v53  ;;  %v12037_v62 = vstv %s11966_s6  ;;  %v12040_v55 = vstv %s11975_s25  ;;  %v4049_v63 = vsel %vm372_vm0, %v3787_v9, %v3837_v46  ;;  %s12382_s6 = sld [smem:[#allocation8 + $0x95]] }
 0x2c9   : > { %v4050_v61 = vsel %vm1175_vm1, %v3787_v9, %v3837_v46  ;;  %v4052_v39 = vsel %vm1178_vm2, %v3787_v9, %v3837_v46  ;;  %v4054_v2 = vsel %vm1181_vm3, %v3787_v9, %v3837_v46  ;;  %7072 = vst.msk [vmem:[%s8017_s20 + $0x382] ss:$4 sm:$0x3] %vm7924_vm4, %v4049_v63  ;;  %v4056_v37 = vsel %vm1184_vm5, %v3787_v9, %v3837_v46  ;;  %s12389_s25 = sld [smem:[#allocation8 + $0x91]] }
 0x2ca   : > { %v4051_v4 = vrot.slane %v4050_v61, 1  ;;  %v4053_v38 = vrot.slane %v4052_v39, 2  ;;  %v4055_v32 = vrot.slane %v4054_v2, 3  ;;  %v4057_v6 = vrot.slane %v4056_v37, 4 }
 0x2cb   : > { %v4058_v8 = vsel %vm1187_vm6, %v3787_v9, %v3837_v46  ;;  %v4060_v3 = vsel %vm1190_vm7, %v3787_v9, %v3837_v46  ;;  %v4062_v51 = vsel %vm421_vm8, %v3837_v46, %v3787_v9  ;;  %v3763_v53 = vadd.f32 %v3759_v7, %v3753_v36 }
 0x2cc   : > { %7073 = vst.msk [vmem:[%s8017_s20 + $0x38a] ss:$4 sm:$0x3] %vm7924_vm4, %v4051_v4  ;;  %v4059_v30 = vrot.slane %v4058_v8, 5  ;;  %v4061_v60 = vrot.slane %v4060_v3, 6  ;;  %v4063_v59 = vrot.slane %v4062_v51, 7  ;;  %v3764_v63 = vadd.f32 %v3760_v54, %v3754_v33 }
 0x2cd   : > { %7074 = vst.msk [vmem:[%s8017_s20 + $0x392] ss:$4 sm:$0x3] %vm7924_vm4, %v4053_v38  ;;  %v4471_v61 = vmul.f32 %v12034_v34, %v10594_v43  ;;  %v4472_v9 = vmul.f32 %v12034_v34, %v10599_v41  ;;  %v4481_v46 = vmul.f32 %v12037_v62, %v7765_v17  ;;  %v3773_v7 = vadd.f32 %v3769_v16, %v3763_v53 }
 0x2ce   : > { %7075 = vst.msk [vmem:[%s8017_s20 + $0x39a] ss:$4 sm:$0x3] %vm7924_vm4, %v4055_v32  ;;  %v4482_v36 = vmul.f32 %v12037_v62, %v7767_v18  ;;  %v4491_v54 = vmul.f32 %v12040_v55, %v10604_v52  ;;  %v4492_v33 = vmul.f32 %v12040_v55, %v10626_v47  ;;  %v3774_v39 = vadd.f32 %v3770_v50, %v3764_v63 }
 0x2cf   : > { %7076 = vst.msk [vmem:[%s8017_s20 + $0x3a2] ss:$4 sm:$0x3] %vm7924_vm4, %v4057_v6  ;;  %v4475_v2 = vadd.f32 %v4471_v61, %v4465_v19  ;;  %v4476_v4 = vadd.f32 %v4472_v9, %v4466_v58  ;;  %v12084_v38 = vstv %s12025_s27  ;;  %v3783_v16 = vadd.f32 %v3779_v5, %v3773_v7  ;;  %s12395_s27 = sld [smem:[#allocation8 + $0xd5]] }
 0x2d0   : > { %7077 = vst.msk [vmem:[%s8017_s20 + $0x3aa] ss:$4 sm:$0x3] %vm7924_vm4, %v4059_v30  ;;  %v4501_v32 = vmul.f32 %v12084_v38, %v7772_v20  ;;  %v4502_v37 = vmul.f32 %v12084_v38, %v7774_v21  ;;  %v12094_v8 = vstv %s12031_s10  ;;  %v3784_v50 = vadd.f32 %v3780_v14, %v3774_v39  ;;  %v13904_v39 = vld [vmem:[#allocation24_spill] sm:$0xff]  ;;  %s12401_s10 = sld [smem:[#allocation8 + $0xd1]] }
 0x2d1   : > { %7078 = vst.msk [vmem:[%s8017_s20 + $0x3b2] ss:$4 sm:$0x3] %vm7924_vm4, %v4061_v60  ;;  %v4485_v19 = vadd.f32 %v4481_v46, %v4475_v2  ;;  %v4486_v58 = vadd.f32 %v4482_v36, %v4476_v4  ;;  %v4511_v6 = vmul.f32 %v12094_v8, %v10636_v40  ;;  %v3789_v5 = vadd.f32 %v11946_v13, %v3783_v16  ;;  %v13905_v4 = vld [vmem:[#allocation25_spill] sm:$0xff] }
 0x2d2   : > { %7079 = vst.msk [vmem:[%s8017_s20 + $0x3ba] ss:$4 sm:$0x3] %vm7924_vm4, %v4063_v59  ;;  %v4512_v3 = vmul.f32 %v12094_v8, %v10641_v49  ;;  %v12108_v51 = vstv %s12042_s15  ;;  %v12111_v30 = vstv %s12048_s29  ;;  %v3790_v14 = vadd.f32 %v11946_v13, %v3784_v50  ;;  %s12410_s15 = sld [smem:[#allocation9 + $0x2]] }
 0x2d3   : > { %v4495_v60 = vadd.f32 %v4491_v54, %v4485_v19  ;;  %v4496_v53 = vadd.f32 %v4492_v33, %v4486_v58  ;;  %v4521_v63 = vmul.f32 %v12108_v51, %v7776_v22  ;;  %v4522_v61 = vmul.f32 %v12108_v51, %v7781_v24  ;;  %s12473_s29 = sld [smem:[#allocation8 + $0x1d]] }
 0x2d4   : > { %v4531_v59 = vmul.f32 %v12111_v30, %v10653_v23  ;;  %v4532_v9 = vmul.f32 %v12111_v30, %v13894_v44  ;;  %v12123_v46 = vstv %s12057_s23  ;;  %v3838_v7 = vrot.slane %v3790_v14, 7  ;;  %s12482_s23 = sld [smem:[#allocation8 + $0x19]] }
 0x2d5   : > { %v4505_v36 = vadd.f32 %v4501_v32, %v4495_v60  ;;  %v4506_v13 = vadd.f32 %v4502_v37, %v4496_v53  ;;  %v4467_v54 = vmul.f32 %v12023_v45, %v13899_v31  ;;  %v4468_v33 = vmul.f32 %v12023_v45, %v13903_v25 }
 0x2d6   : > { %v4473_v2 = vmul.f32 %v12034_v34, %v13904_v39  ;;  %v4474_v16 = vmul.f32 %v12034_v34, %v13905_v4  ;;  %v4483_v50 = vmul.f32 %v12037_v62, %v13898_v42  ;;  %v4064_v32 = vsel %vm372_vm0, %v3789_v5, %v3838_v7 }
 0x2d7   : > { %v4065_v37 = vsel %vm1175_vm1, %v3789_v5, %v3838_v7  ;;  %v4067_v19 = vsel %vm1178_vm2, %v3789_v5, %v3838_v7  ;;  %v4069_v45 = vsel %vm1181_vm3, %v3789_v5, %v3838_v7  ;;  %7080 = vst.msk [vmem:[%s8017_s20 + $0x3c2] ss:$4 sm:$0x3] %vm7924_vm4, %v4064_v32  ;;  %v4071_v60 = vsel %vm1184_vm5, %v3789_v5, %v3838_v7 }
 0x2d8   : > { %v4066_v34 = vrot.slane %v4065_v37, 1  ;;  %v4068_v58 = vrot.slane %v4067_v19, 2  ;;  %v4070_v14 = vrot.slane %v4069_v45, 3  ;;  %v4072_v53 = vrot.slane %v4071_v60, 4 }
 0x2d9   : > { %v4073_v42 = vsel %vm1187_vm6, %v3789_v5, %v3838_v7  ;;  %v4075_v4 = vsel %vm1190_vm7, %v3789_v5, %v3838_v7  ;;  %v4077_v39 = vsel %vm421_vm8, %v3838_v7, %v3789_v5  ;;  %v4515_v45 = vadd.f32 %v4511_v6, %v4505_v36 }
 0x2da   : > { %7081 = vst.msk [vmem:[%s8017_s20 + $0x3ca] ss:$4 sm:$0x3] %vm7924_vm4, %v4066_v34  ;;  %v4074_v32 = vrot.slane %v4073_v42, 5  ;;  %v4076_v37 = vrot.slane %v4075_v4, 6  ;;  %v4078_v19 = vrot.slane %v4077_v39, 7  ;;  %v4516_v60 = vadd.f32 %v4512_v3, %v4506_v13 }
 0x2db   : > { %7082 = vst.msk [vmem:[%s8017_s20 + $0x3d2] ss:$4 sm:$0x3] %vm7924_vm4, %v4068_v58  ;;  %v4477_v25 = vadd.f32 %v4473_v2, %v4467_v54  ;;  %v4478_v44 = vadd.f32 %v4474_v16, %v4468_v33  ;;  %v4484_v5 = vmul.f32 %v12037_v62, %v13888_v15  ;;  %v4525_v7 = vadd.f32 %v4521_v63, %v4515_v45 }
 0x2dc   : > { %7083 = vst.msk [vmem:[%s8017_s20 + $0x3da] ss:$4 sm:$0x3] %vm7924_vm4, %v4070_v14  ;;  %v4493_v42 = vmul.f32 %v12040_v55, %v10762_v10  ;;  %v4494_v6 = vmul.f32 %v12040_v55, %v10767_v11  ;;  %v4503_v36 = vmul.f32 %v12084_v38, %v7918_v29  ;;  %v4526_v3 = vadd.f32 %v4522_v61, %v4516_v60 }
 0x2dd   : > { %7084 = vst.msk [vmem:[%s8017_s20 + $0x3e2] ss:$4 sm:$0x3] %vm7924_vm4, %v4072_v53  ;;  %v4487_v62 = vadd.f32 %v4483_v50, %v4477_v25  ;;  %v4488_v13 = vadd.f32 %v4484_v5, %v4478_v44  ;;  %v4504_v63 = vmul.f32 %v12084_v38, %v7920_v28  ;;  %v4535_v54 = vadd.f32 %v4531_v59, %v4525_v7 }
 0x2de   : > { %7085 = vst.msk [vmem:[%s8017_s20 + $0x3ea] ss:$4 sm:$0x3] %vm7924_vm4, %v4074_v32  ;;  %v4513_v55 = vmul.f32 %v12094_v8, %v10772_v35  ;;  %v4514_v33 = vmul.f32 %v12094_v8, %v10777_v0  ;;  %v4523_v39 = vmul.f32 %v12108_v51, %v7922_v27  ;;  %v4536_v44 = vadd.f32 %v4532_v9, %v4526_v3 }
 0x2df   : > { %7086 = vst.msk [vmem:[%s8017_s20 + $0x3f2] ss:$4 sm:$0x3] %vm7924_vm4, %v4076_v37  ;;  %v4497_v25 = vadd.f32 %v4493_v42, %v4487_v62  ;;  %v4498_v38 = vadd.f32 %v4494_v6, %v4488_v13  ;;  %v4524_v61 = vmul.f32 %v12108_v51, %v7928_v57  ;;  %v4541_v8 = vadd.f32 %v12123_v46, %v4535_v54 }
 0x2e0   : > { %7087 = vst.msk [vmem:[%s8017_s20 + $0x3fa] ss:$4 sm:$0x3] %vm7924_vm4, %v4078_v19  ;;  %v4533_v59 = vmul.f32 %v12111_v30, %v10782_v48  ;;  %v4534_v2 = vmul.f32 %v12111_v30, %v10787_v26  ;;  %v12199_v9 = vstv %s12127_s30  ;;  %v4542_v4 = vadd.f32 %v12123_v46, %v4536_v44  ;;  %s12496_s30 = sld [smem:[#allocation8 + $0x5d]] }
 0x2e1   : > { %v4507_v16 = vadd.f32 %v4503_v36, %v4497_v25  ;;  %v4508_v50 = vadd.f32 %v4504_v63, %v4498_v38  ;;  %v4547_v51 = vmul.f32 %v12199_v9, %v7756_v12  ;;  %v4548_v34 = vmul.f32 %v12199_v9, %v13885_v1 }
 0x2e2   : > { %v12211_v58 = vstv %s12137_s7  ;;  %v12214_v14 = vstv %s12143_s26  ;;  %v12217_v30 = vstv %s12152_s5  ;;  %v5151_v53 = vrot.slane %v4542_v4, 7  ;;  %s12533_s7 = sld [smem:[#allocation8 + $0x59]] }
 0x2e3   : > { %v4517_v32 = vadd.f32 %v4513_v55, %v4507_v16  ;;  %v4518_v37 = vadd.f32 %v4514_v33, %v4508_v50  ;;  %v4553_v19 = vmul.f32 %v12211_v58, %v10594_v43  ;;  %v4554_v45 = vmul.f32 %v12211_v58, %v10599_v41  ;;  %s12541_s26 = sld [smem:[#allocation8 + $0x9d]] }
 0x2e4   : > { %v4563_v60 = vmul.f32 %v12214_v14, %v7765_v17  ;;  %v4564_v5 = vmul.f32 %v12214_v14, %v7767_v18  ;;  %v4573_v7 = vmul.f32 %v12217_v30, %v10604_v52  ;;  %v5167_v42 = vsel %vm372_vm0, %v4541_v8, %v5151_v53  ;;  %s12549_s5 = sld [smem:[#allocation8 + $0x99]] }
 0x2e5   : > { %v5168_v6 = vsel %vm1175_vm1, %v4541_v8, %v5151_v53  ;;  %v5170_v36 = vsel %vm1178_vm2, %v4541_v8, %v5151_v53  ;;  %v5172_v3 = vsel %vm1181_vm3, %v4541_v8, %v5151_v53  ;;  %7159 = vst.msk [vmem:[%s8017_s20 + $0x3] ss:$4 sm:$0x3] %vm7924_vm4, %v5167_v42  ;;  %v5174_v54 = vsel %vm1184_vm5, %v4541_v8, %v5151_v53 }
 0x2e6   : > { %v5169_v62 = vrot.slane %v5168_v6, 1  ;;  %v5171_v13 = vrot.slane %v5170_v36, 2  ;;  %v5173_v63 = vrot.slane %v5172_v3, 3  ;;  %v5175_v55 = vrot.slane %v5174_v54, 4 }
 0x2e7   : > { %v5176_v33 = vsel %vm1187_vm6, %v4541_v8, %v5151_v53  ;;  %v5178_v44 = vsel %vm1190_vm7, %v4541_v8, %v5151_v53  ;;  %v5180_v25 = vsel %vm421_vm8, %v5151_v53, %v4541_v8  ;;  %v4527_v50 = vadd.f32 %v4523_v39, %v4517_v32 }
 0x2e8   : > { %7160 = vst.msk [vmem:[%s8017_s20 + $0xb] ss:$4 sm:$0x3] %vm7924_vm4, %v5169_v62  ;;  %v5177_v38 = vrot.slane %v5176_v33, 5  ;;  %v5179_v4 = vrot.slane %v5178_v44, 6  ;;  %v5181_v16 = vrot.slane %v5180_v25, 7  ;;  %v4528_v42 = vadd.f32 %v4524_v61, %v4518_v37 }
 0x2e9   : > { %7161 = vst.msk [vmem:[%s8017_s20 + $0x13] ss:$4 sm:$0x3] %vm7924_vm4, %v5171_v13  ;;  %v4557_v6 = vadd.f32 %v4553_v19, %v4547_v51  ;;  %v4558_v36 = vadd.f32 %v4554_v45, %v4548_v34  ;;  %v4574_v3 = vmul.f32 %v12217_v30, %v10626_v47  ;;  %v4537_v8 = vadd.f32 %v4533_v59, %v4527_v50  ;;  %v13907_v50 = vld [vmem:[#allocation21_spill] sm:$0xff] }
 0x2ea   : > { %7162 = vst.msk [vmem:[%s8017_s20 + $0x1b] ss:$4 sm:$0x3] %vm7924_vm4, %v5173_v63  ;;  %v12258_v53 = vstv %s12201_s2  ;;  %v12261_v62 = vstv %s12206_s24  ;;  %v12264_v39 = vstv %s12219_s9  ;;  %v4538_v61 = vadd.f32 %v4534_v2, %v4528_v42  ;;  %v13908_v42 = vld [vmem:[#allocation24_spill] sm:$0xff]  ;;  %s12556_s2 = sld [smem:[#allocation8 + $0xdd]] }
 0x2eb   : > { %7163 = vst.msk [vmem:[%s8017_s20 + $0x23] ss:$4 sm:$0x3] %vm7924_vm4, %v5175_v55  ;;  %v4567_v51 = vadd.f32 %v4563_v60, %v4557_v6  ;;  %v4568_v34 = vadd.f32 %v4564_v5, %v4558_v36  ;;  %v4583_v32 = vmul.f32 %v12258_v53, %v7772_v20  ;;  %v4543_v59 = vadd.f32 %v12123_v46, %v4537_v8  ;;  %v13909_v36 = vld [vmem:[#allocation25_spill] sm:$0xff]  ;;  %s12562_s24 = sld [smem:[#allocation8 + $0xd9]] }
 0x2ec   : > { %7164 = vst.msk [vmem:[%s8017_s20 + $0x2b] ss:$4 sm:$0x3] %vm7924_vm4, %v5177_v38  ;;  %v4584_v37 = vmul.f32 %v12258_v53, %v7774_v21  ;;  %v4593_v19 = vmul.f32 %v12261_v62, %v10636_v40  ;;  %v4594_v2 = vmul.f32 %v12261_v62, %v10641_v49  ;;  %v4544_v45 = vadd.f32 %v12123_v46, %v4538_v61  ;;  %v13906_v38 = vld [vmem:[#allocation19_spill] sm:$0xff]  ;;  %s12571_s9 = sld [smem:[#allocation9 + $0x3]] }
 0x2ed   : > { %7165 = vst.msk [vmem:[%s8017_s20 + $0x33] ss:$4 sm:$0x3] %vm7924_vm4, %v5179_v4  ;;  %v4577_v60 = vadd.f32 %v4573_v7, %v4567_v51  ;;  %v4578_v5 = vadd.f32 %v4574_v3, %v4568_v34  ;;  %v4603_v13 = vmul.f32 %v12264_v39, %v7776_v22  ;;  %v4604_v63 = vmul.f32 %v12264_v39, %v7781_v24 }
 0x2ee   : > { %7166 = vst.msk [vmem:[%s8017_s20 + $0x3b] ss:$4 sm:$0x3] %vm7924_vm4, %v5181_v16  ;;  %v4612_v54 = vstv %s12231_s12  ;;  %v12294_v55 = vstv %s12237_s3  ;;  %v4549_v33 = vmul.f32 %v12199_v9, %v13899_v31  ;;  %v5152_v44 = vrot.slane %v4544_v45, 7  ;;  %v13910_v31 = vld [vmem:[#allocation22_spill] sm:$0xff]  ;;  %s12636_s12 = sld [smem:[#allocation8 + $0x25]] }
 0x2ef   : > { %v4587_v46 = vadd.f32 %v4583_v32, %v4577_v60  ;;  %v4588_v7 = vadd.f32 %v4584_v37, %v4578_v5  ;;  %v4613_v25 = vmul.f32 %v4612_v54, %v10653_v23  ;;  %v4614_v4 = vmul.f32 %v4612_v54, %v13906_v38  ;;  %s12644_s3 = sld [smem:[#allocation8 + $0x21]]  ;;  %v6087_v56 = vld [vmem:[%s8017_s20 + $0x8] sm:$0xff] (%p7652_p8) }
 0x2f0   : > { %v4550_v16 = vmul.f32 %v12199_v9, %v13907_v50  ;;  %v4555_v6 = vmul.f32 %v12211_v58, %v13908_v42  ;;  %v4556_v3 = vmul.f32 %v12211_v58, %v13909_v36  ;;  %v5182_v8 = vsel %vm372_vm0, %v4543_v59, %v5152_v44 }
 0x2f1   : > { %v5183_v61 = vsel %vm1175_vm1, %v4543_v59, %v5152_v44  ;;  %v5185_v51 = vsel %vm1178_vm2, %v4543_v59, %v5152_v44  ;;  %v5187_v34 = vsel %vm1181_vm3, %v4543_v59, %v5152_v44  ;;  %7167 = vst.msk [vmem:[%s8017_s20 + $0x43] ss:$4 sm:$0x3] %vm7924_vm4, %v5182_v8  ;;  %v5189_v58 = vsel %vm1184_vm5, %v4543_v59, %v5152_v44 }
 0x2f2   : > { %v5184_v9 = vrot.slane %v5183_v61, 1  ;;  %v5186_v32 = vrot.slane %v5185_v51, 2  ;;  %v5188_v37 = vrot.slane %v5187_v34, 3  ;;  %v5190_v45 = vrot.slane %v5189_v58, 4 }
 0x2f3   : > { %v5191_v60 = vsel %vm1187_vm6, %v4543_v59, %v5152_v44  ;;  %v5193_v5 = vsel %vm1190_vm7, %v4543_v59, %v5152_v44  ;;  %v5195_v36 = vsel %vm421_vm8, %v5152_v44, %v4543_v59  ;;  %v4597_v34 = vadd.f32 %v4593_v19, %v4587_v46 }
 0x2f4   : > { %7168 = vst.msk [vmem:[%s8017_s20 + $0x4b] ss:$4 sm:$0x3] %vm7924_vm4, %v5184_v9  ;;  %v5192_v8 = vrot.slane %v5191_v60, 5  ;;  %v5194_v61 = vrot.slane %v5193_v5, 6  ;;  %v5196_v51 = vrot.slane %v5195_v36, 7  ;;  %v4598_v58 = vadd.f32 %v4594_v2, %v4588_v7 }
 0x2f5   : > { %7169 = vst.msk [vmem:[%s8017_s20 + $0x53] ss:$4 sm:$0x3] %vm7924_vm4, %v5186_v32  ;;  %v4559_v42 = vadd.f32 %v4555_v6, %v4549_v33  ;;  %v4560_v50 = vadd.f32 %v4556_v3, %v4550_v16  ;;  %v4565_v59 = vmul.f32 %v12214_v14, %v13910_v31  ;;  %v4607_v44 = vadd.f32 %v4603_v13, %v4597_v34 }
 0x2f6   : > { %7170 = vst.msk [vmem:[%s8017_s20 + $0x5b] ss:$4 sm:$0x3] %vm7924_vm4, %v5188_v37  ;;  %v4566_v19 = vmul.f32 %v12214_v14, %v13888_v15  ;;  %v4575_v46 = vmul.f32 %v12217_v30, %v10762_v10  ;;  %v4576_v2 = vmul.f32 %v12217_v30, %v10767_v11  ;;  %v4608_v33 = vadd.f32 %v4604_v63, %v4598_v58 }
 0x2f7   : > { %7171 = vst.msk [vmem:[%s8017_s20 + $0x63] ss:$4 sm:$0x3] %vm7924_vm4, %v5190_v45  ;;  %v4569_v7 = vadd.f32 %v4565_v59, %v4559_v42  ;;  %v4585_v16 = vmul.f32 %v12258_v53, %v7918_v29  ;;  %v4586_v13 = vmul.f32 %v12258_v53, %v7920_v28  ;;  %v4617_v14 = vadd.f32 %v4613_v25, %v4607_v44 }
 0x2f8   : > { %7172 = vst.msk [vmem:[%s8017_s20 + $0x6b] ss:$4 sm:$0x3] %vm7924_vm4, %v5192_v8  ;;  %v4570_v6 = vadd.f32 %v4566_v19, %v4560_v50  ;;  %v4595_v30 = vmul.f32 %v12261_v62, %v10772_v35  ;;  %v4596_v63 = vmul.f32 %v12261_v62, %v10777_v0  ;;  %v4618_v42 = vadd.f32 %v4614_v4, %v4608_v33 }
 0x2f9   : > { %7173 = vst.msk [vmem:[%s8017_s20 + $0x73] ss:$4 sm:$0x3] %vm7924_vm4, %v5194_v61  ;;  %v4579_v36 = vadd.f32 %v4575_v46, %v4569_v7  ;;  %v4605_v53 = vmul.f32 %v12264_v39, %v7922_v27  ;;  %v4606_v25 = vmul.f32 %v12264_v39, %v7928_v57  ;;  %v4623_v50 = vadd.f32 %v12294_v55, %v4617_v14 }
 0x2fa   : > { %7174 = vst.msk [vmem:[%s8017_s20 + $0x7b] ss:$4 sm:$0x3] %vm7924_vm4, %v5196_v51  ;;  %v4580_v3 = vadd.f32 %v4576_v2, %v4570_v6  ;;  %v4615_v62 = vmul.f32 %v4612_v54, %v10782_v48  ;;  %v4616_v9 = vmul.f32 %v4612_v54, %v10787_v26  ;;  %v4624_v4 = vadd.f32 %v12294_v55, %v4618_v42 }
 0x2fb   : > { %v4589_v32 = vadd.f32 %v4585_v16, %v4579_v36  ;;  %v12369_v37 = vstv %s12310_s13  ;;  %v12372_v45 = vstv %s12319_s8  ;;  %v12387_v34 = vstv %s12329_s11  ;;  %s12650_s13 = sld [smem:[#allocation8 + $0x65]] }
 0x2fc   : > { %v4590_v39 = vadd.f32 %v4586_v13, %v4580_v3  ;;  %v4629_v60 = vmul.f32 %v12369_v37, %v7756_v12  ;;  %v4630_v5 = vmul.f32 %v12369_v37, %v13885_v1  ;;  %v4635_v8 = vmul.f32 %v12372_v45, %v10594_v43  ;;  %s12659_s8 = sld [smem:[#allocation8 + $0x61]] }
 0x2fd   : > { %v5153_v54 = vrot.slane %v4624_v4, 7  ;;  %v4599_v61 = vadd.f32 %v4595_v30, %v4589_v32  ;;  %v4636_v51 = vmul.f32 %v12372_v45, %v10599_v41  ;;  %v4645_v44 = vmul.f32 %v12387_v34, %v7765_v17  ;;  %s12709_s11 = sld [smem:[#allocation8 + $0xa5]] }
 0x2fe   : > { %v4600_v58 = vadd.f32 %v4596_v63, %v4590_v39  ;;  %v4639_v59 = vadd.f32 %v4635_v8, %v4629_v60  ;;  %v4646_v19 = vmul.f32 %v12387_v34, %v7767_v18 }
 0x2ff   : > { %v5197_v46 = vsel %vm372_vm0, %v4623_v50, %v5153_v54  ;;  %v5198_v2 = vsel %vm1175_vm1, %v4623_v50, %v5153_v54  ;;  %v5200_v33 = vsel %vm1178_vm2, %v4623_v50, %v5153_v54  ;;  %v5202_v7 = vsel %vm1181_vm3, %v4623_v50, %v5153_v54 }
 0x300   : > { %7175 = vst.msk [vmem:[%s8017_s20 + $0x83] ss:$4 sm:$0x3] %vm7924_vm4, %v5197_v46  ;;  %v5199_v16 = vrot.slane %v5198_v2, 1  ;;  %v5201_v13 = vrot.slane %v5200_v33, 2  ;;  %v5203_v14 = vrot.slane %v5202_v7, 3  ;;  %v5204_v6 = vsel %vm1184_vm5, %v4623_v50, %v5153_v54 }
 0x301   : > { %v5205_v30 = vrot.slane %v5204_v6, 4  ;;  %v5206_v63 = vsel %vm1187_vm6, %v4623_v50, %v5153_v54  ;;  %v5208_v42 = vsel %vm1190_vm7, %v4623_v50, %v5153_v54  ;;  %v5210_v36 = vsel %vm421_vm8, %v5153_v54, %v4623_v50 }
 0x302   : > { %7176 = vst.msk [vmem:[%s8017_s20 + $0x8b] ss:$4 sm:$0x3] %vm7924_vm4, %v5199_v16  ;;  %v5207_v3 = vrot.slane %v5206_v63, 5  ;;  %v5209_v4 = vrot.slane %v5208_v42, 6  ;;  %v5211_v32 = vrot.slane %v5210_v36, 7  ;;  %v4609_v39 = vadd.f32 %v4605_v53, %v4599_v61 }
 0x303   : > { %7177 = vst.msk [vmem:[%s8017_s20 + $0x93] ss:$4 sm:$0x3] %vm7924_vm4, %v5201_v13  ;;  %v4610_v60 = vadd.f32 %v4606_v25, %v4600_v58  ;;  %v4640_v8 = vadd.f32 %v4636_v51, %v4630_v5  ;;  %v4649_v46 = vadd.f32 %v4645_v44, %v4639_v59  ;;  %v12419_v50 = vstv %s12374_s4  ;;  %s12715_s4 = sld [smem:[#allocation8 + $0xa1]] }
 0x304   : > { %7178 = vst.msk [vmem:[%s8017_s20 + $0x9b] ss:$4 sm:$0x3] %vm7924_vm4, %v5203_v14  ;;  %v4619_v54 = vadd.f32 %v4615_v62, %v4609_v39  ;;  %v4655_v2 = vmul.f32 %v12419_v50, %v10604_v52  ;;  %v4656_v53 = vmul.f32 %v12419_v50, %v10626_v47  ;;  %v12429_v61 = vstv %s12382_s6  ;;  %v13911_v39 = vld [vmem:[#allocation20_spill] sm:$0xff]  ;;  %s12726_s6 = sld [smem:[#allocation8 + $0xe5]] }
 0x305   : > { %7179 = vst.msk [vmem:[%s8017_s20 + $0xa3] ss:$4 sm:$0x3] %vm7924_vm4, %v5205_v30  ;;  %v4620_v25 = vadd.f32 %v4616_v9, %v4610_v60  ;;  %v4650_v5 = vadd.f32 %v4646_v19, %v4640_v8  ;;  %v4665_v51 = vmul.f32 %v12429_v61, %v7772_v20  ;;  %v4666_v62 = vmul.f32 %v12429_v61, %v7774_v21  ;;  %v13912_v60 = vld [vmem:[#allocation21_spill] sm:$0xff] }
 0x306   : > { %7180 = vst.msk [vmem:[%s8017_s20 + $0xab] ss:$4 sm:$0x3] %vm7924_vm4, %v5207_v3  ;;  %v4625_v58 = vadd.f32 %v12294_v55, %v4619_v54  ;;  %v4659_v59 = vadd.f32 %v4655_v2, %v4649_v46  ;;  %v4674_v44 = vstv %s12389_s25  ;;  %v12444_v33 = vstv %s12395_s27  ;;  %s12732_s25 = sld [smem:[#allocation8 + $0xe1]] }
 0x307   : > { %7181 = vst.msk [vmem:[%s8017_s20 + $0xb3] ss:$4 sm:$0x3] %vm7924_vm4, %v5209_v4  ;;  %v4626_v9 = vadd.f32 %v12294_v55, %v4620_v25  ;;  %v4660_v19 = vadd.f32 %v4656_v53, %v4650_v5  ;;  %v4675_v7 = vmul.f32 %v4674_v44, %v10636_v40  ;;  %v4676_v16 = vmul.f32 %v4674_v44, %v10641_v49  ;;  %s12741_s27 = sld [smem:[#allocation9 + $0x4]] }
 0x308   : > { %7182 = vst.msk [vmem:[%s8017_s20 + $0xbb] ss:$4 sm:$0x3] %vm7924_vm4, %v5211_v32  ;;  %v4669_v13 = vadd.f32 %v4665_v51, %v4659_v59  ;;  %v4685_v14 = vmul.f32 %v12444_v33, %v7776_v22  ;;  %v4686_v6 = vmul.f32 %v12444_v33, %v7781_v24  ;;  %v4694_v30 = vstv %s12401_s10  ;;  %s12811_s10 = sld [smem:[#allocation8 + $0x2d]] }
 0x309   : > { %v5154_v63 = vrot.slane %v4626_v9, 7  ;;  %v4670_v42 = vadd.f32 %v4666_v62, %v4660_v19  ;;  %v4695_v55 = vmul.f32 %v4694_v30, %v10653_v23  ;;  %v4696_v36 = vmul.f32 %v4694_v30, %v13906_v38 }
 0x30a   : > { %v4679_v3 = vadd.f32 %v4675_v7, %v4669_v13  ;;  %v12463_v4 = vstv %s12410_s15  ;;  %v4631_v32 = vmul.f32 %v12369_v37, %v13911_v39  ;;  %v4632_v8 = vmul.f32 %v12369_v37, %v13912_v60  ;;  %v13914_v60 = vld [vmem:[#allocation25_spill] sm:$0xff]  ;;  %s12821_s15 = sld [smem:[#allocation8 + $0x29]] }
 0x30b   : > { %v5212_v46 = vsel %vm372_vm0, %v4625_v58, %v5154_v63  ;;  %v5213_v54 = vsel %vm1175_vm1, %v4625_v58, %v5154_v63  ;;  %v5215_v2 = vsel %vm1178_vm2, %v4625_v58, %v5154_v63  ;;  %v5217_v53 = vsel %vm1181_vm3, %v4625_v58, %v5154_v63 }
 0x30c   : > { %7183 = vst.msk [vmem:[%s8017_s20 + $0xc3] ss:$4 sm:$0x3] %vm7924_vm4, %v5212_v46  ;;  %v5214_v25 = vrot.slane %v5213_v54, 1  ;;  %v5216_v5 = vrot.slane %v5215_v2, 2  ;;  %v5218_v51 = vrot.slane %v5217_v53, 3  ;;  %v5219_v37 = vsel %vm1184_vm5, %v4625_v58, %v5154_v63 }
 0x30d   : > { %v5220_v62 = vrot.slane %v5219_v37, 4  ;;  %v5221_v59 = vsel %vm1187_vm6, %v4625_v58, %v5154_v63  ;;  %v5223_v9 = vsel %vm1190_vm7, %v4625_v58, %v5154_v63  ;;  %v5225_v19 = vsel %vm421_vm8, %v5154_v63, %v4625_v58  ;;  %v13913_v53 = vld [vmem:[#allocation24_spill] sm:$0xff] }
 0x30e   : > { %7184 = vst.msk [vmem:[%s8017_s20 + $0xcb] ss:$4 sm:$0x3] %vm7924_vm4, %v5214_v25  ;;  %v5222_v7 = vrot.slane %v5221_v59, 5  ;;  %v5224_v13 = vrot.slane %v5223_v9, 6  ;;  %v5226_v46 = vrot.slane %v5225_v19, 7  ;;  %v4680_v54 = vadd.f32 %v4676_v16, %v4670_v42 }
 0x30f   : > { %7185 = vst.msk [vmem:[%s8017_s20 + $0xd3] ss:$4 sm:$0x3] %vm7924_vm4, %v5216_v5  ;;  %v4689_v2 = vadd.f32 %v4685_v14, %v4679_v3  ;;  %v4637_v37 = vmul.f32 %v12372_v45, %v13913_v53  ;;  %v4638_v58 = vmul.f32 %v12372_v45, %v13914_v60  ;;  %v4647_v63 = vmul.f32 %v12387_v34, %v13910_v31 }
 0x310   : > { %7186 = vst.msk [vmem:[%s8017_s20 + $0xdb] ss:$4 sm:$0x3] %vm7924_vm4, %v5218_v51  ;;  %v4690_v16 = vadd.f32 %v4686_v6, %v4680_v54  ;;  %v4648_v42 = vmul.f32 %v12387_v34, %v13888_v15  ;;  %v4657_v14 = vmul.f32 %v12419_v50, %v10762_v10  ;;  %v4658_v3 = vmul.f32 %v12419_v50, %v10767_v11 }
 0x311   : > { %7187 = vst.msk [vmem:[%s8017_s20 + $0xe3] ss:$4 sm:$0x3] %vm7924_vm4, %v5220_v62  ;;  %v4699_v45 = vadd.f32 %v4695_v55, %v4689_v2  ;;  %v4641_v25 = vadd.f32 %v4637_v37, %v4631_v32  ;;  %v4642_v5 = vadd.f32 %v4638_v58, %v4632_v8  ;;  %v4667_v51 = vmul.f32 %v12429_v61, %v7918_v29 }
 0x312   : > { %7188 = vst.msk [vmem:[%s8017_s20 + $0xeb] ss:$4 sm:$0x3] %vm7924_vm4, %v5222_v7  ;;  %v4700_v34 = vadd.f32 %v4696_v36, %v4690_v16  ;;  %v4668_v6 = vmul.f32 %v12429_v61, %v7920_v28  ;;  %v4677_v50 = vmul.f32 %v4674_v44, %v10772_v35  ;;  %v4678_v59 = vmul.f32 %v4674_v44, %v10777_v0 }
 0x313   : > { %7189 = vst.msk [vmem:[%s8017_s20 + $0xf3] ss:$4 sm:$0x3] %vm7924_vm4, %v5224_v13  ;;  %v4705_v55 = vadd.f32 %v12463_v4, %v4699_v45  ;;  %v4651_v32 = vadd.f32 %v4647_v63, %v4641_v25  ;;  %v4652_v8 = vadd.f32 %v4648_v42, %v4642_v5  ;;  %v4687_v62 = vmul.f32 %v12444_v33, %v7922_v27 }
 0x314   : > { %7190 = vst.msk [vmem:[%s8017_s20 + $0xfb] ss:$4 sm:$0x3] %vm7924_vm4, %v5226_v46  ;;  %v4706_v61 = vadd.f32 %v12463_v4, %v4700_v34  ;;  %v4688_v36 = vmul.f32 %v12444_v33, %v7928_v57  ;;  %v4697_v44 = vmul.f32 %v4694_v30, %v10782_v48  ;;  %v4698_v9 = vmul.f32 %v4694_v30, %v10787_v26 }
 0x315   : > { %v4661_v19 = vadd.f32 %v4657_v14, %v4651_v32  ;;  %v4662_v7 = vadd.f32 %v4658_v3, %v4652_v8  ;;  %v12536_v13 = vstv %s12473_s29  ;;  %v12539_v54 = vstv %s12482_s23  ;;  %s12827_s29 = sld [smem:[#allocation8 + $0x6d]] }
 0x316   : > { %v5155_v46 = vrot.slane %v4706_v61, 7  ;;  %v4711_v33 = vmul.f32 %v12536_v13, %v7756_v12  ;;  %v4712_v2 = vmul.f32 %v12536_v13, %v13885_v1  ;;  %v4717_v30 = vmul.f32 %v12539_v54, %v10594_v43  ;;  %s12836_s23 = sld [smem:[#allocation8 + $0x69]] }
 0x317   : > { %v4671_v37 = vadd.f32 %v4667_v51, %v4661_v19  ;;  %v4672_v58 = vadd.f32 %v4668_v6, %v4662_v7  ;;  %v4718_v63 = vmul.f32 %v12539_v54, %v10599_v41  ;;  %v12554_v16 = vstv %s12496_s30  ;;  %s12885_s30 = sld [smem:[#allocation8 + $0xad]] }
 0x318   : > { %v5227_v42 = vsel %vm372_vm0, %v4705_v55, %v5155_v46  ;;  %v5228_v14 = vsel %vm1175_vm1, %v4705_v55, %v5155_v46  ;;  %v5230_v3 = vsel %vm1178_vm2, %v4705_v55, %v5155_v46  ;;  %v5232_v45 = vsel %vm1181_vm3, %v4705_v55, %v5155_v46 }
 0x319   : > { %7191 = vst.msk [vmem:[%s8017_s20 + $0x103] ss:$4 sm:$0x3] %vm7924_vm4, %v5227_v42  ;;  %v5229_v25 = vrot.slane %v5228_v14, 1  ;;  %v5231_v5 = vrot.slane %v5230_v3, 2  ;;  %v5233_v51 = vrot.slane %v5232_v45, 3  ;;  %v5234_v34 = vsel %vm1184_vm5, %v4705_v55, %v5155_v46 }
 0x31a   : > { %v5235_v6 = vrot.slane %v5234_v34, 4  ;;  %v5236_v32 = vsel %vm1187_vm6, %v4705_v55, %v5155_v46  ;;  %v5238_v8 = vsel %vm1190_vm7, %v4705_v55, %v5155_v46  ;;  %v5240_v61 = vsel %vm421_vm8, %v5155_v46, %v4705_v55 }
 0x31b   : > { %7192 = vst.msk [vmem:[%s8017_s20 + $0x10b] ss:$4 sm:$0x3] %vm7924_vm4, %v5229_v25  ;;  %v5237_v19 = vrot.slane %v5236_v32, 5  ;;  %v5239_v7 = vrot.slane %v5238_v8, 6  ;;  %v5241_v42 = vrot.slane %v5240_v61, 7  ;;  %v4681_v14 = vadd.f32 %v4677_v50, %v4671_v37 }
 0x31c   : > { %7193 = vst.msk [vmem:[%s8017_s20 + $0x113] ss:$4 sm:$0x3] %vm7924_vm4, %v5231_v5  ;;  %v4682_v3 = vadd.f32 %v4678_v59, %v4672_v58  ;;  %v4721_v45 = vadd.f32 %v4717_v30, %v4711_v33  ;;  %v4722_v34 = vadd.f32 %v4718_v63, %v4712_v2  ;;  %v4727_v55 = vmul.f32 %v12554_v16, %v7765_v17 }
 0x31d   : > { %7194 = vst.msk [vmem:[%s8017_s20 + $0x11b] ss:$4 sm:$0x3] %vm7924_vm4, %v5233_v51  ;;  %v4691_v46 = vadd.f32 %v4687_v62, %v4681_v14  ;;  %v4728_v25 = vmul.f32 %v12554_v16, %v7767_v18  ;;  %v12587_v50 = vstv %s12533_s7  ;;  %v12590_v37 = vstv %s12541_s26  ;;  %s12890_s7 = sld [smem:[#allocation8 + $0xa9]] }
 0x31e   : > { %7195 = vst.msk [vmem:[%s8017_s20 + $0x123] ss:$4 sm:$0x3] %vm7924_vm4, %v5235_v6  ;;  %v4692_v59 = vadd.f32 %v4688_v36, %v4682_v3  ;;  %v4731_v33 = vadd.f32 %v4727_v55, %v4721_v45  ;;  %v4737_v2 = vmul.f32 %v12587_v50, %v10604_v52  ;;  %v4738_v62 = vmul.f32 %v12587_v50, %v10626_v47  ;;  %s12903_s26 = sld [smem:[#allocation8 + $0xed]] }
 0x31f   : > { %7196 = vst.msk [vmem:[%s8017_s20 + $0x12b] ss:$4 sm:$0x3] %vm7924_vm4, %v5237_v19  ;;  %v4701_v30 = vadd.f32 %v4697_v44, %v4691_v46  ;;  %v4732_v58 = vadd.f32 %v4728_v25, %v4722_v34  ;;  %v4747_v63 = vmul.f32 %v12590_v37, %v7772_v20  ;;  %v4748_v5 = vmul.f32 %v12590_v37, %v7774_v21 }
 0x320   : > { %7197 = vst.msk [vmem:[%s8017_s20 + $0x133] ss:$4 sm:$0x3] %vm7924_vm4, %v5239_v7  ;;  %v4702_v36 = vadd.f32 %v4698_v9, %v4692_v59  ;;  %v4741_v51 = vadd.f32 %v4737_v2, %v4731_v33  ;;  %v12610_v6 = vstv %s12549_s5  ;;  %v12613_v32 = vstv %s12556_s2  ;;  %v13915_v2 = vld [vmem:[#allocation21_spill] sm:$0xff]  ;;  %s12915_s5 = sld [smem:[#allocation8 + $0xe9]] }
 0x321   : > { %7198 = vst.msk [vmem:[%s8017_s20 + $0x13b] ss:$4 sm:$0x3] %vm7924_vm4, %v5241_v42  ;;  %v4707_v44 = vadd.f32 %v12463_v4, %v4701_v30  ;;  %v4742_v8 = vadd.f32 %v4738_v62, %v4732_v58  ;;  %v4757_v61 = vmul.f32 %v12610_v6, %v10636_v40  ;;  %v4758_v19 = vmul.f32 %v12610_v6, %v10641_v49  ;;  %s12921_s2 = sld [smem:[#allocation9 + $0x5]] }
 0x322   : > { %v4708_v7 = vadd.f32 %v12463_v4, %v4702_v36  ;;  %v4751_v9 = vadd.f32 %v4747_v63, %v4741_v51  ;;  %v4767_v14 = vmul.f32 %v12613_v32, %v7776_v22  ;;  %v4768_v3 = vmul.f32 %v12613_v32, %v7781_v24 }
 0x323   : > { %v4752_v45 = vadd.f32 %v4748_v5, %v4742_v8  ;;  %v4776_v42 = vstv %s12562_s24  ;;  %v12630_v34 = vstv %s12571_s9  ;;  %v4713_v55 = vmul.f32 %v12536_v13, %v13911_v39  ;;  %s12994_s24 = sld [smem:[#allocation8 + $0x35]] }
 0x324   : > { %v5156_v46 = vrot.slane %v4708_v7, 7  ;;  %v4761_v25 = vadd.f32 %v4757_v61, %v4751_v9  ;;  %v4777_v59 = vmul.f32 %v4776_v42, %v10653_v23  ;;  %v4778_v4 = vmul.f32 %v4776_v42, %v13906_v38  ;;  %s13003_s9 = sld [smem:[#allocation8 + $0x31]] }
 0x325   : > { %v4762_v33 = vadd.f32 %v4758_v19, %v4752_v45  ;;  %v4714_v62 = vmul.f32 %v12536_v13, %v13915_v2  ;;  %v4719_v30 = vmul.f32 %v12539_v54, %v13913_v53  ;;  %v4720_v58 = vmul.f32 %v12539_v54, %v13914_v60 }
 0x326   : > { %v5242_v63 = vsel %vm372_vm0, %v4707_v44, %v5156_v46  ;;  %v5243_v5 = vsel %vm1175_vm1, %v4707_v44, %v5156_v46  ;;  %v5245_v36 = vsel %vm1178_vm2, %v4707_v44, %v5156_v46  ;;  %v5247_v51 = vsel %vm1181_vm3, %v4707_v44, %v5156_v46 }
 0x327   : > { %7199 = vst.msk [vmem:[%s8017_s20 + $0x143] ss:$4 sm:$0x3] %vm7924_vm4, %v5242_v63  ;;  %v5244_v13 = vrot.slane %v5243_v5, 1  ;;  %v5246_v8 = vrot.slane %v5245_v36, 2  ;;  %v5248_v54 = vrot.slane %v5247_v51, 3  ;;  %v5249_v61 = vsel %vm1184_vm5, %v4707_v44, %v5156_v46 }
 0x328   : > { %v5250_v19 = vrot.slane %v5249_v61, 4  ;;  %v5251_v7 = vsel %vm1187_vm6, %v4707_v44, %v5156_v46  ;;  %v5253_v9 = vsel %vm1190_vm7, %v4707_v44, %v5156_v46  ;;  %v5255_v45 = vsel %vm421_vm8, %v5156_v46, %v4707_v44 }
 0x329   : > { %7200 = vst.msk [vmem:[%s8017_s20 + $0x14b] ss:$4 sm:$0x3] %vm7924_vm4, %v5244_v13  ;;  %v5252_v63 = vrot.slane %v5251_v7, 5  ;;  %v5254_v5 = vrot.slane %v5253_v9, 6  ;;  %v5256_v36 = vrot.slane %v5255_v45, 7  ;;  %v4771_v51 = vadd.f32 %v4767_v14, %v4761_v25 }
 0x32a   : > { %7201 = vst.msk [vmem:[%s8017_s20 + $0x153] ss:$4 sm:$0x3] %vm7924_vm4, %v5246_v8  ;;  %v4772_v61 = vadd.f32 %v4768_v3, %v4762_v33  ;;  %v4723_v60 = vadd.f32 %v4719_v30, %v4713_v55  ;;  %v4724_v53 = vadd.f32 %v4720_v58, %v4714_v62  ;;  %v4729_v44 = vmul.f32 %v12554_v16, %v13910_v31 }
 0x32b   : > { %7202 = vst.msk [vmem:[%s8017_s20 + $0x15b] ss:$4 sm:$0x3] %vm7924_vm4, %v5248_v54  ;;  %v4781_v46 = vadd.f32 %v4777_v59, %v4771_v51  ;;  %v4730_v13 = vmul.f32 %v12554_v16, %v13888_v15  ;;  %v4739_v14 = vmul.f32 %v12587_v50, %v10762_v10  ;;  %v4740_v25 = vmul.f32 %v12587_v50, %v10767_v11 }
 0x32c   : > { %7203 = vst.msk [vmem:[%s8017_s20 + $0x163] ss:$4 sm:$0x3] %vm7924_vm4, %v5250_v19  ;;  %v4782_v3 = vadd.f32 %v4778_v4, %v4772_v61  ;;  %v4733_v55 = vadd.f32 %v4729_v44, %v4723_v60  ;;  %v4749_v33 = vmul.f32 %v12590_v37, %v7918_v29  ;;  %v4750_v59 = vmul.f32 %v12590_v37, %v7920_v28 }
 0x32d   : > { %7204 = vst.msk [vmem:[%s8017_s20 + $0x16b] ss:$4 sm:$0x3] %vm7924_vm4, %v5252_v63  ;;  %v4787_v16 = vadd.f32 %v12630_v34, %v4781_v46  ;;  %v4734_v62 = vadd.f32 %v4730_v13, %v4724_v53  ;;  %v4759_v50 = vmul.f32 %v12610_v6, %v10772_v35  ;;  %v4760_v4 = vmul.f32 %v12610_v6, %v10777_v0 }
 0x32e   : > { %7205 = vst.msk [vmem:[%s8017_s20 + $0x173] ss:$4 sm:$0x3] %vm7924_vm4, %v5254_v5  ;;  %v4788_v60 = vadd.f32 %v12630_v34, %v4782_v3  ;;  %v4743_v30 = vadd.f32 %v4739_v14, %v4733_v55  ;;  %v4769_v37 = vmul.f32 %v12613_v32, %v7922_v27  ;;  %v4770_v53 = vmul.f32 %v12613_v32, %v7928_v57 }
 0x32f   : > { %7206 = vst.msk [vmem:[%s8017_s20 + $0x17b] ss:$4 sm:$0x3] %vm7924_vm4, %v5256_v36  ;;  %v4744_v58 = vadd.f32 %v4740_v25, %v4734_v62  ;;  %v4779_v6 = vmul.f32 %v4776_v42, %v10782_v48  ;;  %v4780_v8 = vmul.f32 %v4776_v42, %v10787_v26  ;;  %v12707_v54 = vstv %s12636_s12  ;;  %s13013_s12 = sld [smem:[#allocation8 + $0x75]] }
 0x330   : > { %v5157_v19 = vrot.slane %v4788_v60, 7  ;;  %v4753_v7 = vadd.f32 %v4749_v33, %v4743_v30  ;;  %v4793_v9 = vmul.f32 %v12707_v54, %v7756_v12  ;;  %v4794_v32 = vmul.f32 %v12707_v54, %v13885_v1 }
 0x331   : > { %v4754_v45 = vadd.f32 %v4750_v59, %v4744_v58  ;;  %v12718_v63 = vstv %s12644_s3  ;;  %v12721_v5 = vstv %s12650_s13  ;;  %v12724_v42 = vstv %s12659_s8  ;;  %s13058_s3 = sld [smem:[#allocation8 + $0x71]] }
 0x332   : > { %v5257_v36 = vsel %vm372_vm0, %v4787_v16, %v5157_v19  ;;  %v5258_v51 = vsel %vm1175_vm1, %v4787_v16, %v5157_v19  ;;  %v5260_v61 = vsel %vm1178_vm2, %v4787_v16, %v5157_v19  ;;  %v5262_v44 = vsel %vm1181_vm3, %v4787_v16, %v5157_v19  ;;  %s13066_s13 = sld [smem:[#allocation8 + $0xb5]] }
 0x333   : > { %7207 = vst.msk [vmem:[%s8017_s20 + $0x183] ss:$4 sm:$0x3] %vm7924_vm4, %v5257_v36  ;;  %v5259_v46 = vrot.slane %v5258_v51, 1  ;;  %v5261_v13 = vrot.slane %v5260_v61, 2  ;;  %v5263_v14 = vrot.slane %v5262_v44, 3  ;;  %v5264_v25 = vsel %vm1184_vm5, %v4787_v16, %v5157_v19 }
 0x334   : > { %v5265_v3 = vrot.slane %v5264_v25, 4  ;;  %v5266_v55 = vsel %vm1187_vm6, %v4787_v16, %v5157_v19  ;;  %v5268_v33 = vsel %vm1190_vm7, %v4787_v16, %v5157_v19  ;;  %v5270_v59 = vsel %vm421_vm8, %v5157_v19, %v4787_v16  ;;  %s13073_s8 = sld [smem:[#allocation8 + $0xb1]] }
 0x335   : > { %7208 = vst.msk [vmem:[%s8017_s20 + $0x18b] ss:$4 sm:$0x3] %vm7924_vm4, %v5259_v46  ;;  %v5267_v62 = vrot.slane %v5266_v55, 5  ;;  %v5269_v60 = vrot.slane %v5268_v33, 6  ;;  %v5271_v30 = vrot.slane %v5270_v59, 7  ;;  %v4763_v58 = vadd.f32 %v4759_v50, %v4753_v7 }
 0x336   : > { %7209 = vst.msk [vmem:[%s8017_s20 + $0x193] ss:$4 sm:$0x3] %vm7924_vm4, %v5261_v13  ;;  %v4764_v36 = vadd.f32 %v4760_v4, %v4754_v45  ;;  %v4799_v51 = vmul.f32 %v12718_v63, %v10594_v43  ;;  %v4800_v16 = vmul.f32 %v12718_v63, %v10599_v41  ;;  %v4809_v19 = vmul.f32 %v12721_v5, %v7765_v17 }
 0x337   : > { %7210 = vst.msk [vmem:[%s8017_s20 + $0x19b] ss:$4 sm:$0x3] %vm7924_vm4, %v5263_v14  ;;  %v4773_v50 = vadd.f32 %v4769_v37, %v4763_v58  ;;  %v4810_v7 = vmul.f32 %v12721_v5, %v7767_v18  ;;  %v4819_v4 = vmul.f32 %v12724_v42, %v10604_v52  ;;  %v4820_v45 = vmul.f32 %v12724_v42, %v10626_v47 }
 0x338   : > { %7211 = vst.msk [vmem:[%s8017_s20 + $0x1a3] ss:$4 sm:$0x3] %vm7924_vm4, %v5265_v3  ;;  %v4774_v61 = vadd.f32 %v4770_v53, %v4764_v36  ;;  %v4803_v44 = vadd.f32 %v4799_v51, %v4793_v9  ;;  %v4804_v46 = vadd.f32 %v4800_v16, %v4794_v32  ;;  %v12768_v13 = vstv %s12709_s11  ;;  %s13079_s11 = sld [smem:[#allocation8 + $0xf5]] }
 0x339   : > { %7212 = vst.msk [vmem:[%s8017_s20 + $0x1ab] ss:$4 sm:$0x3] %vm7924_vm4, %v5267_v62  ;;  %v4783_v37 = vadd.f32 %v4779_v6, %v4773_v50  ;;  %v4829_v14 = vmul.f32 %v12768_v13, %v7772_v20  ;;  %v4830_v25 = vmul.f32 %v12768_v13, %v7774_v21  ;;  %v12778_v55 = vstv %s12715_s4  ;;  %s13085_s4 = sld [smem:[#allocation8 + $0xf1]] }
 0x33a   : > { %7213 = vst.msk [vmem:[%s8017_s20 + $0x1b3] ss:$4 sm:$0x3] %vm7924_vm4, %v5269_v60  ;;  %v4784_v53 = vadd.f32 %v4780_v8, %v4774_v61  ;;  %v4813_v9 = vadd.f32 %v4809_v19, %v4803_v44  ;;  %v4814_v32 = vadd.f32 %v4810_v7, %v4804_v46  ;;  %v4839_v3 = vmul.f32 %v12778_v55, %v10636_v40  ;;  %v13916_v61 = vld [vmem:[#allocation24_spill] sm:$0xff]  ;;  %v13917_v46 = vld [vmem:[#allocation25_spill] sm:$0xff] }
 0x33b   : > { %7214 = vst.msk [vmem:[%s8017_s20 + $0x1bb] ss:$4 sm:$0x3] %vm7924_vm4, %v5271_v30  ;;  %v4789_v6 = vadd.f32 %v12630_v34, %v4783_v37  ;;  %v4840_v33 = vmul.f32 %v12778_v55, %v10641_v49  ;;  %v12792_v59 = vstv %s12726_s6  ;;  %v12795_v62 = vstv %s12732_s25  ;;  %s13094_s6 = sld [smem:[#allocation9 + $0x6]] }
 0x33c   : > { %v4790_v8 = vadd.f32 %v12630_v34, %v4784_v53  ;;  %v4823_v60 = vadd.f32 %v4819_v4, %v4813_v9  ;;  %v4824_v58 = vadd.f32 %v4820_v45, %v4814_v32  ;;  %v4849_v36 = vmul.f32 %v12792_v59, %v7776_v22  ;;  %s13157_s25 = sld [smem:[#allocation8 + $0x3d]] }
 0x33d   : > { %v4850_v51 = vmul.f32 %v12792_v59, %v7781_v24  ;;  %v4859_v30 = vmul.f32 %v12795_v62, %v10653_v23  ;;  %v4860_v16 = vmul.f32 %v12795_v62, %v13906_v38  ;;  %v12807_v19 = vstv %s12741_s27  ;;  %s13166_s27 = sld [smem:[#allocation8 + $0x39]] }
 0x33e   : > { %v5158_v50 = vrot.slane %v4790_v8, 7  ;;  %v4833_v7 = vadd.f32 %v4829_v14, %v4823_v60  ;;  %v4834_v34 = vadd.f32 %v4830_v25, %v4824_v58  ;;  %v4795_v4 = vmul.f32 %v12707_v54, %v13911_v39 }
 0x33f   : > { %v4796_v45 = vmul.f32 %v12707_v54, %v13915_v2  ;;  %v4801_v44 = vmul.f32 %v12718_v63, %v13916_v61  ;;  %v4802_v37 = vmul.f32 %v12718_v63, %v13917_v46  ;;  %v4811_v53 = vmul.f32 %v12721_v5, %v13910_v31 }
 0x340   : > { %v5272_v14 = vsel %vm372_vm0, %v4789_v6, %v5158_v50  ;;  %v5273_v25 = vsel %vm1175_vm1, %v4789_v6, %v5158_v50  ;;  %v5275_v9 = vsel %vm1178_vm2, %v4789_v6, %v5158_v50  ;;  %v5277_v54 = vsel %vm1181_vm3, %v4789_v6, %v5158_v50 }
 0x341   : > { %7215 = vst.msk [vmem:[%s8017_s20 + $0x1c3] ss:$4 sm:$0x3] %vm7924_vm4, %v5272_v14  ;;  %v5274_v63 = vrot.slane %v5273_v25, 1  ;;  %v5276_v32 = vrot.slane %v5275_v9, 2  ;;  %v5278_v8 = vrot.slane %v5277_v54, 3  ;;  %v5279_v60 = vsel %vm1184_vm5, %v4789_v6, %v5158_v50 }
 0x342   : > { %v5280_v58 = vrot.slane %v5279_v60, 4  ;;  %v5281_v31 = vsel %vm1187_vm6, %v4789_v6, %v5158_v50  ;;  %v5283_v46 = vsel %vm1190_vm7, %v4789_v6, %v5158_v50  ;;  %v5285_v61 = vsel %vm421_vm8, %v5158_v50, %v4789_v6 }
 0x343   : > { %7216 = vst.msk [vmem:[%s8017_s20 + $0x1cb] ss:$4 sm:$0x3] %vm7924_vm4, %v5274_v63  ;;  %v5282_v14 = vrot.slane %v5281_v31, 5  ;;  %v5284_v25 = vrot.slane %v5283_v46, 6  ;;  %v5286_v9 = vrot.slane %v5285_v61, 7  ;;  %v4843_v54 = vadd.f32 %v4839_v3, %v4833_v7 }
 0x344   : > { %7217 = vst.msk [vmem:[%s8017_s20 + $0x1d3] ss:$4 sm:$0x3] %vm7924_vm4, %v5276_v32  ;;  %v4844_v60 = vadd.f32 %v4840_v33, %v4834_v34  ;;  %v4805_v2 = vadd.f32 %v4801_v44, %v4795_v4  ;;  %v4806_v38 = vadd.f32 %v4802_v37, %v4796_v45  ;;  %v4812_v6 = vmul.f32 %v12721_v5, %v13888_v15 }
 0x345   : > { %7218 = vst.msk [vmem:[%s8017_s20 + $0x1db] ss:$4 sm:$0x3] %vm7924_vm4, %v5278_v8  ;;  %v4853_v50 = vadd.f32 %v4849_v36, %v4843_v54  ;;  %v4821_v31 = vmul.f32 %v12724_v42, %v10762_v10  ;;  %v4822_v3 = vmul.f32 %v12724_v42, %v10767_v11  ;;  %v4831_v7 = vmul.f32 %v12768_v13, %v7918_v29 }
 0x346   : > { %7219 = vst.msk [vmem:[%s8017_s20 + $0x1e3] ss:$4 sm:$0x3] %vm7924_vm4, %v5280_v58  ;;  %v4854_v33 = vadd.f32 %v4850_v51, %v4844_v60  ;;  %v4815_v5 = vadd.f32 %v4811_v53, %v4805_v2  ;;  %v4816_v34 = vadd.f32 %v4812_v6, %v4806_v38  ;;  %v4832_v36 = vmul.f32 %v12768_v13, %v7920_v28 }
 0x347   : > { %7220 = vst.msk [vmem:[%s8017_s20 + $0x1eb] ss:$4 sm:$0x3] %vm7924_vm4, %v5282_v14  ;;  %v4863_v4 = vadd.f32 %v4859_v30, %v4853_v50  ;;  %v4841_v42 = vmul.f32 %v12778_v55, %v10772_v35  ;;  %v4842_v45 = vmul.f32 %v12778_v55, %v10777_v0  ;;  %v4851_v61 = vmul.f32 %v12792_v59, %v7922_v27 }
 0x348   : > { %7221 = vst.msk [vmem:[%s8017_s20 + $0x1f3] ss:$4 sm:$0x3] %vm7924_vm4, %v5284_v25  ;;  %v4864_v38 = vadd.f32 %v4860_v16, %v4854_v33  ;;  %v4825_v2 = vadd.f32 %v4821_v31, %v4815_v5  ;;  %v4826_v13 = vadd.f32 %v4822_v3, %v4816_v34  ;;  %v4852_v51 = vmul.f32 %v12792_v59, %v7928_v57 }
 0x349   : > { %7222 = vst.msk [vmem:[%s8017_s20 + $0x1fb] ss:$4 sm:$0x3] %vm7924_vm4, %v5286_v9  ;;  %v4869_v55 = vadd.f32 %v12807_v19, %v4863_v4  ;;  %v4861_v30 = vmul.f32 %v12795_v62, %v10782_v48  ;;  %v4862_v44 = vmul.f32 %v12795_v62, %v10787_v26  ;;  %v12883_v16 = vstv %s12811_s10  ;;  %s13180_s10 = sld [smem:[#allocation8 + $0x7d]] }
 0x34a   : > { %v4870_v46 = vadd.f32 %v12807_v19, %v4864_v38  ;;  %v4835_v37 = vadd.f32 %v4831_v7, %v4825_v2  ;;  %v4836_v53 = vadd.f32 %v4832_v36, %v4826_v13  ;;  %v4875_v59 = vmul.f32 %v12883_v16, %v7756_v12 }
 0x34b   : > { %v4876_v63 = vmul.f32 %v12883_v16, %v13885_v1  ;;  %v12895_v32 = vstv %s12821_s15  ;;  %v12898_v8 = vstv %s12827_s29  ;;  %v12901_v62 = vstv %s12836_s23  ;;  %s13217_s15 = sld [smem:[#allocation8 + $0x79]] }
 0x34c   : > { %v5159_v58 = vrot.slane %v4870_v46, 7  ;;  %v4845_v14 = vadd.f32 %v4841_v42, %v4835_v37  ;;  %v4846_v25 = vadd.f32 %v4842_v45, %v4836_v53  ;;  %v4881_v9 = vmul.f32 %v12895_v32, %v10594_v43  ;;  %s13225_s29 = sld [smem:[#allocation8 + $0xbd]] }
 0x34d   : > { %v4882_v54 = vmul.f32 %v12895_v32, %v10599_v41  ;;  %v4891_v60 = vmul.f32 %v12898_v8, %v7765_v17  ;;  %v4892_v6 = vmul.f32 %v12898_v8, %v7767_v18  ;;  %v4901_v50 = vmul.f32 %v12901_v62, %v10604_v52  ;;  %s13233_s23 = sld [smem:[#allocation8 + $0xb9]] }
 0x34e   : > { %v5287_v31 = vsel %vm372_vm0, %v4869_v55, %v5159_v58  ;;  %v5288_v3 = vsel %vm1175_vm1, %v4869_v55, %v5159_v58  ;;  %v5290_v7 = vsel %vm1178_vm2, %v4869_v55, %v5159_v58  ;;  %v5292_v33 = vsel %vm1181_vm3, %v4869_v55, %v5159_v58 }
 0x34f   : > { %7223 = vst.msk [vmem:[%s8017_s20 + $0x203] ss:$4 sm:$0x3] %vm7924_vm4, %v5287_v31  ;;  %v5289_v5 = vrot.slane %v5288_v3, 1  ;;  %v5291_v34 = vrot.slane %v5290_v7, 2  ;;  %v5293_v36 = vrot.slane %v5292_v33, 3  ;;  %v5294_v4 = vsel %vm1184_vm5, %v4869_v55, %v5159_v58 }
 0x350   : > { %v5295_v42 = vrot.slane %v5294_v4, 4  ;;  %v5296_v45 = vsel %vm1187_vm6, %v4869_v55, %v5159_v58  ;;  %v5298_v38 = vsel %vm1190_vm7, %v4869_v55, %v5159_v58  ;;  %v5300_v2 = vsel %vm421_vm8, %v5159_v58, %v4869_v55 }
 0x351   : > { %7224 = vst.msk [vmem:[%s8017_s20 + $0x20b] ss:$4 sm:$0x3] %vm7924_vm4, %v5289_v5  ;;  %v5297_v13 = vrot.slane %v5296_v45, 5  ;;  %v5299_v46 = vrot.slane %v5298_v38, 6  ;;  %v5301_v37 = vrot.slane %v5300_v2, 7  ;;  %v4855_v53 = vadd.f32 %v4851_v61, %v4845_v14 }
 0x352   : > { %7225 = vst.msk [vmem:[%s8017_s20 + $0x213] ss:$4 sm:$0x3] %vm7924_vm4, %v5291_v34  ;;  %v4856_v31 = vadd.f32 %v4852_v51, %v4846_v25  ;;  %v4885_v3 = vadd.f32 %v4881_v9, %v4875_v59  ;;  %v4886_v7 = vadd.f32 %v4882_v54, %v4876_v63  ;;  %v4902_v33 = vmul.f32 %v12901_v62, %v10626_v47 }
 0x353   : > { %7226 = vst.msk [vmem:[%s8017_s20 + $0x21b] ss:$4 sm:$0x3] %vm7924_vm4, %v5293_v36  ;;  %v4865_v55 = vadd.f32 %v4861_v30, %v4855_v53  ;;  %v12942_v58 = vstv %s12885_s30  ;;  %v12945_v5 = vstv %s12890_s7  ;;  %v12948_v61 = vstv %s12903_s26  ;;  %v13919_v53 = vld [vmem:[#allocation21_spill] sm:$0xff]  ;;  %s13240_s30 = sld [smem:[#allocation8 + $0xfd]] }
 0x354   : > { %7227 = vst.msk [vmem:[%s8017_s20 + $0x223] ss:$4 sm:$0x3] %vm7924_vm4, %v5295_v42  ;;  %v4866_v51 = vadd.f32 %v4862_v44, %v4856_v31  ;;  %v4895_v59 = vadd.f32 %v4891_v60, %v4885_v3  ;;  %v4896_v63 = vadd.f32 %v4892_v6, %v4886_v7  ;;  %v4911_v14 = vmul.f32 %v12942_v58, %v7772_v20  ;;  %v13920_v31 = vld [vmem:[#allocation24_spill] sm:$0xff]  ;;  %v13921_v7 = vld [vmem:[#allocation25_spill] sm:$0xff]  ;;  %s13246_s7 = sld [smem:[#allocation8 + $0xf9]] }
 0x355   : > { %7228 = vst.msk [vmem:[%s8017_s20 + $0x22b] ss:$4 sm:$0x3] %vm7924_vm4, %v5297_v13  ;;  %v4871_v30 = vadd.f32 %v12807_v19, %v4865_v55  ;;  %v4912_v25 = vmul.f32 %v12942_v58, %v7774_v21  ;;  %v4921_v9 = vmul.f32 %v12945_v5, %v10636_v40  ;;  %v4922_v44 = vmul.f32 %v12945_v5, %v10641_v49  ;;  %v13918_v13 = vld [vmem:[#allocation19_spill] sm:$0xff]  ;;  %s13255_s26 = sld [smem:[#allocation9 + $0x7]] }
 0x356   : > { %7229 = vst.msk [vmem:[%s8017_s20 + $0x233] ss:$4 sm:$0x3] %vm7924_vm4, %v5299_v46  ;;  %v4872_v54 = vadd.f32 %v12807_v19, %v4866_v51  ;;  %v4905_v60 = vadd.f32 %v4901_v50, %v4895_v59  ;;  %v4906_v6 = vadd.f32 %v4902_v33, %v4896_v63  ;;  %v4931_v34 = vmul.f32 %v12948_v61, %v7776_v22 }
 0x357   : > { %7230 = vst.msk [vmem:[%s8017_s20 + $0x23b] ss:$4 sm:$0x3] %vm7924_vm4, %v5301_v37  ;;  %v4932_v36 = vmul.f32 %v12948_v61, %v7781_v24  ;;  %v4940_v4 = vstv %s12915_s5  ;;  %v12978_v42 = vstv %s12921_s2  ;;  %v4877_v45 = vmul.f32 %v12883_v16, %v13911_v39  ;;  %v13922_v39 = vld [vmem:[#allocation22_spill] sm:$0xff]  ;;  %s7288_s5 = sshll.u32 (%p7652_p8), %s7545_s18, 1  ;;  %s7289_s2 = sshll.u32 (%p7652_p8), %s7549_s19, 10 }
 0x358   : > { %v5160_v38 = vrot.slane %v4872_v54, 7  ;;  %v4915_v19 = vadd.f32 %v4911_v14, %v4905_v60  ;;  %v4916_v50 = vadd.f32 %v4912_v25, %v4906_v6  ;;  %v4941_v2 = vmul.f32 %v4940_v4, %v10653_v23 }
 0x359   : > { %v4942_v46 = vmul.f32 %v4940_v4, %v13918_v13  ;;  %v4878_v37 = vmul.f32 %v12883_v16, %v13919_v53  ;;  %v4883_v3 = vmul.f32 %v12895_v32, %v13920_v31  ;;  %v4884_v33 = vmul.f32 %v12895_v32, %v13921_v7 }
 0x35a   : > { %v5302_v55 = vsel %vm372_vm0, %v4871_v30, %v5160_v38  ;;  %v5303_v51 = vsel %vm1175_vm1, %v4871_v30, %v5160_v38  ;;  %v5305_v59 = vsel %vm1178_vm2, %v4871_v30, %v5160_v38  ;;  %v5307_v63 = vsel %vm1181_vm3, %v4871_v30, %v5160_v38 }
 0x35b   : > { %7231 = vst.msk [vmem:[%s8017_s20 + $0x243] ss:$4 sm:$0x3] %vm7924_vm4, %v5302_v55  ;;  %v5304_v16 = vrot.slane %v5303_v51, 1  ;;  %v5306_v14 = vrot.slane %v5305_v59, 2  ;;  %v5308_v25 = vrot.slane %v5307_v63, 3  ;;  %v5309_v32 = vsel %vm1184_vm5, %v4871_v30, %v5160_v38 }
 0x35c   : > { %v5310_v54 = vrot.slane %v5309_v32, 4  ;;  %v5311_v60 = vsel %vm1187_vm6, %v4871_v30, %v5160_v38  ;;  %v5313_v6 = vsel %vm1190_vm7, %v4871_v30, %v5160_v38  ;;  %v5315_v7 = vsel %vm421_vm8, %v5160_v38, %v4871_v30 }
 0x35d   : > { %7232 = vst.msk [vmem:[%s8017_s20 + $0x24b] ss:$4 sm:$0x3] %vm7924_vm4, %v5304_v16  ;;  %v5312_v55 = vrot.slane %v5311_v60, 5  ;;  %v5314_v51 = vrot.slane %v5313_v6, 6  ;;  %v5316_v59 = vrot.slane %v5315_v7, 7  ;;  %v4925_v63 = vadd.f32 %v4921_v9, %v4915_v19 }
 0x35e   : > { %7233 = vst.msk [vmem:[%s8017_s20 + $0x253] ss:$4 sm:$0x3] %vm7924_vm4, %v5306_v14  ;;  %v4926_v32 = vadd.f32 %v4922_v44, %v4916_v50  ;;  %v4887_v31 = vadd.f32 %v4883_v3, %v4877_v45  ;;  %v4888_v53 = vadd.f32 %v4884_v33, %v4878_v37  ;;  %v4893_v30 = vmul.f32 %v12898_v8, %v13922_v39 }
 0x35f   : > { %7234 = vst.msk [vmem:[%s8017_s20 + $0x25b] ss:$4 sm:$0x3] %vm7924_vm4, %v5308_v25  ;;  %v4935_v38 = vadd.f32 %v4931_v34, %v4925_v63  ;;  %v4894_v9 = vmul.f32 %v12898_v8, %v13888_v15  ;;  %v4903_v19 = vmul.f32 %v12901_v62, %v10762_v10  ;;  %v4904_v44 = vmul.f32 %v12901_v62, %v10767_v11 }
 0x360   : > { %7235 = vst.msk [vmem:[%s8017_s20 + $0x263] ss:$4 sm:$0x3] %vm7924_vm4, %v5310_v54  ;;  %v4936_v45 = vadd.f32 %v4932_v36, %v4926_v32  ;;  %v4897_v50 = vadd.f32 %v4893_v30, %v4887_v31  ;;  %v4913_v37 = vmul.f32 %v12942_v58, %v7918_v29  ;;  %v4914_v34 = vmul.f32 %v12942_v58, %v7920_v28 }
 0x361   : > { %7236 = vst.msk [vmem:[%s8017_s20 + $0x26b] ss:$4 sm:$0x3] %vm7924_vm4, %v5312_v55  ;;  %v4945_v8 = vadd.f32 %v4941_v2, %v4935_v38  ;;  %v4898_v3 = vadd.f32 %v4894_v9, %v4888_v53  ;;  %v4923_v62 = vmul.f32 %v12945_v5, %v10772_v35  ;;  %v4924_v36 = vmul.f32 %v12945_v5, %v10777_v0 }
 0x362   : > { %7237 = vst.msk [vmem:[%s8017_s20 + $0x273] ss:$4 sm:$0x3] %vm7924_vm4, %v5314_v51  ;;  %v4946_v31 = vadd.f32 %v4942_v46, %v4936_v45  ;;  %v4907_v7 = vadd.f32 %v4903_v19, %v4897_v50  ;;  %v4933_v58 = vmul.f32 %v12948_v61, %v7922_v27  ;;  %v4934_v2 = vmul.f32 %v12948_v61, %v7928_v57 }
 0x363   : > { %7238 = vst.msk [vmem:[%s8017_s20 + $0x27b] ss:$4 sm:$0x3] %vm7924_vm4, %v5316_v59  ;;  %v4951_v53 = vadd.f32 %v12978_v42, %v4945_v8  ;;  %v4908_v33 = vadd.f32 %v4904_v44, %v4898_v3  ;;  %v4943_v5 = vmul.f32 %v4940_v4, %v10782_v48  ;;  %v4944_v16 = vmul.f32 %v4940_v4, %v10787_v26 }
 0x364   : > { %v4952_v46 = vadd.f32 %v12978_v42, %v4946_v31  ;;  %v4917_v14 = vadd.f32 %v4913_v37, %v4907_v7  ;;  %v13053_v25 = vstv %s12994_s24  ;;  %v13056_v54 = vstv %s13003_s9  ;;  %s5800_s24 = sadd.s32 (%p7652_p8), %s7289_s2, %s7288_s5 }
 0x365   : > { %v4918_v61 = vadd.f32 %v4914_v34, %v4908_v33  ;;  %v4957_v60 = vmul.f32 %v13053_v25, %v7756_v12  ;;  %v4958_v6 = vmul.f32 %v13053_v25, %v13885_v1  ;;  %v4963_v55 = vmul.f32 %v13056_v54, %v10594_v43  ;;  %s7290_s9 = sshll.u32 (%p7652_p8), %s5800_s24, 2 }
 0x366   : > { %v5161_v4 = vrot.slane %v4952_v46, 7  ;;  %v4927_v51 = vadd.f32 %v4923_v62, %v4917_v14  ;;  %v4964_v59 = vmul.f32 %v13056_v54, %v10599_v41  ;;  %v13071_v63 = vstv %s13013_s12 }
 0x367   : > { %v4928_v32 = vadd.f32 %v4924_v36, %v4918_v61  ;;  %v4967_v30 = vadd.f32 %v4963_v55, %v4957_v60  ;;  %v4973_v38 = vmul.f32 %v13071_v63, %v7765_v17  ;;  %v4974_v9 = vmul.f32 %v13071_v63, %v7767_v18 }
 0x368   : > { %v5317_v19 = vsel %vm372_vm0, %v4951_v53, %v5161_v4  ;;  %v5318_v44 = vsel %vm1175_vm1, %v4951_v53, %v5161_v4  ;;  %v5320_v45 = vsel %vm1178_vm2, %v4951_v53, %v5161_v4  ;;  %v5322_v50 = vsel %vm1181_vm3, %v4951_v53, %v5161_v4 }
 0x369   : > { %7239 = vst.msk [vmem:[%s8017_s20 + $0x283] ss:$4 sm:$0x3] %vm7924_vm4, %v5317_v19  ;;  %v5319_v37 = vrot.slane %v5318_v44, 1  ;;  %v5321_v34 = vrot.slane %v5320_v45, 2  ;;  %v5323_v8 = vrot.slane %v5322_v50, 3  ;;  %v5324_v3 = vsel %vm1184_vm5, %v4951_v53, %v5161_v4 }
 0x36a   : > { %v5325_v62 = vrot.slane %v5324_v3, 4  ;;  %v5326_v36 = vsel %vm1187_vm6, %v4951_v53, %v5161_v4  ;;  %v5328_v31 = vsel %vm1190_vm7, %v4951_v53, %v5161_v4  ;;  %v5330_v7 = vsel %vm421_vm8, %v5161_v4, %v4951_v53 }
 0x36b   : > { %7240 = vst.msk [vmem:[%s8017_s20 + $0x28b] ss:$4 sm:$0x3] %vm7924_vm4, %v5319_v37  ;;  %v5327_v33 = vrot.slane %v5326_v36, 5  ;;  %v5329_v46 = vrot.slane %v5328_v31, 6  ;;  %v5331_v14 = vrot.slane %v5330_v7, 7  ;;  %v4937_v61 = vadd.f32 %v4933_v58, %v4927_v51 }
 0x36c   : > { %7241 = vst.msk [vmem:[%s8017_s20 + $0x293] ss:$4 sm:$0x3] %vm7924_vm4, %v5321_v34  ;;  %v4938_v60 = vadd.f32 %v4934_v2, %v4928_v32  ;;  %v4968_v55 = vadd.f32 %v4964_v59, %v4958_v6  ;;  %v4977_v19 = vadd.f32 %v4973_v38, %v4967_v30  ;;  %v13103_v53 = vstv %s13058_s3  ;;  %s13928_s3 = sld [smem:[#allocation28_spill]] (%p7652_p8) }
 0x36d   : > { %7242 = vst.msk [vmem:[%s8017_s20 + $0x29b] ss:$4 sm:$0x3] %vm7924_vm4, %v5323_v8  ;;  %v4947_v4 = vadd.f32 %v4943_v5, %v4937_v61  ;;  %v4983_v44 = vmul.f32 %v13103_v53, %v10604_v52  ;;  %v4984_v58 = vmul.f32 %v13103_v53, %v10626_v47  ;;  %v13113_v51 = vstv %s13066_s13  ;;  %v13923_v61 = vld [vmem:[#allocation20_spill] sm:$0xff] }
 0x36e   : > { %7243 = vst.msk [vmem:[%s8017_s20 + $0x2a3] ss:$4 sm:$0x3] %vm7924_vm4, %v5325_v62  ;;  %v4948_v2 = vadd.f32 %v4944_v16, %v4938_v60  ;;  %v4978_v6 = vadd.f32 %v4974_v9, %v4968_v55  ;;  %v4993_v59 = vmul.f32 %v13113_v51, %v7772_v20  ;;  %v4994_v5 = vmul.f32 %v13113_v51, %v7774_v21  ;;  %v13924_v60 = vld [vmem:[#allocation21_spill] sm:$0xff] }
 0x36f   : > { %7244 = vst.msk [vmem:[%s8017_s20 + $0x2ab] ss:$4 sm:$0x3] %vm7924_vm4, %v5327_v33  ;;  %v4953_v32 = vadd.f32 %v12978_v42, %v4947_v4  ;;  %v4987_v30 = vadd.f32 %v4983_v44, %v4977_v19  ;;  %v5002_v38 = vstv %s13073_s8  ;;  %v13128_v45 = vstv %s13079_s11 }
 0x370   : > { %7245 = vst.msk [vmem:[%s8017_s20 + $0x2b3] ss:$4 sm:$0x3] %vm7924_vm4, %v5329_v46  ;;  %v4954_v16 = vadd.f32 %v12978_v42, %v4948_v2  ;;  %v4988_v9 = vadd.f32 %v4984_v58, %v4978_v6  ;;  %v5003_v50 = vmul.f32 %v5002_v38, %v10636_v40  ;;  %v5004_v37 = vmul.f32 %v5002_v38, %v10641_v49 }
 0x371   : > { %7246 = vst.msk [vmem:[%s8017_s20 + $0x2bb] ss:$4 sm:$0x3] %vm7924_vm4, %v5331_v14  ;;  %v4997_v34 = vadd.f32 %v4993_v59, %v4987_v30  ;;  %v5013_v8 = vmul.f32 %v13128_v45, %v7776_v22  ;;  %v5014_v3 = vmul.f32 %v13128_v45, %v7781_v24  ;;  %v5022_v62 = vstv %s13085_s4 }
 0x372   : > { %v5162_v36 = vrot.slane %v4954_v16, 7  ;;  %v4998_v31 = vadd.f32 %v4994_v5, %v4988_v9  ;;  %v5023_v42 = vmul.f32 %v5022_v62, %v10653_v23  ;;  %v5024_v7 = vmul.f32 %v5022_v62, %v13918_v13  ;;  %s13463_s13 = scalar_lea.vmem (%p7652_p8), %s13928_s3, %s7290_s9 }
 0x373   : > { %v5007_v33 = vadd.f32 %v5003_v50, %v4997_v34  ;;  %v13147_v46 = vstv %s13094_s6  ;;  %v4959_v14 = vmul.f32 %v13053_v25, %v13923_v61  ;;  %v4960_v55 = vmul.f32 %v13053_v25, %v13924_v60  ;;  %v13926_v60 = vld [vmem:[#allocation25_spill] sm:$0xff]  ;;  %6088 = vst [vmem:[%s13463_s13 + $0x20] sm:$0xff] (%p7652_p8), %v6087_v56  ;;  %v6215_v56 = vld [vmem:[%s8017_s20 + $0x208] sm:$0xff] (%p7652_p8) }
 0x374   : > { %v5332_v19 = vsel %vm372_vm0, %v4953_v32, %v5162_v36  ;;  %v5333_v4 = vsel %vm1175_vm1, %v4953_v32, %v5162_v36  ;;  %v5335_v44 = vsel %vm1178_vm2, %v4953_v32, %v5162_v36  ;;  %v5337_v58 = vsel %vm1181_vm3, %v4953_v32, %v5162_v36  ;;  %6216 = vst [vmem:[%s13463_s13 + $0x820] sm:$0xff] (%p7652_p8), %v6215_v56 }
 0x375   : > { %7247 = vst.msk [vmem:[%s8017_s20 + $0x2c3] ss:$4 sm:$0x3] %vm7924_vm4, %v5332_v19  ;;  %v5334_v2 = vrot.slane %v5333_v4, 1  ;;  %v5336_v6 = vrot.slane %v5335_v44, 2  ;;  %v5338_v59 = vrot.slane %v5337_v58, 3  ;;  %v5339_v25 = vsel %vm1184_vm5, %v4953_v32, %v5162_v36 }
 0x376   : > { %v5340_v5 = vrot.slane %v5339_v25, 4  ;;  %v5341_v30 = vsel %vm1187_vm6, %v4953_v32, %v5162_v36  ;;  %v5343_v16 = vsel %vm1190_vm7, %v4953_v32, %v5162_v36  ;;  %v5345_v9 = vsel %vm421_vm8, %v5162_v36, %v4953_v32  ;;  %v13925_v58 = vld [vmem:[#allocation24_spill] sm:$0xff] }
 0x377   : > { %7248 = vst.msk [vmem:[%s8017_s20 + $0x2cb] ss:$4 sm:$0x3] %vm7924_vm4, %v5334_v2  ;;  %v5342_v50 = vrot.slane %v5341_v30, 5  ;;  %v5344_v34 = vrot.slane %v5343_v16, 6  ;;  %v5346_v19 = vrot.slane %v5345_v9, 7  ;;  %v5008_v4 = vadd.f32 %v5004_v37, %v4998_v31 }
 0x378   : > { %7249 = vst.msk [vmem:[%s8017_s20 + $0x2d3] ss:$4 sm:$0x3] %vm7924_vm4, %v5336_v6  ;;  %v5017_v44 = vadd.f32 %v5013_v8, %v5007_v33  ;;  %v4965_v25 = vmul.f32 %v13056_v54, %v13925_v58  ;;  %v4966_v32 = vmul.f32 %v13056_v54, %v13926_v60  ;;  %v4975_v36 = vmul.f32 %v13071_v63, %v13922_v39 }
 0x379   : > { %7250 = vst.msk [vmem:[%s8017_s20 + $0x2db] ss:$4 sm:$0x3] %vm7924_vm4, %v5338_v59  ;;  %v5018_v37 = vadd.f32 %v5014_v3, %v5008_v4  ;;  %v4976_v31 = vmul.f32 %v13071_v63, %v13888_v15  ;;  %v4985_v8 = vmul.f32 %v13103_v53, %v10762_v10  ;;  %v4986_v33 = vmul.f32 %v13103_v53, %v10767_v11 }
 0x37a   : > { %7251 = vst.msk [vmem:[%s8017_s20 + $0x2e3] ss:$4 sm:$0x3] %vm7924_vm4, %v5340_v5  ;;  %v5027_v54 = vadd.f32 %v5023_v42, %v5017_v44  ;;  %v4969_v2 = vadd.f32 %v4965_v25, %v4959_v14  ;;  %v4970_v6 = vadd.f32 %v4966_v32, %v4960_v55  ;;  %v4995_v59 = vmul.f32 %v13113_v51, %v7918_v29 }
 0x37b   : > { %7252 = vst.msk [vmem:[%s8017_s20 + $0x2eb] ss:$4 sm:$0x3] %vm7924_vm4, %v5342_v50  ;;  %v5028_v63 = vadd.f32 %v5024_v7, %v5018_v37  ;;  %v4996_v3 = vmul.f32 %v13113_v51, %v7920_v28  ;;  %v5005_v53 = vmul.f32 %v5002_v38, %v10772_v35  ;;  %v5006_v30 = vmul.f32 %v5002_v38, %v10777_v0 }
 0x37c   : > { %7253 = vst.msk [vmem:[%s8017_s20 + $0x2f3] ss:$4 sm:$0x3] %vm7924_vm4, %v5344_v34  ;;  %v5033_v42 = vadd.f32 %v13147_v46, %v5027_v54  ;;  %v4979_v14 = vadd.f32 %v4975_v36, %v4969_v2  ;;  %v4980_v55 = vadd.f32 %v4976_v31, %v4970_v6  ;;  %v5015_v5 = vmul.f32 %v13128_v45, %v7922_v27 }
 0x37d   : > { %7254 = vst.msk [vmem:[%s8017_s20 + $0x2fb] ss:$4 sm:$0x3] %vm7924_vm4, %v5346_v19  ;;  %v5034_v51 = vadd.f32 %v13147_v46, %v5028_v63  ;;  %v5016_v7 = vmul.f32 %v13128_v45, %v7928_v57  ;;  %v5025_v38 = vmul.f32 %v5022_v62, %v10782_v48  ;;  %v5026_v16 = vmul.f32 %v5022_v62, %v10787_v26 }
 0x37e   : > { %v4989_v9 = vadd.f32 %v4985_v8, %v4979_v14  ;;  %v4990_v50 = vadd.f32 %v4986_v33, %v4980_v55  ;;  %v13220_v34 = vstv %s13157_s25  ;;  %v13223_v4 = vstv %s13166_s27 }
 0x37f   : > { %v5163_v19 = vrot.slane %v5034_v51, 7  ;;  %v5039_v45 = vmul.f32 %v13220_v34, %v7756_v12  ;;  %v5040_v44 = vmul.f32 %v13220_v34, %v13885_v1  ;;  %v5045_v62 = vmul.f32 %v13223_v4, %v10594_v43 }
 0x380   : > { %v4999_v25 = vadd.f32 %v4995_v59, %v4989_v9  ;;  %v5000_v32 = vadd.f32 %v4996_v3, %v4990_v50  ;;  %v5046_v36 = vmul.f32 %v13223_v4, %v10599_v41  ;;  %v13238_v37 = vstv %s13180_s10 }
 0x381   : > { %v5347_v12 = vsel %vm372_vm0, %v5033_v42, %v5163_v19  ;;  %v5348_v31 = vsel %vm1175_vm1, %v5033_v42, %v5163_v19  ;;  %v5350_v1 = vsel %vm1178_vm2, %v5033_v42, %v5163_v19  ;;  %v5352_v43 = vsel %vm1181_vm3, %v5033_v42, %v5163_v19 }
 0x382   : > { %7255 = vst.msk [vmem:[%s8017_s20 + $0x303] ss:$4 sm:$0x3] %vm7924_vm4, %v5347_v12  ;;  %v5349_v41 = vrot.slane %v5348_v31, 1  ;;  %v5351_v8 = vrot.slane %v5350_v1, 2  ;;  %v5353_v33 = vrot.slane %v5352_v43, 3  ;;  %v5354_v54 = vsel %vm1184_vm5, %v5033_v42, %v5163_v19 }
 0x383   : > { %v5355_v2 = vrot.slane %v5354_v54, 4  ;;  %v5356_v6 = vsel %vm1187_vm6, %v5033_v42, %v5163_v19  ;;  %v5358_v59 = vsel %vm1190_vm7, %v5033_v42, %v5163_v19  ;;  %v5360_v63 = vsel %vm421_vm8, %v5163_v19, %v5033_v42 }
 0x384   : > { %7256 = vst.msk [vmem:[%s8017_s20 + $0x30b] ss:$4 sm:$0x3] %vm7924_vm4, %v5349_v41  ;;  %v5357_v3 = vrot.slane %v5356_v6, 5  ;;  %v5359_v14 = vrot.slane %v5358_v59, 6  ;;  %v5361_v55 = vrot.slane %v5360_v63, 7  ;;  %v5009_v51 = vadd.f32 %v5005_v53, %v4999_v25 }
 0x385   : > { %7257 = vst.msk [vmem:[%s8017_s20 + $0x313] ss:$4 sm:$0x3] %vm7924_vm4, %v5351_v8  ;;  %v5010_v9 = vadd.f32 %v5006_v30, %v5000_v32  ;;  %v5049_v50 = vadd.f32 %v5045_v62, %v5039_v45  ;;  %v5050_v12 = vadd.f32 %v5046_v36, %v5040_v44  ;;  %v5055_v42 = vmul.f32 %v13238_v37, %v7765_v17  ;;  %v13927_v63 = vld [vmem:[#allocation21_spill] sm:$0xff] }
 0x386   : > { %7258 = vst.msk [vmem:[%s8017_s20 + $0x31b] ss:$4 sm:$0x3] %vm7924_vm4, %v5353_v33  ;;  %v5019_v19 = vadd.f32 %v5015_v5, %v5009_v51  ;;  %v5056_v31 = vmul.f32 %v13238_v37, %v7767_v18  ;;  %v13271_v53 = vstv %s13217_s15  ;;  %v13274_v25 = vstv %s13225_s29 }
 0x387   : > { %7259 = vst.msk [vmem:[%s8017_s20 + $0x323] ss:$4 sm:$0x3] %vm7924_vm4, %v5355_v2  ;;  %v5020_v30 = vadd.f32 %v5016_v7, %v5010_v9  ;;  %v5059_v17 = vadd.f32 %v5055_v42, %v5049_v50  ;;  %v5065_v45 = vmul.f32 %v13271_v53, %v10604_v52  ;;  %v5066_v5 = vmul.f32 %v13271_v53, %v10626_v47 }
 0x388   : > { %7260 = vst.msk [vmem:[%s8017_s20 + $0x32b] ss:$4 sm:$0x3] %vm7924_vm4, %v5357_v3  ;;  %v5029_v18 = vadd.f32 %v5025_v38, %v5019_v19  ;;  %v5060_v44 = vadd.f32 %v5056_v31, %v5050_v12  ;;  %v5075_v62 = vmul.f32 %v13274_v25, %v7772_v20  ;;  %v5076_v32 = vmul.f32 %v13274_v25, %v7774_v21 }
 0x389   : > { %7261 = vst.msk [vmem:[%s8017_s20 + $0x333] ss:$4 sm:$0x3] %vm7924_vm4, %v5359_v14  ;;  %v5030_v52 = vadd.f32 %v5026_v16, %v5020_v30  ;;  %v5069_v7 = vadd.f32 %v5065_v45, %v5059_v17  ;;  %v13294_v36 = vstv %s13233_s23  ;;  %v13297_v47 = vstv %s13240_s30 }
 0x38a   : > { %7262 = vst.msk [vmem:[%s8017_s20 + $0x33b] ss:$4 sm:$0x3] %vm7924_vm4, %v5361_v55  ;;  %v5035_v38 = vadd.f32 %v13147_v46, %v5029_v18  ;;  %v5070_v20 = vadd.f32 %v5066_v5, %v5060_v44  ;;  %v5085_v21 = vmul.f32 %v13294_v36, %v10636_v40  ;;  %v5086_v1 = vmul.f32 %v13294_v36, %v10641_v49 }
 0x38b   : > { %v5036_v43 = vadd.f32 %v13147_v46, %v5030_v52  ;;  %v5079_v16 = vadd.f32 %v5075_v62, %v5069_v7  ;;  %v5095_v41 = vmul.f32 %v13297_v47, %v7776_v22  ;;  %v5096_v8 = vmul.f32 %v13297_v47, %v7781_v24 }
 0x38c   : > { %v5080_v33 = vadd.f32 %v5076_v32, %v5070_v20  ;;  %v13313_v54 = vstv %s13246_s7  ;;  %v13316_v2 = vstv %s13255_s26  ;;  %v5041_v40 = vmul.f32 %v13220_v34, %v13923_v61 }
 0x38d   : > { %v5164_v6 = vrot.slane %v5036_v43, 7  ;;  %v5089_v49 = vadd.f32 %v5085_v21, %v5079_v16  ;;  %v5105_v46 = vmul.f32 %v13313_v54, %v10653_v23  ;;  %v5106_v22 = vmul.f32 %v13313_v54, %v13918_v13 }
 0x38e   : > { %v5090_v59 = vadd.f32 %v5086_v1, %v5080_v33  ;;  %v5042_v24 = vmul.f32 %v13220_v34, %v13927_v63  ;;  %v5047_v3 = vmul.f32 %v13223_v4, %v13925_v58  ;;  %v5048_v14 = vmul.f32 %v13223_v4, %v13926_v60 }
 0x38f   : > { %v5362_v61 = vsel %vm372_vm0, %v5035_v38, %v5164_v6  ;;  %v5363_v55 = vsel %vm1175_vm1, %v5035_v38, %v5164_v6  ;;  %v5365_v23 = vsel %vm1178_vm2, %v5035_v38, %v5164_v6  ;;  %v5367_v13 = vsel %vm1181_vm3, %v5035_v38, %v5164_v6 }
 0x390   : > { %7263 = vst.msk [vmem:[%s8017_s20 + $0x343] ss:$4 sm:$0x3] %vm7924_vm4, %v5362_v61  ;;  %v5364_v34 = vrot.slane %v5363_v55, 1  ;;  %v5366_v51 = vrot.slane %v5365_v23, 2  ;;  %v5368_v9 = vrot.slane %v5367_v13, 3  ;;  %v5369_v58 = vsel %vm1184_vm5, %v5035_v38, %v5164_v6 }
 0x391   : > { %v5370_v50 = vrot.slane %v5369_v58, 4  ;;  %v5371_v60 = vsel %vm1187_vm6, %v5035_v38, %v5164_v6  ;;  %v5373_v4 = vsel %vm1190_vm7, %v5035_v38, %v5164_v6  ;;  %v5375_v12 = vsel %vm421_vm8, %v5164_v6, %v5035_v38 }
 0x392   : > { %7264 = vst.msk [vmem:[%s8017_s20 + $0x34b] ss:$4 sm:$0x3] %vm7924_vm4, %v5364_v34  ;;  %v5372_v42 = vrot.slane %v5371_v60, 5  ;;  %v5374_v19 = vrot.slane %v5373_v4, 6  ;;  %v5376_v31 = vrot.slane %v5375_v12, 7  ;;  %v5099_v30 = vadd.f32 %v5095_v41, %v5089_v49 }
 0x393   : > { %7265 = vst.msk [vmem:[%s8017_s20 + $0x353] ss:$4 sm:$0x3] %vm7924_vm4, %v5366_v51  ;;  %v5100_v17 = vadd.f32 %v5096_v8, %v5090_v59  ;;  %v5051_v45 = vadd.f32 %v5047_v3, %v5041_v40  ;;  %v5052_v5 = vadd.f32 %v5048_v14, %v5042_v24  ;;  %v5057_v18 = vmul.f32 %v13238_v37, %v13922_v39 }
 0x394   : > { %7266 = vst.msk [vmem:[%s8017_s20 + $0x35b] ss:$4 sm:$0x3] %vm7924_vm4, %v5368_v9  ;;  %v5109_v44 = vadd.f32 %v5105_v46, %v5099_v30  ;;  %v5058_v62 = vmul.f32 %v13238_v37, %v13888_v15  ;;  %v5067_v32 = vmul.f32 %v13271_v53, %v10762_v10  ;;  %v5068_v52 = vmul.f32 %v13271_v53, %v10767_v11 }
 0x395   : > { %7267 = vst.msk [vmem:[%s8017_s20 + $0x363] ss:$4 sm:$0x3] %vm7924_vm4, %v5370_v50  ;;  %v5110_v7 = vadd.f32 %v5106_v22, %v5100_v17  ;;  %v5061_v38 = vadd.f32 %v5057_v18, %v5051_v45  ;;  %v5077_v20 = vmul.f32 %v13274_v25, %v7918_v29  ;;  %v5078_v15 = vmul.f32 %v13274_v25, %v7920_v28  ;;  %v6089_v18 = vld [vmem:[%s8017_s20 + $0x10] sm:$0xff] (%p7652_p8) }
 0x396   : > { %7268 = vst.msk [vmem:[%s8017_s20 + $0x36b] ss:$4 sm:$0x3] %vm7924_vm4, %v5372_v42  ;;  %v5062_v39 = vadd.f32 %v5058_v62, %v5052_v5  ;;  %v5115_v10 = vadd.f32 %v13316_v2, %v5109_v44  ;;  %v5087_v29 = vmul.f32 %v13294_v36, %v10772_v35  ;;  %v5088_v28 = vmul.f32 %v13294_v36, %v10777_v0  ;;  %v6085_v5 = vld [vmem:[%s8017_s20] sm:$0xff] (%p7652_p8)  ;;  %v6091_v44 = vld [vmem:[%s8017_s20 + $0x18] sm:$0xff] (%p7652_p8) }
 0x397   : > { %7269 = vst.msk [vmem:[%s8017_s20 + $0x373] ss:$4 sm:$0x3] %vm7924_vm4, %v5374_v19  ;;  %v5116_v11 = vadd.f32 %v13316_v2, %v5110_v7  ;;  %v5071_v37 = vadd.f32 %v5067_v32, %v5061_v38  ;;  %v5097_v43 = vmul.f32 %v13297_v47, %v7922_v27  ;;  %v5098_v16 = vmul.f32 %v13297_v47, %v7928_v57  ;;  %v6093_v62 = vld [vmem:[%s8017_s20 + $0x20] sm:$0xff] (%p7652_p8)  ;;  %v6095_v32 = vld [vmem:[%s8017_s20 + $0x28] sm:$0xff] (%p7652_p8)  ;;  %v6099_v7 = vld [vmem:[%s8017_s20 + $0x38] sm:$0xff] (%p7652_p8) }
 0x398   : > { %7270 = vst.msk [vmem:[%s8017_s20 + $0x37b] ss:$4 sm:$0x3] %vm7924_vm4, %v5376_v31  ;;  %v5072_v53 = vadd.f32 %v5068_v52, %v5062_v39  ;;  %v5107_v59 = vmul.f32 %v13313_v54, %v10782_v48  ;;  %v5108_v3 = vmul.f32 %v13313_v54, %v10787_v26  ;;  %v6097_v52 = vld [vmem:[%s8017_s20 + $0x30] sm:$0xff] (%p7652_p8)  ;;  %v6101_v38 = vld [vmem:[%s8017_s20 + $0x40] sm:$0xff] (%p7652_p8)  ;;  %v6103_v39 = vld [vmem:[%s8017_s20 + $0x48] sm:$0xff] (%p7652_p8) }
 0x399   : > { %v5165_v21 = vrot.slane %v5116_v11, 7  ;;  %v5081_v25 = vadd.f32 %v5077_v20, %v5071_v37  ;;  %6086 = vst [vmem:[%s13463_s13] sm:$0xff] (%p7652_p8), %v6085_v5  ;;  %v6105_v20 = vld [vmem:[%s8017_s20 + $0x50] sm:$0xff] (%p7652_p8)  ;;  %v6111_v11 = vld [vmem:[%s8017_s20 + $0x68] sm:$0xff] (%p7652_p8)  ;;  %v6213_v5 = vld [vmem:[%s8017_s20 + $0x200] sm:$0xff] (%p7652_p8) }
 0x39a   : > { %v5082_v1 = vadd.f32 %v5078_v15, %v5072_v53  ;;  %6090 = vst [vmem:[%s13463_s13 + $0x40] sm:$0xff] (%p7652_p8), %v6089_v18  ;;  %v6107_v15 = vld [vmem:[%s8017_s20 + $0x58] sm:$0xff] (%p7652_p8)  ;;  %v6113_v37 = vld [vmem:[%s8017_s20 + $0x70] sm:$0xff] (%p7652_p8) }
 0x39b   : > { %v5377_v41 = vsel %vm372_vm0, %v5115_v10, %v5165_v21  ;;  %v5378_v8 = vsel %vm1175_vm1, %v5115_v10, %v5165_v21  ;;  %v5380_v33 = vsel %vm1178_vm2, %v5115_v10, %v5165_v21  ;;  %v5382_v35 = vsel %vm1181_vm3, %v5115_v10, %v5165_v21  ;;  %6092 = vst [vmem:[%s13463_s13 + $0x60] sm:$0xff] (%p7652_p8), %v6091_v44  ;;  %v6115_v53 = vld [vmem:[%s8017_s20 + $0x78] sm:$0xff] (%p7652_p8)  ;;  %v6217_v18 = vld [vmem:[%s8017_s20 + $0x210] sm:$0xff] (%p7652_p8) }
 0x39c   : > { %7271 = vst.msk [vmem:[%s8017_s20 + $0x383] ss:$4 sm:$0x3] %vm7924_vm4, %v5377_v41  ;;  %v5379_v0 = vrot.slane %v5378_v8, 1  ;;  %v5381_v36 = vrot.slane %v5380_v33, 2  ;;  %v5383_v40 = vrot.slane %v5382_v35, 3  ;;  %v5384_v27 = vsel %vm1184_vm5, %v5115_v10, %v5165_v21 }
 0x39d   : > { %v5385_v57 = vrot.slane %v5384_v27, 4  ;;  %v5386_v47 = vsel %vm1187_vm6, %v5115_v10, %v5165_v21  ;;  %v5388_v6 = vsel %vm1190_vm7, %v5115_v10, %v5165_v21  ;;  %v5390_v49 = vsel %vm421_vm8, %v5165_v21, %v5115_v10  ;;  %6094 = vst [vmem:[%s13463_s13 + $0x80] sm:$0xff] (%p7652_p8), %v6093_v62  ;;  %v6109_v10 = vld [vmem:[%s8017_s20 + $0x60] sm:$0xff] (%p7652_p8)  ;;  %v6131_v41 = vld [vmem:[%s8017_s20 + $0xb8] sm:$0xff] (%p7652_p8)  ;;  %v6135_v33 = vld [vmem:[%s8017_s20 + $0xc8] sm:$0xff] (%p7652_p8) }
 0x39e   : > { %7272 = vst.msk [vmem:[%s8017_s20 + $0x38b] ss:$4 sm:$0x3] %vm7924_vm4, %v5379_v0  ;;  %v5387_v46 = vrot.slane %v5386_v47, 5  ;;  %v5091_v22 = vadd.f32 %v5087_v29, %v5081_v25  ;;  %v5389_v63 = vrot.slane %v5388_v6, 6  ;;  %v5092_v24 = vadd.f32 %v5088_v28, %v5082_v1  ;;  %v6117_v21 = vld [vmem:[%s8017_s20 + $0x80] sm:$0xff] (%p7652_p8) }
 0x39f   : > { %7273 = vst.msk [vmem:[%s8017_s20 + $0x393] ss:$4 sm:$0x3] %vm7924_vm4, %v5381_v36  ;;  %v5391_v14 = vrot.slane %v5390_v49, 7  ;;  %v6119_v29 = vld [vmem:[%s8017_s20 + $0x88] sm:$0xff] (%p7652_p8)  ;;  %v6121_v28 = vld [vmem:[%s8017_s20 + $0x90] sm:$0xff] (%p7652_p8) }
 0x3a0   : > { %7274 = vst.msk [vmem:[%s8017_s20 + $0x39b] ss:$4 sm:$0x3] %vm7924_vm4, %v5383_v40  ;;  %v5101_v61 = vadd.f32 %v5097_v43, %v5091_v22  ;;  %v5102_v55 = vadd.f32 %v5098_v16, %v5092_v24  ;;  %v6123_v25 = vld [vmem:[%s8017_s20 + $0x98] sm:$0xff] (%p7652_p8)  ;;  %v6125_v1 = vld [vmem:[%s8017_s20 + $0xa0] sm:$0xff] (%p7652_p8)  ;;  %v6127_v43 = vld [vmem:[%s8017_s20 + $0xa8] sm:$0xff] (%p7652_p8) }
 0x3a1   : > { %7275 = vst.msk [vmem:[%s8017_s20 + $0x3a3] ss:$4 sm:$0x3] %vm7924_vm4, %v5385_v57  ;;  %v6129_v16 = vld [vmem:[%s8017_s20 + $0xb0] sm:$0xff] (%p7652_p8)  ;;  %v6133_v8 = vld [vmem:[%s8017_s20 + $0xc0] sm:$0xff] (%p7652_p8)  ;;  %v6139_v0 = vld [vmem:[%s8017_s20 + $0xd8] sm:$0xff] (%p7652_p8) }
 0x3a2   : > { %7276 = vst.msk [vmem:[%s8017_s20 + $0x3ab] ss:$4 sm:$0x3] %vm7924_vm4, %v5387_v46  ;;  %v5111_v48 = vadd.f32 %v5107_v59, %v5101_v61  ;;  %v5112_v23 = vadd.f32 %v5108_v3, %v5102_v55  ;;  %v6137_v35 = vld [vmem:[%s8017_s20 + $0xd0] sm:$0xff] (%p7652_p8)  ;;  %v6141_v36 = vld [vmem:[%s8017_s20 + $0xe0] sm:$0xff] (%p7652_p8)  ;;  %v6143_v40 = vld [vmem:[%s8017_s20 + $0xe8] sm:$0xff] (%p7652_p8) }
 0x3a3   : > { %7277 = vst.msk [vmem:[%s8017_s20 + $0x3b3] ss:$4 sm:$0x3] %vm7924_vm4, %v5389_v63  ;;  %v6145_v27 = vld [vmem:[%s8017_s20 + $0xf0] sm:$0xff] (%p7652_p8)  ;;  %v6147_v57 = vld [vmem:[%s8017_s20 + $0xf8] sm:$0xff] (%p7652_p8)  ;;  %v6149_v47 = vld [vmem:[%s8017_s20 + $0x100] sm:$0xff] (%p7652_p8) }
 0x3a4   : > { %7278 = vst.msk [vmem:[%s8017_s20 + $0x3bb] ss:$4 sm:$0x3] %vm7924_vm4, %v5391_v14  ;;  %v5117_v26 = vadd.f32 %v13316_v2, %v5111_v48  ;;  %v5118_v54 = vadd.f32 %v13316_v2, %v5112_v23  ;;  %v6151_v6 = vld [vmem:[%s8017_s20 + $0x108] sm:$0xff] (%p7652_p8)  ;;  %v6153_v49 = vld [vmem:[%s8017_s20 + $0x110] sm:$0xff] (%p7652_p8)  ;;  %v6155_v46 = vld [vmem:[%s8017_s20 + $0x118] sm:$0xff] (%p7652_p8) }
 0x3a5   : > { %6096 = vst [vmem:[%s13463_s13 + $0xa0] sm:$0xff] (%p7652_p8), %v6095_v32  ;;  %v6157_v22 = vld [vmem:[%s8017_s20 + $0x120] sm:$0xff] (%p7652_p8)  ;;  %v6159_v59 = vld [vmem:[%s8017_s20 + $0x128] sm:$0xff] (%p7652_p8)  ;;  %v6161_v63 = vld [vmem:[%s8017_s20 + $0x130] sm:$0xff] (%p7652_p8) }
 0x3a6   : > { %v5166_v13 = vrot.slane %v5118_v54, 7  ;;  %6098 = vst [vmem:[%s13463_s13 + $0xc0] sm:$0xff] (%p7652_p8), %v6097_v52  ;;  %v6163_v24 = vld [vmem:[%s8017_s20 + $0x138] sm:$0xff] (%p7652_p8)  ;;  %v6165_v3 = vld [vmem:[%s8017_s20 + $0x140] sm:$0xff] (%p7652_p8)  ;;  %v6167_v14 = vld [vmem:[%s8017_s20 + $0x148] sm:$0xff] (%p7652_p8) }
 0x3a7   : > { %6100 = vst [vmem:[%s13463_s13 + $0xe0] sm:$0xff] (%p7652_p8), %v6099_v7  ;;  %v6169_v61 = vld [vmem:[%s8017_s20 + $0x150] sm:$0xff] (%p7652_p8)  ;;  %v6171_v55 = vld [vmem:[%s8017_s20 + $0x158] sm:$0xff] (%p7652_p8)  ;;  %v6173_v48 = vld [vmem:[%s8017_s20 + $0x160] sm:$0xff] (%p7652_p8) }
 0x3a8   : > { %v5392_v34 = vsel %vm372_vm0, %v5117_v26, %v5166_v13  ;;  %v5393_v51 = vsel %vm1175_vm1, %v5117_v26, %v5166_v13  ;;  %v5395_v9 = vsel %vm1178_vm2, %v5117_v26, %v5166_v13  ;;  %v5397_v58 = vsel %vm1181_vm3, %v5117_v26, %v5166_v13  ;;  %6102 = vst [vmem:[%s13463_s13 + $0x100] sm:$0xff] (%p7652_p8), %v6101_v38  ;;  %v6175_v23 = vld [vmem:[%s8017_s20 + $0x168] sm:$0xff] (%p7652_p8)  ;;  %v6179_v54 = vld [vmem:[%s8017_s20 + $0x178] sm:$0xff] (%p7652_p8)  ;;  %v6221_v62 = vld [vmem:[%s8017_s20 + $0x220] sm:$0xff] (%p7652_p8) }
 0x3a9   : > { %7279 = vst.msk [vmem:[%s8017_s20 + $0x3c3] ss:$4 sm:$0x3] %vm7924_vm4, %v5392_v34  ;;  %v5394_v50 = vrot.slane %v5393_v51, 1  ;;  %v5396_v60 = vrot.slane %v5395_v9, 2  ;;  %v5398_v2 = vrot.slane %v5397_v58, 3  ;;  %v5399_v4 = vsel %vm1184_vm5, %v5117_v26, %v5166_v13 }
 0x3aa   : > { %v5400_v12 = vrot.slane %v5399_v4, 4  ;;  %v5401_v42 = vsel %vm1187_vm6, %v5117_v26, %v5166_v13  ;;  %v5403_v19 = vsel %vm1190_vm7, %v5117_v26, %v5166_v13  ;;  %v5405_v31 = vsel %vm421_vm8, %v5166_v13, %v5117_v26  ;;  %6104 = vst [vmem:[%s13463_s13 + $0x120] sm:$0xff] (%p7652_p8), %v6103_v39  ;;  %v6177_v26 = vld [vmem:[%s8017_s20 + $0x170] sm:$0xff] (%p7652_p8)  ;;  %v6181_v13 = vld [vmem:[%s8017_s20 + $0x180] sm:$0xff] (%p7652_p8)  ;;  %v6183_v34 = vld [vmem:[%s8017_s20 + $0x188] sm:$0xff] (%p7652_p8) }
 0x3ab   : > { %7280 = vst.msk [vmem:[%s8017_s20 + $0x3cb] ss:$4 sm:$0x3] %vm7924_vm4, %v5394_v50  ;;  %v5402_v30 = vrot.slane %v5401_v42, 5  ;;  %v5404_v17 = vrot.slane %v5403_v19, 6  ;;  %v5406_v45 = vrot.slane %v5405_v31, 7 }
 0x3ac   : > { %7281 = vst.msk [vmem:[%s8017_s20 + $0x3d3] ss:$4 sm:$0x3] %vm7924_vm4, %v5396_v60  ;;  %v6185_v51 = vld [vmem:[%s8017_s20 + $0x190] sm:$0xff] (%p7652_p8)  ;;  %v6187_v9 = vld [vmem:[%s8017_s20 + $0x198] sm:$0xff] (%p7652_p8)  ;;  %v6189_v58 = vld [vmem:[%s8017_s20 + $0x1a0] sm:$0xff] (%p7652_p8) }
 0x3ad   : > { %7282 = vst.msk [vmem:[%s8017_s20 + $0x3db] ss:$4 sm:$0x3] %vm7924_vm4, %v5398_v2  ;;  %5797 = sbr.rel (!%p7652_p8) target bundleno = 1063 (0x427), region = 56  ;;  %v6191_v50 = vld [vmem:[%s8017_s20 + $0x1a8] sm:$0xff] (%p7652_p8)  ;;  %v6193_v60 = vld [vmem:[%s8017_s20 + $0x1b0] sm:$0xff] (%p7652_p8) }
 0x3ae   : > { %7283 = vst.msk [vmem:[%s8017_s20 + $0x3e3] ss:$4 sm:$0x3] %vm7924_vm4, %v5400_v12  ;;  %v6195_v2 = vld [vmem:[%s8017_s20 + $0x1b8] sm:$0xff] (%p7652_p8)  ;;  %v6197_v4 = vld [vmem:[%s8017_s20 + $0x1c0] sm:$0xff] (%p7652_p8)  ;;  %v6199_v12 = vld [vmem:[%s8017_s20 + $0x1c8] sm:$0xff] (%p7652_p8) }
 0x3af   : > { %7284 = vst.msk [vmem:[%s8017_s20 + $0x3eb] ss:$4 sm:$0x3] %vm7924_vm4, %v5402_v30  ;;  %v6201_v42 = vld [vmem:[%s8017_s20 + $0x1d0] sm:$0xff] (%p7652_p8)  ;;  %v6203_v19 = vld [vmem:[%s8017_s20 + $0x1d8] sm:$0xff] (%p7652_p8)  ;;  %v6205_v31 = vld [vmem:[%s8017_s20 + $0x1e0] sm:$0xff] (%p7652_p8) }
 0x3b0   : > { %7285 = vst.msk [vmem:[%s8017_s20 + $0x3f3] ss:$4 sm:$0x3] %vm7924_vm4, %v5404_v17  ;;  %v6207_v30 = vld [vmem:[%s8017_s20 + $0x1e8] sm:$0xff] (%p7652_p8)  ;;  %v6209_v17 = vld [vmem:[%s8017_s20 + $0x1f0] sm:$0xff] (%p7652_p8)  ;;  %v6219_v44 = vld [vmem:[%s8017_s20 + $0x218] sm:$0xff] (%p7652_p8) }
 0x3b1   : > { %7286 = vst.msk [vmem:[%s8017_s20 + $0x3fb] ss:$4 sm:$0x3] %vm7924_vm4, %v5406_v45  ;;  %v6211_v45 = vld [vmem:[%s8017_s20 + $0x1f8] sm:$0xff] (%p7652_p8)  ;;  %v6223_v32 = vld [vmem:[%s8017_s20 + $0x228] sm:$0xff] (%p7652_p8)  ;;  %v6225_v52 = vld [vmem:[%s8017_s20 + $0x230] sm:$0xff] (%p7652_p8) }
 0x3b2   : > { %6106 = vst [vmem:[%s13463_s13 + $0x140] sm:$0xff] %v6105_v20  ;;  %v6227_v7 = vld [vmem:[%s8017_s20 + $0x238] sm:$0xff]  ;;  %v6229_v38 = vld [vmem:[%s8017_s20 + $0x240] sm:$0xff]  ;;  %v6231_v39 = vld [vmem:[%s8017_s20 + $0x248] sm:$0xff] }
 0x3b3   : > { %6108 = vst [vmem:[%s13463_s13 + $0x160] sm:$0xff] %v6107_v15  ;;  %v6233_v20 = vld [vmem:[%s8017_s20 + $0x250] sm:$0xff]  ;;  %v6235_v15 = vld [vmem:[%s8017_s20 + $0x258] sm:$0xff] }
 0x3b4   : > { %6110 = vst [vmem:[%s13463_s13 + $0x180] sm:$0xff] %v6109_v10  ;;  %v6237_v10 = vld [vmem:[%s8017_s20 + $0x260] sm:$0xff] }
 0x3b5   : > { %6112 = vst [vmem:[%s13463_s13 + $0x1a0] sm:$0xff] %v6111_v11  ;;  %v6239_v11 = vld [vmem:[%s8017_s20 + $0x268] sm:$0xff] }
 0x3b6   : > { %6114 = vst [vmem:[%s13463_s13 + $0x1c0] sm:$0xff] %v6113_v37  ;;  %v6241_v37 = vld [vmem:[%s8017_s20 + $0x270] sm:$0xff] }
 0x3b7   : > { %6116 = vst [vmem:[%s13463_s13 + $0x1e0] sm:$0xff] %v6115_v53  ;;  %v6243_v53 = vld [vmem:[%s8017_s20 + $0x278] sm:$0xff] }
 0x3b8   : > { %6118 = vst [vmem:[%s13463_s13 + $0x200] sm:$0xff] %v6117_v21  ;;  %v6245_v21 = vld [vmem:[%s8017_s20 + $0x280] sm:$0xff] }
 0x3b9   : > { %6120 = vst [vmem:[%s13463_s13 + $0x220] sm:$0xff] %v6119_v29  ;;  %v6247_v29 = vld [vmem:[%s8017_s20 + $0x288] sm:$0xff] }
 0x3ba   : > { %6122 = vst [vmem:[%s13463_s13 + $0x240] sm:$0xff] %v6121_v28  ;;  %v6249_v28 = vld [vmem:[%s8017_s20 + $0x290] sm:$0xff] }
 0x3bb   : > { %6124 = vst [vmem:[%s13463_s13 + $0x260] sm:$0xff] %v6123_v25  ;;  %v6251_v25 = vld [vmem:[%s8017_s20 + $0x298] sm:$0xff] }
 0x3bc   : > { %6126 = vst [vmem:[%s13463_s13 + $0x280] sm:$0xff] %v6125_v1  ;;  %v6253_v1 = vld [vmem:[%s8017_s20 + $0x2a0] sm:$0xff] }
 0x3bd   : > { %6128 = vst [vmem:[%s13463_s13 + $0x2a0] sm:$0xff] %v6127_v43  ;;  %v6255_v43 = vld [vmem:[%s8017_s20 + $0x2a8] sm:$0xff] }
 0x3be   : > { %6130 = vst [vmem:[%s13463_s13 + $0x2c0] sm:$0xff] %v6129_v16  ;;  %v6257_v16 = vld [vmem:[%s8017_s20 + $0x2b0] sm:$0xff] }
 0x3bf   : > { %6132 = vst [vmem:[%s13463_s13 + $0x2e0] sm:$0xff] %v6131_v41  ;;  %v6259_v41 = vld [vmem:[%s8017_s20 + $0x2b8] sm:$0xff] }
 0x3c0   : > { %6134 = vst [vmem:[%s13463_s13 + $0x300] sm:$0xff] %v6133_v8  ;;  %v6261_v8 = vld [vmem:[%s8017_s20 + $0x2c0] sm:$0xff] }
 0x3c1   : > { %6136 = vst [vmem:[%s13463_s13 + $0x320] sm:$0xff] %v6135_v33  ;;  %v6263_v33 = vld [vmem:[%s8017_s20 + $0x2c8] sm:$0xff] }
 0x3c2   : > { %6138 = vst [vmem:[%s13463_s13 + $0x340] sm:$0xff] %v6137_v35  ;;  %v6265_v35 = vld [vmem:[%s8017_s20 + $0x2d0] sm:$0xff] }
 0x3c3   : > { %6140 = vst [vmem:[%s13463_s13 + $0x360] sm:$0xff] %v6139_v0  ;;  %v6267_v0 = vld [vmem:[%s8017_s20 + $0x2d8] sm:$0xff] }
 0x3c4   : > { %6142 = vst [vmem:[%s13463_s13 + $0x380] sm:$0xff] %v6141_v36  ;;  %v6269_v36 = vld [vmem:[%s8017_s20 + $0x2e0] sm:$0xff] }
 0x3c5   : > { %6144 = vst [vmem:[%s13463_s13 + $0x3a0] sm:$0xff] %v6143_v40  ;;  %v6271_v40 = vld [vmem:[%s8017_s20 + $0x2e8] sm:$0xff] }
 0x3c6   : > { %6146 = vst [vmem:[%s13463_s13 + $0x3c0] sm:$0xff] %v6145_v27  ;;  %v6273_v27 = vld [vmem:[%s8017_s20 + $0x2f0] sm:$0xff] }
 0x3c7   : > { %6148 = vst [vmem:[%s13463_s13 + $0x3e0] sm:$0xff] %v6147_v57  ;;  %v6275_v57 = vld [vmem:[%s8017_s20 + $0x2f8] sm:$0xff] }
 0x3c8   : > { %6150 = vst [vmem:[%s13463_s13 + $0x400] sm:$0xff] %v6149_v47  ;;  %v6277_v47 = vld [vmem:[%s8017_s20 + $0x300] sm:$0xff] }
 0x3c9   : > { %6152 = vst [vmem:[%s13463_s13 + $0x420] sm:$0xff] %v6151_v6  ;;  %v6279_v6 = vld [vmem:[%s8017_s20 + $0x308] sm:$0xff] }
 0x3ca   : > { %6154 = vst [vmem:[%s13463_s13 + $0x440] sm:$0xff] %v6153_v49  ;;  %v6281_v49 = vld [vmem:[%s8017_s20 + $0x310] sm:$0xff] }
 0x3cb   : > { %6156 = vst [vmem:[%s13463_s13 + $0x460] sm:$0xff] %v6155_v46  ;;  %v6283_v46 = vld [vmem:[%s8017_s20 + $0x318] sm:$0xff] }
 0x3cc   : > { %6158 = vst [vmem:[%s13463_s13 + $0x480] sm:$0xff] %v6157_v22  ;;  %v6285_v22 = vld [vmem:[%s8017_s20 + $0x320] sm:$0xff] }
 0x3cd   : > { %6160 = vst [vmem:[%s13463_s13 + $0x4a0] sm:$0xff] %v6159_v59  ;;  %v6287_v59 = vld [vmem:[%s8017_s20 + $0x328] sm:$0xff] }
 0x3ce   : > { %6162 = vst [vmem:[%s13463_s13 + $0x4c0] sm:$0xff] %v6161_v63  ;;  %v6289_v63 = vld [vmem:[%s8017_s20 + $0x330] sm:$0xff] }
 0x3cf   : > { %6164 = vst [vmem:[%s13463_s13 + $0x4e0] sm:$0xff] %v6163_v24  ;;  %v6291_v24 = vld [vmem:[%s8017_s20 + $0x338] sm:$0xff] }
 0x3d0   : > { %6166 = vst [vmem:[%s13463_s13 + $0x500] sm:$0xff] %v6165_v3  ;;  %v6293_v3 = vld [vmem:[%s8017_s20 + $0x340] sm:$0xff] }
 0x3d1   : > { %6168 = vst [vmem:[%s13463_s13 + $0x520] sm:$0xff] %v6167_v14  ;;  %v6295_v14 = vld [vmem:[%s8017_s20 + $0x348] sm:$0xff] }
 0x3d2   : > { %6170 = vst [vmem:[%s13463_s13 + $0x540] sm:$0xff] %v6169_v61  ;;  %v6297_v61 = vld [vmem:[%s8017_s20 + $0x350] sm:$0xff] }
 0x3d3   : > { %6172 = vst [vmem:[%s13463_s13 + $0x560] sm:$0xff] %v6171_v55  ;;  %v6299_v55 = vld [vmem:[%s8017_s20 + $0x358] sm:$0xff] }
 0x3d4   : > { %6174 = vst [vmem:[%s13463_s13 + $0x580] sm:$0xff] %v6173_v48  ;;  %v6301_v48 = vld [vmem:[%s8017_s20 + $0x360] sm:$0xff] }
 0x3d5   : > { %6176 = vst [vmem:[%s13463_s13 + $0x5a0] sm:$0xff] %v6175_v23  ;;  %v6303_v23 = vld [vmem:[%s8017_s20 + $0x368] sm:$0xff] }
 0x3d6   : > { %6178 = vst [vmem:[%s13463_s13 + $0x5c0] sm:$0xff] %v6177_v26  ;;  %v6305_v26 = vld [vmem:[%s8017_s20 + $0x370] sm:$0xff] }
 0x3d7   : > { %6180 = vst [vmem:[%s13463_s13 + $0x5e0] sm:$0xff] %v6179_v54  ;;  %v6307_v54 = vld [vmem:[%s8017_s20 + $0x378] sm:$0xff] }
 0x3d8   : > { %6182 = vst [vmem:[%s13463_s13 + $0x600] sm:$0xff] %v6181_v13  ;;  %v6309_v13 = vld [vmem:[%s8017_s20 + $0x380] sm:$0xff] }
 0x3d9   : > { %6184 = vst [vmem:[%s13463_s13 + $0x620] sm:$0xff] %v6183_v34  ;;  %v6311_v34 = vld [vmem:[%s8017_s20 + $0x388] sm:$0xff] }
 0x3da   : > { %6186 = vst [vmem:[%s13463_s13 + $0x640] sm:$0xff] %v6185_v51  ;;  %v6313_v51 = vld [vmem:[%s8017_s20 + $0x390] sm:$0xff] }
 0x3db   : > { %6188 = vst [vmem:[%s13463_s13 + $0x660] sm:$0xff] %v6187_v9  ;;  %v6315_v9 = vld [vmem:[%s8017_s20 + $0x398] sm:$0xff] }
 0x3dc   : > { %6190 = vst [vmem:[%s13463_s13 + $0x680] sm:$0xff] %v6189_v58  ;;  %v6317_v58 = vld [vmem:[%s8017_s20 + $0x3a0] sm:$0xff] }
 0x3dd   : > { %6192 = vst [vmem:[%s13463_s13 + $0x6a0] sm:$0xff] %v6191_v50  ;;  %v6319_v50 = vld [vmem:[%s8017_s20 + $0x3a8] sm:$0xff] }
 0x3de   : > { %6194 = vst [vmem:[%s13463_s13 + $0x6c0] sm:$0xff] %v6193_v60  ;;  %v6321_v60 = vld [vmem:[%s8017_s20 + $0x3b0] sm:$0xff] }
 0x3df   : > { %6196 = vst [vmem:[%s13463_s13 + $0x6e0] sm:$0xff] %v6195_v2  ;;  %v6323_v2 = vld [vmem:[%s8017_s20 + $0x3b8] sm:$0xff] }
 0x3e0   : > { %6198 = vst [vmem:[%s13463_s13 + $0x700] sm:$0xff] %v6197_v4  ;;  %v6325_v4 = vld [vmem:[%s8017_s20 + $0x3c0] sm:$0xff] }
 0x3e1   : > { %6200 = vst [vmem:[%s13463_s13 + $0x720] sm:$0xff] %v6199_v12  ;;  %v6327_v12 = vld [vmem:[%s8017_s20 + $0x3c8] sm:$0xff] }
 0x3e2   : > { %6202 = vst [vmem:[%s13463_s13 + $0x740] sm:$0xff] %v6201_v42  ;;  %v6329_v42 = vld [vmem:[%s8017_s20 + $0x3d0] sm:$0xff] }
 0x3e3   : > { %6204 = vst [vmem:[%s13463_s13 + $0x760] sm:$0xff] %v6203_v19  ;;  %v6331_v19 = vld [vmem:[%s8017_s20 + $0x3d8] sm:$0xff] }
 0x3e4   : > { %6206 = vst [vmem:[%s13463_s13 + $0x780] sm:$0xff] %v6205_v31  ;;  %v6333_v31 = vld [vmem:[%s8017_s20 + $0x3e0] sm:$0xff] }
 0x3e5   : > { %6208 = vst [vmem:[%s13463_s13 + $0x7a0] sm:$0xff] %v6207_v30  ;;  %v6335_v30 = vld [vmem:[%s8017_s20 + $0x3e8] sm:$0xff] }
 0x3e6   : > { %6210 = vst [vmem:[%s13463_s13 + $0x7c0] sm:$0xff] %v6209_v17  ;;  %v6337_v17 = vld [vmem:[%s8017_s20 + $0x3f0] sm:$0xff] }
 0x3e7   : > { %6212 = vst [vmem:[%s13463_s13 + $0x7e0] sm:$0xff] %v6211_v45  ;;  %v6339_v45 = vld [vmem:[%s8017_s20 + $0x3f8] sm:$0xff] }
 0x3e8   : > { %6214 = vst [vmem:[%s13463_s13 + $0x800] sm:$0xff] %v6213_v5 }
 0x3e9   : > { %6218 = vst [vmem:[%s13463_s13 + $0x840] sm:$0xff] %v6217_v18 }
 0x3ea   : > { %6220 = vst [vmem:[%s13463_s13 + $0x860] sm:$0xff] %v6219_v44 }
 0x3eb   : > { %6222 = vst [vmem:[%s13463_s13 + $0x880] sm:$0xff] %v6221_v62 }
 0x3ec   : > { %6224 = vst [vmem:[%s13463_s13 + $0x8a0] sm:$0xff] %v6223_v32 }
 0x3ed   : > { %6226 = vst [vmem:[%s13463_s13 + $0x8c0] sm:$0xff] %v6225_v52 }
 0x3ee   : > { %6228 = vst [vmem:[%s13463_s13 + $0x8e0] sm:$0xff] %v6227_v7 }
 0x3ef   : > { %6230 = vst [vmem:[%s13463_s13 + $0x900] sm:$0xff] %v6229_v38 }
 0x3f0   : > { %6232 = vst [vmem:[%s13463_s13 + $0x920] sm:$0xff] %v6231_v39 }
 0x3f1   : > { %6234 = vst [vmem:[%s13463_s13 + $0x940] sm:$0xff] %v6233_v20 }
 0x3f2   : > { %6236 = vst [vmem:[%s13463_s13 + $0x960] sm:$0xff] %v6235_v15 }
 0x3f3   : > { %6238 = vst [vmem:[%s13463_s13 + $0x980] sm:$0xff] %v6237_v10 }
 0x3f4   : > { %6240 = vst [vmem:[%s13463_s13 + $0x9a0] sm:$0xff] %v6239_v11 }
 0x3f5   : > { %6242 = vst [vmem:[%s13463_s13 + $0x9c0] sm:$0xff] %v6241_v37 }
 0x3f6   : > { %6244 = vst [vmem:[%s13463_s13 + $0x9e0] sm:$0xff] %v6243_v53 }
 0x3f7   : > { %6246 = vst [vmem:[%s13463_s13 + $0xa00] sm:$0xff] %v6245_v21 }
 0x3f8   : > { %6248 = vst [vmem:[%s13463_s13 + $0xa20] sm:$0xff] %v6247_v29 }
 0x3f9   : > { %6250 = vst [vmem:[%s13463_s13 + $0xa40] sm:$0xff] %v6249_v28 }
 0x3fa   : > { %6252 = vst [vmem:[%s13463_s13 + $0xa60] sm:$0xff] %v6251_v25 }
 0x3fb   : > { %6254 = vst [vmem:[%s13463_s13 + $0xa80] sm:$0xff] %v6253_v1 }
 0x3fc   : > { %6256 = vst [vmem:[%s13463_s13 + $0xaa0] sm:$0xff] %v6255_v43 }
 0x3fd   : > { %6258 = vst [vmem:[%s13463_s13 + $0xac0] sm:$0xff] %v6257_v16 }
 0x3fe   : > { %6260 = vst [vmem:[%s13463_s13 + $0xae0] sm:$0xff] %v6259_v41 }
 0x3ff   : > { %6262 = vst [vmem:[%s13463_s13 + $0xb00] sm:$0xff] %v6261_v8 }
 0x400   : > { %6264 = vst [vmem:[%s13463_s13 + $0xb20] sm:$0xff] %v6263_v33 }
 0x401   : > { %6266 = vst [vmem:[%s13463_s13 + $0xb40] sm:$0xff] %v6265_v35 }
 0x402   : > { %6268 = vst [vmem:[%s13463_s13 + $0xb60] sm:$0xff] %v6267_v0 }
 0x403   : > { %6270 = vst [vmem:[%s13463_s13 + $0xb80] sm:$0xff] %v6269_v36 }
 0x404   : > { %6272 = vst [vmem:[%s13463_s13 + $0xba0] sm:$0xff] %v6271_v40 }
 0x405   : > { %6274 = vst [vmem:[%s13463_s13 + $0xbc0] sm:$0xff] %v6273_v27 }
 0x406   : > { %6276 = vst [vmem:[%s13463_s13 + $0xbe0] sm:$0xff] %v6275_v57 }
 0x407   : > { %6278 = vst [vmem:[%s13463_s13 + $0xc00] sm:$0xff] %v6277_v47 }
 0x408   : > { %6280 = vst [vmem:[%s13463_s13 + $0xc20] sm:$0xff] %v6279_v6 }
 0x409   : > { %6282 = vst [vmem:[%s13463_s13 + $0xc40] sm:$0xff] %v6281_v49 }
 0x40a   : > { %6284 = vst [vmem:[%s13463_s13 + $0xc60] sm:$0xff] %v6283_v46 }
 0x40b   : > { %6286 = vst [vmem:[%s13463_s13 + $0xc80] sm:$0xff] %v6285_v22 }
 0x40c   : > { %6288 = vst [vmem:[%s13463_s13 + $0xca0] sm:$0xff] %v6287_v59 }
 0x40d   : > { %6290 = vst [vmem:[%s13463_s13 + $0xcc0] sm:$0xff] %v6289_v63 }
 0x40e   : > { %6292 = vst [vmem:[%s13463_s13 + $0xce0] sm:$0xff] %v6291_v24 }
 0x40f   : > { %6294 = vst [vmem:[%s13463_s13 + $0xd00] sm:$0xff] %v6293_v3 }
 0x410   : > { %6296 = vst [vmem:[%s13463_s13 + $0xd20] sm:$0xff] %v6295_v14 }
 0x411   : > { %6298 = vst [vmem:[%s13463_s13 + $0xd40] sm:$0xff] %v6297_v61 }
 0x412   : > { %6300 = vst [vmem:[%s13463_s13 + $0xd60] sm:$0xff] %v6299_v55 }
 0x413   : > { %6302 = vst [vmem:[%s13463_s13 + $0xd80] sm:$0xff] %v6301_v48 }
 0x414   : > { %6304 = vst [vmem:[%s13463_s13 + $0xda0] sm:$0xff] %v6303_v23 }
 0x415   : > { %6306 = vst [vmem:[%s13463_s13 + $0xdc0] sm:$0xff] %v6305_v26 }
 0x416   : > { %6308 = vst [vmem:[%s13463_s13 + $0xde0] sm:$0xff] %v6307_v54 }
 0x417   : > { %6310 = vst [vmem:[%s13463_s13 + $0xe00] sm:$0xff] %v6309_v13 }
 0x418   : > { %6312 = vst [vmem:[%s13463_s13 + $0xe20] sm:$0xff] %v6311_v34 }
 0x419   : > { %6314 = vst [vmem:[%s13463_s13 + $0xe40] sm:$0xff] %v6313_v51 }
 0x41a   : > { %6316 = vst [vmem:[%s13463_s13 + $0xe60] sm:$0xff] %v6315_v9 }
 0x41b   : > { %6318 = vst [vmem:[%s13463_s13 + $0xe80] sm:$0xff] %v6317_v58 }
 0x41c   : > { %6320 = vst [vmem:[%s13463_s13 + $0xea0] sm:$0xff] %v6319_v50 }
 0x41d   : > { %6322 = vst [vmem:[%s13463_s13 + $0xec0] sm:$0xff] %v6321_v60 }
 0x41e   : > { %6324 = vst [vmem:[%s13463_s13 + $0xee0] sm:$0xff] %v6323_v2 }
 0x41f   : > { %6326 = vst [vmem:[%s13463_s13 + $0xf00] sm:$0xff] %v6325_v4 }
 0x420   : > { %6328 = vst [vmem:[%s13463_s13 + $0xf20] sm:$0xff] %v6327_v12 }
 0x421   : > { %6330 = vst [vmem:[%s13463_s13 + $0xf40] sm:$0xff] %v6329_v42 }
 0x422   : > { %6332 = vst [vmem:[%s13463_s13 + $0xf60] sm:$0xff] %v6331_v19 }
 0x423   : > { %6334 = vst [vmem:[%s13463_s13 + $0xf80] sm:$0xff] %v6333_v31 }
 0x424   : > { %6336 = vst [vmem:[%s13463_s13 + $0xfa0] sm:$0xff] %v6335_v30 }
 0x425   : > { %6338 = vst [vmem:[%s13463_s13 + $0xfc0] sm:$0xff] %v6337_v17 }
 0x426   : > { %6340 = vst [vmem:[%s13463_s13 + $0xfe0] sm:$0xff] %v6339_v45 }
 0x427 PF: > { %s13929_s18 = sld [smem:[#allocation16_spill]]  ;;  %s13932_s15 = smov %s7537_s16 }
 0x428   : > { %s13931_s20 = sld [smem:[#allocation17_spill]]  ;;  %s13933_s16 = smov %s7541_s17 }
 0x429   : > { %s13934_s17 = smov %s7701_s22  ;;  %s13935_s19 = smov %s7557_s21 }
 0x42a   : > { %s13936_s21 = smov %s13943_s14 }
 0x42d   : > { %s22_s8 = sadd.s32 1, %s13929_s18   ;;  %s13930_s18 = sld [smem:[#allocation15_spill]] }
 0x42e   : > { %p19_p3 = scmp.ge.s32.totalorder %s22_s8, 10   ;;  %s13937_s22 = smov %s22_s8 }
 0x430   :  { %21 = sbr.rel (!%p19_p3) target bundleno = 13 (0xd), region = 648 }
 0x435   :  { %6356 = vsyncpa [#allocation3], 1 }
 0x436   :  { %6358 = vsyncpa [#allocation3 + $0x1], 1 }
 0x437   :  { %6359 = vsyncpa [#allocation7], 1 }
 0x438   :  { %6361 = vsyncpa [#allocation7 + $0x1], 1 }
 0x439   :  { %6362 = vsyncpa [#allocation4], 1 }
 0x43a   :  { %6364 = vsyncpa [#allocation4 + $0x1], 1 }
 0x43b   :  { %6365 = vsyncpa [#allocation5], 1 }
 0x43c   :  { %6367 = vsyncpa [#allocation5 + $0x1], 1 }

</bundles_post_ra>
